<compile_context>
chip_gen: v7x
topology: tpu7x:2x2x1
jax: 0.10.0
libtpu: 0.0.40
codegen_flags: <defaults>
</compile_context>

<pallas_src>
import functools
import math

import jax
import jax.numpy as jnp
import numpy as np
from jax.experimental import pallas as pl
from jax.experimental.pallas import tpu as pltpu

LANE = 128  # TPU lane width; channel dims are zero-padded to a multiple of this.


def _round_up(c, m=LANE):
    return ((c + m - 1) // m) * m


# ----------------------------------------------------------------------------
# Pallas kernels
# ----------------------------------------------------------------------------
def _conv3x3_relu_kernel(x_ref, w_ref, b_ref, o_ref, xp_ref, *, pool):
    """Fused 3x3 conv (stride 1, pad 1) + bias + ReLU [+ 2x2 max-pool].

    x_ref : (1, H, W, Cin)      bf16 activation tile (unpadded, NHWC)
    w_ref : (9*Cin, CoutP)      bf16 im2col-reshaped weights
    b_ref : (1, CoutP)          f32 bias
    o_ref : (1, Ho, Wo, CoutP)  bf16 output (pooled iff `pool`)
    xp_ref: (H+2, W+2, Cin)     bf16 VMEM scratch (in-kernel halo)
    """
    _, h, w, cin = x_ref.shape
    coutp = o_ref.shape[-1]

    # Build the 1-px zero halo in VMEM — no HBM pad round trip.
    xp_ref[...] = jnp.zeros_like(xp_ref)
    xp_ref[1:h + 1, 1:w + 1, :] = x_ref[0]

    # im2col: concatenate the 9 shifted taps on the channel (lane) axis so the
    # conv becomes ONE deep (H*W, 9*Cin) x (9*Cin, CoutP) MXU contraction
    # instead of 9 tiny K=Cin matmuls.
    taps = [xp_ref[dy:dy + h, dx:dx + w, :] for dy in range(3) for dx in range(3)]
    patches = jnp.concatenate(taps, axis=-1).reshape(h * w, 9 * cin)

    acc = jnp.dot(patches, w_ref[...], preferred_element_type=jnp.float32)
    acc = jnp.maximum(acc + b_ref[...], 0.0)  # bias + ReLU in f32

    if pool:
        # Fused MaxPool2d(2, 2) on the f32 accumulator (data already in vregs).
        v = acc.reshape(h // 2, 2, w // 2, 2, coutp)
        v = jnp.max(v, axis=3)
        v = jnp.max(v, axis=1)
        o_ref[...] = v.reshape(1, h // 2, w // 2, coutp).astype(o_ref.dtype)
    else:
        o_ref[...] = acc.reshape(1, h, w, coutp).astype(o_ref.dtype)


def _maxpool2x2_kernel(x_ref, o_ref):
    """Standalone MaxPool2d(2,2) — only used if an 'M' is not preceded by a conv."""
    _, h, w, c = x_ref.shape
    v = x_ref[0].reshape(h // 2, 2, w // 2, 2, c)
    v = jnp.max(v, axis=3)
    v = jnp.max(v, axis=1)
    o_ref[...] = v.reshape(1, h // 2, w // 2, c)


# ----------------------------------------------------------------------------
# Wrappers
# ----------------------------------------------------------------------------
def conv3x3_relu(x, w_flat, b, *, pool):
    """x: (N,H,W,Cin) bf16, w_flat: (9*Cin, CoutP) bf16, b: (1, CoutP) f32."""
    n, h, wd, cin = x.shape
    coutp = w_flat.shape[-1]
    ho, wo = (h // 2, wd // 2) if pool else (h, wd)

    flops = 2 * n * h * wd * (9 * cin) * coutp
    bytes_accessed = (x.size * x.dtype.itemsize
                      + w_flat.size * w_flat.dtype.itemsize
                      + b.size * b.dtype.itemsize
                      + n * ho * wo * coutp * x.dtype.itemsize)

    return pl.pallas_call(
        functools.partial(_conv3x3_relu_kernel, pool=pool),
        out_shape=jax.ShapeDtypeStruct((n, ho, wo, coutp), x.dtype),
        grid=(n,),
        in_specs=[
            pl.BlockSpec((1, h, wd, cin), lambda i: (i, 0, 0, 0)),
            pl.BlockSpec((9 * cin, coutp), lambda i: (0, 0)),
            pl.BlockSpec((1, coutp), lambda i: (0, 0)),
        ],
        out_specs=pl.BlockSpec((1, ho, wo, coutp), lambda i: (i, 0, 0, 0)),
        scratch_shapes=[pltpu.VMEM((h + 2, wd + 2, cin), x.dtype)],
        compiler_params=pltpu.CompilerParams(dimension_semantics=("parallel",)),
        cost_estimate=pl.CostEstimate(
            flops=flops, transcendentals=0, bytes_accessed=bytes_accessed),
    )(x, w_flat, b)


def maxpool2x2(x):
    """x: (N,H,W,C) -> (N,H//2,W//2,C). Only for bare 'M' entries (rare)."""
    n, h, w, c = x.shape
    return pl.pallas_call(
        _maxpool2x2_kernel,
        out_shape=jax.ShapeDtypeStruct((n, h // 2, w // 2, c), x.dtype),
        grid=(n,),
        in_specs=[pl.BlockSpec((1, h, w, c), lambda i: (i, 0, 0, 0))],
        out_specs=pl.BlockSpec((1, h // 2, w // 2, c), lambda i: (i, 0, 0, 0)),
        compiler_params=pltpu.CompilerParams(dimension_semantics=("parallel",)),
        cost_estimate=pl.CostEstimate(
            flops=n * h * w * c, transcendentals=0,
            bytes_accessed=(x.size + n * (h // 2) * (w // 2) * c) * x.dtype.itemsize),
    )(x)


# ----------------------------------------------------------------------------
# Parameters (PyTorch-equivalent init) and kernel-layout packing
# ----------------------------------------------------------------------------
def init_vgg_params(cfg, in_channels, key):
    """kaiming_normal_(mode='fan_out', relu) conv init, zero bias (HWIO, f32)."""
    params = []
    c_in = in_channels
    for v in cfg:
        if v == "M":
            continue
        c_out = int(v)
        key, sub = jax.random.split(key)
        std = math.sqrt(2.0 / (c_out * 3 * 3))
        w = std * jax.random.normal(sub, (3, 3, c_in, c_out), jnp.float32)  # HWIO
        b = jnp.zeros((c_out,), jnp.float32)
        params.append((w, b))
        c_in = c_out
    return params


def pack_params(cfg, in_channels, params):
    """Kernel layout: bf16 weights reshaped to (9*CinP, CoutP), channels padded
    to a multiple of 128 so loads/stores and the matmul output are lane-dense.
    The first layer keeps its natural Cin (e.g. 3) to avoid inflating the
    input-image HBM read.  Padded channels carry exact zeros end-to-end."""
    packed = []
    c_in_p = in_channels
    p_idx = 0
    for v in cfg:
        if v == "M":
            continue
        w, b = params[p_idx]
        p_idx += 1
        c_in, c_out = w.shape[2], w.shape[3]
        c_out_p = _round_up(c_out)
        w_p = jnp.zeros((3, 3, c_in_p, c_out_p), jnp.float32)
        w_p = w_p.at[:, :, :c_in, :c_out].set(w)
        w_flat = w_p.reshape(9 * c_in_p, c_out_p).astype(jnp.bfloat16)
        b_p = jnp.zeros((1, c_out_p), jnp.float32).at[0, :c_out].set(b)
        packed.append((w_flat, b_p, c_out))
        c_in_p = c_out_p
    return packed


# ----------------------------------------------------------------------------
# VGG feature extractor (mirrors VGG.forward)
# ----------------------------------------------------------------------------
def _extract_feature(x_nhwc, c_real):
    # strip channel padding, NHWC -> NCHW, back to f32 like the torch module
    return jnp.transpose(x_nhwc[..., :c_real], (0, 3, 1, 2)).astype(jnp.float32)


def vgg_features_forward(x_nchw, cfg, packed_params, in_channels):
    """Run features, collect the output after every MaxPool2d (NCHW, f32).
    Conv layers immediately followed by 'M' are fused into a single kernel."""
    x = jnp.transpose(x_nchw, (0, 2, 3, 1)).astype(jnp.bfloat16)  # NHWC bf16
    feats = []
    c_real = in_channels
    p_idx = 0
    i = 0
    while i < len(cfg):
        v = cfg[i]
        if v == "M":
            x = maxpool2x2(x)
            feats.append(_extract_feature(x, c_real))
            i += 1
        else:
            w_flat, b_p, c_out = packed_params[p_idx]
            p_idx += 1
            fuse = (i + 1 < len(cfg)) and cfg[i + 1] == "M"
            x = conv3x3_relu(x, w_flat, b_p, pool=fuse)
            c_real = c_out
            if fuse:
                feats.append(_extract_feature(x, c_real))
                i += 2
            else:
                i += 1
    return feats


# Pure-JAX reference with matching bf16-input / f32-accumulate numerics.
def _reference_forward(x_nchw, cfg, params):
    x = jnp.transpose(x_nchw, (0, 2, 3, 1)).astype(jnp.bfloat16)
    feats = []
    p_idx = 0
    for v in cfg:
        if v == "M":
            n, h, w, c = x.shape
            x = jnp.max(x.reshape(n, h // 2, 2, w // 2, 2, c), axis=(2, 4))
            feats.append(jnp.transpose(x, (0, 3, 1, 2)).astype(jnp.float32))
        else:
            wgt, b = params[p_idx]
            p_idx += 1
            y = jax.lax.conv_general_dilated(
                x, wgt.astype(jnp.bfloat16), window_strides=(1, 1),
                padding="SAME", dimension_numbers=("NHWC", "HWIO", "NHWC"),
                preferred_element_type=jnp.float32)
            x = jnp.maximum(y + b, 0.0).astype(jnp.bfloat16)
    return feats


if __name__ == "__main__":
    # Small VGG-style config: [conv8, conv8, pool, conv16, pool]
    cfg = [8, 8, "M", 16, "M"]
    in_channels = 3

    key = jax.random.PRNGKey(0)
    key, kx = jax.random.split(key)
    x = jax.random.normal(kx, (2, in_channels, 16, 16), jnp.float32)  # NCHW

    params = init_vgg_params(cfg, in_channels, key)
    packed = pack_params(cfg, in_channels, params)

    fwd = jax.jit(lambda inp: vgg_features_forward(inp, cfg, packed, in_channels))
    feats = fwd(x)
    feats = [jax.block_until_ready(f) for f in feats]

    # Correctness check against a pure-JAX reference.
    ref_feats = _reference_forward(x, cfg, params)
    expected_shapes = [(2, 8, 8, 8), (2, 16, 4, 4)]
    assert len(feats) == len(ref_feats) == len(expected_shapes)
    for f, r, s in zip(feats, ref_feats, expected_shapes):
        assert f.shape == s, (f.shape, s)
        np.testing.assert_allclose(np.asarray(f, np.float32),
                                   np.asarray(r, np.float32),
                                   rtol=1e-2, atol=1e-2)

    print("KERNEL_OK")
</pallas_src>

<mosaic_0001>
module attributes {stable_mosaic.version = 11 : i64} {
  func.func @_conv3x3_relu_kernel(%arg0: i32, %arg1: memref<1x16x16x3xbf16, #tpu.memory_space<vmem>>, %arg2: memref<27x128xbf16, #tpu.memory_space<vmem>>, %arg3: memref<1x128xf32, #tpu.memory_space<vmem>>, %arg4: memref<1x16x16x128xbf16, #tpu.memory_space<vmem>>, %arg5: memref<18x18x3xbf16, #tpu.memory_space<vmem>>) attributes {dimension_semantics = [#tpu.dimension_semantics<parallel>], iteration_bounds = array<i64: 2>, scalar_prefetch = 0 : i64, scratch_operands = 1 : i64, tpu.core_type = #tpu.core_type<tc>, window_params = [{transform_indices = @transform_0, window_bounds = array<i64: 1, 16, 16, 3>}, {pipeline_mode = #tpu.pipeline_mode<synchronous>, transform_indices = @transform_1, window_bounds = array<i64: 27, 128>}, {pipeline_mode = #tpu.pipeline_mode<synchronous>, transform_indices = @transform_2, window_bounds = array<i64: 1, 128>}, {transform_indices = @transform_3, window_bounds = array<i64: 1, 16, 16, 128>}]} {
    %cst = arith.constant 0.000000e+00 : bf16
    %0 = vector.broadcast %cst : bf16 to vector<18x18x3xbf16>
    %c0 = arith.constant 0 : index
    %c0_0 = arith.constant 0 : index
    %c0_1 = arith.constant 0 : index
    %1 = vector.load %arg5[%c0, %c0_0, %c0_1] : memref<18x18x3xbf16, #tpu.memory_space<vmem>>, vector<18x18x3xbf16>
    tpu.vector_store %arg5[%c0, %c0_0, %c0_1], %0 {strides = array<i32>} : memref<18x18x3xbf16, #tpu.memory_space<vmem>>, vector<18x18x3xbf16>,
    %c0_2 = arith.constant 0 : index
    %c0_3 = arith.constant 0 : index
    %c0_4 = arith.constant 0 : index
    %c0_5 = arith.constant 0 : index
    %2 = vector.load %arg1[%c0_2, %c0_3, %c0_4, %c0_5] : memref<1x16x16x3xbf16, #tpu.memory_space<vmem>>, vector<1x16x16x3xbf16>
    %3 = vector.shape_cast %2 : vector<1x16x16x3xbf16> to vector<16x16x3xbf16>
    %c1 = arith.constant 1 : index
    %c1_6 = arith.constant 1 : index
    %c0_7 = arith.constant 0 : index
    %4 = vector.load %arg5[%c1, %c1_6, %c0_7] : memref<18x18x3xbf16, #tpu.memory_space<vmem>>, vector<16x16x3xbf16>
    tpu.vector_store %arg5[%c1, %c1_6, %c0_7], %3 {strides = array<i32>} : memref<18x18x3xbf16, #tpu.memory_space<vmem>>, vector<16x16x3xbf16>,
    %c0_8 = arith.constant 0 : index
    %c0_9 = arith.constant 0 : index
    %c0_10 = arith.constant 0 : index
    %5 = vector.load %arg5[%c0_8, %c0_9, %c0_10] : memref<18x18x3xbf16, #tpu.memory_space<vmem>>, vector<16x16x3xbf16>
    %c0_11 = arith.constant 0 : index
    %c1_12 = arith.constant 1 : index
    %c0_13 = arith.constant 0 : index
    %6 = vector.load %arg5[%c0_11, %c1_12, %c0_13] : memref<18x18x3xbf16, #tpu.memory_space<vmem>>, vector<16x16x3xbf16>
    %c0_14 = arith.constant 0 : index
    %c2 = arith.constant 2 : index
    %c0_15 = arith.constant 0 : index
    %7 = vector.load %arg5[%c0_14, %c2, %c0_15] : memref<18x18x3xbf16, #tpu.memory_space<vmem>>, vector<16x16x3xbf16>
    %c1_16 = arith.constant 1 : index
    %c0_17 = arith.constant 0 : index
    %c0_18 = arith.constant 0 : index
    %8 = vector.load %arg5[%c1_16, %c0_17, %c0_18] : memref<18x18x3xbf16, #tpu.memory_space<vmem>>, vector<16x16x3xbf16>
    %c1_19 = arith.constant 1 : index
    %c1_20 = arith.constant 1 : index
    %c0_21 = arith.constant 0 : index
    %9 = vector.load %arg5[%c1_19, %c1_20, %c0_21] : memref<18x18x3xbf16, #tpu.memory_space<vmem>>, vector<16x16x3xbf16>
    %c1_22 = arith.constant 1 : index
    %c2_23 = arith.constant 2 : index
    %c0_24 = arith.constant 0 : index
    %10 = vector.load %arg5[%c1_22, %c2_23, %c0_24] : memref<18x18x3xbf16, #tpu.memory_space<vmem>>, vector<16x16x3xbf16>
    %c2_25 = arith.constant 2 : index
    %c0_26 = arith.constant 0 : index
    %c0_27 = arith.constant 0 : index
    %11 = vector.load %arg5[%c2_25, %c0_26, %c0_27] : memref<18x18x3xbf16, #tpu.memory_space<vmem>>, vector<16x16x3xbf16>
    %c2_28 = arith.constant 2 : index
    %c1_29 = arith.constant 1 : index
    %c0_30 = arith.constant 0 : index
    %12 = vector.load %arg5[%c2_28, %c1_29, %c0_30] : memref<18x18x3xbf16, #tpu.memory_space<vmem>>, vector<16x16x3xbf16>
    %c2_31 = arith.constant 2 : index
    %c2_32 = arith.constant 2 : index
    %c0_33 = arith.constant 0 : index
    %13 = vector.load %arg5[%c2_31, %c2_32, %c0_33] : memref<18x18x3xbf16, #tpu.memory_space<vmem>>, vector<16x16x3xbf16>
    %14 = tpu.concatenate %5, %6, %7, %8, %9, %10, %11, %12, %13 in 2 : vector<16x16x3xbf16>, vector<16x16x3xbf16>, vector<16x16x3xbf16>, vector<16x16x3xbf16>, vector<16x16x3xbf16>, vector<16x16x3xbf16>, vector<16x16x3xbf16>, vector<16x16x3xbf16>, vector<16x16x3xbf16> -> vector<16x16x27xbf16>
    %15 = vector.shape_cast %14 : vector<16x16x27xbf16> to vector<256x27xbf16>
    %c0_34 = arith.constant 0 : index
    %c0_35 = arith.constant 0 : index
    %16 = vector.load %arg2[%c0_34, %c0_35] : memref<27x128xbf16, #tpu.memory_space<vmem>>, vector<27x128xbf16>
    %cst_36 = arith.constant dense<0.000000e+00> : vector<256x128xf32>
    %17 = tpu.matmul %15, %16, %cst_36 {dimension_numbers = #tpu.dot_dimension_numbers<[1], [0], [0], [1], [0, 0, 1, 1], [], []>} : vector<256x27xbf16>, vector<27x128xbf16>, vector<256x128xf32> -> vector<256x128xf32>
    %c0_37 = arith.constant 0 : index
    %c0_38 = arith.constant 0 : index
    %18 = vector.load %arg3[%c0_37, %c0_38] : memref<1x128xf32, #tpu.memory_space<vmem>>, vector<1x128xf32>
    %19 = vector.broadcast %18 : vector<1x128xf32> to vector<256x128xf32>
    %20 = arith.addf %17, %19 : vector<256x128xf32>
    %cst_39 = arith.constant 0.000000e+00 : f32
    %21 = vector.broadcast %cst_39 : f32 to vector<256x128xf32>
    %22 = arith.maximumf %20, %21 : vector<256x128xf32>
    %23 = vector.shape_cast %22 : vector<256x128xf32> to vector<1x16x16x128xf32>
    %24 = arith.truncf %23 : vector<1x16x16x128xf32> to vector<1x16x16x128xbf16>
    %c0_40 = arith.constant 0 : index
    %c0_41 = arith.constant 0 : index
    %c0_42 = arith.constant 0 : index
    %c0_43 = arith.constant 0 : index
    %25 = vector.load %arg4[%c0_40, %c0_41, %c0_42, %c0_43] : memref<1x16x16x128xbf16, #tpu.memory_space<vmem>>, vector<1x16x16x128xbf16>
    tpu.vector_store %arg4[%c0_40, %c0_41, %c0_42, %c0_43], %24 {strides = array<i32>} : memref<1x16x16x128xbf16, #tpu.memory_space<vmem>>, vector<1x16x16x128xbf16>,
    return
  }
  func.func @transform_0(%arg0: i32) -> (i32, i32, i32, i32) {
    %c0_i32 = arith.constant 0 : i32
    %c0_i32_0 = arith.constant 0 : i32
    %c0_i32_1 = arith.constant 0 : i32
    %c0_i32_2 = arith.constant 0 : i32
    return %arg0, %c0_i32, %c0_i32_0, %c0_i32_1 : i32, i32, i32, i32
  }
  func.func @transform_1(%arg0: i32) -> (i32, i32) {
    %c0_i32 = arith.constant 0 : i32
    %c0_i32_0 = arith.constant 0 : i32
    %c0_i32_1 = arith.constant 0 : i32
    return %c0_i32, %c0_i32_0 : i32, i32
  }
  func.func @transform_2(%arg0: i32) -> (i32, i32) {
    %c0_i32 = arith.constant 0 : i32
    %c0_i32_0 = arith.constant 0 : i32
    %c0_i32_1 = arith.constant 0 : i32
    return %c0_i32, %c0_i32_0 : i32, i32
  }
  func.func @transform_3(%arg0: i32) -> (i32, i32, i32, i32) {
    %c0_i32 = arith.constant 0 : i32
    %c0_i32_0 = arith.constant 0 : i32
    %c0_i32_1 = arith.constant 0 : i32
    %c0_i32_2 = arith.constant 0 : i32
    return %arg0, %c0_i32, %c0_i32_0, %c0_i32_1 : i32, i32, i32, i32
  }
}

module attributes {stable_mosaic.version = 11 : i64} {
  func.func @_conv3x3_relu_kernel(%arg0: i32, %arg1: memref<1x16x16x128xbf16, #tpu.memory_space<vmem>>, %arg2: memref<1152x128xbf16, #tpu.memory_space<vmem>>, %arg3: memref<1x128xf32, #tpu.memory_space<vmem>>, %arg4: memref<1x8x8x128xbf16, #tpu.memory_space<vmem>>, %arg5: memref<18x18x128xbf16, #tpu.memory_space<vmem>>) attributes {dimension_semantics = [#tpu.dimension_semantics<parallel>], iteration_bounds = array<i64: 2>, scalar_prefetch = 0 : i64, scratch_operands = 1 : i64, tpu.core_type = #tpu.core_type<tc>, window_params = [{transform_indices = @transform_0, window_bounds = array<i64: 1, 16, 16, 128>}, {pipeline_mode = #tpu.pipeline_mode<synchronous>, transform_indices = @transform_1, window_bounds = array<i64: 1152, 128>}, {pipeline_mode = #tpu.pipeline_mode<synchronous>, transform_indices = @transform_2, window_bounds = array<i64: 1, 128>}, {transform_indices = @transform_3, window_bounds = array<i64: 1, 8, 8, 128>}]} {
    %cst = arith.constant 0.000000e+00 : bf16
    %0 = vector.broadcast %cst : bf16 to vector<18x18x128xbf16>
    %c0 = arith.constant 0 : index
    %c0_0 = arith.constant 0 : index
    %c0_1 = arith.constant 0 : index
    %1 = vector.load %arg5[%c0, %c0_0, %c0_1] : memref<18x18x128xbf16, #tpu.memory_space<vmem>>, vector<18x18x128xbf16>
    tpu.vector_store %arg5[%c0, %c0_0, %c0_1], %0 {strides = array<i32>} : memref<18x18x128xbf16, #tpu.memory_space<vmem>>, vector<18x18x128xbf16>,
    %c0_2 = arith.constant 0 : index
    %c0_3 = arith.constant 0 : index
    %c0_4 = arith.constant 0 : index
    %c0_5 = arith.constant 0 : index
    %2 = vector.load %arg1[%c0_2, %c0_3, %c0_4, %c0_5] : memref<1x16x16x128xbf16, #tpu.memory_space<vmem>>, vector<1x16x16x128xbf16>
    %3 = vector.shape_cast %2 : vector<1x16x16x128xbf16> to vector<16x16x128xbf16>
    %c1 = arith.constant 1 : index
    %c1_6 = arith.constant 1 : index
    %c0_7 = arith.constant 0 : index
    %4 = vector.load %arg5[%c1, %c1_6, %c0_7] : memref<18x18x128xbf16, #tpu.memory_space<vmem>>, vector<16x16x128xbf16>
    tpu.vector_store %arg5[%c1, %c1_6, %c0_7], %3 {strides = array<i32>} : memref<18x18x128xbf16, #tpu.memory_space<vmem>>, vector<16x16x128xbf16>,
    %c0_8 = arith.constant 0 : index
    %c0_9 = arith.constant 0 : index
    %c0_10 = arith.constant 0 : index
    %5 = vector.load %arg5[%c0_8, %c0_9, %c0_10] : memref<18x18x128xbf16, #tpu.memory_space<vmem>>, vector<16x16x128xbf16>
    %c0_11 = arith.constant 0 : index
    %c1_12 = arith.constant 1 : index
    %c0_13 = arith.constant 0 : index
    %6 = vector.load %arg5[%c0_11, %c1_12, %c0_13] : memref<18x18x128xbf16, #tpu.memory_space<vmem>>, vector<16x16x128xbf16>
    %c0_14 = arith.constant 0 : index
    %c2 = arith.constant 2 : index
    %c0_15 = arith.constant 0 : index
    %7 = vector.load %arg5[%c0_14, %c2, %c0_15] : memref<18x18x128xbf16, #tpu.memory_space<vmem>>, vector<16x16x128xbf16>
    %c1_16 = arith.constant 1 : index
    %c0_17 = arith.constant 0 : index
    %c0_18 = arith.constant 0 : index
    %8 = vector.load %arg5[%c1_16, %c0_17, %c0_18] : memref<18x18x128xbf16, #tpu.memory_space<vmem>>, vector<16x16x128xbf16>
    %c1_19 = arith.constant 1 : index
    %c1_20 = arith.constant 1 : index
    %c0_21 = arith.constant 0 : index
    %9 = vector.load %arg5[%c1_19, %c1_20, %c0_21] : memref<18x18x128xbf16, #tpu.memory_space<vmem>>, vector<16x16x128xbf16>
    %c1_22 = arith.constant 1 : index
    %c2_23 = arith.constant 2 : index
    %c0_24 = arith.constant 0 : index
    %10 = vector.load %arg5[%c1_22, %c2_23, %c0_24] : memref<18x18x128xbf16, #tpu.memory_space<vmem>>, vector<16x16x128xbf16>
    %c2_25 = arith.constant 2 : index
    %c0_26 = arith.constant 0 : index
    %c0_27 = arith.constant 0 : index
    %11 = vector.load %arg5[%c2_25, %c0_26, %c0_27] : memref<18x18x128xbf16, #tpu.memory_space<vmem>>, vector<16x16x128xbf16>
    %c2_28 = arith.constant 2 : index
    %c1_29 = arith.constant 1 : index
    %c0_30 = arith.constant 0 : index
    %12 = vector.load %arg5[%c2_28, %c1_29, %c0_30] : memref<18x18x128xbf16, #tpu.memory_space<vmem>>, vector<16x16x128xbf16>
    %c2_31 = arith.constant 2 : index
    %c2_32 = arith.constant 2 : index
    %c0_33 = arith.constant 0 : index
    %13 = vector.load %arg5[%c2_31, %c2_32, %c0_33] : memref<18x18x128xbf16, #tpu.memory_space<vmem>>, vector<16x16x128xbf16>
    %14 = tpu.concatenate %5, %6, %7, %8, %9, %10, %11, %12, %13 in 2 : vector<16x16x128xbf16>, vector<16x16x128xbf16>, vector<16x16x128xbf16>, vector<16x16x128xbf16>, vector<16x16x128xbf16>, vector<16x16x128xbf16>, vector<16x16x128xbf16>, vector<16x16x128xbf16>, vector<16x16x128xbf16> -> vector<16x16x1152xbf16>
    %15 = vector.shape_cast %14 : vector<16x16x1152xbf16> to vector<256x1152xbf16>
    %c0_34 = arith.constant 0 : index
    %c0_35 = arith.constant 0 : index
    %16 = vector.load %arg2[%c0_34, %c0_35] : memref<1152x128xbf16, #tpu.memory_space<vmem>>, vector<1152x128xbf16>
    %cst_36 = arith.constant dense<0.000000e+00> : vector<256x128xf32>
    %17 = tpu.matmul %15, %16, %cst_36 {dimension_numbers = #tpu.dot_dimension_numbers<[1], [0], [0], [1], [0, 0, 1, 1], [], []>} : vector<256x1152xbf16>, vector<1152x128xbf16>, vector<256x128xf32> -> vector<256x128xf32>
    %c0_37 = arith.constant 0 : index
    %c0_38 = arith.constant 0 : index
    %18 = vector.load %arg3[%c0_37, %c0_38] : memref<1x128xf32, #tpu.memory_space<vmem>>, vector<1x128xf32>
    %19 = vector.broadcast %18 : vector<1x128xf32> to vector<256x128xf32>
    %20 = arith.addf %17, %19 : vector<256x128xf32>
    %cst_39 = arith.constant 0.000000e+00 : f32
    %21 = vector.broadcast %cst_39 : f32 to vector<256x128xf32>
    %22 = arith.maximumf %20, %21 : vector<256x128xf32>
    %23 = vector.shape_cast %22 : vector<256x128xf32> to vector<8x2x8x2x128xf32>
    %cst_40 = arith.constant dense<0xFF800000> : vector<8x2x8x128xf32>
    %24 = vector.multi_reduction <maximumf>, %23, %cst_40 [3] : vector<8x2x8x2x128xf32> to vector<8x2x8x128xf32>
    %cst_41 = arith.constant dense<0xFF800000> : vector<8x8x128xf32>
    %25 = vector.multi_reduction <maximumf>, %24, %cst_41 [1] : vector<8x2x8x128xf32> to vector<8x8x128xf32>
    %26 = vector.shape_cast %25 : vector<8x8x128xf32> to vector<1x8x8x128xf32>
    %27 = arith.truncf %26 : vector<1x8x8x128xf32> to vector<1x8x8x128xbf16>
    %c0_42 = arith.constant 0 : index
    %c0_43 = arith.constant 0 : index
    %c0_44 = arith.constant 0 : index
    %c0_45 = arith.constant 0 : index
    %28 = vector.load %arg4[%c0_42, %c0_43, %c0_44, %c0_45] : memref<1x8x8x128xbf16, #tpu.memory_space<vmem>>, vector<1x8x8x128xbf16>
    tpu.vector_store %arg4[%c0_42, %c0_43, %c0_44, %c0_45], %27 {strides = array<i32>} : memref<1x8x8x128xbf16, #tpu.memory_space<vmem>>, vector<1x8x8x128xbf16>,
    return
  }
  func.func @transform_0(%arg0: i32) -> (i32, i32, i32, i32) {
    %c0_i32 = arith.constant 0 : i32
    %c0_i32_0 = arith.constant 0 : i32
    %c0_i32_1 = arith.constant 0 : i32
    %c0_i32_2 = arith.constant 0 : i32
    return %arg0, %c0_i32, %c0_i32_0, %c0_i32_1 : i32, i32, i32, i32
  }
  func.func @transform_1(%arg0: i32) -> (i32, i32) {
    %c0_i32 = arith.constant 0 : i32
    %c0_i32_0 = arith.constant 0 : i32
    %c0_i32_1 = arith.constant 0 : i32
    return %c0_i32, %c0_i32_0 : i32, i32
  }
  func.func @transform_2(%arg0: i32) -> (i32, i32) {
    %c0_i32 = arith.constant 0 : i32
    %c0_i32_0 = arith.constant 0 : i32
    %c0_i32_1 = arith.constant 0 : i32
    return %c0_i32, %c0_i32_0 : i32, i32
  }
  func.func @transform_3(%arg0: i32) -> (i32, i32, i32, i32) {
    %c0_i32 = arith.constant 0 : i32
    %c0_i32_0 = arith.constant 0 : i32
    %c0_i32_1 = arith.constant 0 : i32
    %c0_i32_2 = arith.constant 0 : i32
    return %arg0, %c0_i32, %c0_i32_0, %c0_i32_1 : i32, i32, i32, i32
  }
}

module attributes {stable_mosaic.version = 11 : i64} {
  func.func @_conv3x3_relu_kernel(%arg0: i32, %arg1: memref<1x8x8x128xbf16, #tpu.memory_space<vmem>>, %arg2: memref<1152x128xbf16, #tpu.memory_space<vmem>>, %arg3: memref<1x128xf32, #tpu.memory_space<vmem>>, %arg4: memref<1x4x4x128xbf16, #tpu.memory_space<vmem>>, %arg5: memref<10x10x128xbf16, #tpu.memory_space<vmem>>) attributes {dimension_semantics = [#tpu.dimension_semantics<parallel>], iteration_bounds = array<i64: 2>, scalar_prefetch = 0 : i64, scratch_operands = 1 : i64, tpu.core_type = #tpu.core_type<tc>, window_params = [{transform_indices = @transform_0, window_bounds = array<i64: 1, 8, 8, 128>}, {pipeline_mode = #tpu.pipeline_mode<synchronous>, transform_indices = @transform_1, window_bounds = array<i64: 1152, 128>}, {pipeline_mode = #tpu.pipeline_mode<synchronous>, transform_indices = @transform_2, window_bounds = array<i64: 1, 128>}, {transform_indices = @transform_3, window_bounds = array<i64: 1, 4, 4, 128>}]} {
    %cst = arith.constant 0.000000e+00 : bf16
    %0 = vector.broadcast %cst : bf16 to vector<10x10x128xbf16>
    %c0 = arith.constant 0 : index
    %c0_0 = arith.constant 0 : index
    %c0_1 = arith.constant 0 : index
    %1 = vector.load %arg5[%c0, %c0_0, %c0_1] : memref<10x10x128xbf16, #tpu.memory_space<vmem>>, vector<10x10x128xbf16>
    tpu.vector_store %arg5[%c0, %c0_0, %c0_1], %0 {strides = array<i32>} : memref<10x10x128xbf16, #tpu.memory_space<vmem>>, vector<10x10x128xbf16>,
    %c0_2 = arith.constant 0 : index
    %c0_3 = arith.constant 0 : index
    %c0_4 = arith.constant 0 : index
    %c0_5 = arith.constant 0 : index
    %2 = vector.load %arg1[%c0_2, %c0_3, %c0_4, %c0_5] : memref<1x8x8x128xbf16, #tpu.memory_space<vmem>>, vector<1x8x8x128xbf16>
    %3 = vector.shape_cast %2 : vector<1x8x8x128xbf16> to vector<8x8x128xbf16>
    %c1 = arith.constant 1 : index
    %c1_6 = arith.constant 1 : index
    %c0_7 = arith.constant 0 : index
    %4 = vector.load %arg5[%c1, %c1_6, %c0_7] : memref<10x10x128xbf16, #tpu.memory_space<vmem>>, vector<8x8x128xbf16>
    tpu.vector_store %arg5[%c1, %c1_6, %c0_7], %3 {strides = array<i32>} : memref<10x10x128xbf16, #tpu.memory_space<vmem>>, vector<8x8x128xbf16>,
    %c0_8 = arith.constant 0 : index
    %c0_9 = arith.constant 0 : index
    %c0_10 = arith.constant 0 : index
    %5 = vector.load %arg5[%c0_8, %c0_9, %c0_10] : memref<10x10x128xbf16, #tpu.memory_space<vmem>>, vector<8x8x128xbf16>
    %c0_11 = arith.constant 0 : index
    %c1_12 = arith.constant 1 : index
    %c0_13 = arith.constant 0 : index
    %6 = vector.load %arg5[%c0_11, %c1_12, %c0_13] : memref<10x10x128xbf16, #tpu.memory_space<vmem>>, vector<8x8x128xbf16>
    %c0_14 = arith.constant 0 : index
    %c2 = arith.constant 2 : index
    %c0_15 = arith.constant 0 : index
    %7 = vector.load %arg5[%c0_14, %c2, %c0_15] : memref<10x10x128xbf16, #tpu.memory_space<vmem>>, vector<8x8x128xbf16>
    %c1_16 = arith.constant 1 : index
    %c0_17 = arith.constant 0 : index
    %c0_18 = arith.constant 0 : index
    %8 = vector.load %arg5[%c1_16, %c0_17, %c0_18] : memref<10x10x128xbf16, #tpu.memory_space<vmem>>, vector<8x8x128xbf16>
    %c1_19 = arith.constant 1 : index
    %c1_20 = arith.constant 1 : index
    %c0_21 = arith.constant 0 : index
    %9 = vector.load %arg5[%c1_19, %c1_20, %c0_21] : memref<10x10x128xbf16, #tpu.memory_space<vmem>>, vector<8x8x128xbf16>
    %c1_22 = arith.constant 1 : index
    %c2_23 = arith.constant 2 : index
    %c0_24 = arith.constant 0 : index
    %10 = vector.load %arg5[%c1_22, %c2_23, %c0_24] : memref<10x10x128xbf16, #tpu.memory_space<vmem>>, vector<8x8x128xbf16>
    %c2_25 = arith.constant 2 : index
    %c0_26 = arith.constant 0 : index
    %c0_27 = arith.constant 0 : index
    %11 = vector.load %arg5[%c2_25, %c0_26, %c0_27] : memref<10x10x128xbf16, #tpu.memory_space<vmem>>, vector<8x8x128xbf16>
    %c2_28 = arith.constant 2 : index
    %c1_29 = arith.constant 1 : index
    %c0_30 = arith.constant 0 : index
    %12 = vector.load %arg5[%c2_28, %c1_29, %c0_30] : memref<10x10x128xbf16, #tpu.memory_space<vmem>>, vector<8x8x128xbf16>
    %c2_31 = arith.constant 2 : index
    %c2_32 = arith.constant 2 : index
    %c0_33 = arith.constant 0 : index
    %13 = vector.load %arg5[%c2_31, %c2_32, %c0_33] : memref<10x10x128xbf16, #tpu.memory_space<vmem>>, vector<8x8x128xbf16>
    %14 = tpu.concatenate %5, %6, %7, %8, %9, %10, %11, %12, %13 in 2 : vector<8x8x128xbf16>, vector<8x8x128xbf16>, vector<8x8x128xbf16>, vector<8x8x128xbf16>, vector<8x8x128xbf16>, vector<8x8x128xbf16>, vector<8x8x128xbf16>, vector<8x8x128xbf16>, vector<8x8x128xbf16> -> vector<8x8x1152xbf16>
    %15 = vector.shape_cast %14 : vector<8x8x1152xbf16> to vector<64x1152xbf16>
    %c0_34 = arith.constant 0 : index
    %c0_35 = arith.constant 0 : index
    %16 = vector.load %arg2[%c0_34, %c0_35] : memref<1152x128xbf16, #tpu.memory_space<vmem>>, vector<1152x128xbf16>
    %cst_36 = arith.constant dense<0.000000e+00> : vector<64x128xf32>
    %17 = tpu.matmul %15, %16, %cst_36 {dimension_numbers = #tpu.dot_dimension_numbers<[1], [0], [0], [1], [0, 0, 1, 1], [], []>} : vector<64x1152xbf16>, vector<1152x128xbf16>, vector<64x128xf32> -> vector<64x128xf32>
    %c0_37 = arith.constant 0 : index
    %c0_38 = arith.constant 0 : index
    %18 = vector.load %arg3[%c0_37, %c0_38] : memref<1x128xf32, #tpu.memory_space<vmem>>, vector<1x128xf32>
    %19 = vector.broadcast %18 : vector<1x128xf32> to vector<64x128xf32>
    %20 = arith.addf %17, %19 : vector<64x128xf32>
    %cst_39 = arith.constant 0.000000e+00 : f32
    %21 = vector.broadcast %cst_39 : f32 to vector<64x128xf32>
    %22 = arith.maximumf %20, %21 : vector<64x128xf32>
    %23 = vector.shape_cast %22 : vector<64x128xf32> to vector<4x2x4x2x128xf32>
    %cst_40 = arith.constant dense<0xFF800000> : vector<4x2x4x128xf32>
    %24 = vector.multi_reduction <maximumf>, %23, %cst_40 [3] : vector<4x2x4x2x128xf32> to vector<4x2x4x128xf32>
    %cst_41 = arith.constant dense<0xFF800000> : vector<4x4x128xf32>
    %25 = vector.multi_reduction <maximumf>, %24, %cst_41 [1] : vector<4x2x4x128xf32> to vector<4x4x128xf32>
    %26 = vector.shape_cast %25 : vector<4x4x128xf32> to vector<1x4x4x128xf32>
    %27 = arith.truncf %26 : vector<1x4x4x128xf32> to vector<1x4x4x128xbf16>
    %c0_42 = arith.constant 0 : index
    %c0_43 = arith.constant 0 : index
    %c0_44 = arith.constant 0 : index
    %c0_45 = arith.constant 0 : index
    %28 = vector.load %arg4[%c0_42, %c0_43, %c0_44, %c0_45] : memref<1x4x4x128xbf16, #tpu.memory_space<vmem>>, vector<1x4x4x128xbf16>
    tpu.vector_store %arg4[%c0_42, %c0_43, %c0_44, %c0_45], %27 {strides = array<i32>} : memref<1x4x4x128xbf16, #tpu.memory_space<vmem>>, vector<1x4x4x128xbf16>,
    return
  }
  func.func @transform_0(%arg0: i32) -> (i32, i32, i32, i32) {
    %c0_i32 = arith.constant 0 : i32
    %c0_i32_0 = arith.constant 0 : i32
    %c0_i32_1 = arith.constant 0 : i32
    %c0_i32_2 = arith.constant 0 : i32
    return %arg0, %c0_i32, %c0_i32_0, %c0_i32_1 : i32, i32, i32, i32
  }
  func.func @transform_1(%arg0: i32) -> (i32, i32) {
    %c0_i32 = arith.constant 0 : i32
    %c0_i32_0 = arith.constant 0 : i32
    %c0_i32_1 = arith.constant 0 : i32
    return %c0_i32, %c0_i32_0 : i32, i32
  }
  func.func @transform_2(%arg0: i32) -> (i32, i32) {
    %c0_i32 = arith.constant 0 : i32
    %c0_i32_0 = arith.constant 0 : i32
    %c0_i32_1 = arith.constant 0 : i32
    return %c0_i32, %c0_i32_0 : i32, i32
  }
  func.func @transform_3(%arg0: i32) -> (i32, i32, i32, i32) {
    %c0_i32 = arith.constant 0 : i32
    %c0_i32_0 = arith.constant 0 : i32
    %c0_i32_1 = arith.constant 0 : i32
    %c0_i32_2 = arith.constant 0 : i32
    return %arg0, %c0_i32, %c0_i32_0, %c0_i32_1 : i32, i32, i32, i32
  }
}

</mosaic_0001>

<bundles_post_ra>
// kernel: _lambda_.5
= control target key start
LH: loop header
LB: loop body
LE: loop exit
PB: predicated region body
PF: predicated region fallthrough
CT: control target
= control target key end

     0   :  { %s3197_s12 = smov 0   ;;  %s3939_s0 = inlined_call_operand.vmem [shape: bf16[2,8,8,128], index: 0, kind: input, shape index: {}]   ;;  %s3940_s1 = inlined_call_operand.vmem [shape: bf16[1152,128], index: 1, kind: input, shape index: {}]   ;;  %s3941_s2 = inlined_call_operand.vmem [shape: f32[1,128], index: 2, kind: input, shape index: {}]   ;;  %s3942_s3 = inlined_call_operand.vmem [shape: bf16[2,4,4,128], index: 3, kind: output, shape index: {}]  }
   0x1 LB: > { %s2639_s13 = sadd.s32 4294967295, %s3173_s12   ;;  %p2643_p0 = scmp.ge.s32.totalorder %s3173_s12, 1  ;;  %s3173_s12 = sphi %s3197_s12, %s13_s12  }
   0x2   : > { %p137_p1 = scmp.lt.s32.totalorder %s3173_s12, 3 }
   0x4   : > { %p138_p2 = pnand %p2643_p0, %p137_p1 }
   0x5   : > { %v3035_v0 = vld [vmem:[%s3940_s1 + $0x40] sm:$0xff] (!%p138_p2)   ;;  %v3175_v3 = vmov (!%p138_p2), 0   ;;  %v3039_v5 = vld [vmem:[%s3940_s1 + $0x48] sm:$0xff] (!%p138_p2)   ;;  %v3043_v9 = vld [vmem:[%s3940_s1 + $0x50] sm:$0xff] (!%p138_p2)   ;;  %p161_p3 = scmp.lt.s32.totalorder (!%p138_p2), %s2639_s13, 1  ;;  %vm281_vm0 = vcmask (!%p138_p2), 1043456  }
   0x6   : > { %141 = sbr.rel (%p138_p2) target bundleno = 440 (0x1b8), region = 32  ;;  %v3036_v1 = vld [vmem:[%s3940_s1 + $0xc0] sm:$0xff] (!%p138_p2)   ;;  %2813 = vmatprep.subr.bf16.mxu0 (!%p138_p2), %v3035_v0  ;;  %172 = vst [vmem:[#allocation2] sm:$0xf] (!%p138_p2), %v3175_v3  ;;  %173 = vst [vmem:[#allocation2 + $0x4] sm:$0x1] (!%p138_p2), %v3175_v3 }
   0x7   : > { %v3037_v2 = vld [vmem:[%s3940_s1] sm:$0xff] (!%p138_p2)   ;;  %174 = vst [vmem:[#allocation2 + $0x8] sm:$0xf] (!%p138_p2), %v3175_v3  ;;  %175 = vst [vmem:[#allocation2 + $0xc] sm:$0x1] (!%p138_p2), %v3175_v3  ;;  %2853 = vmatprep.subr.bf16.mxu1 (!%p138_p2), %v3036_v1  ;;  %v3040_v6 = vld [vmem:[%s3940_s1 + $0xc8] sm:$0xff] (!%p138_p2)  }
   0x8   : > { %176 = vst [vmem:[#allocation2 + $0x10] sm:$0xf] (!%p138_p2), %v3175_v3  ;;  %177 = vst [vmem:[#allocation2 + $0x14] sm:$0x1] (!%p138_p2), %v3175_v3  ;;  %v3038_v4 = vld [vmem:[%s3940_s1 + $0x80] sm:$0xff] (!%p138_p2)   ;;  %2814 = vmatpush3.bf16.msra.mxu0 (!%p138_p2), %v3037_v2  ;;  %v3041_v7 = vld [vmem:[%s3940_s1 + $0x8] sm:$0xff] (!%p138_p2)  }
   0x9   : > { %178 = vst [vmem:[#allocation2 + $0x18] sm:$0xf] (!%p138_p2), %v3175_v3  ;;  %179 = vst [vmem:[#allocation2 + $0x1c] sm:$0x1] (!%p138_p2), %v3175_v3  ;;  %2854 = vmatpush3.bf16.msra.mxu1 (!%p138_p2), %v3038_v4  ;;  %2815 = vmatprep.subr.bf16.mxu0 (!%p138_p2), %v3039_v5  ;;  %v3042_v8 = vld [vmem:[%s3940_s1 + $0x88] sm:$0xff] (!%p138_p2)   ;;  %v3044_v10 = vld [vmem:[%s3940_s1 + $0xd0] sm:$0xff] (!%p138_p2)  }
   0xa   : > { %180 = vst [vmem:[#allocation2 + $0x20] sm:$0xf] (!%p138_p2), %v3175_v3  ;;  %181 = vst [vmem:[#allocation2 + $0x24] sm:$0x1] (!%p138_p2), %v3175_v3  ;;  %2855 = vmatprep.subr.bf16.mxu1 (!%p138_p2), %v3040_v6  ;;  %v3045_v11 = vld [vmem:[%s3940_s1 + $0x10] sm:$0xff] (!%p138_p2)   ;;  %v3047_v13 = vld [vmem:[%s3940_s1 + $0x58] sm:$0xff] (!%p138_p2)  }
   0xb   : > { %182 = vst [vmem:[#allocation2 + $0x28] sm:$0xf] (!%p138_p2), %v3175_v3  ;;  %183 = vst [vmem:[#allocation2 + $0x2c] sm:$0x1] (!%p138_p2), %v3175_v3  ;;  %v3046_v12 = vld [vmem:[%s3940_s1 + $0x90] sm:$0xff] (!%p138_p2)   ;;  %v3048_v14 = vld [vmem:[%s3940_s1 + $0xd8] sm:$0xff] (!%p138_p2)  }
   0xc   : > { %184 = vst [vmem:[#allocation2 + $0x30] sm:$0xf] (!%p138_p2), %v3175_v3  ;;  %185 = vst [vmem:[#allocation2 + $0x34] sm:$0x1] (!%p138_p2), %v3175_v3  ;;  %2816 = vmatpush3.bf16.msra.mxu0 (!%p138_p2), %v3041_v7  ;;  %v3049_v15 = vld [vmem:[%s3940_s1 + $0x18] sm:$0xff] (!%p138_p2)   ;;  %v3051_v17 = vld [vmem:[%s3940_s1 + $0x60] sm:$0xff] (!%p138_p2)  }
   0xd   : > { %186 = vst [vmem:[#allocation2 + $0x38] sm:$0xf] %v3175_v3  ;;  %187 = vst [vmem:[#allocation2 + $0x3c] sm:$0x1] %v3175_v3  ;;  %2856 = vmatpush3.bf16.msra.mxu1 %v3042_v8  ;;  %2817 = vmatprep.subr.bf16.mxu0 %v3043_v9  ;;  %v3050_v16 = vld [vmem:[%s3940_s1 + $0x98] sm:$0xff]   ;;  %v3052_v18 = vld [vmem:[%s3940_s1 + $0xe0] sm:$0xff]  }
   0xe   : > { %188 = vst [vmem:[#allocation2 + $0x40] sm:$0xf] %v3175_v3  ;;  %189 = vst [vmem:[#allocation2 + $0x44] sm:$0x1] %v3175_v3  ;;  %2857 = vmatprep.subr.bf16.mxu1 %v3044_v10  ;;  %v3053_v19 = vld [vmem:[%s3940_s1 + $0x20] sm:$0xff]   ;;  %v3055_v21 = vld [vmem:[%s3940_s1 + $0x68] sm:$0xff]  }
   0xf   : > { %190 = vst [vmem:[#allocation2 + $0x48] sm:$0xf] %v3175_v3  ;;  %191 = vst [vmem:[#allocation2 + $0x4c] sm:$0x1] %v3175_v3  ;;  %v3054_v20 = vld [vmem:[%s3940_s1 + $0xa0] sm:$0xff]   ;;  %v3056_v22 = vld [vmem:[%s3940_s1 + $0xe8] sm:$0xff]  }
  0x10   : > { %2818 = vmatpush3.bf16.msra.mxu0 %v3045_v11  ;;  %v3057_v23 = vld [vmem:[%s3940_s1 + $0x28] sm:$0xff]   ;;  %s3948_s13 = smov (!%p161_p3, %s2639_s13), 1  ;;  %v3059_v25 = vld [vmem:[%s3940_s1 + $0x70] sm:$0xff]   ;;  %v3063_v29 = vld [vmem:[%s3940_s1 + $0x78] sm:$0xff]   ;;  %vm282_vm1 = vsmask.f32 7938 }
  0x11   : > { %2858 = vmatpush3.bf16.msra.mxu1 %v3046_v12  ;;  %2819 = vmatprep.subr.bf16.mxu0 %v3047_v13  ;;  %v3058_v24 = vld [vmem:[%s3940_s1 + $0xa8] sm:$0xff]   ;;  %v3060_v26 = vld [vmem:[%s3940_s1 + $0xf0] sm:$0xff]   ;;  %s2811_s18 = sshll.u32 %s3948_s13, 5  ;;  %v3064_v30 = vld [vmem:[%s3940_s1 + $0xf8] sm:$0xff]   ;;  %vm287_vm2 = vcmask 1040384   ;;  %vm2004_vm6 = vcmask 1041408  }
  0x12   : > { %2859 = vmatprep.subr.bf16.mxu1 %v3048_v14  ;;  %v3061_v27 = vld [vmem:[%s3940_s1 + $0x30] sm:$0xff]   ;;  %s3305_s27 = scalar_lea.vmem %s3939_s0, %s2811_s18  ;;  %v3065_v31 = vld [vmem:[%s3940_s1 + $0x38] sm:$0xff]   ;;  %vm288_vm3 = vsmask.f32 256  ;;  %vm3314_vm4 = vmand %vm281_vm0, %vm282_vm1  ;;  %vm2518_vm7 = vcmask 1041409   ;;  %vm2521_vm8 = vcmask 1042434  }
  0x13   : > { %v3062_v28 = vld [vmem:[%s3940_s1 + $0xb0] sm:$0xff]   ;;  %v3066_v32 = vld [vmem:[%s3940_s1 + $0xb8] sm:$0xff]   ;;  %v192_v33 = vld [vmem:[%s3305_s27] sm:$0xf]  ;;  %vm2524_vm9 = vcmask 1043459   ;;  %s2812_s15 = sshll.u32 %s3948_s13, 3 }
  0x14   : > { %2820 = vmatpush3.bf16.msra.mxu0 %v3049_v15  ;;  %v201_v34 = vshrl.u32 %v192_v33, 16  ;;  %v204_v35 = vshll.u32 %v192_v33, 16  ;;  %v284_v37 = vld [vmem:[#allocation2 + $0x8] sm:$0xf]  ;;  %v290_v39 = vld [vmem:[#allocation2 + $0xc] sm:$0x1]  ;;  %vm3322_vm5 = vmand %vm287_vm2, %vm288_vm3  ;;  %s3877_s13 = scalar_lea.vmem %s3942_s3, %s2812_s15 }
  0x15   : > { %2860 = vmatpush3.bf16.msra.mxu1 %v3050_v16  ;;  %2821 = vmatprep.subr.bf16.mxu0 %v3051_v17  ;;  %v193_v40 = vld [vmem:[%s3305_s27 + $0x4] sm:$0xf]  ;;  %v3326_v43 = vld [vmem:[#allocation2] sm:$0xf]  ;;  %v293_v49 = vld [vmem:[#allocation2 + $0x10] sm:$0xf] }
  0x16   : > { %2861 = vmatprep.subr.bf16.mxu1 %v3052_v18  ;;  %v203_v38 = vrot.slane %v201_v34, 7  ;;  %v3077_v41 = vld [vmem:[%s3940_s1 + $0x140] sm:$0xff]   ;;  %v209_v45 = vshrl.u32 %v193_v40, 16  ;;  %v212_v46 = vshll.u32 %v193_v40, 16  ;;  %v296_v54 = vld [vmem:[#allocation2 + $0x14] sm:$0x1] }
  0x17   : > { %v343_v44 = vld [vmem:[#allocation2 + $0x4] sm:$0x1]  ;;  %v351_v60 = vld [vmem:[#allocation2] sm:$0xe]  ;;  %v194_v62 = vld [vmem:[%s3305_s27 + $0x8] sm:$0xf] }
  0x18   : > { %2822 = vmatpush3.bf16.msra.mxu0 %v3053_v19  ;;  %v206_v47 = vor.u32 %v204_v35, %v203_v38  ;;  %v207_v48 = vrot.slane %v203_v38, 4  ;;  %v3078_v50 = vld [vmem:[%s3940_s1 + $0x1c0] sm:$0xff]   ;;  %v211_v51 = vrot.slane %v209_v45, 7  ;;  %v2648_v55 = vcombine.low %v3326_v43, %v343_v44  ;;  %v299_v15 = vld [vmem:[#allocation2 + $0x18] sm:$0xf]  ;;  %v3084_v33 = vld [vmem:[%s3940_s1 + $0x188] sm:$0xff]  }
  0x19   : > { %2862 = vmatpush3.bf16.msra.mxu1 %v3054_v20  ;;  %2823 = vmatprep.subr.bf16.mxu0 %v3055_v21  ;;  %v2656_v63 = vcombine.low %v351_v60, %v343_v44  ;;  %v217_v0 = vshrl.u32 %v194_v62, 16  ;;  %v220_v10 = vshll.u32 %v194_v62, 16  ;;  %v3083_v45 = vld [vmem:[%s3940_s1 + $0x108] sm:$0xff]   ;;  %v3131_v42 = vld [vmem:[%s3940_s1 + $0x138] sm:$0xff]  }
  0x1a   : > { %2863 = vmatprep.subr.bf16.mxu1 %v3056_v22  ;;  %v285_v52 = vsel %vm3314_vm4, %v206_v47, %v284_v37  ;;  %v291_v53 = vsel %vm3322_vm5, %v207_v48, %v290_v39  ;;  %v214_v56 = vor.u32 %v212_v46, %v211_v51  ;;  %v215_v57 = vrot.slane %v211_v51, 4  ;;  %v3080_v22 = vld [vmem:[%s3940_s1 + $0x180] sm:$0xff]   ;;  %v3094_v47 = vld [vmem:[%s3940_s1 + $0x1d0] sm:$0xff]  }
  0x1b   : > { %286 = vst [vmem:[#allocation2 + $0x8] sm:$0xf] %v285_v52  ;;  %292 = vst [vmem:[#allocation2 + $0xc] sm:$0x1] %v291_v53  ;;  %v451_v61 = vshll.u32 %v2648_v55, 16  ;;  %v449_v4 = vshrl.u32 %v2648_v55, 16 }
  0x1c   : > { %2824 = vmatpush3.bf16.msra.mxu0 %v3057_v23  ;;  %v294_v58 = vsel %vm3314_vm4, %v214_v56, %v293_v49  ;;  %v297_v59 = vsel %vm3322_vm5, %v215_v57, %v296_v54  ;;  %v219_v9 = vrot.slane %v217_v0, 7  ;;  %v528_v14 = vrot.slane %v2656_v63, 1  ;;  %v3093_v48 = vld [vmem:[%s3940_s1 + $0x150] sm:$0xff]   ;;  %v3098_v56 = vld [vmem:[%s3940_s1 + $0x1d8] sm:$0xff]  }
  0x1d   : > { %2864 = vmatpush3.bf16.msra.mxu1 %v3058_v24  ;;  %2825 = vmatprep.subr.bf16.mxu0 %v3059_v25  ;;  %295 = vst [vmem:[#allocation2 + $0x10] sm:$0xf] %v294_v58  ;;  %298 = vst [vmem:[#allocation2 + $0x14] sm:$0x1] %v297_v59  ;;  %v453_v5 = vrot.slane %v451_v61, 1  ;;  %v3096_v53 = vld [vmem:[%s3940_s1 + $0x190] sm:$0xff]  }
  0x1e   : > { %2865 = vmatprep.subr.bf16.mxu1 %v3060_v26  ;;  %v222_v23 = vor.u32 %v220_v10, %v219_v9  ;;  %v302_v24 = vld [vmem:[#allocation2 + $0x1c] sm:$0x1]  ;;  %v195_v25 = vld [vmem:[%s3305_s27 + $0xc] sm:$0xf]  ;;  %v196_v57 = vld [vmem:[%s3305_s27 + $0x10] sm:$0xf] }
  0x1f   : > { %v454_v16 = vor.u32 %v453_v5, %v449_v4  ;;  %v225_v39 = vshrl.u32 %v195_v25, 16  ;;  %v228_v40 = vshll.u32 %v195_v25, 16  ;;  %v3095_v61 = vld [vmem:[%s3940_s1 + $0x110] sm:$0xff]  }
  0x20   : > { %2826 = vmatpush3.bf16.msra.mxu0 %v3061_v27  ;;  %v300_v34 = vsel %vm3314_vm4, %v222_v23, %v299_v15  ;;  %v197_v10 = vld [vmem:[%s3305_s27 + $0x14] sm:$0xf]  ;;  %v314_v15 = vld [vmem:[#allocation2 + $0x2c] sm:$0x1]  ;;  %v317_v23 = vld [vmem:[#allocation2 + $0x30] sm:$0xf] }
  0x21   : > { %2866 = vmatpush3.bf16.msra.mxu1 %v3062_v28  ;;  %2827 = vmatprep.subr.bf16.mxu0 %v3063_v29  ;;  %v3079_v28 = vld [vmem:[%s3940_s1 + $0x100] sm:$0xff]   ;;  %v3082_v29 = vld [vmem:[%s3940_s1 + $0x1c8] sm:$0xff]   ;;  %301 = vst [vmem:[#allocation2 + $0x18] sm:$0xf] %v300_v34  ;;  %v227_v46 = vrot.slane %v225_v39, 7 }
  0x22   : > { %2867 = vmatprep.subr.bf16.mxu1 %v3064_v30  ;;  %v336_v1 = vld [vmem:[#allocation2 + $0x8] sm:$0xf]  ;;  %v344_v2 = vld [vmem:[#allocation2 + $0xc] sm:$0x1]  ;;  %v223_v30 = vrot.slane %v219_v9, 4 }
  0x23   : > { %v2649_v3 = vcombine.low %v336_v1, %v344_v2  ;;  %v352_v6 = vld [vmem:[#allocation2 + $0x8] sm:$0xe]  ;;  %v231_v51 = vrot.slane %v227_v46, 4  ;;  %v3400_v62 = vld [vmem:[#allocation2 + $0xc] sm:$0x1] }
  0x24   : > { %2828 = vmatpush3.bf16.msra.mxu0 %v3065_v31  ;;  %v3341_v7 = vld [vmem:[#allocation2 + $0x8] sm:$0xf]  ;;  %v2657_v8 = vcombine.low %v352_v6, %v344_v2  ;;  %v3343_v13 = vld [vmem:[#allocation2 + $0x10] sm:$0xf]  ;;  %v345_v21 = vld [vmem:[#allocation2 + $0x14] sm:$0x1]  ;;  %v2697_v31 = vcombine.low %v3326_v43, %v336_v1  ;;  %v303_v38 = vsel %vm3322_vm5, %v223_v30, %v302_v24 }
  0x25   : > { %2868 = vmatpush3.bf16.msra.mxu1 %v3066_v32  ;;  %2893 = vmatprep.subr.bf16.mxu0 %v3077_v41  ;;  %v456_v11 = vshrl.u32 %v2649_v3, 16  ;;  %v458_v12 = vshll.u32 %v2649_v3, 16  ;;  %v2700_v18 = vcombine.low %v3341_v7, %v3343_v13  ;;  %v3347_v20 = vld [vmem:[#allocation2 + $0x10] sm:$0xf]  ;;  %v3081_v32 = vld [vmem:[%s3940_s1 + $0x148] sm:$0xff]   ;;  %v3097_v1 = vld [vmem:[%s3940_s1 + $0x158] sm:$0xff]  }
  0x26   : > { %2933 = vmatprep.subr.bf16.mxu1 %v3078_v50  ;;  %v529_v19 = vrot.slane %v2657_v8, 1  ;;  %v3369_v35 = vcombine.low %v3347_v20, %v345_v21  ;;  %304 = vst [vmem:[#allocation2 + $0x1c] sm:$0x1] %v303_v38  ;;  %v305_v41 = vld [vmem:[#allocation2 + $0x20] sm:$0xf]  ;;  %v230_v50 = vor.u32 %v228_v40, %v227_v46  ;;  %v233_v2 = vshrl.u32 %v196_v57, 16 }
  0x27   : > { %v460_v17 = vrot.slane %v458_v12, 1  ;;  %1592 = vmatprep.mubr.bf16.mxu1 %v2700_v18  ;;  %v308_v43 = vld [vmem:[#allocation2 + $0x24] sm:$0x1]  ;;  %v353_v44 = vld [vmem:[#allocation2 + $0x10] sm:$0xe]  ;;  %v236_v3 = vshll.u32 %v196_v57, 16 }
  0x28   : > { %v2699_v27 = vcombine.low %v528_v14, %v529_v19  ;;  %v465_v49 = vshll.u32 %v3369_v35, 16  ;;  %v2658_v52 = vcombine.low %v353_v44, %v345_v21  ;;  %v306_v54 = vsel %vm3314_vm4, %v230_v50, %v305_v41  ;;  %v3394_v58 = vld [vmem:[#allocation2 + $0x18] sm:$0xf]  ;;  %v311_v9 = vld [vmem:[#allocation2 + $0x28] sm:$0xf]  ;;  %v3109_v24 = vld [vmem:[%s3940_s1 + $0x160] sm:$0xff]  }
  0x29   : > { %v461_v26 = vor.u32 %v460_v17, %v456_v11  ;;  %v309_v55 = vsel %vm3322_vm5, %v231_v51, %v308_v43  ;;  %v463_v59 = vshrl.u32 %v3369_v35, 16  ;;  %307 = vst [vmem:[#allocation2 + $0x20] sm:$0xf] %v306_v54  ;;  %v354_v60 = vld [vmem:[#allocation2 + $0x18] sm:$0xe]  ;;  %v235_v14 = vrot.slane %v233_v2, 7 }
  0x2a   : > { %1593 = vmatmul.mubr.bf16.vlgmr.msra.gmra.mrb[0].mxu1 %v2699_v27  ;;  %310 = vst [vmem:[#allocation2 + $0x24] sm:$0x1] %v309_v55  ;;  %v467_v0 = vrot.slane %v465_v49, 1  ;;  %v530_v6 = vrot.slane %v2658_v52, 1  ;;  %v3100_v8 = vld [vmem:[%s3940_s1 + $0x198] sm:$0xff]   ;;  %v244_v17 = vshll.u32 %v197_v10, 16 }
  0x2b   : > { %v2698_v37 = vcombine.low %v454_v16, %v461_v26  ;;  %2934 = vmatpush3.bf16.msra.mxu1 %v3080_v22  ;;  %v3410_v11 = vld [vmem:[#allocation2 + $0x18] sm:$0xf]  ;;  %v241_v16 = vshrl.u32 %v197_v10, 16  ;;  %v375_v18 = vld [vmem:[#allocation2 + $0x8] sm:$0xe]  ;;  %v238_v25 = vor.u32 %v236_v3, %v235_v14  ;;  %v239_v26 = vrot.slane %v235_v14, 4 }
  0x2c   : > { %2935 = vmatprep.subr.bf16.mxu1 %v3082_v29  ;;  %v3099_v12 = vld [vmem:[%s3940_s1 + $0x118] sm:$0xff]   ;;  %v468_v29 = vor.u32 %v467_v0, %v463_v59  ;;  %v320_v38 = vld [vmem:[#allocation2 + $0x34] sm:$0x1]  ;;  %v2672_v46 = vcombine.low %v375_v18, %v3400_v62  ;;  %v3112_v52 = vld [vmem:[%s3940_s1 + $0x1a0] sm:$0xff]  }
  0x2d   : > { %1527 = vmatprep.mubr.bf16.mxu0 %v2698_v37  ;;  %v346_v63 = vld [vmem:[#allocation2 + $0x1c] sm:$0x1]  ;;  %v243_v27 = vrot.slane %v241_v16, 7  ;;  %v312_v34 = vsel %vm3314_vm4, %v238_v25, %v311_v9  ;;  %v315_v35 = vsel %vm3322_vm5, %v239_v26, %v314_v15  ;;  %v3113_v54 = vld [vmem:[%s3940_s1 + $0x168] sm:$0xff]   ;;  %v3454_v55 = vld [vmem:[#allocation2 + $0x14] sm:$0x1] }
  0x2e   : > { %1528 = vmatmul.mubr.bf16.vlgmr.msra.gmra.mrb[0].mxu0 %v2697_v31  ;;  %v2651_v4 = vcombine.low %v3394_v58, %v346_v63  ;;  %v2659_v5 = vcombine.low %v354_v60, %v346_v63  ;;  %v3110_v31 = vld [vmem:[%s3940_s1 + $0x1e0] sm:$0xff]   ;;  %313 = vst [vmem:[#allocation2 + $0x28] sm:$0xf] %v312_v34  ;;  %316 = vst [vmem:[#allocation2 + $0x2c] sm:$0x1] %v315_v35  ;;  %v3114_v57 = vld [vmem:[%s3940_s1 + $0x1e8] sm:$0xff]   ;;  %v3475_v10 = vcombine.low %v3343_v13, %v3454_v55 }
  0x2f   : > { %2894 = vmatpush3.bf16.msra.mxu0 %v3079_v28  ;;  %2936 = vmatpush3.bf16.msra.mxu1 %v3084_v33  ;;  %v3420_v28 = vcombine.low %v3341_v7, %v3400_v62  ;;  %v246_v7 = vor.u32 %v244_v17, %v243_v27  ;;  %v247_v43 = vrot.slane %v243_v27, 4  ;;  %v3115_v60 = vld [vmem:[%s3940_s1 + $0x128] sm:$0xff]   ;;  %v198_v0 = vld [vmem:[%s3305_s27 + $0x18] sm:$0xf]  ;;  %v3125_v13 = vld [vmem:[%s3940_s1 + $0x170] sm:$0xff]  }
  0x30   : > { %2895 = vmatprep.subr.bf16.mxu0 %v3081_v32  ;;  %2937 = vmatprep.subr.bf16.mxu1 %v3094_v47  ;;  %v470_v19 = vshrl.u32 %v2651_v4, 16  ;;  %v472_v21 = vshll.u32 %v2651_v4, 16  ;;  %v531_v22 = vrot.slane %v2659_v5, 1  ;;  %v3425_v32 = vld [vmem:[#allocation2 + $0x20] sm:$0xf]  ;;  %v2706_v47 = vcombine.low %v3347_v20, %v3394_v58  ;;  %v3116_v63 = vld [vmem:[%s3940_s1 + $0x1a8] sm:$0xff]  }
  0x31   : > { %v3431_v37 = vld [vmem:[#allocation2 + $0x20] sm:$0xf]  ;;  %v2709_v40 = vcombine.low %v3410_v11, %v3425_v32  ;;  %v347_v41 = vld [vmem:[#allocation2 + $0x24] sm:$0x1]  ;;  %v318_v49 = vsel %vm3314_vm4, %v246_v7, %v317_v23  ;;  %v321_v51 = vsel %vm3322_vm5, %v247_v43, %v320_v38  ;;  %v579_v20 = vshll.u32 %v3420_v28, 16 }
  0x32   : > { %v474_v30 = vrot.slane %v472_v21, 1  ;;  %v2708_v33 = vcombine.low %v530_v6, %v531_v22  ;;  %v355_v44 = vld [vmem:[#allocation2 + $0x20] sm:$0xe]  ;;  %319 = vst [vmem:[#allocation2 + $0x30] sm:$0xf] %v318_v49  ;;  %v3459_v58 = vrot.slane %v2672_v46, 1 }
  0x33   : > { %2896 = vmatpush3.bf16.msra.mxu0 %v3083_v45  ;;  %2938 = vmatpush3.bf16.msra.mxu1 %v3096_v53  ;;  %v3111_v45 = vld [vmem:[%s3940_s1 + $0x120] sm:$0xff]   ;;  %v577_v53 = vshrl.u32 %v3420_v28, 16  ;;  %322 = vst [vmem:[#allocation2 + $0x34] sm:$0x1] %v321_v51  ;;  %v2660_v59 = vcombine.low %v355_v44, %v347_v41  ;;  %v252_v9 = vshll.u32 %v198_v0, 16  ;;  %v3126_v44 = vld [vmem:[%s3940_s1 + $0x1f0] sm:$0xff]  }
  0x34   : > { %2897 = vmatprep.subr.bf16.mxu0 %v3093_v48  ;;  %2939 = vmatprep.subr.bf16.mxu1 %v3098_v56  ;;  %v475_v39 = vor.u32 %v474_v30, %v470_v19  ;;  %v2652_v48 = vcombine.low %v3431_v37, %v347_v41  ;;  %v323_v17 = vld [vmem:[#allocation2 + $0x38] sm:$0xf]  ;;  %v326_v23 = vld [vmem:[#allocation2 + $0x3c] sm:$0x1]  ;;  %v3495_v38 = vld [vmem:[#allocation2 + $0x24] sm:$0x1] }
  0x35   : > { %1600 = vmatprep.mubr.bf16.mxu1 %v2709_v40  ;;  %v348_v2 = vld [vmem:[#allocation2 + $0x2c] sm:$0x1]  ;;  %v3470_v3 = vld [vmem:[#allocation2 + $0x28] sm:$0xf]  ;;  %v532_v16 = vrot.slane %v2660_v59, 1  ;;  %v3522_v59 = vcombine.low %v3425_v32, %v3495_v38 }
  0x36   : > { %v2707_v50 = vcombine.low %v468_v29, %v475_v39  ;;  %1601 = vmatmul.mubr.bf16.gmra.mrb[4].mxu1 %v2708_v33  ;;  %v479_v56 = vshll.u32 %v2652_v48, 16  ;;  %v477_v62 = vshrl.u32 %v2652_v48, 16  ;;  %v356_v6 = vld [vmem:[#allocation2 + $0x28] sm:$0xe]  ;;  %v3492_v30 = vld [vmem:[#allocation2 + $0x1c] sm:$0x1] }
  0x37   : > { %2898 = vmatpush3.bf16.msra.mxu0 %v3095_v61  ;;  %2940 = vmatpush3.bf16.msra.mxu1 %v3100_v8  ;;  %v376_v61 = vld [vmem:[#allocation2 + $0x10] sm:$0xe]  ;;  %v249_v8 = vshrl.u32 %v198_v0, 16  ;;  %v2661_v15 = vcombine.low %v356_v6, %v348_v2  ;;  %v199_v7 = vld [vmem:[%s3305_s27 + $0x1c] sm:$0xf]  ;;  %v600_v36 = vshll.u32 %v3522_v59, 16 }
  0x38   : > { %2899 = vmatprep.subr.bf16.mxu0 %v3097_v1  ;;  %2941 = vmatprep.subr.bf16.mxu1 %v3110_v31  ;;  %v3468_v1 = vld [vmem:[#allocation2 + $0x28] sm:$0xf]  ;;  %v481_v5 = vrot.slane %v479_v56, 1  ;;  %v2673_v25 = vcombine.low %v376_v61, %v3454_v55  ;;  %v257_v41 = vshrl.u32 %v199_v7, 16  ;;  %v260_v43 = vshll.u32 %v199_v7, 16 }
  0x39   : > { %1535 = vmatprep.mubr.bf16.mxu0 %v2707_v50  ;;  %v2653_v4 = vcombine.low %v3468_v1, %v348_v2  ;;  %v3479_v14 = vld [vmem:[#allocation2 + $0x30] sm:$0xf]  ;;  %v251_v22 = vrot.slane %v249_v8, 7  ;;  %v533_v26 = vrot.slane %v2661_v15, 1  ;;  %v329_v49 = vld [vmem:[#allocation2 + $0x40] sm:$0xf]  ;;  %v3518_v56 = vcombine.low %v3410_v11, %v3492_v30 }
  0x3a   : > { %1536 = vmatmul.mubr.bf16.gmra.mrb[4].mxu0 %v2706_v47  ;;  %v2718_v21 = vcombine.low %v3470_v3, %v3479_v14  ;;  %v3488_v27 = vld [vmem:[#allocation2 + $0x30] sm:$0xf]  ;;  %v3490_v29 = vld [vmem:[#allocation2 + $0x34] sm:$0x1]  ;;  %v482_v31 = vor.u32 %v481_v5, %v477_v62  ;;  %v332_v50 = vld [vmem:[#allocation2 + $0x44] sm:$0x1] }
  0x3b   : > { %2900 = vmatpush3.bf16.msra.mxu0 %v3099_v12  ;;  %2942 = vmatpush3.bf16.msra.mxu1 %v3112_v52  ;;  %v3477_v12 = vrot.slane %v579_v20, 1  ;;  %v484_v18 = vshrl.u32 %v2653_v4, 16  ;;  %v486_v19 = vshll.u32 %v2653_v4, 16  ;;  %v254_v34 = vor.u32 %v252_v9, %v251_v22  ;;  %v357_v51 = vld [vmem:[#allocation2 + $0x30] sm:$0xe]  ;;  %v3129_v2 = vld [vmem:[%s3940_s1 + $0x178] sm:$0xff]  }
  0x3c   : > { %2901 = vmatprep.subr.bf16.mxu0 %v3109_v24  ;;  %2943 = vmatprep.subr.bf16.mxu1 %v3114_v57  ;;  %v584_v24 = vshrl.u32 %v3475_v10, 16  ;;  %v255_v35 = vrot.slane %v251_v22, 4  ;;  %v2717_v39 = vcombine.low %v532_v16, %v533_v26  ;;  %v3499_v40 = vcombine.low %v3488_v27, %v3490_v29  ;;  %v3127_v52 = vld [vmem:[%s3940_s1 + $0x130] sm:$0xff]   ;;  %v3130_v5 = vld [vmem:[%s3940_s1 + $0x1f8] sm:$0xff]  }
  0x3d   : > { %v488_v33 = vrot.slane %v486_v19, 1  ;;  %1608 = vmatprep.mubr.bf16.mxu1 %v2718_v21  ;;  %v324_v47 = vsel %vm3314_vm4, %v254_v34, %v323_v17  ;;  %v3512_v20 = vrot.slane %v2673_v25, 1  ;;  %v259_v55 = vrot.slane %v257_v41, 7  ;;  %v3545_v6 = vld [vmem:[#allocation2 + $0x34] sm:$0x1] }
  0x3e   : > { %v327_v48 = vsel %vm3322_vm5, %v255_v35, %v326_v23  ;;  %1609 = vmatmul.mubr.bf16.gmra.mrb[8].mxu1 %v2717_v39  ;;  %325 = vst [vmem:[#allocation2 + $0x38] sm:$0xf] %v324_v47  ;;  %v593_v4 = vshll.u32 %v3518_v56, 16  ;;  %v491_v15 = vshrl.u32 %v3499_v40, 16  ;;  %v3132_v23 = vld [vmem:[%s3940_s1 + $0x1b8] sm:$0xff]   ;;  %v3575_v35 = vcombine.low %v3479_v14, %v3545_v6 }
  0x3f   : > { %2902 = vmatpush3.bf16.msra.mxu0 %v3111_v45  ;;  %2944 = vmatpush3.bf16.msra.mxu1 %v3116_v63  ;;  %v586_v45 = vshll.u32 %v3475_v10, 16  ;;  %v489_v46 = vor.u32 %v488_v33, %v484_v18  ;;  %328 = vst [vmem:[#allocation2 + $0x3c] sm:$0x1] %v327_v48  ;;  %v262_v61 = vor.u32 %v260_v43, %v259_v55  ;;  %v263_v62 = vrot.slane %v259_v55, 4  ;;  %v3528_v63 = vld [vmem:[#allocation2 + $0x2c] sm:$0x1] }
  0x40   : > { %2903 = vmatprep.subr.bf16.mxu0 %v3113_v54  ;;  %v2715_v54 = vcombine.low %v3431_v37, %v3468_v1  ;;  %2945 = vmatprep.subr.bf16.mxu1 %v3126_v44  ;;  %v3128_v37 = vld [vmem:[%s3940_s1 + $0x1b0] sm:$0xff]   ;;  %v2662_v1 = vcombine.low %v357_v51, %v3490_v29  ;;  %v3555_v17 = vcombine.low %v3470_v3, %v3528_v63  ;;  %v3565_v26 = vld [vmem:[#allocation2 + $0x18] sm:$0xf]  ;;  %v3569_v33 = vld [vmem:[#allocation2 + $0x1c] sm:$0x1]  ;;  %v591_v41 = vshrl.u32 %v3518_v56, 16 }
  0x41   : > { %v2716_v57 = vcombine.low %v482_v31, %v489_v46  ;;  %v3530_v0 = vrot.slane %v586_v45, 1  ;;  %v330_v11 = vsel %vm3314_vm4, %v262_v61, %v329_v49  ;;  %v333_v32 = vsel %vm3322_vm5, %v263_v62, %v332_v50  ;;  %v3563_v25 = vld [vmem:[#allocation2 + $0x10] sm:$0xf]  ;;  %v3567_v29 = vld [vmem:[#allocation2 + $0x14] sm:$0x1] }
  0x42   : > { %331 = vst [vmem:[#allocation2 + $0x40] sm:$0xf] %v330_v11  ;;  %334 = vst [vmem:[#allocation2 + $0x44] sm:$0x1] %v333_v32  ;;  %v534_v22 = vrot.slane %v2662_v1, 1  ;;  %v2680_v34 = vcombine.low %v3563_v25, %v3567_v29  ;;  %v2681_v39 = vcombine.low %v3565_v26, %v3569_v33  ;;  %v607_v43 = vshll.u32 %v3555_v17, 16 }
  0x43   : > { %2904 = vmatpush3.bf16.msra.mxu0 %v3115_v60  ;;  %v493_v60 = vshll.u32 %v3499_v40, 16  ;;  %1543 = vmatprep.mubr.bf16.mxu0 %v2716_v57  ;;  %v3582_v40 = vld [vmem:[%s3940_s1 + $0x200] sm:$0xff]   ;;  %v595_v47 = vrot.slane %v593_v4, 1  ;;  %v377_v57 = vld [vmem:[#allocation2 + $0x18] sm:$0xe]  ;;  %v614_v61 = vshll.u32 %v3575_v35, 16 }
  0x44   : > { %2905 = vmatprep.subr.bf16.mxu0 %v3125_v13  ;;  %1544 = vmatmul.mubr.bf16.gmra.mrb[8].mxu0 %v2715_v54  ;;  %v705_v49 = vshrl.u32 %v2680_v34, 16  ;;  %v707_v50 = vshll.u32 %v2680_v34, 16  ;;  %v712_v54 = vshrl.u32 %v2681_v39, 16  ;;  %v714_v55 = vshll.u32 %v2681_v39, 16  ;;  %v3598_v32 = vld [vmem:[#allocation2 + $0x20] sm:$0xf] }
  0x45   : > { %2946 = vmatpush3.bf16.msra.mxu1 %v3128_v37  ;;  %v3550_v8 = vld [vmem:[#allocation2 + $0x38] sm:$0xf]  ;;  %v495_v16 = vrot.slane %v493_v60, 1  ;;  %v378_v60 = vld [vmem:[#allocation2 + $0x20] sm:$0xe]  ;;  %v2674_v11 = vcombine.low %v377_v57, %v3492_v30 }
  0x46   : > { %v350_v9 = vld [vmem:[#allocation2 + $0x3c] sm:$0x1]  ;;  %2947 = vmatprep.subr.bf16.mxu1 %v3130_v5  ;;  %v3558_v19 = vld [vmem:[#allocation2 + $0x38] sm:$0xf]  ;;  %v2724_v62 = vcombine.low %v3488_v27, %v3550_v8  ;;  %v709_v37 = vrot.slane %v707_v50, 1 }
  0x47   : > { %2906 = vmatpush3.bf16.msra.mxu0 %v3127_v52  ;;  %v2655_v18 = vcombine.low %v3550_v8, %v350_v9  ;;  %v358_v21 = vld [vmem:[#allocation2 + $0x38] sm:$0xe]  ;;  %v496_v44 = vor.u32 %v495_v16, %v491_v15  ;;  %v2702_v52 = vcombine.low %v3459_v58, %v3512_v20  ;;  %v3600_v1 = vld [vmem:[#allocation2 + $0x28] sm:$0xf]  ;;  %v716_v58 = vrot.slane %v714_v55, 1 }
  0x48   : > { %2907 = vmatprep.subr.bf16.mxu0 %v3129_v2  ;;  %v2663_v13 = vcombine.low %v358_v21, %v350_v9  ;;  %v2675_v20 = vcombine.low %v378_v60, %v3495_v38  ;;  %v3603_v4 = vld [vmem:[#allocation2 + $0x24] sm:$0x1]  ;;  %v3605_v5 = vld [vmem:[#allocation2 + $0x2c] sm:$0x1]  ;;  %v710_v9 = vor.u32 %v709_v37, %v705_v49  ;;  %v658_v27 = vrot.slane %v2674_v11, 1 }
  0x49   : > { %v498_v3 = vshrl.u32 %v2655_v18, 16  ;;  %v500_v31 = vshll.u32 %v2655_v18, 16  ;;  %2948 = vmatpush3.bf16.msra.mxu1 %v3132_v23  ;;  %v3586_v46 = vld [vmem:[#allocation2 + $0x40] sm:$0xf]  ;;  %v2682_v30 = vcombine.low %v3598_v32, %v3603_v4  ;;  %v602_v8 = vrot.slane %v600_v36, 1 }
  0x4a   : > { %v535_v7 = vrot.slane %v2663_v13, 1  ;;  %v2727_v14 = vcombine.low %v3558_v19, %v3586_v46  ;;  %3009 = vmatprep.subr.bf16.mxu1 %v3582_v40  ;;  %v582_v15 = vor.u32 %v3477_v12, %v577_v53  ;;  %v589_v38 = vor.u32 %v3530_v0, %v584_v24  ;;  %v379_v36 = vld [vmem:[#allocation2 + $0x28] sm:$0xe]  ;;  %v380_v10 = vld [vmem:[#allocation2 + $0x30] sm:$0xe] }
  0x4b   : > { %2908 = vmatpush3.bf16.msra.mxu0 %v3131_v42  ;;  %v502_v45 = vrot.slane %v500_v31, 1  ;;  %v598_v42 = vshrl.u32 %v3522_v59, 16  ;;  %v717_v16 = vor.u32 %v716_v58, %v712_v54  ;;  %v2683_v18 = vcombine.low %v3600_v1, %v3605_v5  ;;  %v3623_v0 = vld [vmem:[#allocation2 + $0x30] sm:$0xf]  ;;  %v3633_v39 = vld [vmem:[#allocation2 + $0x3c] sm:$0x1] }
  0x4c   : > { %v2726_v48 = vcombine.low %v534_v22, %v535_v7  ;;  %2985 = vmatprep.subr.bf16.mxu0 %v3582_v40  ;;  %1616 = vmatprep.mubr.bf16.mxu1 %v2727_v14  ;;  %v2703_v21 = vcombine.low %v3563_v25, %v3565_v26  ;;  %v719_v22 = vshrl.u32 %v2682_v30, 16  ;;  %v721_v59 = vshll.u32 %v2682_v30, 16  ;;  %v3137_v25 = vld [vmem:[%s3940_s1 + $0x208] sm:$0xff]   ;;  %v3631_v7 = vld [vmem:[#allocation2 + $0x34] sm:$0x1] }
  0x4d   : > { %v503_v51 = vor.u32 %v502_v45, %v498_v3  ;;  %v2704_v28 = vcombine.low %v710_v9, %v717_v16  ;;  %v659_v23 = vrot.slane %v2675_v20, 1  ;;  %v726_v53 = vshrl.u32 %v2683_v18, 16  ;;  %v3625_v3 = vld [vmem:[#allocation2 + $0x38] sm:$0xf]  ;;  %v3648_v54 = vld [vmem:[#allocation2 + $0x44] sm:$0x1] }
  0x4e   : > { %1617 = vmatmul.mubr.bf16.gmra.mrb[12].mxu1 %v2726_v48  ;;  %v728_v12 = vshll.u32 %v2683_v18, 16  ;;  %v723_v13 = vrot.slane %v721_v59, 1  ;;  %v2676_v24 = vcombine.low %v379_v36, %v3528_v63  ;;  %v605_v31 = vshrl.u32 %v3555_v17, 16  ;;  %v3654_v37 = vld [vmem:[#allocation2 + $0x40] sm:$0xf]  ;;  %v3153_v17 = vld [vmem:[%s3940_s1 + $0x228] sm:$0xff]  }
  0x4f   : > { %v2725_v2 = vcombine.low %v496_v44, %v503_v51  ;;  %v2701_v34 = vcombine.low %v582_v15, %v589_v38  ;;  %1722 = vmatprep.mubr.bf16.mxu1 %v2704_v28  ;;  %v3635_v44 = vld [vmem:[#allocation2 + $0x3c] sm:$0x1]  ;;  %v3639_v45 = vor.u32 %v595_v47, %v591_v41  ;;  %v2677_v14 = vcombine.low %v380_v10, %v3545_v6  ;;  %v3145_v6 = vld [vmem:[%s3940_s1 + $0x210] sm:$0xff]   ;;  %v3656_v11 = vld [vmem:[#allocation2 + $0x48] sm:$0xf] }
  0x50   : > { %v730_v26 = vrot.slane %v728_v12, 1  ;;  %v724_v63 = vor.u32 %v723_v13, %v719_v22  ;;  %v2684_v48 = vcombine.low %v3623_v0, %v3631_v7  ;;  %v2711_v49 = vcombine.low %v658_v27, %v659_v23  ;;  %v3662_v20 = vld [vmem:[#allocation2 + $0x44] sm:$0x1]  ;;  %v381_v30 = vld [vmem:[#allocation2 + $0x38] sm:$0xe] }
  0x51   : > { %1551 = vmatprep.mubr.bf16.mxu0 %v2725_v2  ;;  %v2685_v51 = vcombine.low %v3625_v3, %v3633_v39  ;;  %v603_v56 = vor.u32 %v602_v8, %v598_v42  ;;  %v660_v41 = vrot.slane %v2676_v24, 1  ;;  %v661_v2 = vrot.slane %v2677_v14, 1  ;;  %v3664_v42 = vld [vmem:[#allocation2 + $0x4c] sm:$0x1]  ;;  %v382_v16 = vld [vmem:[#allocation2 + $0x40] sm:$0xe] }
  0x52   : > { %1552 = vmatmul.mubr.bf16.gmra.mrb[12].mxu0 %v2724_v62  ;;  %v731_v50 = vor.u32 %v730_v26, %v726_v53  ;;  %v733_v47 = vshrl.u32 %v2684_v48, 16  ;;  %v735_v55 = vshll.u32 %v2684_v48, 16  ;;  %v2712_v9 = vcombine.low %v3598_v32, %v3600_v1  ;;  %v3146_v32 = vld [vmem:[%s3940_s1 + $0x218] sm:$0xff]  }
  0x53   : > { %1657 = vmatprep.mubr.bf16.mxu0 %v2702_v52  ;;  %v609_v52 = vrot.slane %v607_v43, 1  ;;  %v740_v60 = vshrl.u32 %v2685_v51, 16  ;;  %v742_v62 = vshll.u32 %v2685_v51, 16  ;;  %v3660_v43 = vcombine.low %v3558_v19, %v3635_v44  ;;  %v401_v51 = vld [vmem:[#allocation2 + $0x18] sm:$0xe] }
  0x54   : > { %v2713_v57 = vcombine.low %v724_v63, %v731_v50  ;;  %v737_v58 = vrot.slane %v735_v55, 1  ;;  %v2686_v8 = vcombine.low %v3654_v37, %v3662_v20  ;;  %v2687_v19 = vcombine.low %v3656_v11, %v3664_v42  ;;  %v404_v63 = vld [vmem:[#allocation2 + $0x30] sm:$0xe]  ;;  %v406_v55 = vld [vmem:[#allocation2 + $0x40] sm:$0xe] }
  0x55   : > { %v744_v27 = vrot.slane %v742_v62, 1  ;;  %v3675_v15 = vcombine.low %v3586_v46, %v3648_v54  ;;  %v612_v18 = vshrl.u32 %v3575_v35, 16  ;;  %v2720_v59 = vcombine.low %v660_v41, %v661_v2  ;;  %v3152_v35 = vld [vmem:[%s3940_s1 + $0x220] sm:$0xff]   ;;  %v400_v50 = vld [vmem:[#allocation2 + $0x10] sm:$0xe] }
  0x56   : > { %1723 = vmatmul.mubr.bf16.vlgmr.msra.gmra.mrb[16].mxu1 %v2703_v21  ;;  %v738_v38 = vor.u32 %v737_v58, %v733_v47  ;;  %v747_v21 = vshrl.u32 %v2686_v8, 16  ;;  %v749_v22 = vshll.u32 %v2686_v8, 16  ;;  %v616_v46 = vrot.slane %v614_v61, 1  ;;  %v407_v62 = vld [vmem:[#allocation2 + $0x48] sm:$0xe] }
  0x57   : > { %3017 = vmatpush3.bf16.msra.mxu1 %v3582_v40  ;;  %1730 = vmatprep.mubr.bf16.mxu1 %v2713_v57  ;;  %v745_v1 = vor.u32 %v744_v27, %v740_v60  ;;  %v754_v36 = vshrl.u32 %v2687_v19, 16  ;;  %v756_v28 = vshll.u32 %v2687_v19, 16  ;;  %v2678_v53 = vcombine.low %v381_v30, %v3635_v44  ;;  %v402_v27 = vld [vmem:[#allocation2 + $0x20] sm:$0xe] }
  0x58   : > { %3010 = vmatprep.subr.bf16.mxu1 %v3137_v25  ;;  %v2679_v12 = vcombine.low %v382_v16, %v3648_v54  ;;  %v751_v10 = vrot.slane %v749_v22, 1  ;;  %v621_v24 = vshll.u32 %v3660_v43, 16  ;;  %v617_v26 = vor.u32 %v616_v46, %v612_v18 }
  0x59   : > { %v2722_v23 = vcombine.low %v738_v38, %v745_v1  ;;  %v758_v13 = vrot.slane %v756_v28, 1  ;;  %v2721_v14 = vcombine.low %v3623_v0, %v3625_v3  ;;  %v662_v48 = vrot.slane %v2678_v53, 1  ;;  %v2696_v28 = vld [vmem:[%s3941_s2] ss:$0 sm:$0xff] }
  0x5a   : > { %1658 = vmatmul.mubr.bf16.vlgmr.msra.gmra.mrb[16].mxu0 %v2701_v34  ;;  %v752_v61 = vor.u32 %v751_v10, %v747_v21  ;;  %v628_v34 = vshll.u32 %v3675_v15, 16  ;;  %v2692_v54 = vcombine.low %v404_v63, %v3631_v7  ;;  %v623_v0 = vrot.slane %v621_v24, 1  ;;  %v3161_v7 = vld [vmem:[%s3940_s1 + $0x230] sm:$0xff]  }
  0x5b   : > { %2986 = vmatpush3.bf16.msra.mxu0 %v3582_v40  ;;  %1665 = vmatprep.mubr.bf16.mxu0 %v2711_v49  ;;  %v2710_v40 = vcombine.low %v3639_v45, %v603_v56  ;;  %v759_v44 = vor.u32 %v758_v13, %v754_v36  ;;  %v405_v45 = vld [vmem:[#allocation2 + $0x38] sm:$0xe]  ;;  %v663_v49 = vrot.slane %v2679_v12, 1  ;;  %v626_v3 = vshrl.u32 %v3675_v15, 16 }
  0x5c   : > { %2987 = vmatprep.subr.bf16.mxu0 %v3137_v25  ;;  %3018 = vmatpush3.bf16.msra.mxu1 %v3137_v25  ;;  %v2693_v56 = vcombine.low %v405_v45, %v3633_v39  ;;  %v630_v41 = vrot.slane %v628_v34, 1  ;;  %v2688_v57 = vcombine.low %v400_v50, %v3567_v29  ;;  %v2689_v60 = vcombine.low %v401_v51, %v3569_v33  ;;  %v403_v29 = vld [vmem:[#allocation2 + $0x28] sm:$0xe] }
  0x5d   : > { %3011 = vmatprep.subr.bf16.mxu1 %v3145_v6  ;;  %v2729_v47 = vcombine.low %v662_v48, %v663_v49  ;;  %v788_v39 = vrot.slane %v2692_v54, 1  ;;  %v2694_v2 = vcombine.low %v406_v55, %v3662_v20  ;;  %v2695_v33 = vcombine.low %v407_v62, %v3664_v42  ;;  %v3162_v20 = vld [vmem:[%s3940_s1 + $0x238] sm:$0xff]  }
  0x5e   : > { %1731 = vmatmul.mubr.bf16.gmra.mrb[20].mxu1 %v2712_v9  ;;  %v631_v9 = vor.u32 %v630_v41, %v626_v3  ;;  %v2730_v30 = vcombine.low %v3654_v37, %v3656_v11  ;;  %v784_v8 = vrot.slane %v2688_v57, 1  ;;  %v785_v19 = vrot.slane %v2689_v60, 1 }
  0x5f   : > { %2988 = vmatpush3.bf16.msra.mxu0 %v3137_v25  ;;  %1738 = vmatprep.mubr.bf16.mxu1 %v2722_v23  ;;  %v610_v25 = vor.u32 %v609_v52, %v605_v31  ;;  %v2731_v31 = vcombine.low %v752_v61, %v759_v44  ;;  %v619_v52 = vshrl.u32 %v3660_v43, 16  ;;  %v789_v43 = vrot.slane %v2693_v56, 1 }
  0x60   : > { %2989 = vmatprep.subr.bf16.mxu0 %v3145_v6  ;;  %3019 = vmatpush3.bf16.msra.mxu1 %v3145_v6  ;;  %v2691_v38 = vcombine.low %v403_v29, %v3605_v5  ;;  %v790_v42 = vrot.slane %v2694_v2, 1  ;;  %v2705_v37 = vcombine.low %v784_v8, %v785_v19 }
  0x61   : > { %3012 = vmatprep.subr.bf16.mxu1 %v3146_v32  ;;  %v624_v58 = vor.u32 %v623_v0, %v619_v52  ;;  %v2723_v15 = vcombine.low %v788_v39, %v789_v43 }
  0x62   : > { %1666 = vmatmul.mubr.bf16.gmra.mrb[20].mxu0 %v2710_v40  ;;  %v2690_v40 = vcombine.low %v402_v27, %v3603_v4  ;;  %v787_v1 = vrot.slane %v2691_v38, 1 }
  0x63   : > { %2990 = vmatpush3.bf16.msra.mxu0 %v3145_v6  ;;  %1673 = vmatprep.mubr.bf16.mxu0 %v2720_v59  ;;  %v2719_v6 = vcombine.low %v610_v25, %v617_v26  ;;  %v2728_v16 = vcombine.low %v624_v58, %v631_v9 }
  0x64   : > { %2991 = vmatprep.subr.bf16.mxu0 %v3146_v32  ;;  %3020 = vmatpush3.bf16.msra.mxu1 %v3146_v32  ;;  %v786_v11 = vrot.slane %v2690_v40, 1 }
  0x65   : > { %3013 = vmatprep.subr.bf16.mxu1 %v3152_v35 }
  0x66   : > { %1739 = vmatmul.mubr.bf16.gmra.mrb[24].mxu1 %v2721_v14  ;;  %v2714_v4 = vcombine.low %v786_v11, %v787_v1 }
  0x67   : > { %2992 = vmatpush3.bf16.msra.mxu0 %v3146_v32  ;;  %1746 = vmatprep.mubr.bf16.mxu1 %v2731_v31  ;;  %v791_v32 = vrot.slane %v2695_v33, 1 }
  0x68   : > { %2993 = vmatprep.subr.bf16.mxu0 %v3152_v35  ;;  %3021 = vmatpush3.bf16.msra.mxu1 %v3152_v35 }
  0x69   : > { %3014 = vmatprep.subr.bf16.mxu1 %v3153_v17  ;;  %v2732_v18 = vcombine.low %v790_v42, %v791_v32 }
  0x6a   : > { %1674 = vmatmul.mubr.bf16.gmra.mrb[24].mxu0 %v2719_v6 }
  0x6b   : > { %2994 = vmatpush3.bf16.msra.mxu0 %v3152_v35  ;;  %1681 = vmatprep.mubr.bf16.mxu0 %v2729_v47 }
  0x6c   : > { %2995 = vmatprep.subr.bf16.mxu0 %v3153_v17  ;;  %3022 = vmatpush3.bf16.msra.mxu1 %v3153_v17 }
  0x6d   : > { %3015 = vmatprep.subr.bf16.mxu1 %v3161_v7 }
  0x6e   : > { %1747 = vmatmul.mubr.bf16.gmra.mrb[28].mxu1 %v2730_v30 }
  0x6f   : > { %2996 = vmatpush3.bf16.msra.mxu0 %v3153_v17  ;;  %3005 = vmatprep.mubr.bf16.mxu1 %v2723_v15 }
  0x70   : > { %2997 = vmatprep.subr.bf16.mxu0 %v3161_v7  ;;  %3023 = vmatpush3.bf16.msra.mxu1 %v3161_v7 }
  0x71   : > { %3016 = vmatprep.subr.bf16.mxu1 %v3162_v20 }
  0x72   : > { %1682 = vmatmul.mubr.bf16.gmra.mrb[28].mxu0 %v2728_v16 }
  0x73   : > { %2998 = vmatpush3.bf16.msra.mxu0 %v3161_v7  ;;  %3001 = vmatprep.mubr.bf16.mxu0 %v2705_v37 }
  0x74   : > { %2999 = vmatprep.subr.bf16.mxu0 %v3162_v20  ;;  %3024 = vmatpush3.bf16.msra.mxu1 %v3162_v20 }
  0x77   : > { %3000 = vmatpush3.bf16.msra.mxu0 %v3162_v20  ;;  %3006 = vmatmul.mubr.bf16.vlgmr.msra.gmra.mrb[32].mxu1 %v2732_v18 }
  0x7a   : > { %3002 = vmatmul.mubr.bf16.vlgmr.msra.gmra.mrb[32].mxu0 %v2714_v4 }
  0xfd   : > { %v2869_v5 = vpop.f32.mrb[0].mxu1 }
  0xfe   : > { %v2870_v21 = vpop.f32.mrb[1].mxu1 }
  0xff   : > { %v2871_v22 = vadd.f32 %v2870_v21, %v2869_v5  ;;  %v2872_v59 = vpop.f32.mrb[2].mxu1 }
 0x100   : > { %v2873_v36 = vpop.f32.mrb[3].mxu1 }
 0x101   : > { %v2829_v46 = vpop.f32.mrb[0].mxu0  ;;  %v2874_v53 = vadd.f32 %v2873_v36, %v2872_v59 }
 0x102   : > { %v2830_v23 = vpop.f32.mrb[1].mxu0 }
 0x103   : > { %v2831_v12 = vadd.f32 %v2830_v23, %v2829_v46  ;;  %v2832_v10 = vpop.f32.mrb[2].mxu0 }
 0x104   : > { %v2833_v13 = vpop.f32.mrb[3].mxu0 }
 0x105   : > { %v1530_v24 = vadd.f32 %v2831_v12, %v2696_v28  ;;  %v2834_v35 = vadd.f32 %v2833_v13, %v2832_v10 }
 0x107   : > { %v1595_v61 = vadd.f32 %v2871_v22, %v1530_v24  ;;  %v1533_v34 = vadd.f32 %v2834_v35, %v2696_v28 }
 0x109   : > { %v3719_v25 = vadd.f32 %v2874_v53, %v1533_v34  ;;  %v2875_v26 = vpop.f32.mrb[4].mxu1 }
 0x10a   : > { %v2876_v44 = vpop.f32.mrb[5].mxu1 }
 0x10b   : > { %v2877_v45 = vadd.f32 %v2876_v44, %v2875_v26  ;;  %v2878_v14 = vpop.f32.mrb[6].mxu1 }
 0x10c   : > { %v2879_v49 = vpop.f32.mrb[7].mxu1 }
 0x10d   : > { %v2835_v63 = vpop.f32.mrb[4].mxu0  ;;  %v2880_v17 = vadd.f32 %v2879_v49, %v2878_v14 }
 0x10e   : > { %v2836_v48 = vpop.f32.mrb[5].mxu0 }
 0x10f   : > { %v2837_v50 = vadd.f32 %v2836_v48, %v2835_v63  ;;  %v2838_v51 = vpop.f32.mrb[6].mxu0 }
 0x110   : > { %v2839_v31 = vpop.f32.mrb[7].mxu0 }
 0x111   : > { %v1538_v52 = vadd.f32 %v2837_v50, %v2696_v28  ;;  %v2840_v54 = vadd.f32 %v2839_v31, %v2838_v51  ;;  %v2881_v3 = vpop.f32.mrb[8].mxu1 }
 0x112   : > { %v2882_v41 = vpop.f32.mrb[9].mxu1 }
 0x113   : > { %v1603_v56 = vadd.f32 %v2877_v45, %v1538_v52  ;;  %v1541_v6 = vadd.f32 %v2840_v54, %v2696_v28  ;;  %v2883_v47 = vadd.f32 %v2882_v41, %v2881_v3  ;;  %v2884_v55 = vpop.f32.mrb[10].mxu1 }
 0x114   : > { %v2885_v57 = vpop.f32.mrb[11].mxu1 }
 0x115   : > { %v3721_v0 = vadd.f32 %v2880_v17, %v1541_v6  ;;  %v2886_v62 = vadd.f32 %v2885_v57, %v2884_v55 }
 0x117   : > { %v2841_v60 = vpop.f32.mrb[8].mxu0 }
 0x118   : > { %v2842_v7 = vpop.f32.mrb[9].mxu0 }
 0x119   : > { %v2843_v39 = vadd.f32 %v2842_v7, %v2841_v60  ;;  %v2844_v43 = vpop.f32.mrb[10].mxu0 }
 0x11a   : > { %v2845_v2 = vpop.f32.mrb[11].mxu0 }
 0x11b   : > { %v1546_v58 = vadd.f32 %v2843_v39, %v2696_v28  ;;  %v2846_v9 = vadd.f32 %v2845_v2, %v2844_v43 }
 0x11d   : > { %v1611_v27 = vadd.f32 %v2883_v47, %v1546_v58  ;;  %v1549_v29 = vadd.f32 %v2846_v9, %v2696_v28 }
 0x11f   : > { %v3723_v33 = vadd.f32 %v2886_v62, %v1549_v29 }
 0x121   : > { %v2887_v30 = vpop.f32.mrb[12].mxu1 }
 0x122   : > { %v2888_v8 = vpop.f32.mrb[13].mxu1 }
 0x123   : > { %v2889_v19 = vadd.f32 %v2888_v8, %v2887_v30  ;;  %v2890_v20 = vpop.f32.mrb[14].mxu1 }
 0x124   : > { %v2891_v40 = vpop.f32.mrb[15].mxu1 }
 0x125   : > { %v2847_v15 = vpop.f32.mrb[12].mxu0  ;;  %v2892_v16 = vadd.f32 %v2891_v40, %v2890_v20 }
 0x126   : > { %v2848_v38 = vpop.f32.mrb[13].mxu0 }
 0x127   : > { %v2849_v42 = vadd.f32 %v2848_v38, %v2847_v15  ;;  %v2850_v32 = vpop.f32.mrb[14].mxu0 }
 0x128   : > { %v2851_v37 = vpop.f32.mrb[15].mxu0 }
 0x129   : > { %v1554_v11 = vadd.f32 %v2849_v42, %v2696_v28  ;;  %v2852_v1 = vadd.f32 %v2851_v37, %v2850_v32  ;;  %v2949_v18 = vpop.f32.mrb[16].mxu1  ;;  %v1840_v32 = vlaneseq }
 0x12a   : > { %v2950_v21 = vpop.f32.mrb[17].mxu1 }
 0x12b   : > { %v3725_v4 = vadd.f32 %v2889_v19, %v1554_v11  ;;  %v1557_v5 = vadd.f32 %v2852_v1, %v2696_v28  ;;  %v2951_v22 = vadd.f32 %v2950_v21, %v2949_v18  ;;  %v2952_v59 = vpop.f32.mrb[18].mxu1 }
 0x12c   : > { %v2953_v23 = vpop.f32.mrb[19].mxu1 }
 0x12d   : > { %v3727_v46 = vadd.f32 %v2892_v16, %v1557_v5  ;;  %v2909_v36 = vpop.f32.mrb[16].mxu0  ;;  %v2954_v12 = vadd.f32 %v2953_v23, %v2952_v59  ;;  %v3176_v16 = vmov 1983009808  }
 0x12e   : > { %v2910_v53 = vpop.f32.mrb[17].mxu0  ;;  %v1838_v42 = vunpack.c.l.s4 %v3176_v16 }
 0x12f   : > { %v2911_v10 = vadd.f32 %v2910_v53, %v2909_v36  ;;  %v2912_v13 = vpop.f32.mrb[18].mxu0 }
 0x130   : > { %v2913_v24 = vpop.f32.mrb[19].mxu0  ;;  %v1839_v59 = vunpack.c.0.s8 %v1838_v42 }
 0x131   : > { %v1660_v35 = vadd.f32 %v2911_v10, %v1595_v61  ;;  %v2914_v34 = vadd.f32 %v2913_v24, %v2912_v13  ;;  %v2955_v26 = vpop.f32.mrb[20].mxu1 }
 0x132   : > { %v2956_v63 = vpop.f32.mrb[21].mxu1 }
 0x133   : > { %v1663_v44 = vadd.f32 %v2914_v34, %v3719_v25  ;;  %v3730_v45 = vadd.f32 %v2951_v22, %v1660_v35  ;;  %v2957_v28 = vadd.f32 %v2956_v63, %v2955_v26  ;;  %v2958_v14 = vpop.f32.mrb[22].mxu1 }
 0x134   : > { %v2959_v49 = vpop.f32.mrb[23].mxu1 }
 0x135   : > { %v2915_v48 = vpop.f32.mrb[20].mxu0  ;;  %v3732_v50 = vadd.f32 %v2954_v12, %v1663_v44  ;;  %v2960_v17 = vadd.f32 %v2959_v49, %v2958_v14 }
 0x136   : > { %v2916_v51 = vpop.f32.mrb[21].mxu0 }
 0x137   : > { %v2917_v31 = vadd.f32 %v2916_v51, %v2915_v48  ;;  %v2918_v52 = vpop.f32.mrb[22].mxu0 }
 0x138   : > { %v2919_v54 = vpop.f32.mrb[23].mxu0 }
 0x139   : > { %v1668_v6 = vadd.f32 %v2917_v31, %v1603_v56  ;;  %v2920_v61 = vadd.f32 %v2919_v54, %v2918_v52  ;;  %v2961_v3 = vpop.f32.mrb[24].mxu1 }
 0x13a   : > { %v2962_v25 = vpop.f32.mrb[25].mxu1 }
 0x13b   : > { %v1671_v41 = vadd.f32 %v2920_v61, %v3721_v0  ;;  %v1733_v47 = vadd.f32 %v2957_v28, %v1668_v6  ;;  %v2963_v55 = vadd.f32 %v2962_v25, %v2961_v3  ;;  %v2964_v57 = vpop.f32.mrb[26].mxu1 }
 0x13c   : > { %v2965_v62 = vpop.f32.mrb[27].mxu1 }
 0x13d   : > { %v2921_v60 = vpop.f32.mrb[24].mxu0  ;;  %v1736_v7 = vadd.f32 %v2960_v17, %v1671_v41  ;;  %v2966_v43 = vadd.f32 %v2965_v62, %v2964_v57 }
 0x13e   : > { %v2922_v39 = vpop.f32.mrb[25].mxu0 }
 0x13f   : > { %v2923_v2 = vadd.f32 %v2922_v39, %v2921_v60  ;;  %v2924_v58 = vpop.f32.mrb[26].mxu0 }
 0x140   : > { %v2925_v9 = vpop.f32.mrb[27].mxu0 }
 0x141   : > { %v1676_v29 = vadd.f32 %v2923_v2, %v1611_v27  ;;  %v2926_v30 = vadd.f32 %v2925_v9, %v2924_v58  ;;  %v2967_v8 = vpop.f32.mrb[28].mxu1 }
 0x142   : > { %v2968_v19 = vpop.f32.mrb[29].mxu1 }
 0x143   : > { %v1679_v56 = vadd.f32 %v2926_v30, %v3723_v33  ;;  %v1741_v20 = vadd.f32 %v2963_v55, %v1676_v29  ;;  %v2969_v0 = vadd.f32 %v2968_v19, %v2967_v8  ;;  %v2970_v15 = vpop.f32.mrb[30].mxu1  ;;  %v1841_v33 = vshrl.u32 %v1840_v32, 7 }
 0x144   : > { %v2971_v38 = vpop.f32.mrb[31].mxu1 }
 0x145   : > { %v2927_v40 = vpop.f32.mrb[28].mxu0  ;;  %v1744_v37 = vadd.f32 %v2966_v43, %v1679_v56  ;;  %v2972_v1 = vadd.f32 %v2971_v38, %v2970_v15  ;;  %v3738_v35 = vsub.s32 %v1839_v59, %v1841_v33 }
 0x146   : > { %v2928_v11 = vpop.f32.mrb[29].mxu0 }
 0x147   : > { %v2929_v18 = vadd.f32 %v2928_v11, %v2927_v40  ;;  %v2930_v5 = vpop.f32.mrb[30].mxu0 }
 0x148   : > { %v2931_v21 = vpop.f32.mrb[31].mxu0 }
 0x149   : > { %v1684_v27 = vadd.f32 %v2929_v18, %v3725_v4  ;;  %v2932_v22 = vadd.f32 %v2931_v21, %v2930_v5 }
 0x14a   : > { %v3007_v36 = vpop.f32.mrb[32].mxu1 }
 0x14b   : > { %v1687_v23 = vadd.f32 %v2932_v22, %v3727_v46  ;;  %v1749_v53 = vadd.f32 %v2969_v0, %v1684_v27  ;;  %v1805_v12 = vpop.f32.mrb[33].mxu1 }
 0x14c   : > { %v1806_v10 = vadd.f32 %v1805_v12, %v1741_v20  ;;  %v3008_v13 = vpop.f32.mrb[34].mxu1 }
 0x14d   : > { %v3003_v24 = vpop.f32.mrb[32].mxu0  ;;  %v1814_v34 = vadd.f32 %v3007_v36, %v1749_v53  ;;  %v1752_v26 = vadd.f32 %v2972_v1, %v1687_v23  ;;  %v1808_v44 = vpop.f32.mrb[35].mxu1 }
 0x14e   : > { %v1798_v63 = vadd.f32 %v3003_v24, %v1733_v47  ;;  %v1789_v28 = vpop.f32.mrb[33].mxu0  ;;  %v3740_v14 = vmax.f32 %v1806_v10, 0.0  ;;  %v3742_v4 = vadd.f32 %v1808_v44, %v1744_v37 }
 0x14f   : > { %v1826_v48 = vmax.f32 %v1814_v34, 0.0  ;;  %v1790_v49 = vadd.f32 %v1789_v28, %v3730_v45  ;;  %v3004_v46 = vpop.f32.mrb[34].mxu0  ;;  %v1817_v51 = vadd.f32 %v3008_v13, %v1752_v26 }
 0x150   : > { %v1822_v17 = vmax.f32 %v1798_v63, 0.0  ;;  %v3745_v31 = vadd.f32 %v3004_v46, %v1736_v7  ;;  %v3747_v52 = vpop.f32.mrb[35].mxu0  ;;  %v1904_v3 = vcombine.high %v3740_v14, %v3740_v14  ;;  %v3757_v45 = vrot.slane %v3740_v14, %v3738_v35 }
 0x151   : > { %v1938_v54 = vcombine.high %v1826_v48, %v1826_v48  ;;  %v1945_v6 = vrot.slane %v1826_v48, %v3738_v35  ;;  %v3750_v61 = vmax.f32 %v1790_v49, 0.0  ;;  %v3759_v47 = vmax.f32 %v1817_v51, 0.0 }
 0x152   : > { %v1870_v41 = vcombine.high %v1822_v17, %v1822_v17  ;;  %v1877_v25 = vrot.slane %v1822_v17, %v3738_v35  ;;  %v1918_v49 = vrot.slane %v1904_v3, %v3738_v35 }
 0x153   : > { %v1952_v55 = vrot.slane %v1938_v54, %v3738_v35  ;;  %v1953_v57 = vcombine.high %v1945_v6, %v1945_v6  ;;  %v2173_v60 = vsel %vm2004_vm6, %v1945_v6, -inf  ;;  %v1836_v62 = vcombine.high %v3750_v61, %v3750_v61 }
 0x154   : > { %v1884_v7 = vrot.slane %v1870_v41, %v3738_v35  ;;  %v1885_v39 = vcombine.high %v1877_v25, %v1877_v25  ;;  %v2061_v43 = vsel %vm2004_vm6, %v1877_v25, -inf  ;;  %v2174_v2 = vrot.slane %v2173_v60, 4 }
 0x155   : > { %v2062_v58 = vrot.slane %v2061_v43, 4  ;;  %v1954_v9 = vcombine.high %v1952_v55, %v1952_v55  ;;  %v2180_v29 = vsel %vm2004_vm6, %v1953_v57, -inf  ;;  %v2187_v30 = vsel %vm2004_vm6, %v1952_v55, -inf }
 0x156   : > { %v1886_v8 = vcombine.high %v1884_v7, %v1884_v7  ;;  %v2068_v56 = vsel %vm2004_vm6, %v1885_v39, -inf  ;;  %v2075_v19 = vsel %vm2004_vm6, %v1884_v7, -inf  ;;  %v2175_v20 = vmax.f32 %v2173_v60, %v2174_v2 }
 0x157   : > { %v2063_v0 = vmax.f32 %v2061_v43, %v2062_v58  ;;  %v2069_v15 = vrot.slane %v2068_v56, 4  ;;  %v2076_v40 = vrot.slane %v2075_v19, 4  ;;  %v2181_v38 = vrot.slane %v2180_v29, 4 }
 0x158   : > { %v2082_v16 = vsel %vm2004_vm6, %v1886_v8, -inf  ;;  %v2176_v42 = vrot.slane %v2175_v20, 2  ;;  %v2188_v32 = vrot.slane %v2187_v30, 4  ;;  %v2194_v37 = vsel %vm2004_vm6, %v1954_v9, -inf }
 0x159   : > { %v2064_v11 = vrot.slane %v2063_v0, 2  ;;  %v2070_v1 = vmax.f32 %v2068_v56, %v2069_v15  ;;  %v2077_v18 = vmax.f32 %v2075_v19, %v2076_v40  ;;  %v2083_v5 = vrot.slane %v2082_v16, 4 }
 0x15a   : > { %v2177_v21 = vmax.f32 %v2175_v20, %v2176_v42  ;;  %v2182_v27 = vmax.f32 %v2180_v29, %v2181_v38  ;;  %v2189_v22 = vmax.f32 %v2187_v30, %v2188_v32  ;;  %v2195_v59 = vrot.slane %v2194_v37, 4 }
 0x15b   : > { %v2065_v33 = vmax.f32 %v2063_v0, %v2064_v11  ;;  %v2071_v36 = vrot.slane %v2070_v1, 2  ;;  %v2078_v23 = vrot.slane %v2077_v18, 2  ;;  %v2084_v53 = vmax.f32 %v2082_v16, %v2083_v5 }
 0x15c   : > { %v2178_v12 = vrot.slane %v2177_v21, 1  ;;  %v2183_v10 = vrot.slane %v2182_v27, 2  ;;  %v2190_v13 = vrot.slane %v2189_v22, 2  ;;  %v2196_v24 = vmax.f32 %v2194_v37, %v2195_v59 }
 0x15d   : > { %v2066_v34 = vrot.slane %v2065_v33, 1  ;;  %v2072_v26 = vmax.f32 %v2070_v1, %v2071_v36  ;;  %v2079_v44 = vmax.f32 %v2077_v18, %v2078_v23  ;;  %v2085_v63 = vrot.slane %v2084_v53, 2 }
 0x15e   : > { %v2184_v28 = vmax.f32 %v2182_v27, %v2183_v10  ;;  %v2191_v14 = vmax.f32 %v2189_v22, %v2190_v13  ;;  %v2197_v48 = vrot.slane %v2196_v24, 2  ;;  %v1919_v54 = vcombine.high %v3757_v45, %v3757_v45 }
 0x15f   : > { %v2073_v46 = vrot.slane %v2072_v26, 1  ;;  %v2080_v51 = vrot.slane %v2079_v44, 1  ;;  %v2086_v17 = vmax.f32 %v2084_v53, %v2085_v63  ;;  %v1843_v55 = vrot.slane %v3750_v61, %v3738_v35 }
 0x160   : > { %v2185_v6 = vrot.slane %v2184_v28, 1  ;;  %v2192_v41 = vrot.slane %v2191_v14, 1  ;;  %v2198_v25 = vmax.f32 %v2196_v24, %v2197_v48  ;;  %v3778_v57 = vmax.f32 %v2065_v33, %v2066_v34 }
 0x161   : > { %v3780_v60 = vmax.f32 %v2072_v26, %v2073_v46  ;;  %v3782_v7 = vmax.f32 %v2177_v21, %v2178_v12  ;;  %v1850_v3 = vrot.slane %v1836_v62, %v3738_v35  ;;  %v3785_v39 = vmax.f32 %v2079_v44, %v2080_v51 }
 0x162   : > { %v2087_v43 = vrot.slane %v2086_v17, 1  ;;  %v3787_v2 = vmax.f32 %v2184_v28, %v2185_v6  ;;  %v1851_v58 = vcombine.high %v1843_v55, %v1843_v55  ;;  %v3789_v9 = vmax.f32 %v2191_v14, %v2192_v41 }
 0x163   : > { %v1852_v29 = vcombine.high %v1850_v3, %v1850_v3  ;;  %v2005_v30 = vsel %vm2004_vm6, %v1843_v55, -inf  ;;  %v2019_v61 = vsel %vm2004_vm6, %v1850_v3, -inf  ;;  %v2199_v8 = vrot.slane %v2198_v25, 1 }
 0x164   : > { %v2006_v56 = vrot.slane %v2005_v30, 4  ;;  %v2012_v19 = vsel %vm2004_vm6, %v1851_v58, -inf  ;;  %v2020_v20 = vrot.slane %v2019_v61, 4  ;;  %v1920_v15 = vcombine.high %v1918_v49, %v1918_v49 }
 0x165   : > { %v2013_v0 = vrot.slane %v2012_v19, 4  ;;  %v2026_v62 = vsel %vm2004_vm6, %v1852_v29, -inf  ;;  %v2117_v40 = vsel %vm2004_vm6, %v3757_v45, -inf  ;;  %v2124_v11 = vsel %vm2004_vm6, %v1919_v54, -inf }
 0x166   : > { %v2007_v38 = vmax.f32 %v2005_v30, %v2006_v56  ;;  %v2021_v16 = vmax.f32 %v2019_v61, %v2020_v20  ;;  %v2027_v42 = vrot.slane %v2026_v62, 4  ;;  %v2118_v32 = vrot.slane %v2117_v40, 4 }
 0x167   : > { %v2014_v37 = vmax.f32 %v2012_v19, %v2013_v0  ;;  %v2131_v1 = vsel %vm2004_vm6, %v1918_v49, -inf  ;;  %v2138_v18 = vsel %vm2004_vm6, %v1920_v15, -inf  ;;  %v2125_v33 = vrot.slane %v2124_v11, 4 }
 0x168   : > { %v2008_v5 = vrot.slane %v2007_v38, 2  ;;  %v2022_v21 = vrot.slane %v2021_v16, 2  ;;  %v2028_v27 = vmax.f32 %v2026_v62, %v2027_v42  ;;  %v2119_v22 = vmax.f32 %v2117_v40, %v2118_v32 }
 0x169   : > { %v2015_v59 = vrot.slane %v2014_v37, 2  ;;  %v2132_v36 = vrot.slane %v2131_v1, 4  ;;  %v2139_v23 = vrot.slane %v2138_v18, 4  ;;  %v2126_v24 = vmax.f32 %v2124_v11, %v2125_v33 }
 0x16a   : > { %v2009_v45 = vmax.f32 %v2007_v38, %v2008_v5  ;;  %v2023_v53 = vmax.f32 %v2021_v16, %v2022_v21  ;;  %v2029_v12 = vrot.slane %v2028_v27, 2  ;;  %v2120_v10 = vrot.slane %v2119_v22, 2 }
 0x16b   : > { %v2016_v13 = vmax.f32 %v2014_v37, %v2015_v59  ;;  %v2133_v34 = vmax.f32 %v2131_v1, %v2132_v36  ;;  %v2140_v26 = vmax.f32 %v2138_v18, %v2139_v23  ;;  %v2127_v49 = vrot.slane %v2126_v24, 2 }
 0x16c   : > { %v2010_v44 = vrot.slane %v2009_v45, 1  ;;  %v2024_v63 = vrot.slane %v2023_v53, 1  ;;  %v2030_v28 = vmax.f32 %v2028_v27, %v2029_v12  ;;  %v2121_v14 = vmax.f32 %v2119_v22, %v2120_v10 }
 0x16d   : > { %v2017_v48 = vrot.slane %v2016_v13, 1  ;;  %v2134_v46 = vrot.slane %v2133_v34, 2  ;;  %v2141_v51 = vrot.slane %v2140_v26, 2  ;;  %v3800_v54 = vmax.f32 %v2086_v17, %v2087_v43 }
 0x16e   : > { %v3802_v6 = vmax.f32 %v2198_v25, %v2199_v8  ;;  %v2031_v41 = vrot.slane %v2030_v28, 1  ;;  %v2122_v55 = vrot.slane %v2121_v14, 1  ;;  %v3804_v3 = vmax.f32 %v2009_v45, %v2010_v44 }
 0x16f   : > { %v2128_v58 = vmax.f32 %v2126_v24, %v2127_v49  ;;  %v3806_v29 = vmax.f32 %v2133_v34, %v2134_v46  ;;  %v3808_v30 = vmax.f32 %v2140_v26, %v2141_v51  ;;  %v3810_v61 = vmax.f32 %v2016_v13, %v2017_v48 }
 0x170   : > { %v3812_v56 = vmax.f32 %v2023_v53, %v2024_v63  ;;  %v1823_v19 = vmax.f32 %v3745_v31, 0.0  ;;  %v1955_v17 = vcombine.high %v3759_v47, %v3759_v47  ;;  %v3817_v25 = vmax.f32 %v2030_v28, %v2031_v41 }
 0x171   : > { %v3819_v43 = vmax.f32 %v2121_v14, %v2122_v55  ;;  %v2129_v8 = vrot.slane %v2128_v58, 1  ;;  %v1962_v20 = vrot.slane %v3759_v47, %v3738_v35  ;;  %v3827_v40 = vadd.f32 %v3747_v52, %v3732_v50 }
 0x172   : > { %v1887_v0 = vcombine.high %v1823_v19, %v1823_v19  ;;  %v1894_v62 = vrot.slane %v1823_v19, %v3738_v35  ;;  %v1969_v15 = vrot.slane %v1955_v17, %v3738_v35  ;;  %v2136_v38 = vrot.slane %v3806_v29, 1 }
 0x173   : > { %v3829_v31 = vmax.f32 %v2128_v58, %v2129_v8  ;;  %v2143_v16 = vrot.slane %v3808_v30, 1  ;;  %v1970_v42 = vcombine.high %v1962_v20, %v1962_v20  ;;  %v2201_v18 = vsel %vm2004_vm6, %v1962_v20, -inf }
 0x174   : > { %v1901_v32 = vrot.slane %v1887_v0, %v3738_v35  ;;  %v1902_v37 = vcombine.high %v1894_v62, %v1894_v62  ;;  %v2089_v47 = vsel %vm2004_vm6, %v1894_v62, -inf  ;;  %v1971_v11 = vcombine.high %v1969_v15, %v1969_v15 }
 0x175   : > { %v2090_v1 = vrot.slane %v2089_v47, 4  ;;  %v2208_v5 = vsel %vm2004_vm6, %v1970_v42, -inf  ;;  %v2215_v50 = vsel %vm2004_vm6, %v1969_v15, -inf  ;;  %v2202_v22 = vrot.slane %v2201_v18, 4 }
 0x176   : > { %v1903_v52 = vcombine.high %v1901_v32, %v1901_v32  ;;  %v2096_v21 = vsel %vm2004_vm6, %v1902_v37, -inf  ;;  %v2103_v27 = vsel %vm2004_vm6, %v1901_v32, -inf  ;;  %v2209_v23 = vrot.slane %v2208_v5, 4 }
 0x177   : > { %v2091_v59 = vmax.f32 %v2089_v47, %v2090_v1  ;;  %v2097_v33 = vrot.slane %v2096_v21, 4  ;;  %v2104_v36 = vrot.slane %v2103_v27, 4  ;;  %v2203_v53 = vmax.f32 %v2201_v18, %v2202_v22 }
 0x178   : > { %v2110_v45 = vsel %vm2004_vm6, %v1903_v52, -inf  ;;  %v2216_v12 = vrot.slane %v2215_v50, 4  ;;  %v2222_v10 = vsel %vm2004_vm6, %v1971_v11, -inf  ;;  %v2210_v63 = vmax.f32 %v2208_v5, %v2209_v23 }
 0x179   : > { %v2092_v13 = vrot.slane %v2091_v59, 2  ;;  %v2098_v24 = vmax.f32 %v2096_v21, %v2097_v33  ;;  %v2105_v34 = vmax.f32 %v2103_v27, %v2104_v36  ;;  %v2111_v26 = vrot.slane %v2110_v45, 4 }
 0x17a   : > { %v2204_v44 = vrot.slane %v2203_v53, 2  ;;  %v2217_v28 = vmax.f32 %v2215_v50, %v2216_v12  ;;  %v2223_v14 = vrot.slane %v2222_v10, 4  ;;  %v2211_v55 = vrot.slane %v2210_v63, 2 }
 0x17b   : > { %v2093_v48 = vmax.f32 %v2091_v59, %v2092_v13  ;;  %v2099_v49 = vrot.slane %v2098_v24, 2  ;;  %v2106_v46 = vrot.slane %v2105_v34, 2  ;;  %v2112_v51 = vmax.f32 %v2110_v45, %v2111_v26 }
 0x17c   : > { %v2205_v41 = vmax.f32 %v2203_v53, %v2204_v44  ;;  %v2218_v58 = vrot.slane %v2217_v28, 2  ;;  %v2224_v19 = vmax.f32 %v2222_v10, %v2223_v14  ;;  %v2212_v15 = vmax.f32 %v2210_v63, %v2211_v55 }
 0x17d   : > { %v2094_v17 = vrot.slane %v2093_v48, 1  ;;  %v2100_v8 = vmax.f32 %v2098_v24, %v2099_v49  ;;  %v2107_v20 = vmax.f32 %v2105_v34, %v2106_v46  ;;  %v2113_v0 = vrot.slane %v2112_v51, 2 }
 0x17e   : > { %v2206_v62 = vrot.slane %v2205_v41, 1  ;;  %v2219_v42 = vmax.f32 %v2217_v28, %v2218_v58  ;;  %v2225_v32 = vrot.slane %v2224_v19, 2  ;;  %v2213_v5 = vrot.slane %v2212_v15, 1 }
 0x17f   : > { %v2095_v37 = vmax.f32 %v2093_v48, %v2094_v17  ;;  %v2101_v47 = vrot.slane %v2100_v8, 1  ;;  %v2108_v11 = vrot.slane %v2107_v20, 1  ;;  %v2114_v1 = vmax.f32 %v2112_v51, %v2113_v0 }
 0x180   : > { %v2207_v18 = vmax.f32 %v2205_v41, %v2206_v62  ;;  %v2220_v50 = vrot.slane %v2219_v42, 1  ;;  %v2226_v52 = vmax.f32 %v2224_v19, %v2225_v32  ;;  %v2214_v33 = vmax.f32 %v2212_v15, %v2213_v5 }
 0x181   : > { %v2102_v21 = vmax.f32 %v2100_v8, %v2101_v47  ;;  %v2109_v27 = vmax.f32 %v2107_v20, %v2108_v11  ;;  %v2115_v22 = vrot.slane %v2114_v1, 1  ;;  %v2233_v59 = vmax.f32 %v3778_v57, %v2095_v37 }
 0x182   : > { %v2221_v36 = vmax.f32 %v2219_v42, %v2220_v50  ;;  %v2227_v23 = vrot.slane %v2226_v52, 1  ;;  %v2241_v45 = vmax.f32 %v3782_v7, %v2207_v18  ;;  %v2242_v34 = vmax.f32 %v3787_v2, %v2214_v33 }
 0x183   : > { %v2116_v53 = vmax.f32 %v2114_v1, %v2115_v22  ;;  %v2234_v12 = vmax.f32 %v3780_v60, %v2102_v21  ;;  %v2235_v10 = vmax.f32 %v3785_v39, %v2109_v27  ;;  %v2249_v13 = vpack.c.bf16 %v2233_v59, %v2233_v59 }
 0x184   : > { %v2228_v24 = vmax.f32 %v2226_v52, %v2227_v23  ;;  %v2243_v26 = vmax.f32 %v3789_v9, %v2221_v36  ;;  %v2257_v44 = vpack.c.bf16 %v2241_v45, %v2241_v45  ;;  %v2258_v7 = vpack.c.bf16 %v2242_v34, %v2242_v34 }
 0x185   : > { %v2236_v57 = vmax.f32 %v3800_v54, %v2116_v53  ;;  %v2250_v63 = vpack.c.bf16 %v2234_v12, %v2234_v12  ;;  %v2251_v28 = vpack.c.bf16 %v2235_v10, %v2235_v10  ;;  %v2311_v14 = vrot.slane %v2249_v13, %v3738_v35 }
 0x186   : > { %v2244_v60 = vmax.f32 %v3802_v6, %v2228_v24  ;;  %v2259_v39 = vpack.c.bf16 %v2243_v26, %v2243_v26  ;;  %v2367_v48 = vrot.slane %v2257_v44, %v3738_v35  ;;  %v2374_v51 = vrot.slane %v2258_v7, %v3738_v35 }
 0x187   : > { %v2252_v49 = vpack.c.bf16 %v2236_v57, %v2236_v57  ;;  %v2318_v2 = vrot.slane %v2250_v63, %v3738_v35  ;;  %v2325_v9 = vrot.slane %v2251_v28, %v3738_v35  ;;  %v2423_v46 = vrot.slane %v2311_v14, %v3738_v35 }
 0x188   : > { %v2260_v54 = vpack.c.bf16 %v2244_v60, %v2244_v60  ;;  %v2381_v41 = vrot.slane %v2259_v39, %v3738_v35  ;;  %v2479_v55 = vrot.slane %v2367_v48, %v3738_v35  ;;  %v2486_v20 = vrot.slane %v2374_v51, %v3738_v35 }
 0x189   : > { %v2332_v6 = vrot.slane %v2252_v49, %v3738_v35  ;;  %v2430_v58 = vrot.slane %v2318_v2, %v3738_v35  ;;  %v2437_v19 = vrot.slane %v2325_v9, %v3738_v35  ;;  %v2505_v17 = vunpack.c.l.b16 %v2423_v46 }
 0x18a   : > { %v2388_v8 = vrot.slane %v2260_v54, %v3738_v35  ;;  %v2493_v0 = vrot.slane %v2381_v41, %v3738_v35  ;;  %v2513_v62 = vunpack.c.l.b16 %v2479_v55  ;;  %v1821_v37 = vmax.f32 %v3827_v40, 0.0 }
 0x18b   : > { %v2444_v15 = vrot.slane %v2332_v6, %v3738_v35  ;;  %v2506_v42 = vunpack.c.l.b16 %v2430_v58  ;;  %v2507_v32 = vunpack.c.l.b16 %v2437_v19  ;;  %v2514_v11 = vunpack.c.l.b16 %v2486_v20 }
 0x18c   : > { %v2500_v47 = vrot.slane %v2388_v8, %v3738_v35  ;;  %v2515_v1 = vunpack.c.l.b16 %v2493_v0  ;;  %v1825_v18 = vmax.f32 %v3742_v4, 0.0  ;;  %v1853_v21 = vcombine.high %v1821_v37, %v1821_v37 }
 0x18d   : > { %v2508_v5 = vunpack.c.l.b16 %v2444_v15  ;;  %v2526_v50 = vrot.slane %v2506_v42, 7  ;;  %v2528_v52 = vrot.slane %v2507_v32, 6  ;;  %v2538_v22 = vrot.slane %v2514_v11, 7 }
 0x18e   : > { %v2516_v27 = vunpack.c.l.b16 %v2500_v47  ;;  %v2540_v59 = vrot.slane %v2515_v1, 6  ;;  %v1860_v33 = vrot.slane %v1821_v37, %v3738_v35  ;;  %v1867_v40 = vrot.slane %v1853_v21, %v3738_v35 }
 0x18f   : > { %v2527_v36 = vsel %vm2518_vm7, %v2526_v50, %v2505_v17  ;;  %v2530_v23 = vrot.slane %v2508_v5, 5  ;;  %v1921_v45 = vcombine.high %v1825_v18, %v1825_v18  ;;  %v2539_v4 = vsel %vm2518_vm7, %v2538_v22, %v2513_v62 }
 0x190   : > { %v2529_v53 = vsel %vm2521_vm8, %v2528_v52, %v2527_v36  ;;  %v2542_v12 = vrot.slane %v2516_v27, 5  ;;  %v1868_v10 = vcombine.high %v1860_v33, %v1860_v33  ;;  %v2541_v24 = vsel %vm2521_vm8, %v2540_v59, %v2539_v4 }
 0x191   : > { %v2531_v13 = vsel %vm2524_vm9, %v2530_v23, %v2529_v53  ;;  %v1869_v34 = vcombine.high %v1867_v40, %v1867_v40  ;;  %v2033_v26 = vsel %vm2004_vm6, %v1860_v33, -inf  ;;  %v2047_v7 = vsel %vm2004_vm6, %v1867_v40, -inf }
 0x192   : > { %v2545_v44 = vpack.c.b16 %v2531_v13, %v2531_v13  ;;  %v2543_v57 = vsel %vm2524_vm9, %v2542_v12, %v2541_v24  ;;  %v2034_v63 = vrot.slane %v2033_v26, 4  ;;  %v2040_v28 = vsel %vm2004_vm6, %v1868_v10, -inf }
 0x193   : > { %v2547_v14 = vpack.c.b16 %v2543_v57, %v2543_v57  ;;  %v2041_v60 = vrot.slane %v2040_v28, 4  ;;  %v2054_v39 = vsel %vm2004_vm6, %v1869_v34, -inf  ;;  %v2048_v49 = vrot.slane %v2047_v7, 4 }
 0x194   : > { %2806 = vst.sshfl [vmem:[%s3877_s13 + $0x2] sm:$0x3 pattern:$0x76325410] %v2545_v44  ;;  %v2035_v48 = vmax.f32 %v2033_v26, %v2034_v63  ;;  %v2055_v2 = vrot.slane %v2054_v39, 4  ;;  %v1928_v9 = vrot.slane %v1825_v18, %v3738_v35  ;;  %v3891_v46 = vmax.f32 %v3806_v29, %v2136_v38 }
 0x195   : > { %v3896_v54 = vmax.f32 %v3808_v30, %v2143_v16  ;;  %2808 = vst.sshfl [vmem:[%s3877_s13 + $0x6] sm:$0x3 pattern:$0x76325410] %v2547_v14  ;;  %v2042_v51 = vmax.f32 %v2040_v28, %v2041_v60  ;;  %v1935_v41 = vrot.slane %v1921_v45, %v3738_v35  ;;  %v2049_v6 = vmax.f32 %v2047_v7, %v2048_v49 }
 0x196   : > { %v2036_v55 = vrot.slane %v2035_v48, 2  ;;  %v2056_v58 = vmax.f32 %v2054_v39, %v2055_v2  ;;  %v1936_v19 = vcombine.high %v1928_v9, %v1928_v9  ;;  %v2145_v20 = vsel %vm2004_vm6, %v1928_v9, -inf }
 0x197   : > { %v2043_v17 = vrot.slane %v2042_v51, 2  ;;  %v1937_v8 = vcombine.high %v1935_v41, %v1935_v41  ;;  %v2159_v29 = vsel %vm2004_vm6, %v1935_v41, -inf  ;;  %v2050_v0 = vrot.slane %v2049_v6, 2 }
 0x198   : > { %v2037_v38 = vmax.f32 %v2035_v48, %v2036_v55  ;;  %v2057_v62 = vrot.slane %v2056_v58, 2  ;;  %v2146_v15 = vrot.slane %v2145_v20, 4  ;;  %v2152_v16 = vsel %vm2004_vm6, %v1936_v19, -inf }
 0x199   : > { %v2044_v30 = vmax.f32 %v2042_v51, %v2043_v17  ;;  %v2160_v42 = vrot.slane %v2159_v29, 4  ;;  %v2166_v32 = vsel %vm2004_vm6, %v1937_v8, -inf  ;;  %v2051_v47 = vmax.f32 %v2049_v6, %v2050_v0 }
 0x19a   : > { %v2038_v37 = vrot.slane %v2037_v38, 1  ;;  %v2058_v11 = vmax.f32 %v2056_v58, %v2057_v62  ;;  %v2147_v1 = vmax.f32 %v2145_v20, %v2146_v15  ;;  %v2153_v5 = vrot.slane %v2152_v16, 4 }
 0x19b   : > { %v2045_v18 = vrot.slane %v2044_v30, 1  ;;  %v2161_v50 = vmax.f32 %v2159_v29, %v2160_v42  ;;  %v2167_v52 = vrot.slane %v2166_v32, 4  ;;  %v2052_v27 = vrot.slane %v2051_v47, 1 }
 0x19c   : > { %v2039_v21 = vmax.f32 %v2037_v38, %v2038_v37  ;;  %v2059_v22 = vrot.slane %v2058_v11, 1  ;;  %v2148_v59 = vrot.slane %v2147_v1, 2  ;;  %v2154_v36 = vmax.f32 %v2152_v16, %v2153_v5 }
 0x19d   : > { %v2046_v33 = vmax.f32 %v2044_v30, %v2045_v18  ;;  %v2162_v23 = vrot.slane %v2161_v50, 2  ;;  %v2168_v40 = vmax.f32 %v2166_v32, %v2167_v52  ;;  %v2053_v45 = vmax.f32 %v2051_v47, %v2052_v27 }
 0x19e   : > { %v2060_v53 = vmax.f32 %v2058_v11, %v2059_v22  ;;  %v2229_v4 = vmax.f32 %v3804_v3, %v2039_v21  ;;  %v2149_v12 = vmax.f32 %v2147_v1, %v2148_v59  ;;  %v2155_v13 = vrot.slane %v2154_v36, 2 }
 0x19f   : > { %v2230_v10 = vmax.f32 %v3810_v61, %v2046_v33  ;;  %v2163_v24 = vmax.f32 %v2161_v50, %v2162_v23  ;;  %v2169_v34 = vrot.slane %v2168_v40, 2  ;;  %v2231_v26 = vmax.f32 %v3812_v56, %v2053_v45 }
 0x1a0   : > { %v2232_v44 = vmax.f32 %v3817_v25, %v2060_v53  ;;  %v2245_v57 = vpack.c.bf16 %v2229_v4, %v2229_v4  ;;  %v2150_v63 = vrot.slane %v2149_v12, 1  ;;  %v2156_v14 = vmax.f32 %v2154_v36, %v2155_v13 }
 0x1a1   : > { %v2246_v28 = vpack.c.bf16 %v2230_v10, %v2230_v10  ;;  %v2164_v60 = vrot.slane %v2163_v24, 1  ;;  %v2170_v7 = vmax.f32 %v2168_v40, %v2169_v34  ;;  %v2247_v39 = vpack.c.bf16 %v2231_v26, %v2231_v26 }
 0x1a2   : > { %v2248_v48 = vpack.c.bf16 %v2232_v44, %v2232_v44  ;;  %v2283_v3 = vrot.slane %v2245_v57, %v3738_v35  ;;  %v2151_v49 = vmax.f32 %v2149_v12, %v2150_v63  ;;  %v2157_v2 = vrot.slane %v2156_v14, 1 }
 0x1a3   : > { %v2290_v61 = vrot.slane %v2246_v28, %v3738_v35  ;;  %v2165_v9 = vmax.f32 %v2163_v24, %v2164_v60  ;;  %v2171_v51 = vrot.slane %v2170_v7, 1  ;;  %v2297_v56 = vrot.slane %v2247_v39, %v3738_v35 }
 0x1a4   : > { %v2304_v25 = vrot.slane %v2248_v48, %v3738_v35  ;;  %v2395_v41 = vrot.slane %v2283_v3, %v3738_v35  ;;  %v2237_v55 = vmax.f32 %v3819_v43, %v2151_v49  ;;  %v2158_v58 = vmax.f32 %v2156_v14, %v2157_v2 }
 0x1a5   : > { %v2402_v6 = vrot.slane %v2290_v61, %v3738_v35  ;;  %v2172_v19 = vmax.f32 %v2170_v7, %v2171_v51  ;;  %v2239_v17 = vmax.f32 %v3891_v46, %v2165_v9  ;;  %v2409_v8 = vrot.slane %v2297_v56, %v3738_v35 }
 0x1a6   : > { %v2416_v20 = vrot.slane %v2304_v25, %v3738_v35  ;;  %v2253_v29 = vpack.c.bf16 %v2237_v55, %v2237_v55  ;;  %v2238_v0 = vmax.f32 %v3829_v31, %v2158_v58  ;;  %v2501_v30 = vunpack.c.l.b16 %v2395_v41 }
 0x1a7   : > { %v2502_v38 = vunpack.c.l.b16 %v2402_v6  ;;  %v2240_v62 = vmax.f32 %v3896_v54, %v2172_v19  ;;  %v2255_v15 = vpack.c.bf16 %v2239_v17, %v2239_v17  ;;  %v2503_v16 = vunpack.c.l.b16 %v2409_v8 }
 0x1a8   : > { %v2504_v43 = vunpack.c.l.b16 %v2416_v20  ;;  %v2339_v42 = vrot.slane %v2253_v29, %v3738_v35  ;;  %v2254_v37 = vpack.c.bf16 %v2238_v0, %v2238_v0 }
 0x1a9   : > { %v2517_v32 = vrot.slane %v2502_v38, 7  ;;  %v2256_v47 = vpack.c.bf16 %v2240_v62, %v2240_v62  ;;  %v2353_v46 = vrot.slane %v2255_v15, %v3738_v35  ;;  %v2520_v11 = vrot.slane %v2503_v16, 6 }
 0x1aa   : > { %v2523_v1 = vrot.slane %v2504_v43, 5  ;;  %v2346_v31 = vrot.slane %v2254_v37, %v3738_v35  ;;  %v2451_v52 = vrot.slane %v2339_v42, %v3738_v35 }
 0x1ab   : > { %v2519_v18 = vsel %vm2518_vm7, %v2517_v32, %v2501_v30  ;;  %v2360_v54 = vrot.slane %v2256_v47, %v3738_v35  ;;  %v2465_v5 = vrot.slane %v2353_v46, %v3738_v35 }
 0x1ac   : > { %v2522_v50 = vsel %vm2521_vm8, %v2520_v11, %v2519_v18  ;;  %v2458_v27 = vrot.slane %v2346_v31, %v3738_v35  ;;  %v2509_v45 = vunpack.c.l.b16 %v2451_v52 }
 0x1ad   : > { %v2525_v21 = vsel %vm2524_vm9, %v2523_v1, %v2522_v50  ;;  %v2472_v22 = vrot.slane %v2360_v54, %v3738_v35  ;;  %v2511_v59 = vunpack.c.l.b16 %v2465_v5 }
 0x1ae   : > { %v2544_v33 = vpack.c.b16 %v2525_v21, %v2525_v21  ;;  %v2510_v36 = vunpack.c.l.b16 %v2458_v27 }
 0x1af   : > { %v2512_v23 = vunpack.c.l.b16 %v2472_v22  ;;  %v2534_v40 = vrot.slane %v2511_v59, 6 }
 0x1b0   : > { %2805 = vst.sshfl [vmem:[%s3877_s13] sm:$0x3 pattern:$0x76325410] %v2544_v33  ;;  %v2532_v53 = vrot.slane %v2510_v36, 7 }
 0x1b1   : > { %v2536_v4 = vrot.slane %v2512_v23, 5 }
 0x1b2   : > { %v2533_v12 = vsel %vm2518_vm7, %v2532_v53, %v2509_v45 }
 0x1b3   : > { %v2535_v10 = vsel %vm2521_vm8, %v2534_v40, %v2533_v12 }
 0x1b4   : > { %v2537_v13 = vsel %vm2524_vm9, %v2536_v4, %v2535_v10 }
 0x1b5   : > { %v2546_v24 = vpack.c.b16 %v2537_v13, %v2537_v13 }
 0x1b7   : > { %2807 = vst.sshfl [vmem:[%s3877_s13 + $0x4] sm:$0x3 pattern:$0x76325410] %v2546_v24 }
 0x1b8 PF: > { %s13_s12 = sadd.s32 1, %s3173_s12  }
 0x1b9   : > { %p10_p4 = scmp.ge.s32.totalorder %s13_s12, 4  }
 0x1bb   :  { %12 = sbr.rel (!%p10_p4) target bundleno = 1 (0x1), region = 64 }

// kernel: _lambda_.3
= control target key start
LH: loop header
LB: loop body
LE: loop exit
PB: predicated region body
PF: predicated region fallthrough
CT: control target
= control target key end

     0   :  { %s3724_s12 = smov 0   ;;  %s5090_s0 = inlined_call_operand.vmem [shape: bf16[2,16,16,3], index: 0, kind: input, shape index: {}]   ;;  %s5091_s1 = inlined_call_operand.vmem [shape: bf16[27,128], index: 1, kind: input, shape index: {}]   ;;  %s5092_s2 = inlined_call_operand.vmem [shape: f32[1,128], index: 2, kind: input, shape index: {}]   ;;  %s5093_s3 = inlined_call_operand.vmem [shape: bf16[2,16,16,128], index: 3, kind: output, shape index: {}]  }
   0x1 LB: > { %s3134_s13 = sadd.s32 4294967295, %s3692_s12   ;;  %p3138_p0 = scmp.ge.s32.totalorder %s3692_s12, 1  ;;  %s3692_s12 = sphi %s3724_s12, %s13_s12  }
   0x2   : > { %p137_p1 = scmp.lt.s32.totalorder %s3692_s12, 3 }
   0x4   : > { %p138_p2 = pnand %p3138_p0, %p137_p1 }
   0x6   : > { %141 = sbr.rel (%p138_p2) target bundleno = 653 (0x28d), region = 32 }
   0xd   : > { %vm172_vm0 = vcmask 19456   ;;  %vm175_vm1 = vcmask 16384   ;;  %v3694_v0 = vmov 0   ;;  %p161_p3 = scmp.lt.s32.totalorder %s3134_s13, 1  ;;  %vm1295_vm2 = vcmask 1046528   ;;  %s3695_s18 = smov 6  }
   0xe   : > { %173 = vst.msk [vmem:[#allocation2] sm:$0xf] %vm172_vm0, %v3694_v0  ;;  %174 = vst.msk [vmem:[#allocation2 + $0x4] sm:$0xf] %vm172_vm0, %v3694_v0  ;;  %vm260_vm3 = vsmask.f32 256 }
   0xf   : > { %176 = vst.msk [vmem:[#allocation2 + $0x8] sm:$0x1] %vm175_vm1, %v3694_v0  ;;  %179 = vst.msk [vmem:[#allocation2 + $0x14] sm:$0x1] %vm175_vm1, %v3694_v0  ;;  %s5115_s13 = smov (!%p161_p3, %s3134_s13), 1  ;;  %s3696_s19 = smov 3  }
  0x10   : > { %177 = vst.msk [vmem:[#allocation2 + $0xc] sm:$0xf] %vm172_vm0, %v3694_v0  ;;  %178 = vst.msk [vmem:[#allocation2 + $0x10] sm:$0xf] %vm172_vm0, %v3694_v0  ;;  %s3340_s14 = sshll.u32 %s5115_s13, 7  ;;  %s3697_s20 = smov 9  }
  0x11   : > { %180 = vst.msk [vmem:[#allocation2 + $0x18] sm:$0xf] %vm172_vm0, %v3694_v0  ;;  %181 = vst.msk [vmem:[#allocation2 + $0x1c] sm:$0xf] %vm172_vm0, %v3694_v0  ;;  %s3798_s17 = scalar_lea.vmem %s5090_s0, %s3340_s14  ;;  %vm261_vm4 = vsmask.f32 4368  ;;  %s5041_s7 = scalar_lea.vmem %s5093_s3, %s3340_s14 }
  0x12   : > { %182 = vst.msk [vmem:[#allocation2 + $0x20] sm:$0x1] %vm175_vm1, %v3694_v0  ;;  %185 = vst.msk [vmem:[#allocation2 + $0x2c] sm:$0x1] %vm175_vm1, %v3694_v0  ;;  %vm585_vm5 = vsmask.f32 7938 }
  0x13   : > { %183 = vst.msk [vmem:[#allocation2 + $0x24] sm:$0xf] %vm172_vm0, %v3694_v0  ;;  %184 = vst.msk [vmem:[#allocation2 + $0x28] sm:$0xf] %vm172_vm0, %v3694_v0  ;;  %vm1022_vm6 = vsmask.f32 7424 }
  0x14   : > { %186 = vst.msk [vmem:[#allocation2 + $0x30] sm:$0xf] %vm172_vm0, %v3694_v0  ;;  %187 = vst.msk [vmem:[#allocation2 + $0x34] sm:$0xf] %vm172_vm0, %v3694_v0  ;;  %v244_v1 = vld [vmem:[%s3798_s17 + $0x40] sm:$0xf] }
  0x15   : > { %188 = vst.msk [vmem:[#allocation2 + $0x38] sm:$0x1] %vm175_vm1, %v3694_v0  ;;  %191 = vst.msk [vmem:[#allocation2 + $0x44] sm:$0x1] %vm175_vm1, %v3694_v0  ;;  %v245_v2 = vld [vmem:[%s3798_s17 + $0x44] sm:$0xf] }
  0x16   : > { %189 = vst.msk [vmem:[#allocation2 + $0x3c] sm:$0xf] %vm172_vm0, %v3694_v0  ;;  %190 = vst.msk [vmem:[#allocation2 + $0x40] sm:$0xf] %vm172_vm0, %v3694_v0  ;;  %v228_v3 = vld [vmem:[%s3798_s17] sm:$0xf] }
  0x17   : > { %192 = vst.msk [vmem:[#allocation2 + $0x48] sm:$0xf] %vm172_vm0, %v3694_v0  ;;  %193 = vst.msk [vmem:[#allocation2 + $0x4c] sm:$0xf] %vm172_vm0, %v3694_v0  ;;  %v702_v4 = vld [vmem:[#allocation2 + $0x4] sm:$0xf] }
  0x18   : > { %194 = vst.msk [vmem:[#allocation2 + $0x50] sm:$0x1] %vm175_vm1, %v3694_v0  ;;  %197 = vst.msk [vmem:[#allocation2 + $0x5c] sm:$0x1] %vm175_vm1, %v3694_v0  ;;  %v749_v5 = vld [vmem:[#allocation2] sm:$0xe] }
  0x19   : > { %195 = vst.msk [vmem:[#allocation2 + $0x54] sm:$0xf] %vm172_vm0, %v3694_v0  ;;  %196 = vst.msk [vmem:[#allocation2 + $0x58] sm:$0xf] %vm172_vm0, %v3694_v0  ;;  %v3175_v7 = vcombine.low %v749_v5, %v702_v4  ;;  %v701_v8 = vld [vmem:[#allocation2] sm:$0xf] }
  0x1a   : > { %198 = vst.msk [vmem:[#allocation2 + $0x60] sm:$0xf] %vm172_vm0, %v3694_v0  ;;  %199 = vst.msk [vmem:[#allocation2 + $0x64] sm:$0xf] %vm172_vm0, %v3694_v0  ;;  %v400_v9 = vshrl.u32 %v244_v1, 16  ;;  %v3803_v10 = vcombine.low %v701_v8, %v702_v4  ;;  %v403_v11 = vshll.u32 %v244_v1, 16 }
  0x1b   : > { %200 = vst.msk [vmem:[#allocation2 + $0x68] sm:$0x1] %vm175_vm1, %v3694_v0  ;;  %203 = vst.msk [vmem:[#allocation2 + $0x74] sm:$0x1] %vm175_vm1, %v3694_v0  ;;  %v408_v12 = vshrl.u32 %v245_v2, 16  ;;  %v411_v13 = vshll.u32 %v245_v2, 16 }
  0x1c   : > { %201 = vst.msk [vmem:[#allocation2 + $0x6c] sm:$0xf] %vm172_vm0, %v3694_v0  ;;  %202 = vst.msk [vmem:[#allocation2 + $0x70] sm:$0xf] %vm172_vm0, %v3694_v0  ;;  %v1296_v14 = vrot.slane %v3175_v7, 1  ;;  %v402_v17 = vrot.slane %v400_v9, 7 }
  0x1d   : > { %204 = vst.msk [vmem:[#allocation2 + $0x78] sm:$0xf] %vm172_vm0, %v3694_v0  ;;  %205 = vst.msk [vmem:[#allocation2 + $0x7c] sm:$0xf] %vm172_vm0, %v3694_v0  ;;  %v1024_v19 = vshrl.u32 %v3803_v10, 16  ;;  %v1026_v20 = vshll.u32 %v3803_v10, 16 }
  0x1e   : > { %206 = vst.msk [vmem:[#allocation2 + $0x80] sm:$0x1] %vm175_vm1, %v3694_v0  ;;  %209 = vst.msk [vmem:[#allocation2 + $0x8c] sm:$0x1] %vm175_vm1, %v3694_v0  ;;  %v3807_v21 = vrot.slane %v408_v12, 7  ;;  %v264_v24 = vshrl.u32 %v228_v3, 16  ;;  %v405_v28 = vor.u32 %v403_v11, %v402_v17 }
  0x1f   : > { %207 = vst.msk [vmem:[#allocation2 + $0x84] sm:$0xf] %vm172_vm0, %v3694_v0  ;;  %208 = vst.msk [vmem:[#allocation2 + $0x88] sm:$0xf] %vm172_vm0, %v3694_v0  ;;  %v229_v23 = vld [vmem:[%s3798_s17 + $0x4] sm:$0xf] }
  0x20   : > { %210 = vst.msk [vmem:[#allocation2 + $0x90] sm:$0xf] %vm172_vm0, %v3694_v0  ;;  %211 = vst.msk [vmem:[#allocation2 + $0x94] sm:$0xf] %vm172_vm0, %v3694_v0  ;;  %v406_v29 = vrot.slane %v402_v17, 4  ;;  %v1028_v32 = vrot.slane %v1026_v20, 1  ;;  %v413_v33 = vor.u32 %v411_v13, %v3807_v21 }
  0x21   : > { %212 = vst.msk [vmem:[#allocation2 + $0x98] sm:$0x1] %vm175_vm1, %v3694_v0  ;;  %215 = vst.msk [vmem:[#allocation2 + $0xa4] sm:$0x1] %vm175_vm1, %v3694_v0  ;;  %v587_v30 = vld [vmem:[#allocation2 + $0xc] sm:$0xf] }
  0x22   : > { %213 = vst.msk [vmem:[#allocation2 + $0x9c] sm:$0xf] %vm172_vm0, %v3694_v0  ;;  %214 = vst.msk [vmem:[#allocation2 + $0xa0] sm:$0xf] %vm172_vm0, %v3694_v0  ;;  %v246_v31 = vld [vmem:[%s3798_s17 + $0x48] sm:$0xf]  ;;  %v1029_v42 = vor.u32 %v1028_v32, %v1024_v19 }
  0x23   : > { %216 = vst.msk [vmem:[#allocation2 + $0xa8] sm:$0xf] %vm172_vm0, %v3694_v0  ;;  %217 = vst.msk [vmem:[#allocation2 + $0xac] sm:$0xf] %vm172_vm0, %v3694_v0  ;;  %v645_v18 = vld [vmem:[#allocation2 + $0x6c] sm:$0xf] }
  0x24   : > { %218 = vst.msk [vmem:[#allocation2 + $0xb0] sm:$0x1] %vm175_vm1, %v3694_v0  ;;  %221 = vst.msk [vmem:[#allocation2 + $0xbc] sm:$0x1] %vm175_vm1, %v3694_v0  ;;  %v266_v34 = vrot.slane %v264_v24, 7  ;;  %v267_v35 = vshll.u32 %v228_v3, 16 }
  0x25   : > { %219 = vst.msk [vmem:[#allocation2 + $0xb4] sm:$0xf] %vm172_vm0, %v3694_v0  ;;  %220 = vst.msk [vmem:[#allocation2 + $0xb8] sm:$0xf] %vm172_vm0, %v3694_v0  ;;  %v247_v36 = vld [vmem:[%s3798_s17 + $0x4c] sm:$0xf] }
  0x26   : > { %222 = vst.msk [vmem:[#allocation2 + $0xc0] sm:$0xf] %vm172_vm0, %v3694_v0  ;;  %223 = vst.msk [vmem:[#allocation2 + $0xc4] sm:$0xf] %vm172_vm0, %v3694_v0  ;;  %v272_v38 = vshrl.u32 %v229_v23, 16  ;;  %v275_v39 = vshll.u32 %v229_v23, 16  ;;  %v269_v44 = vor.u32 %v267_v35, %v266_v34 }
  0x27   : > { %224 = vst.msk [vmem:[#allocation2 + $0xc8] sm:$0x1] %vm175_vm1, %v3694_v0  ;;  %227 = vst.msk [vmem:[#allocation2 + $0xd4] sm:$0x1] %vm175_vm1, %v3694_v0  ;;  %v417_v40 = vshrl.u32 %v246_v31, 16  ;;  %v270_v45 = vrot.slane %v266_v34, 4 }
  0x28   : > { %225 = vst.msk [vmem:[#allocation2 + $0xcc] sm:$0xf] %vm172_vm0, %v3694_v0  ;;  %226 = vst.msk [vmem:[#allocation2 + $0xd0] sm:$0xf] %vm172_vm0, %v3694_v0  ;;  %v230_v41 = vld [vmem:[%s3798_s17 + $0x8] sm:$0xf] }
  0x29   : > { %v3545_v6 = vld [vmem:[#allocation2 + $0x8] ss:$0 sps:$4 sm:$0x11]   ;;  %vm3811_vm7 = vmand %vm172_vm0, %vm585_vm5  ;;  %v274_v46 = vrot.slane %v272_v38, 7  ;;  %v419_v47 = vrot.slane %v417_v40, 7  ;;  %v420_v48 = vshll.u32 %v246_v31, 16 }
  0x2a   : > { %v1297_v15 = vrot.slane %v3545_v6, 1  ;;  %v1031_v16 = vshll.u32 %v3545_v6, 16  ;;  %vm3819_vm8 = vmor %vm260_vm3, %vm261_vm4  ;;  %v646_v37 = vsel %vm3811_vm7, %v405_v28, %v645_v18  ;;  %v425_v49 = vshrl.u32 %v247_v36, 16  ;;  %v231_v50 = vld [vmem:[%s3798_s17 + $0xc] sm:$0xf]  ;;  %s3698_s21 = smov 12  }
  0x2b   : > { %v414_v43 = vsel %vm3819_vm8, %v406_v29, %v413_v33  ;;  %647 = vst [vmem:[#allocation2 + $0x6c] sm:$0xf] %v646_v37  ;;  %v588_v52 = vsel %vm3811_vm7, %v269_v44, %v587_v30  ;;  %v428_v53 = vshll.u32 %v247_v36, 16  ;;  %v652_v54 = vld [vmem:[#allocation2 + $0x78] sm:$0xf]  ;;  %v281_v55 = vshrl.u32 %v230_v41, 16  ;;  %vm3850_vm9 = vmand %vm175_vm1, %vm260_vm3 }
  0x2c   : > { %v1298_v25 = vsel %vm1295_vm2, %v1296_v14, %v1297_v15  ;;  %v1033_v26 = vrot.slane %v1031_v16, 1  ;;  %648 = vst.msk [vmem:[#allocation2 + $0x70] sm:$0xf] %vm172_vm0, %v414_v43  ;;  %v242_v56 = vld [vmem:[%s3798_s17 + $0x38] sm:$0xf]  ;;  %v277_v57 = vor.u32 %v275_v39, %v274_v46  ;;  %v422_v58 = vor.u32 %v420_v48, %v419_v47  ;;  %s3699_s22 = smov 15  }
  0x2d   : > { %1344 = vrot.lane.b32.xlu0 %v1298_v25, %s3695_s18  ;;  %589 = vst [vmem:[#allocation2 + $0xc] sm:$0xf] %v588_v52  ;;  %v423_v59 = vrot.slane %v419_v47, 4  ;;  %v3839_v60 = vrot.slane %v425_v49, 7  ;;  %v283_v61 = vrot.slane %v281_v55, 7  ;;  %v284_v62 = vshll.u32 %v230_v41, 16 }
  0x2e   : > { %v1034_v51 = vsel %vm1022_vm6, %v1029_v42, %v1033_v26  ;;  %v289_v63 = vshrl.u32 %v231_v50, 16  ;;  %v292_v0 = vshll.u32 %v231_v50, 16  ;;  %v243_v1 = vld [vmem:[%s3798_s17 + $0x3c] sm:$0xf]  ;;  %v278_v2 = vsel %vm3819_vm8, %v270_v45, %v277_v57  ;;  %v596_v5 = vld [vmem:[#allocation2 + $0x18] sm:$0xf] }
  0x2f   : > { %v430_v3 = vor.u32 %v428_v53, %v3839_v60  ;;  %v653_v4 = vsel %vm3811_vm7, %v422_v58, %v652_v54  ;;  %v383_v6 = vshrl.u32 %v242_v56, 16  ;;  %590 = vst.msk [vmem:[#allocation2 + $0x10] sm:$0xf] %vm172_vm0, %v278_v2  ;;  %v286_v7 = vor.u32 %v284_v62, %v283_v61  ;;  %v593_v17 = vld [vmem:[#allocation2 + $0x14] sm:$0x1]  ;;  %s3700_s23 = smov 18  }
  0x30   : > { %654 = vst [vmem:[#allocation2 + $0x78] sm:$0xf] %v653_v4  ;;  %v287_v8 = vrot.slane %v283_v61, 4  ;;  %v291_v9 = vrot.slane %v289_v63, 7  ;;  %v386_v11 = vshll.u32 %v242_v56, 16  ;;  %v391_v16 = vshrl.u32 %v243_v1, 16 }
  0x31   : > { %1215 = vrot.lane.b32.xlu0 %v1034_v51, %s3696_s19  ;;  %v431_v14 = vsel %vm3819_vm8, %v423_v59, %v430_v3  ;;  %v385_v15 = vrot.slane %v383_v6, 7  ;;  %v597_v20 = vsel %vm3811_vm7, %v286_v7, %v596_v5  ;;  %v394_v23 = vshll.u32 %v243_v1, 16  ;;  %v638_v24 = vld [vmem:[#allocation2 + $0x60] sm:$0xf]  ;;  %v649_v30 = vld [vmem:[#allocation2 + $0x74] sm:$0x1] }
  0x32   : > { %v781_v13 = vld [vmem:[#allocation2 + $0x6c] sm:$0xf]  ;;  %655 = vst.msk [vmem:[#allocation2 + $0x7c] sm:$0xf] %vm172_vm0, %v431_v14  ;;  %v294_v19 = vor.u32 %v292_v0, %v291_v9  ;;  %v279_v25 = vrot.slane %v274_v46, 4  ;;  %v393_v32 = vrot.slane %v391_v16, 7 }
  0x33   : > { %v3856_v18 = vld [vmem:[#allocation2 + $0x70] sm:$0xf]  ;;  %598 = vst [vmem:[#allocation2 + $0x18] sm:$0xf] %v597_v20  ;;  %v388_v28 = vor.u32 %v386_v11, %v385_v15  ;;  %v389_v29 = vrot.slane %v385_v15, 4  ;;  %v415_v34 = vrot.slane %v3807_v21, 4 }
  0x34   : > { %v3862_v26 = vcombine.low %v781_v13, %v3856_v18  ;;  %v295_v31 = vsel %vm3819_vm8, %v287_v8, %v294_v19  ;;  %v594_v33 = vsel %vm3850_vm9, %v279_v25, %v593_v17  ;;  %v720_v35 = vld [vmem:[#allocation2 + $0x70] sm:$0xf]  ;;  %v758_v36 = vld [vmem:[#allocation2 + $0x6c] sm:$0xe]  ;;  %v642_v39 = vld [vmem:[#allocation2 + $0x68] sm:$0x1]  ;;  %v396_v41 = vor.u32 %v394_v23, %v393_v32 }
  0x35   : > { %v765_v37 = vld [vmem:[#allocation2 + $0xc] sm:$0xf]  ;;  %599 = vst.msk [vmem:[#allocation2 + $0x1c] sm:$0xf] %vm172_vm0, %v295_v31  ;;  %v639_v38 = vsel %vm3811_vm7, %v388_v28, %v638_v24  ;;  %595 = vst [vmem:[#allocation2 + $0x14] sm:$0x1] %v594_v33  ;;  %v650_v44 = vsel %vm3850_vm9, %v415_v34, %v649_v30  ;;  %v3184_v48 = vcombine.low %v758_v36, %v720_v35 }
  0x36   : > { %1472 = vrot.lane.b32.xlu1 %v3862_v26, %s3697_s20  ;;  %v600_v40 = vld [vmem:[#allocation2 + $0x20] sm:$0x1]  ;;  %v398_v42 = vrot.slane %v393_v32, 4  ;;  %640 = vst [vmem:[#allocation2 + $0x60] sm:$0xf] %v639_v38  ;;  %v296_v45 = vrot.slane %v291_v9, 4  ;;  %v397_v50 = vsel %vm3819_vm8, %v389_v29, %v396_v41 }
  0x37   : > { %v750_v43 = vld [vmem:[#allocation2 + $0xc] sm:$0xe]  ;;  %v3876_v46 = vld [vmem:[#allocation2 + $0x10] sm:$0xf]  ;;  %v783_v47 = vld [vmem:[#allocation2 + $0x78] sm:$0xf] }
  0x38   : > { %v703_v21 = vld [vmem:[#allocation2 + $0xc] sm:$0xf]  ;;  %651 = vst [vmem:[#allocation2 + $0x74] sm:$0x1] %v650_v44  ;;  %v3879_v49 = vcombine.low %v765_v37, %v3876_v46  ;;  %v643_v51 = vsel %vm3850_vm9, %v398_v42, %v642_v39  ;;  %v704_v52 = vld [vmem:[#allocation2 + $0x10] sm:$0xf]  ;;  %v601_v56 = vsel %vm3850_vm9, %v296_v45, %v600_v40 }
  0x39   : > { %v3885_v53 = vld [vmem:[#allocation2 + $0x7c] sm:$0xf]  ;;  %641 = vst.msk [vmem:[#allocation2 + $0x64] sm:$0xf] %vm172_vm0, %v397_v50  ;;  %644 = vst [vmem:[#allocation2 + $0x68] sm:$0x1] %v643_v51  ;;  %v3176_v54 = vcombine.low %v750_v43, %v704_v52  ;;  %v3888_v55 = vcombine.low %v703_v21, %v704_v52 }
  0x3a   : > { %1456 = vrot.lane.b32.xlu0 %v3879_v49, %s3697_s20  ;;  %v3895_v57 = vcombine.low %v783_v47, %v3885_v53  ;;  %v767_v58 = vld [vmem:[#allocation2 + $0x18] sm:$0xf]  ;;  %v719_v59 = vld [vmem:[#allocation2 + $0x6c] sm:$0xf]  ;;  %602 = vst [vmem:[#allocation2 + $0x20] sm:$0x1] %v601_v56 }
  0x3b   : > { %v1539_v61 = vshll.u32 %v3879_v49, 16  ;;  %v1323_v62 = vrot.slane %v3184_v48, 1  ;;  %v1038_v63 = vshll.u32 %v3888_v55, 16  ;;  %v1299_v1 = vrot.slane %v3176_v54, 1  ;;  %v813_v19 = vld [vmem:[#allocation2 + $0xc] sm:$0xe] }
  0x3c   : > { %1474 = vrot.lane.b32.xlu1 %v3895_v57, %s3697_s20  ;;  %v3901_v0 = vld [vmem:[#allocation2 + $0x1c] sm:$0xf]  ;;  %v1537_v2 = vshrl.u32 %v3879_v49, 16  ;;  %v3905_v6 = vcombine.low %v719_v59, %v720_v35  ;;  %v3559_v7 = vld [vmem:[#allocation2 + $0x14] ss:$0 sps:$4 sm:$0x11]   ;;  %v3223_v47 = vcombine.low %v813_v19, %v3876_v46 }
  0x3d   : > { %v3192_v3 = vcombine.low %v767_v58, %v3901_v0  ;;  %v757_v4 = vld [vmem:[#allocation2 + $0x60] sm:$0xe]  ;;  %v1036_v8 = vshrl.u32 %v3888_v55, 16  ;;  %v1040_v13 = vrot.slane %v1038_v63, 1  ;;  %v1300_v16 = vrot.slane %v3559_v7, 1  ;;  %s3701_s26 = smov 21  }
  0x3e   : > { %v717_v5 = vld [vmem:[#allocation2 + $0x60] sm:$0xf]  ;;  %v1132_v14 = vshrl.u32 %v3905_v6, 16  ;;  %v1043_v17 = vshll.u32 %v3559_v7, 16  ;;  %v1134_v25 = vshll.u32 %v3905_v6, 16  ;;  %v1541_v31 = vrot.slane %v1539_v61, 1 }
  0x3f   : > { %v1551_v9 = vshll.u32 %v3192_v3, 16  ;;  %1458 = vrot.lane.b32.xlu0 %v3192_v3, %s3697_s20  ;;  %v3563_v11 = vld [vmem:[#allocation2 + $0x74] ss:$0 sps:$4 sm:$0x11]   ;;  %v1301_v28 = vsel %vm1295_vm2, %v1299_v1, %v1300_v16  ;;  %v1549_v32 = vshrl.u32 %v3192_v3, 16  ;;  %v1041_v35 = vor.u32 %v1040_v13, %v1036_v8  ;;  %s3702_s27 = smov 24  }
  0x40   : > { %v718_v15 = vld [vmem:[#allocation2 + $0x64] sm:$0xf]  ;;  %v3556_v20 = vld [vmem:[#allocation2 + $0x68] ss:$0 sps:$4 sm:$0x11]   ;;  %v1324_v29 = vrot.slane %v3563_v11, 1  ;;  %v1542_v56 = vor.u32 %v1541_v31, %v1537_v2 }
  0x41   : > { %v3183_v23 = vcombine.low %v757_v4, %v718_v15  ;;  %v3910_v24 = vcombine.low %v717_v5, %v718_v15  ;;  %v3565_v30 = vld [vmem:[#allocation2 + $0x14] ss:$0 sps:$4 sm:$0x11]   ;;  %v1321_v34 = vrot.slane %v3556_v20, 1  ;;  %v1045_v36 = vrot.slane %v1043_v17, 1 }
  0x42   : > { %v3915_v37 = vld [vmem:[#allocation2 + $0x20] ss:$0 sps:$4 sm:$0x11]   ;;  %v1127_v40 = vshll.u32 %v3556_v20, 16  ;;  %v1544_v41 = vshll.u32 %v3565_v30, 16  ;;  %v1553_v43 = vrot.slane %v1551_v9, 1  ;;  %v1325_v50 = vsel %vm1295_vm2, %v1323_v62, %v1324_v29 }
  0x43   : > { %v1320_v33 = vrot.slane %v3183_v23, 1  ;;  %1346 = vrot.lane.b32.xlu0 %v1301_v28, %s3695_s18  ;;  %v1120_v38 = vshrl.u32 %v3910_v24, 16  ;;  %v1122_v39 = vshll.u32 %v3910_v24, 16  ;;  %v1556_v21 = vshll.u32 %v3915_v37, 16  ;;  %v814_v59 = vld [vmem:[#allocation2 + $0x18] sm:$0xe] }
  0x44   : > { %v1136_v44 = vrot.slane %v1134_v25, 1  ;;  %v1635_v45 = vshll.u32 %v3862_v26, 16  ;;  %v1129_v49 = vrot.slane %v1127_v40, 1  ;;  %v1139_v51 = vshll.u32 %v3563_v11, 16  ;;  %v656_v3 = vld [vmem:[#allocation2 + $0x80] sm:$0x1] }
  0x45   : > { %v1322_v42 = vsel %vm1295_vm2, %v1320_v33, %v1321_v34  ;;  %v1124_v48 = vrot.slane %v1122_v39, 1  ;;  %v3925_v52 = vld [vmem:[#allocation2 + $0x74] ss:$0 sps:$4 sm:$0x11]   ;;  %v1546_v58 = vrot.slane %v1544_v41, 1  ;;  %v1046_v61 = vsel %vm1022_vm6, %v1041_v35, %v1045_v36 }
  0x46   : > { %1360 = vrot.lane.b32.xlu1 %v1322_v42, %s3695_s18  ;;  %v1554_v63 = vor.u32 %v1553_v43, %v1549_v32  ;;  %v1558_v1 = vrot.slane %v1556_v21, 1  ;;  %v1137_v46 = vor.u32 %v1136_v44, %v1132_v14  ;;  %v1808_v62 = vrot.slane %v3223_v47, 1  ;;  %v232_v8 = vld [vmem:[%s3798_s17 + $0x10] sm:$0xf]  ;;  %v233_v14 = vld [vmem:[%s3798_s17 + $0x14] sm:$0xf] }
  0x47   : > { %v1125_v54 = vor.u32 %v1124_v48, %v1120_v38  ;;  %v1809_v5 = vrot.slane %v3565_v30, 1  ;;  %v1633_v7 = vshrl.u32 %v3862_v26, 16  ;;  %v1141_v2 = vrot.slane %v1139_v51, 1  ;;  %v248_v20 = vld [vmem:[%s3798_s17 + $0x50] sm:$0xf] }
  0x48   : > { %v1637_v9 = vrot.slane %v1635_v45, 1  ;;  %v1640_v11 = vshll.u32 %v3925_v52, 16  ;;  %v432_v13 = vrot.slane %v3839_v60, 4  ;;  %v3224_v15 = vcombine.low %v814_v59, %v3901_v0  ;;  %v249_v29 = vld [vmem:[%s3798_s17 + $0x54] sm:$0xf] }
  0x49   : > { %v1130_v4 = vsel %vm1022_vm6, %v1125_v54, %v1129_v49  ;;  %v1547_v16 = vsel %vm1022_vm6, %v1542_v56, %v1546_v58  ;;  %v1647_v17 = vshll.u32 %v3895_v57, 16  ;;  %v1559_v19 = vsel %vm1022_vm6, %v1554_v63, %v1558_v1  ;;  %v603_v33 = vld [vmem:[#allocation2 + $0x24] sm:$0xf]  ;;  %v830_v36 = vld [vmem:[#allocation2 + $0x18] sm:$0xf] }
  0x4a   : > { %1362 = vrot.lane.b32.xlu1 %v1325_v50, %s3695_s18  ;;  %1231 = vrot.lane.b32.xlu0 %v1130_v4, %s3696_s19  ;;  %v657_v26 = vsel %vm3850_vm9, %v432_v13, %v656_v3  ;;  %v1810_v23 = vsel %vm1295_vm2, %v1808_v62, %v1809_v5  ;;  %v298_v25 = vshrl.u32 %v232_v8, 16  ;;  %v301_v60 = vshll.u32 %v232_v8, 16  ;;  %v3950_v41 = vld [vmem:[#allocation2 + $0x1c] sm:$0xf]  ;;  %v821_v44 = vld [vmem:[#allocation2 + $0x6c] sm:$0xe] }
  0x4b   : > { %658 = vst [vmem:[#allocation2 + $0x80] sm:$0x1] %v657_v26  ;;  %v306_v28 = vshrl.u32 %v233_v14, 16  ;;  %v1142_v0 = vsel %vm1022_vm6, %v1137_v46, %v1141_v2  ;;  %v1638_v30 = vor.u32 %v1637_v9, %v1633_v7  ;;  %v1642_v31 = vrot.slane %v1640_v11, 1  ;;  %v607_v50 = vld [vmem:[#allocation2 + $0x2c] sm:$0x1] }
  0x4c   : > { %v309_v32 = vshll.u32 %v233_v14, 16  ;;  %v1811_v34 = vrot.slane %v3224_v15, 1  ;;  %v1812_v35 = vrot.slane %v3915_v37, 1  ;;  %v300_v38 = vrot.slane %v298_v25, 7  ;;  %v822_v56 = vld [vmem:[#allocation2 + $0x78] sm:$0xe] }
  0x4d   : > { %v308_v39 = vrot.slane %v306_v28, 7  ;;  %v1645_v40 = vshrl.u32 %v3895_v57, 16  ;;  %v434_v42 = vshrl.u32 %v248_v20, 16  ;;  %v437_v43 = vshll.u32 %v248_v20, 16  ;;  %v659_v1 = vld [vmem:[#allocation2 + $0x84] sm:$0xf] }
  0x4e   : > { %1217 = vrot.lane.b32.xlu1 %v1046_v61, %s3696_s19  ;;  %1728 = vrot.lane.b32.xlu0 %v1547_v16, %s3698_s21  ;;  %v442_v21 = vshrl.u32 %v249_v29, 16  ;;  %v1649_v45 = vrot.slane %v1647_v17, 1  ;;  %v303_v47 = vor.u32 %v301_v60, %v300_v38  ;;  %v304_v48 = vrot.slane %v300_v38, 4  ;;  %v846_v7 = vld [vmem:[#allocation2 + $0x78] sm:$0xf] }
  0x4f   : > { %v311_v49 = vor.u32 %v309_v32, %v308_v39  ;;  %v1643_v37 = vsel %vm1022_vm6, %v1638_v30, %v1642_v31  ;;  %v313_v51 = vrot.slane %v308_v39, 4  ;;  %v436_v54 = vrot.slane %v434_v42, 7  ;;  %v3970_v11 = vld [vmem:[#allocation2 + $0x7c] sm:$0xf]  ;;  %v663_v20 = vld [vmem:[#allocation2 + $0x8c] sm:$0x1] }
  0x50   : > { %v444_v57 = vrot.slane %v442_v21, 7  ;;  %v3239_v58 = vcombine.low %v830_v36, %v3950_v41  ;;  %v604_v61 = vsel %vm3811_vm7, %v303_v47, %v603_v33  ;;  %v445_v63 = vshll.u32 %v249_v29, 16  ;;  %v3975_v16 = vld [vmem:[#allocation2 + $0x20] ss:$0 sps:$4 sm:$0x11]  }
  0x51   : > { %v312_v59 = vsel %vm3819_vm8, %v304_v48, %v311_v49  ;;  %v3231_v46 = vcombine.low %v821_v44, %v3856_v18  ;;  %605 = vst [vmem:[#allocation2 + $0x24] sm:$0xf] %v604_v61  ;;  %v608_v4 = vsel %vm3850_vm9, %v313_v51, %v607_v50  ;;  %v439_v62 = vor.u32 %v437_v43, %v436_v54  ;;  %v3986_v30 = vld [vmem:[#allocation2 + $0x1c] sm:$0xf]  ;;  %v878_v31 = vld [vmem:[#allocation2 + $0x18] sm:$0xe] }
  0x52   : > { %1233 = vrot.lane.b32.xlu1 %v1142_v0, %s3696_s19  ;;  %1730 = vrot.lane.b32.xlu0 %v1559_v19, %s3698_s21  ;;  %v3961_v3 = vld [vmem:[#allocation2 + $0x80] ss:$0 sps:$4 sm:$0x11]   ;;  %606 = vst.msk [vmem:[#allocation2 + $0x28] sm:$0xf] %vm172_vm0, %v312_v59  ;;  %v440_v5 = vrot.slane %v436_v54, 4  ;;  %v447_v8 = vor.u32 %v445_v63, %v444_v57  ;;  %v3232_v2 = vcombine.low %v822_v56, %v3885_v53 }
  0x53   : > { %609 = vst [vmem:[#allocation2 + $0x2c] sm:$0x1] %v608_v4  ;;  %v1650_v18 = vor.u32 %v1649_v45, %v1645_v40  ;;  %v1652_v9 = vshll.u32 %v3961_v3, 16  ;;  %v660_v13 = vsel %vm3811_vm7, %v439_v62, %v659_v1  ;;  %v1813_v14 = vsel %vm1295_vm2, %v1811_v34, %v1812_v35  ;;  %v705_v0 = vld [vmem:[#allocation2 + $0x18] sm:$0xf] }
  0x54   : > { %v2051_v15 = vshll.u32 %v3239_v58, 16  ;;  %v448_v17 = vsel %vm3819_vm8, %v440_v5, %v447_v8  ;;  %661 = vst [vmem:[#allocation2 + $0x84] sm:$0xf] %v660_v13  ;;  %v1832_v19 = vrot.slane %v3231_v46, 1  ;;  %v1833_v26 = vrot.slane %v3925_v52, 1 }
  0x55   : > { %v1654_v53 = vrot.slane %v1652_v9, 1  ;;  %662 = vst.msk [vmem:[#allocation2 + $0x88] sm:$0xf] %vm172_vm0, %v448_v17  ;;  %v449_v25 = vrot.slane %v444_v57, 4  ;;  %v1835_v28 = vrot.slane %v3232_v2, 1  ;;  %v2049_v29 = vshrl.u32 %v3239_v58, 16 }
  0x56   : > { %1744 = vrot.lane.b32.xlu1 %v1643_v37, %s3698_s21  ;;  %1856 = vrot.lane.b32.xlu0 %v1810_v23, %s3699_s22  ;;  %v3982_v23 = vcombine.low %v846_v7, %v3970_v11  ;;  %v2053_v33 = vrot.slane %v2051_v15, 1  ;;  %v2056_v34 = vshll.u32 %v3975_v16, 16  ;;  %v1834_v36 = vsel %vm1295_vm2, %v1832_v19, %v1833_v26  ;;  %v4000_v43 = vld [vmem:[#allocation2 + $0x80] ss:$0 sps:$4 sm:$0x11]  }
  0x57   : > { %v1655_v60 = vsel %vm1022_vm6, %v1650_v18, %v1654_v53  ;;  %v664_v35 = vsel %vm3850_vm9, %v449_v25, %v663_v20  ;;  %v1836_v39 = vrot.slane %v3961_v3, 1  ;;  %v4003_v21 = vcombine.low %v705_v0, %v3986_v30  ;;  %v886_v57 = vld [vmem:[#allocation2 + $0x78] sm:$0xe]  ;;  %v4022_v5 = vld [vmem:[#allocation2 + $0x7c] sm:$0xf] }
  0x58   : > { %v832_v52 = vld [vmem:[#allocation2 + $0x24] sm:$0xf]  ;;  %665 = vst [vmem:[#allocation2 + $0x8c] sm:$0x1] %v664_v35  ;;  %v2147_v42 = vshll.u32 %v3982_v23, 16  ;;  %v2054_v47 = vor.u32 %v2053_v33, %v2049_v29  ;;  %v2058_v48 = vrot.slane %v2056_v34, 1  ;;  %v3271_v51 = vcombine.low %v878_v31, %v3950_v41 }
  0x59   : > { %v3989_v32 = vld [vmem:[#allocation2 + $0x28] sm:$0xf]  ;;  %v1837_v54 = vsel %vm1295_vm2, %v1835_v28, %v1836_v39  ;;  %v2145_v61 = vshrl.u32 %v3982_v23, 16  ;;  %v2152_v1 = vshll.u32 %v4000_v43, 16  ;;  %v1050_v46 = vshll.u32 %v4003_v21, 16  ;;  %v3641_v41 = vld [vmem:[%s5091_s1] sm:$0xff]  }
  0x5a   : > { %1858 = vrot.lane.b32.xlu0 %v1813_v14, %s3699_s22  ;;  %1746 = vrot.lane.b32.xlu1 %v1655_v60, %s3698_s21  ;;  %v3240_v38 = vcombine.low %v832_v52, %v3989_v32  ;;  %v3997_v40 = vld [vmem:[#allocation2 + $0x2c] ss:$0 sps:$4 sm:$0x11]   ;;  %v2149_v63 = vrot.slane %v2147_v42, 1  ;;  %v721_v3 = vld [vmem:[#allocation2 + $0x78] sm:$0xf]  ;;  %v2059_v7 = vsel %vm1022_vm6, %v2054_v47, %v2058_v48  ;;  %v3279_v9 = vcombine.low %v886_v57, %v3970_v11 }
  0x5b   : > { %v848_v45 = vld [vmem:[#allocation2 + $0x84] sm:$0xf]  ;;  %v2068_v50 = vshll.u32 %v3997_v40, 16  ;;  %v4026_v18 = vld [vmem:[#allocation2 + $0x28] sm:$0xf]  ;;  %3487 = vmatprep.subr.bf16.mxu0 %v3641_v41  ;;  %v2320_v14 = vrot.slane %v3271_v51, 1  ;;  %3523 = vmatprep.subr.bf16.mxu1 %v3641_v41  ;;  %v4040_v60 = vcombine.low %v721_v3, %v4022_v5 }
  0x5c   : > { %v2063_v44 = vshll.u32 %v3240_v38, 16  ;;  %v2061_v49 = vshrl.u32 %v3240_v38, 16  ;;  %v4008_v37 = vld [vmem:[#allocation2 + $0x88] sm:$0xf]  ;;  %v879_v4 = vld [vmem:[#allocation2 + $0x24] sm:$0xe]  ;;  %3488 = vmatpush3.bf16.msra.mxu0 %v3641_v41  ;;  %v2150_v53 = vor.u32 %v2149_v63, %v2145_v61  ;;  %3525 = vmatpush3.bf16.msra.mxu1 %v3641_v41 }
  0x5d   : > { %v3248_v59 = vcombine.low %v848_v45, %v4008_v37  ;;  %v707_v62 = vld [vmem:[#allocation2 + $0x24] sm:$0xf]  ;;  %v2070_v2 = vrot.slane %v2068_v50, 1  ;;  %v2321_v15 = vrot.slane %v3975_v16, 1  ;;  %v2154_v19 = vrot.slane %v2152_v1, 1 }
  0x5e   : > { %1968 = vrot.lane.b32.xlu0 %v3239_v58, %s3700_s23  ;;  %1872 = vrot.lane.b32.xlu1 %v1834_v36, %s3699_s22  ;;  %v2065_v56 = vrot.slane %v2063_v44, 1  ;;  %v4013_v58 = vld [vmem:[#allocation2 + $0x20] ss:$0 sps:$4 sm:$0x11]   ;;  %v1048_v26 = vshrl.u32 %v4003_v21, 16  ;;  %v1052_v20 = vrot.slane %v1050_v46, 1  ;;  %v3272_v25 = vcombine.low %v879_v4, %v3989_v32 }
  0x5f   : > { %v2159_v13 = vshll.u32 %v3248_v59, 16  ;;  %v4030_v17 = vld [vmem:[#allocation2 + $0x8c] ss:$0 sps:$4 sm:$0x11]   ;;  %v1055_v11 = vshll.u32 %v4013_v58, 16  ;;  %v4037_v16 = vcombine.low %v707_v62, %v4026_v18  ;;  %v2322_v0 = vsel %vm1295_vm2, %v2320_v14, %v2321_v15 }
  0x60   : > { %v2066_v8 = vor.u32 %v2065_v56, %v2061_v49  ;;  %v4045_v29 = vld [vmem:[#allocation2 + $0x2c] ss:$0 sps:$4 sm:$0x11]   ;;  %v2157_v31 = vshrl.u32 %v3248_v59, 16  ;;  %v2164_v32 = vshll.u32 %v4030_v17, 16  ;;  %v2155_v34 = vsel %vm1022_vm6, %v2150_v53, %v2154_v19 }
  0x61   : > { %v2161_v52 = vrot.slane %v2159_v13, 1  ;;  %v4049_v33 = vld [vmem:[#allocation2 + $0x80] ss:$0 sps:$4 sm:$0x11]   ;;  %v1053_v35 = vor.u32 %v1052_v20, %v1048_v26  ;;  %v2344_v36 = vrot.slane %v3279_v9, 1  ;;  %v1057_v39 = vrot.slane %v1055_v11, 1 }
  0x62   : > { %1970 = vrot.lane.b32.xlu0 %v3240_v38, %s3700_s23  ;;  %1874 = vrot.lane.b32.xlu1 %v1837_v54, %s3699_s22  ;;  %v2071_v28 = vsel %vm1022_vm6, %v2066_v8, %v2070_v2  ;;  %v2345_v38 = vrot.slane %v4000_v43, 1  ;;  %v2323_v42 = vrot.slane %v3272_v25, 1  ;;  %v1062_v44 = vshll.u32 %v4037_v16, 16  ;;  %v235_v47 = vld [vmem:[%s3798_s17 + $0x1c] sm:$0xf] }
  0x63   : > { %v1146_v45 = vshll.u32 %v4040_v60, 16  ;;  %v2324_v48 = vrot.slane %v3997_v40, 1  ;;  %v1060_v49 = vshrl.u32 %v4037_v16, 16  ;;  %v1067_v50 = vshll.u32 %v4045_v29, 16  ;;  %v751_v51 = vld [vmem:[#allocation2 + $0x18] sm:$0xe] }
  0x64   : > { %v1144_v43 = vshrl.u32 %v4040_v60, 16  ;;  %v2162_v54 = vor.u32 %v2161_v52, %v2157_v31  ;;  %v2166_v57 = vrot.slane %v2164_v32, 1  ;;  %v723_v56 = vld [vmem:[#allocation2 + $0x84] sm:$0xf]  ;;  %v4063_v1 = vld [vmem:[#allocation2 + $0x88] sm:$0xf]  ;;  %v2346_v8 = vsel %vm1295_vm2, %v2344_v36, %v2345_v38 }
  0x65   : > { %v323_v46 = vshrl.u32 %v235_v47, 16  ;;  %v326_v3 = vshll.u32 %v235_v47, 16  ;;  %v887_v41 = vld [vmem:[#allocation2 + $0x84] sm:$0xe]  ;;  %v1064_v40 = vrot.slane %v1062_v44, 1  ;;  %v1151_v4 = vshll.u32 %v4049_v33, 16 }
  0x66   : > { %2240 = vrot.lane.b32.xlu0 %v2059_v7, %s3701_s26  ;;  %1984 = vrot.lane.b32.xlu1 %v3982_v23, %s3700_s23  ;;  %v234_v23 = vld [vmem:[%s3798_s17 + $0x18] sm:$0xf]  ;;  %v1058_v7 = vsel %vm1022_vm6, %v1053_v35, %v1057_v39  ;;  %v3177_v2 = vcombine.low %v751_v51, %v3986_v30  ;;  %v610_v13 = vld [vmem:[#allocation2 + $0x30] sm:$0xf]  ;;  %v2167_v14 = vsel %vm1022_vm6, %v2162_v54, %v2166_v57  ;;  %v1069_v11 = vrot.slane %v1067_v50, 1 }
  0x67   : > { %v315_v61 = vshrl.u32 %v234_v23, 16  ;;  %v318_v63 = vshll.u32 %v234_v23, 16  ;;  %v325_v9 = vrot.slane %v323_v46, 7  ;;  %v4073_v15 = vcombine.low %v723_v56, %v4063_v1  ;;  %v250_v26 = vld [vmem:[%s3798_s17 + $0x58] sm:$0xf] }
  0x68   : > { %v3280_v20 = vcombine.low %v887_v41, %v4008_v37  ;;  %v2325_v25 = vsel %vm1295_vm2, %v2323_v42, %v2324_v48  ;;  %v1065_v30 = vor.u32 %v1064_v40, %v1060_v49  ;;  %v1153_v52 = vrot.slane %v1151_v4, 1  ;;  %v752_v32 = vld [vmem:[#allocation2 + $0x24] sm:$0xe]  ;;  %v614_v35 = vld [vmem:[#allocation2 + $0x38] sm:$0x1] }
  0x69   : > { %v317_v62 = vrot.slane %v315_v61, 7  ;;  %v4083_v36 = vld [vmem:[#allocation2 + $0x8c] ss:$0 sps:$4 sm:$0x11]   ;;  %v330_v38 = vrot.slane %v325_v9, 4  ;;  %v451_v23 = vshrl.u32 %v250_v26, 16 }
  0x6a   : > { %2242 = vrot.lane.b32.xlu0 %v2071_v28, %s3701_s26  ;;  %1986 = vrot.lane.b32.xlu1 %v3248_v59, %s3700_s23  ;;  %v1148_v59 = vrot.slane %v1146_v45, 1  ;;  %v328_v28 = vor.u32 %v326_v3, %v325_v9  ;;  %v454_v39 = vshll.u32 %v250_v26, 16  ;;  %v1302_v42 = vrot.slane %v3177_v2, 1  ;;  %v759_v45 = vld [vmem:[#allocation2 + $0x78] sm:$0xe] }
  0x6b   : > { %v320_v53 = vor.u32 %v318_v63, %v317_v62  ;;  %v321_v19 = vrot.slane %v317_v62, 4  ;;  %v1158_v44 = vshll.u32 %v4073_v15, 16  ;;  %v666_v49 = vld [vmem:[#allocation2 + $0x90] sm:$0xf]  ;;  %v1303_v50 = vrot.slane %v4013_v58, 1 }
  0x6c   : > { %v1149_v31 = vor.u32 %v1148_v59, %v1144_v43  ;;  %v2347_v43 = vrot.slane %v3280_v20, 1  ;;  %v769_v51 = vld [vmem:[#allocation2 + $0x24] sm:$0xf]  ;;  %v615_v54 = vsel %vm3850_vm9, %v330_v38, %v614_v35  ;;  %v453_v57 = vrot.slane %v451_v23, 7  ;;  %v4096_v46 = vld [vmem:[#allocation2 + $0x28] sm:$0xf] }
  0x6d   : > { %v329_v37 = vsel %vm3819_vm8, %v321_v19, %v328_v28  ;;  %v1070_v56 = vsel %vm1022_vm6, %v1065_v30, %v1069_v11  ;;  %v2348_v61 = vrot.slane %v4030_v17, 1  ;;  %v3178_v63 = vcombine.low %v752_v32, %v4026_v18  ;;  %616 = vst [vmem:[#allocation2 + $0x38] sm:$0x1] %v615_v54  ;;  %v236_v41 = vld [vmem:[%s3798_s17 + $0x20] sm:$0xf] }
  0x6e   : > { %2368 = vrot.lane.b32.xlu0 %v2322_v0, %s3702_s27  ;;  %2256 = vrot.lane.b32.xlu1 %v2155_v34, %s3701_s26  ;;  %v251_v0 = vld [vmem:[%s3798_s17 + $0x5c] sm:$0xf]  ;;  %v611_v34 = vsel %vm3811_vm7, %v320_v53, %v610_v13  ;;  %613 = vst.msk [vmem:[#allocation2 + $0x34] sm:$0xf] %vm172_vm0, %v329_v37  ;;  %v1154_v58 = vsel %vm1022_vm6, %v1149_v31, %v1153_v52  ;;  %v1163_v40 = vshll.u32 %v4083_v36, 16  ;;  %v457_v4 = vrot.slane %v453_v57, 4 }
  0x6f   : > { %612 = vst [vmem:[#allocation2 + $0x30] sm:$0xf] %v611_v34  ;;  %v459_v47 = vshrl.u32 %v251_v0, 16  ;;  %v462_v48 = vshll.u32 %v251_v0, 16  ;;  %v456_v59 = vor.u32 %v454_v39, %v453_v57  ;;  %v670_v62 = vld [vmem:[#allocation2 + $0x98] sm:$0x1]  ;;  %v4104_v18 = vcombine.low %v769_v51, %v4096_v46 }
  0x70   : > { %v1160_v2 = vrot.slane %v1158_v44, 1  ;;  %v3185_v13 = vcombine.low %v759_v45, %v4022_v5  ;;  %v1305_v53 = vrot.slane %v3178_v63, 1  ;;  %v1306_v19 = vrot.slane %v4045_v29, 1  ;;  %v4117_v11 = vld [vmem:[#allocation2 + $0x2c] ss:$0 sps:$4 sm:$0x11]  }
  0x71   : > { %v461_v3 = vrot.slane %v459_v47, 7  ;;  %v1304_v5 = vsel %vm1295_vm2, %v1302_v42, %v1303_v50  ;;  %v335_v28 = vshll.u32 %v236_v41, 16  ;;  %v2349_v29 = vsel %vm1295_vm2, %v2347_v43, %v2348_v61  ;;  %v237_v34 = vld [vmem:[%s3798_s17 + $0x24] sm:$0xf]  ;;  %v617_v23 = vld [vmem:[#allocation2 + $0x3c] sm:$0xf] }
  0x72   : > { %1219 = vrot.lane.b32.xlu0 %v1058_v7, %s3696_s19  ;;  %2258 = vrot.lane.b32.xlu1 %v2167_v14, %s3701_s26  ;;  %v1156_v7 = vshrl.u32 %v4073_v15, 16  ;;  %v332_v14 = vshrl.u32 %v236_v41, 16  ;;  %v1165_v30 = vrot.slane %v1163_v40, 1  ;;  %v1563_v32 = vshll.u32 %v4104_v18, 16  ;;  %v785_v45 = vld [vmem:[#allocation2 + $0x84] sm:$0xf] }
  0x73   : > { %v464_v17 = vor.u32 %v462_v48, %v461_v3  ;;  %v466_v9 = vrot.slane %v461_v3, 4  ;;  %v1307_v37 = vsel %vm1295_vm2, %v1305_v53, %v1306_v19  ;;  %v1326_v38 = vrot.slane %v3185_v13, 1  ;;  %v4131_v47 = vld [vmem:[#allocation2 + $0x88] sm:$0xf] }
  0x74   : > { %v1161_v0 = vor.u32 %v1160_v2, %v1156_v7  ;;  %v334_v35 = vrot.slane %v332_v14, 7  ;;  %v1327_v39 = vrot.slane %v4049_v33, 1  ;;  %v1568_v50 = vshll.u32 %v4117_v11, 16  ;;  %v4153_v19 = vld [vmem:[#allocation2 + $0x8c] ss:$0 sps:$4 sm:$0x11]  }
  0x75   : > { %v465_v26 = vsel %vm3819_vm8, %v457_v4, %v464_v17  ;;  %v671_v20 = vsel %vm3850_vm9, %v466_v9, %v670_v62  ;;  %v4121_v52 = vld [vmem:[#allocation2 + $0x34] sm:$0xf]  ;;  %v340_v43 = vshrl.u32 %v237_v34, 16  ;;  %v343_v51 = vshll.u32 %v237_v34, 16  ;;  %v815_v4 = vld [vmem:[#allocation2 + $0x24] sm:$0xe] }
  0x76   : > { %2370 = vrot.lane.b32.xlu0 %v2325_v25, %s3702_s27  ;;  %2384 = vrot.lane.b32.xlu1 %v2346_v8, %s3702_s27  ;;  %v667_v8 = vsel %vm3811_vm7, %v456_v59, %v666_v49  ;;  %v760_v25 = vld [vmem:[#allocation2 + $0x84] sm:$0xe]  ;;  %669 = vst.msk [vmem:[#allocation2 + $0x94] sm:$0xf] %vm172_vm0, %v465_v26  ;;  %672 = vst [vmem:[#allocation2 + $0x98] sm:$0x1] %v671_v20  ;;  %v337_v48 = vor.u32 %v335_v28, %v334_v35 }
  0x77   : > { %668 = vst [vmem:[#allocation2 + $0x90] sm:$0xf] %v667_v8  ;;  %v771_v31 = vld [vmem:[#allocation2 + $0x30] sm:$0xf]  ;;  %v3186_v44 = vcombine.low %v760_v25, %v4063_v1  ;;  %v1166_v49 = vsel %vm1022_vm6, %v1161_v0, %v1165_v30  ;;  %v1561_v54 = vshrl.u32 %v4104_v18, 16  ;;  %v1565_v57 = vrot.slane %v1563_v32, 1 }
  0x78   : > { %v3194_v42 = vcombine.low %v771_v31, %v4121_v52  ;;  %v618_v33 = vsel %vm3811_vm7, %v337_v48, %v617_v23  ;;  %v4141_v1 = vcombine.low %v785_v45, %v4131_v47  ;;  %v338_v61 = vrot.slane %v334_v35, 4  ;;  %v4146_v59 = vld [vmem:[#allocation2 + $0x38] ss:$0 sps:$4 sm:$0x11]   ;;  %v621_v17 = vld [vmem:[#allocation2 + $0x44] sm:$0x1] }
  0x79   : > { %v342_v63 = vrot.slane %v340_v43, 7  ;;  %619 = vst [vmem:[#allocation2 + $0x3c] sm:$0xf] %v618_v33  ;;  %v1328_v3 = vsel %vm1295_vm2, %v1326_v38, %v1327_v39  ;;  %v1330_v40 = vrot.slane %v4083_v36, 1  ;;  %v1570_v62 = vrot.slane %v1568_v50, 1 }
  0x7a   : > { %1221 = vrot.lane.b32.xlu0 %v1070_v56, %s3696_s19  ;;  %1235 = vrot.lane.b32.xlu1 %v1154_v58, %s3696_s19  ;;  %v252_v56 = vld [vmem:[%s3798_s17 + $0x60] sm:$0xf]  ;;  %v1575_v41 = vshll.u32 %v3194_v42, 16  ;;  %v1329_v58 = vrot.slane %v3186_v44, 1  ;;  %v1566_v13 = vor.u32 %v1565_v57, %v1561_v54  ;;  %v1659_v53 = vshll.u32 %v4141_v1, 16 }
  0x7b   : > { %v345_v7 = vor.u32 %v343_v51, %v342_v63  ;;  %v347_v2 = vrot.slane %v342_v63, 4  ;;  %v468_v9 = vshrl.u32 %v252_v56, 16  ;;  %v253_v26 = vld [vmem:[%s3798_s17 + $0x64] sm:$0xf]  ;;  %v1573_v20 = vshrl.u32 %v3194_v42, 16 }
  0x7c   : > { %v1580_v25 = vshll.u32 %v4146_v59, 16  ;;  %v471_v30 = vshll.u32 %v252_v56, 16  ;;  %v3225_v31 = vcombine.low %v815_v4, %v4096_v46  ;;  %v1571_v32 = vsel %vm1022_vm6, %v1566_v13, %v1570_v62  ;;  %v816_v46 = vld [vmem:[#allocation2 + $0x30] sm:$0xe]  ;;  %v677_v57 = vld [vmem:[#allocation2 + $0xa4] sm:$0x1] }
  0x7d   : > { %v4148_v14 = vld [vmem:[#allocation2 + $0x94] sm:$0xf]  ;;  %v346_v36 = vsel %vm3819_vm8, %v338_v61, %v345_v7  ;;  %v622_v28 = vsel %vm3850_vm9, %v347_v2, %v621_v17  ;;  %v470_v0 = vrot.slane %v468_v9, 7  ;;  %v476_v34 = vshrl.u32 %v253_v26, 16  ;;  %v834_v63 = vld [vmem:[#allocation2 + $0x30] sm:$0xf] }
  0x7e   : > { %1348 = vrot.lane.b32.xlu0 %v1304_v5, %s3695_s18  ;;  %2386 = vrot.lane.b32.xlu1 %v2349_v29, %s3702_s27  ;;  %v787_v8 = vld [vmem:[#allocation2 + $0x90] sm:$0xf]  ;;  %v1577_v5 = vrot.slane %v1575_v41, 1  ;;  %620 = vst.msk [vmem:[#allocation2 + $0x40] sm:$0xf] %vm172_vm0, %v346_v36  ;;  %v479_v35 = vshll.u32 %v253_v26, 16  ;;  %v3226_v41 = vcombine.low %v816_v46, %v4121_v52 }
  0x7f   : > { %v3202_v29 = vcombine.low %v787_v8, %v4148_v14  ;;  %623 = vst [vmem:[#allocation2 + $0x44] sm:$0x1] %v622_v28  ;;  %v1657_v38 = vshrl.u32 %v4141_v1, 16  ;;  %v1661_v23 = vrot.slane %v1659_v53, 1  ;;  %v1664_v39 = vshll.u32 %v4153_v19, 16 }
  0x80   : > { %v473_v44 = vor.u32 %v471_v30, %v470_v0  ;;  %v1578_v45 = vor.u32 %v1577_v5, %v1573_v20  ;;  %v1582_v48 = vrot.slane %v1580_v25, 1  ;;  %v478_v50 = vrot.slane %v476_v34, 7  ;;  %v4171_v51 = vld [vmem:[#allocation2 + $0x98] ss:$0 sps:$4 sm:$0x11]  }
  0x81   : > { %v1671_v43 = vshll.u32 %v3202_v29, 16  ;;  %v1814_v33 = vrot.slane %v3225_v31, 1  ;;  %v1815_v56 = vrot.slane %v4117_v11, 1  ;;  %v1662_v61 = vor.u32 %v1661_v23, %v1657_v38  ;;  %v823_v62 = vld [vmem:[#allocation2 + $0x84] sm:$0xe] }
  0x82   : > { %1350 = vrot.lane.b32.xlu0 %v1307_v37, %s3695_s18  ;;  %1237 = vrot.lane.b32.xlu1 %v1166_v49, %s3696_s19  ;;  %v673_v37 = vld [vmem:[#allocation2 + $0x9c] sm:$0xf]  ;;  %v474_v49 = vrot.slane %v470_v0, 4  ;;  %v483_v4 = vrot.slane %v478_v50, 4  ;;  %v1666_v7 = vrot.slane %v1664_v39, 1  ;;  %v1669_v2 = vshrl.u32 %v3202_v29, 16 }
  0x83   : > { %v674_v54 = vsel %vm3811_vm7, %v473_v44, %v673_v37  ;;  %v1673_v17 = vrot.slane %v1671_v43, 1  ;;  %v1676_v11 = vshll.u32 %v4171_v51, 16  ;;  %v850_v52 = vld [vmem:[#allocation2 + $0x90] sm:$0xf]  ;;  %v4188_v13 = vld [vmem:[#allocation2 + $0x94] sm:$0xf]  ;;  %v3233_v8 = vcombine.low %v823_v62, %v4131_v47 }
  0x84   : > { %675 = vst [vmem:[#allocation2 + $0x9c] sm:$0xf] %v674_v54  ;;  %v1816_v53 = vsel %vm1295_vm2, %v1814_v33, %v1815_v56  ;;  %v1817_v36 = vrot.slane %v3226_v41, 1  ;;  %v1818_v26 = vrot.slane %v4146_v59, 1  ;;  %v836_v20 = vld [vmem:[#allocation2 + $0x3c] sm:$0xf]  ;;  %v1667_v28 = vsel %vm1022_vm6, %v1662_v61, %v1666_v7 }
  0x85   : > { %v4197_v5 = vld [vmem:[#allocation2 + $0x40] sm:$0xf]  ;;  %v824_v25 = vld [vmem:[#allocation2 + $0x90] sm:$0xe]  ;;  %v1678_v0 = vrot.slane %v1676_v11, 1  ;;  %v4201_v30 = vcombine.low %v850_v52, %v4188_v13  ;;  %v1839_v37 = vrot.slane %v4153_v19, 1 }
  0x86   : > { %1460 = vrot.lane.b32.xlu0 %v4104_v18, %s3697_s20  ;;  %1364 = vrot.lane.b32.xlu1 %v1328_v3, %s3695_s18  ;;  %v1331_v18 = vsel %vm1295_vm2, %v1329_v58, %v1330_v40  ;;  %v4177_v3 = vld [vmem:[#allocation2 + $0x34] sm:$0xf]  ;;  %v1583_v58 = vsel %vm1022_vm6, %v1578_v45, %v1582_v48  ;;  %v4203_v47 = vld [vmem:[#allocation2 + $0x38] ss:$0 sps:$4 sm:$0x11]   ;;  %v3234_v59 = vcombine.low %v824_v25, %v4148_v14  ;;  %v1842_v54 = vrot.slane %v4171_v51, 1 }
  0x87   : > { %v3241_v9 = vcombine.low %v834_v63, %v4177_v3  ;;  %v880_v34 = vld [vmem:[#allocation2 + $0x30] sm:$0xe]  ;;  %v2171_v23 = vshll.u32 %v4201_v30, 16  ;;  %v4213_v39 = vld [vmem:[#allocation2 + $0x98] ss:$0 sps:$4 sm:$0x11]  }
  0x88   : > { %v709_v44 = vld [vmem:[#allocation2 + $0x30] sm:$0xf]  ;;  %v4215_v45 = vld [vmem:[#allocation2 + $0x34] sm:$0xf]  ;;  %v2080_v14 = vshll.u32 %v4203_v47, 16  ;;  %v3273_v19 = vcombine.low %v880_v34, %v4177_v3  ;;  %v1841_v43 = vrot.slane %v3234_v59, 1 }
  0x89   : > { %v2075_v31 = vshll.u32 %v3241_v9, 16  ;;  %v2073_v48 = vshrl.u32 %v3241_v9, 16  ;;  %v4219_v46 = vld [vmem:[#allocation2 + $0x44] ss:$0 sps:$4 sm:$0x11]   ;;  %v2169_v33 = vshrl.u32 %v4201_v30, 16  ;;  %v4232_v3 = vcombine.low %v709_v44, %v4215_v45 }
  0x8a   : > { %1462 = vrot.lane.b32.xlu0 %v3194_v42, %s3697_s20  ;;  %1366 = vrot.lane.b32.xlu1 %v1331_v18, %s3695_s18  ;;  %v481_v42 = vor.u32 %v479_v35, %v478_v50  ;;  %v1674_v18 = vor.u32 %v1673_v17, %v1669_v2  ;;  %v1838_v35 = vrot.slane %v3233_v8, 1  ;;  %v2173_v56 = vrot.slane %v2171_v23, 1  ;;  %v4227_v63 = vld [vmem:[#allocation2 + $0x38] ss:$0 sps:$4 sm:$0x11]  }
  0x8b   : > { %v2176_v61 = vshll.u32 %v4213_v39, 16  ;;  %5104 = vst [vmem:[#allocation3_spill] sm:$0xff] %v4232_v3  ;;  %v2082_v51 = vrot.slane %v2080_v14, 1  ;;  %v2092_v7 = vshll.u32 %v4219_v46, 16  ;;  %v238_v2 = vld [vmem:[%s3798_s17 + $0x28] sm:$0xf]  ;;  %v1843_v17 = vsel %vm1295_vm2, %v1841_v43, %v1842_v54 }
  0x8c   : > { %v482_v40 = vsel %vm3819_vm8, %v474_v49, %v481_v42  ;;  %v1679_v38 = vsel %vm1022_vm6, %v1674_v18, %v1678_v0  ;;  %v2077_v49 = vrot.slane %v2075_v31, 1  ;;  %v888_v42 = vld [vmem:[#allocation2 + $0x90] sm:$0xe]  ;;  %v2327_v8 = vrot.slane %v4203_v47, 1  ;;  %v881_v18 = vld [vmem:[#allocation2 + $0x3c] sm:$0xe] }
  0x8d   : > { %676 = vst.msk [vmem:[#allocation2 + $0xa0] sm:$0xf] %vm172_vm0, %v482_v40  ;;  %v3281_v11 = vcombine.low %v888_v42, %v4188_v13  ;;  %v725_v25 = vld [vmem:[#allocation2 + $0x90] sm:$0xf]  ;;  %v1074_v0 = vshll.u32 %v4232_v3, 16  ;;  %v1079_v13 = vshll.u32 %v4227_v63, 16  ;;  %v3274_v14 = vcombine.low %v881_v18, %v4197_v5 }
  0x8e   : > { %1732 = vrot.lane.b32.xlu0 %v1571_v32, %s3698_s21  ;;  %1476 = vrot.lane.b32.xlu1 %v4141_v1, %s3697_s20  ;;  %v678_v1 = vsel %vm3850_vm9, %v483_v4, %v677_v57  ;;  %v1819_v32 = vsel %vm1295_vm2, %v1817_v36, %v1818_v26  ;;  %v1840_v57 = vsel %vm1295_vm2, %v1838_v35, %v1839_v37  ;;  %v2178_v26 = vrot.slane %v2176_v61, 1  ;;  %v711_v34 = vld [vmem:[#allocation2 + $0x3c] sm:$0xf]  ;;  %v624_v54 = vld [vmem:[#allocation2 + $0x48] sm:$0xf] }
  0x8f   : > { %679 = vst [vmem:[#allocation2 + $0xa4] sm:$0x1] %v678_v1  ;;  %v2078_v41 = vor.u32 %v2077_v49, %v2073_v48  ;;  %v2326_v1 = vrot.slane %v3273_v19, 1  ;;  %v2174_v36 = vor.u32 %v2173_v56, %v2169_v33  ;;  %v349_v31 = vshrl.u32 %v238_v2, 16  ;;  %v4260_v48 = vld [vmem:[#allocation2 + $0x40] sm:$0xf] }
  0x90   : > { %v352_v59 = vshll.u32 %v238_v2, 16  ;;  %v628_v42 = vld [vmem:[#allocation2 + $0x50] sm:$0x1]  ;;  %v1076_v33 = vrot.slane %v1074_v0, 1  ;;  %v1081_v56 = vrot.slane %v1079_v13, 1  ;;  %vm2719_vm10 = vcmask 1044480  }
  0x91   : > { %v4256_v23 = vsel %vm1295_vm2, %v2326_v1, %v2327_v8  ;;  %v4268_v19 = vsel %vm1022_vm6, %v2174_v36, %v2178_v26  ;;  %v4287_v36 = vld [vmem:[#allocation2 + $0x98] ss:$0 sps:$4 sm:$0x11]   ;;  %v4291_v0 = vld [vmem:[#allocation2 + $0x44] ss:$0 sps:$4 sm:$0x11]  }
  0x92   : > { %1734 = vrot.lane.b32.xlu0 %v1583_v58, %s3698_s21  ;;  %1478 = vrot.lane.b32.xlu1 %v3202_v29, %s3697_s20  ;;  %v3242_v29 = vcombine.low %v836_v20, %v4197_v5  ;;  %v852_v58 = vld [vmem:[#allocation2 + $0x9c] sm:$0xf]  ;;  %v1072_v20 = vshrl.u32 %v4232_v3, 16  ;;  %vm2720_vm11 = vcmask 1045504   ;;  %vm2400_vm12 = vcmask 23552  }
  0x93   : > { %vm2433_vm13 = vcmask 48128   ;;  %vm2466_vm14 = vcmask 72704   ;;  %vm2499_vm15 = vcmask 97280   ;;  %vm2532_vm1 = vcmask 121856  }
  0x94   : > { %v2087_v50 = vshll.u32 %v3242_v29, 16  ;;  %v4229_v40 = vld [vmem:[#allocation2 + $0xa0] sm:$0xf]  ;;  %v2085_v4 = vshrl.u32 %v3242_v29, 16  ;;  %v1077_v18 = vor.u32 %v1076_v33, %v1072_v20  ;;  %v753_v33 = vld [vmem:[#allocation2 + $0x30] sm:$0xe] }
  0x95   : > { %vm2565_vm3 = vcmask 146432   ;;  %vm2598_vm4 = vcmask 171008   ;;  %vm2631_vm5 = vcmask 195584  }
  0x96   : > { %1860 = vrot.lane.b32.xlu0 %v1816_v53, %s3699_s22  ;;  %1748 = vrot.lane.b32.xlu1 %v1667_v28, %s3698_s21  ;;  %v2089_v62 = vrot.slane %v2087_v50, 1  ;;  %v239_v53 = vld [vmem:[%s3798_s17 + $0x2c] sm:$0xf]  ;;  %v4248_v28 = vld [vmem:[#allocation2 + $0x94] sm:$0xf] }
  0x97   : > { %v357_v35 = vshrl.u32 %v239_v53, 16  ;;  %v360_v37 = vshll.u32 %v239_v53, 16  ;;  %v4258_v44 = vld [vmem:[#allocation2 + $0xa4] ss:$0 sps:$4 sm:$0x11]   ;;  %v4263_v49 = vcombine.low %v725_v25, %v4248_v28 }
  0x98   : > { %v2090_v47 = vor.u32 %v2089_v62, %v2085_v4  ;;  %v4278_v4 = vcombine.low %v711_v34, %v4260_v48  ;;  %v2351_v34 = vrot.slane %v4213_v39, 1 }
  0x99   : > { %5105 = vst [vmem:[#allocation4_spill] sm:$0xff] %v4263_v49  ;;  %v359_v43 = vrot.slane %v357_v35, 7  ;;  %v684_v35 = vld [vmem:[#allocation2 + $0xb0] sm:$0x1] }
  0x9a   : > { %1862 = vrot.lane.b32.xlu0 %v1819_v32, %s3699_s22  ;;  %1750 = vrot.lane.b32.xlu1 %v1679_v38, %s3698_s21  ;;  %v2094_v32 = vrot.slane %v2092_v7, 1  ;;  %v2083_v38 = vsel %vm1022_vm6, %v2078_v41, %v2082_v51  ;;  %v4275_v51 = vrot.slane %v3281_v11, 1  ;;  %5106 = vst [vmem:[#allocation5_spill] sm:$0xff] %v4278_v4  ;;  %v255_v7 = vld [vmem:[%s3798_s17 + $0x6c] sm:$0xf] }
  0x9b   : > { %v362_v62 = vor.u32 %v360_v37, %v359_v43  ;;  %v364_v8 = vrot.slane %v359_v43, 4  ;;  %v493_v13 = vshrl.u32 %v255_v7, 16 }
  0x9c   : > { %v2095_v5 = vsel %vm1022_vm6, %v2090_v47, %v2094_v32  ;;  %v2329_v47 = vrot.slane %v3274_v14, 1  ;;  %v2330_v32 = vrot.slane %v4219_v46, 1  ;;  %v1170_v14 = vshll.u32 %v4263_v49, 16  ;;  %v240_v46 = vld [vmem:[%s3798_s17 + $0x30] sm:$0xf] }
  0x9d   : > { %v495_v43 = vrot.slane %v493_v13, 7  ;;  %v3179_v13 = vcombine.low %v753_v33, %v4215_v45  ;;  %v2352_v45 = vsel %vm1295_vm2, %v4275_v51, %v2351_v34  ;;  %v773_v51 = vld [vmem:[#allocation2 + $0x3c] sm:$0xf]  ;;  %v4347_v34 = vld [vmem:[#allocation2 + $0x40] sm:$0xf] }
  0x9e   : > { %1972 = vrot.lane.b32.xlu0 %v3241_v9, %s3700_s23  ;;  %1876 = vrot.lane.b32.xlu1 %v1840_v57, %s3699_s22  ;;  %v4245_v9 = vcombine.low %v852_v58, %v4229_v40  ;;  %v254_v58 = vld [vmem:[%s3798_s17 + $0x68] sm:$0xf] }
  0x9f   : > { %v4240_v52 = vpop.permute.xlu0 %1344  ;;  %v485_v26 = vshrl.u32 %v254_v58, 16  ;;  %v488_v25 = vshll.u32 %v254_v58, 16  ;;  %v1091_v58 = vshll.u32 %v4291_v0, 16 }
  0xa0   : > { %v2183_v50 = vshll.u32 %v4245_v9, 16  ;;  %v2181_v2 = vshrl.u32 %v4245_v9, 16 }
  0xa1   : > { %v487_v20 = vrot.slane %v485_v26, 7 }
  0xa2   : > { %1974 = vrot.lane.b32.xlu0 %v3242_v29, %s3700_s23  ;;  %1878 = vrot.lane.b32.xlu1 %v1843_v17, %s3699_s22  ;;  %v351_v29 = vrot.slane %v349_v31, 7  ;;  %v2188_v17 = vshll.u32 %v4258_v44, 16  ;;  %v2185_v53 = vrot.slane %v2183_v50, 1  ;;  %v496_v31 = vshll.u32 %v255_v7, 16 }
  0xa3   : > { %v4270_v57 = vpop.permute.xlu0 %1215  ;;  %v1168_v50 = vshrl.u32 %v4263_v49, 16 }
  0xa4   : > { %v354_v61 = vor.u32 %v352_v59, %v351_v29  ;;  %v355_v41 = vrot.slane %v351_v29, 4  ;;  %v680_v59 = vld [vmem:[#allocation2 + $0xa8] sm:$0xf]  ;;  %v1086_v29 = vshll.u32 %v4278_v4, 16  ;;  %v2186_v39 = vor.u32 %v2185_v53, %v2181_v2 }
  0xa5   : > { %v498_v7 = vor.u32 %v496_v31, %v495_v43  ;;  %v1175_v2 = vshll.u32 %v4287_v36, 16  ;;  %v366_v53 = vshrl.u32 %v240_v46, 16  ;;  %v754_v31 = vld [vmem:[#allocation2 + $0x3c] sm:$0xe] }
  0xa6   : > { %2244 = vrot.lane.b32.xlu0 %v2083_v38, %s3701_s26  ;;  %1988 = vrot.lane.b32.xlu1 %v4201_v30, %s3700_s23  ;;  %v625_v1 = vsel %vm3811_vm7, %v354_v61, %v624_v54  ;;  %v363_v11 = vsel %vm3819_vm8, %v355_v41, %v362_v62  ;;  %v629_v30 = vsel %vm3850_vm9, %v364_v8, %v628_v42  ;;  %v889_v54 = vld [vmem:[#allocation2 + $0x9c] sm:$0xe]  ;;  %v2190_v42 = vrot.slane %v2188_v17, 1  ;;  %v4311_v62 = vld [vmem:[#allocation2 + $0xa0] sm:$0xf] }
  0xa7   : > { %626 = vst [vmem:[#allocation2 + $0x48] sm:$0xf] %v625_v1  ;;  %627 = vst.msk [vmem:[#allocation2 + $0x4c] sm:$0xf] %vm172_vm0, %v363_v11  ;;  %v490_v61 = vor.u32 %v488_v25, %v487_v20  ;;  %v491_v41 = vrot.slane %v487_v20, 4  ;;  %v500_v1 = vrot.slane %v495_v43, 4  ;;  %v3282_v20 = vcombine.low %v889_v54, %v4229_v40 }
  0xa8   : > { %630 = vst [vmem:[#allocation2 + $0x50] sm:$0x1] %v629_v30  ;;  %v4301_v37 = vpop.permute.xlu1 %1472  ;;  %v1084_v8 = vshrl.u32 %v4278_v4, 16  ;;  %v1172_v11 = vrot.slane %v1170_v14, 1  ;;  %v241_v25 = vld [vmem:[%s3798_s17 + $0x34] sm:$0xf] }
  0xa9   : > { %v681_v17 = vsel %vm3811_vm7, %v490_v61, %v680_v59  ;;  %v499_v26 = vsel %vm3819_vm8, %v491_v41, %v498_v7  ;;  %v4338_v14 = vld [vmem:[#allocation2 + $0xa4] ss:$0 sps:$4 sm:$0x11]   ;;  %v1093_v43 = vrot.slane %v1091_v58, 1  ;;  %v1177_v61 = vrot.slane %v1175_v2, 1 }
  0xaa   : > { %2246 = vrot.lane.b32.xlu0 %v2095_v5, %s3701_s26  ;;  %1990 = vrot.lane.b32.xlu1 %v4245_v9, %s3700_s23  ;;  %v1082_v9 = vsel %vm1022_vm6, %v1077_v18, %v1081_v56  ;;  %v727_v5 = vld [vmem:[#allocation2 + $0x9c] sm:$0xf]  ;;  %v1088_v56 = vrot.slane %v1086_v29, 1  ;;  %682 = vst [vmem:[#allocation2 + $0xa8] sm:$0xf] %v681_v17  ;;  %v2191_v18 = vsel %vm1022_vm6, %v2186_v39, %v2190_v42  ;;  %v368_v39 = vrot.slane %v366_v53, 7 }
  0xab   : > { %v4331_v59 = vcombine.low %v727_v5, %v4311_v62  ;;  %683 = vst.msk [vmem:[#allocation2 + $0xac] sm:$0xf] %vm172_vm0, %v499_v26  ;;  %v374_v42 = vshrl.u32 %v241_v25, 16  ;;  %v377_v40 = vshll.u32 %v241_v25, 16  ;;  %v631_v54 = vld [vmem:[#allocation2 + $0x54] sm:$0xf]  ;;  %v3180_v7 = vcombine.low %v754_v31, %v4260_v48 }
  0xac   : > { %v4303_v38 = vpop.permute.xlu0 %1456  ;;  %v1089_v33 = vor.u32 %v1088_v56, %v1084_v8  ;;  %v1308_v41 = vrot.slane %v3179_v13, 1  ;;  %v372_v58 = vrot.slane %v368_v39, 4  ;;  %v1187_v8 = vshll.u32 %v4338_v14, 16  ;;  %v761_v2 = vld [vmem:[#allocation2 + $0x90] sm:$0xe] }
  0xad   : > { %5107 = vst [vmem:[#allocation6_spill] sm:$0xff] %v4331_v59  ;;  %v2354_v26 = vrot.slane %v4258_v44, 1  ;;  %v1311_v31 = vrot.slane %v3180_v7, 1  ;;  %v4371_v44 = vcombine.low %v773_v51, %v4347_v34  ;;  %v762_v51 = vld [vmem:[#allocation2 + $0x9c] sm:$0xe] }
  0xae   : > { %2372 = vrot.lane.b32.xlu0 %v4256_v23, %s3702_s27  ;;  %2260 = vrot.lane.b32.xlu1 %v4268_v19, %s3701_s26  ;;  %v685_v23 = vsel %vm3850_vm9, %v500_v1, %v684_v35  ;;  %v369_v19 = vshll.u32 %v240_v46, 16  ;;  %v4335_v29 = vpop.permute.xlu1 %1474  ;;  %v2331_v35 = vsel %vm1295_vm2, %v2329_v47, %v2330_v32  ;;  %v1173_v46 = vor.u32 %v1172_v11, %v1168_v50  ;;  %v3644_v11 = vld [vmem:[%s5091_s1 + $0x8] sm:$0x3f]  }
  0xaf   : > { %686 = vst [vmem:[#allocation2 + $0xb0] sm:$0x1] %v685_v23  ;;  %v1309_v47 = vrot.slane %v4227_v63, 1  ;;  %v1182_v32 = vshll.u32 %v4331_v59, 16  ;;  %v376_v1 = vrot.slane %v374_v42, 7  ;;  %v1094_v17 = vsel %vm1022_vm6, %v1089_v33, %v1093_v43 }
  0xb0   : > { %v371_v5 = vor.u32 %v369_v19, %v368_v39  ;;  %v1178_v53 = vsel %vm1022_vm6, %v1173_v46, %v1177_v61  ;;  %v1180_v23 = vshrl.u32 %v4331_v59, 16  ;;  %v1312_v19 = vrot.slane %v4291_v0, 1  ;;  %v635_v39 = vld [vmem:[#allocation2 + $0x5c] sm:$0x1]  ;;  %v256_v46 = vld [vmem:[%s3798_s17 + $0x70] sm:$0xf] }
  0xb1   : > { %v4327_v30 = vpop.permute.xlu0 %1458  ;;  %v379_v56 = vor.u32 %v377_v40, %v376_v1  ;;  %v1184_v25 = vrot.slane %v1182_v32, 1  ;;  %v3187_v43 = vcombine.low %v761_v2, %v4248_v28  ;;  %v1310_v42 = vsel %vm1295_vm2, %v1308_v41, %v1309_v47  ;;  %v775_v32 = vld [vmem:[#allocation2 + $0x48] sm:$0xf]  ;;  %v257_v28 = vld [vmem:[%s3798_s17 + $0x74] sm:$0xf] }
  0xb2   : > { %1223 = vrot.lane.b32.xlu0 %v1082_v9, %s3696_s19  ;;  %2262 = vrot.lane.b32.xlu1 %v2191_v18, %s3701_s26  ;;  %v2353_v9 = vrot.slane %v3282_v20, 1  ;;  %v632_v63 = vsel %vm3811_vm7, %v371_v5, %v631_v54  ;;  %v3703_v18 = vmov 65535   ;;  %v4383_v5 = vld [vmem:[#allocation2 + $0x4c] sm:$0xf]  ;;  %v1313_v7 = vsel %vm1295_vm2, %v1311_v31, %v1312_v19 }
  0xb3   : > { %633 = vst [vmem:[#allocation2 + $0x54] sm:$0xf] %v632_v63  ;;  %v2721_v13 = vsel %vm2719_vm10, 4294967295, %v3703_v18  ;;  %v380_v20 = vsel %vm3819_vm8, %v372_v58, %v379_v56  ;;  %v1185_v54 = vor.u32 %v1184_v25, %v1180_v23  ;;  %v4387_v58 = vld [vmem:[#allocation2 + $0x44] ss:$0 sps:$4 sm:$0x11]   ;;  %v2402_v59 = vsel %vm2400_vm12, %v3803_v10, %v4270_v57 }
  0xb4   : > { %634 = vst.msk [vmem:[#allocation2 + $0x58] sm:$0xf] %vm172_vm0, %v380_v20  ;;  %v2355_v40 = vsel %vm1295_vm2, %v2353_v9, %v2354_v26  ;;  %v1587_v41 = vshll.u32 %v4371_v44, 16  ;;  %v1332_v47 = vrot.slane %v3187_v43, 1  ;;  %v1333_v9 = vrot.slane %v4287_v36, 1 }
  0xb5   : > { %v4350_v50 = vpop.permute.xlu0 %1346  ;;  %v502_v2 = vshrl.u32 %v256_v46, 16  ;;  %v505_v56 = vshll.u32 %v256_v46, 16  ;;  %v3188_v36 = vcombine.low %v762_v51, %v4311_v62  ;;  %v4402_v25 = vld [vmem:[#allocation2 + $0xa0] sm:$0xf]  ;;  %v1592_v31 = vshll.u32 %v4387_v58, 16 }
  0xb6   : > { %2374 = vrot.lane.b32.xlu0 %v2331_v35, %s3702_s27  ;;  %2388 = vrot.lane.b32.xlu1 %v2352_v45, %s3702_s27  ;;  %v2722_v35 = vsel %vm2720_vm11, %v2721_v13, 0  ;;  %v1189_v45 = vrot.slane %v1187_v8, 1  ;;  %v381_v8 = vrot.slane %v376_v1, 4  ;;  %v513_v13 = vshll.u32 %v257_v28, 16  ;;  %v687_v20 = vld [vmem:[#allocation2 + $0xb4] sm:$0xf] }
  0xb7   : > { %v2724_v33 = vand.u32 %v3644_v11, %v2722_v35  ;;  %v510_v11 = vshrl.u32 %v257_v28, 16  ;;  %v504_v18 = vrot.slane %v502_v2, 7  ;;  %v1585_v35 = vshrl.u32 %v4371_v44, 16  ;;  %v791_v2 = vld [vmem:[#allocation2 + $0xa8] sm:$0xf] }
  0xb8   : > { %v4356_v48 = vpop.permute.xlu1 %1360  ;;  %v636_v1 = vsel %vm3850_vm9, %v381_v8, %v635_v39  ;;  %v1190_v23 = vsel %vm1022_vm6, %v1185_v54, %v1189_v45  ;;  %v1589_v43 = vrot.slane %v1587_v41, 1  ;;  %v1335_v28 = vrot.slane %v3188_v36, 1  ;;  %v817_v8 = vld [vmem:[#allocation2 + $0x3c] sm:$0xe] }
  0xb9   : > { %3489 = vmatprep.subr.bf16.mxu0 %v2724_v33  ;;  %3524 = vmatprep.subr.bf16.mxu1 %v2724_v33  ;;  %637 = vst [vmem:[#allocation2 + $0x5c] sm:$0x1] %v636_v1  ;;  %v512_v19 = vrot.slane %v510_v11, 7  ;;  %v507_v39 = vor.u32 %v505_v56, %v504_v18  ;;  %v508_v46 = vrot.slane %v504_v18, 4  ;;  %v1594_v41 = vrot.slane %v1592_v31, 1 }
  0xba   : > { %1225 = vrot.lane.b32.xlu0 %v1094_v17, %s3696_s19  ;;  %1239 = vrot.lane.b32.xlu1 %v1178_v53, %s3696_s19  ;;  %v3196_v17 = vcombine.low %v775_v32, %v4383_v5  ;;  %v789_v53 = vld [vmem:[#allocation2 + $0x9c] sm:$0xf]  ;;  %v1334_v32 = vsel %vm1295_vm2, %v1332_v47, %v1333_v9  ;;  %v4421_v1 = vld [vmem:[#allocation2 + $0xac] sm:$0xf]  ;;  %v1590_v56 = vor.u32 %v1589_v43, %v1585_v35  ;;  %v838_v47 = vld [vmem:[#allocation2 + $0x48] sm:$0xf] }
  0xbb   : > { %3490 = vmatpush3.bf16.msra.mxu0 %v2724_v33  ;;  %3526 = vmatpush3.bf16.msra.mxu1 %v2724_v33  ;;  %v4413_v33 = vld [vmem:[#allocation2 + $0x50] ss:$0 sps:$4 sm:$0x11]   ;;  %v688_v51 = vsel %vm3811_vm7, %v507_v39, %v687_v20  ;;  %v4427_v9 = vld [vmem:[#allocation2 + $0x4c] sm:$0xf]  ;;  %v3204_v31 = vcombine.low %v791_v2, %v4421_v1  ;;  %v3227_v43 = vcombine.low %v817_v8, %v4347_v34  ;;  %vm2686_vm10 = vcmask 220160  }
  0xbc   : > { %v4376_v0 = vpop.permute.xlu1 %1362  ;;  %v4380_v61 = vpop.permute.xlu0 %1231  ;;  %v1599_v62 = vshll.u32 %v3196_v17, 16  ;;  %689 = vst [vmem:[#allocation2 + $0xb4] sm:$0xf] %v688_v51  ;;  %v1604_v18 = vshll.u32 %v4413_v33, 16  ;;  %v691_v35 = vld [vmem:[#allocation2 + $0xbc] sm:$0x1] }
  0xbd   : > { %v4439_v20 = vld [vmem:[#allocation2 + $0xa4] ss:$0 sps:$4 sm:$0x11]   ;;  %v818_v39 = vld [vmem:[#allocation2 + $0x48] sm:$0xe] }
  0xbe   : > { %1352 = vrot.lane.b32.xlu0 %v1310_v42, %s3695_s18  ;;  %2390 = vrot.lane.b32.xlu1 %v2355_v40, %s3702_s27  ;;  %v4411_v42 = vcombine.low %v789_v53, %v4402_v25  ;;  %v515_v40 = vor.u32 %v513_v13, %v512_v19  ;;  %v1601_v36 = vrot.slane %v1599_v62, 1  ;;  %v4445_v62 = vcombine.low %v838_v47, %v4427_v9  ;;  %v4452_v8 = vld [vmem:[#allocation2 + $0xb0] ss:$0 sps:$4 sm:$0x11]   ;;  %v840_v57 = vld [vmem:[#allocation2 + $0x54] sm:$0xf] }
  0xbf   : > { %v1688_v34 = vshll.u32 %v4439_v20, 16  ;;  %v1845_v49 = vrot.slane %v4439_v20, 1 }
  0xc0   : > { %v4393_v63 = vpop.permute.xlu1 %1217  ;;  %v4398_v26 = vpop.permute.xlu0 %1728  ;;  %v516_v53 = vsel %vm3819_vm8, %v508_v46, %v515_v40  ;;  %v1683_v11 = vshll.u32 %v4411_v42, 16  ;;  %v1595_v46 = vsel %vm1022_vm6, %v1590_v56, %v1594_v41  ;;  %v517_v40 = vrot.slane %v512_v19, 4  ;;  %v825_v56 = vld [vmem:[#allocation2 + $0x9c] sm:$0xe] }
  0xc1   : > { %690 = vst.msk [vmem:[#allocation2 + $0xb8] sm:$0xf] %vm172_vm0, %v516_v53  ;;  %v1695_v53 = vshll.u32 %v3204_v31, 16  ;;  %v3228_v19 = vcombine.low %v818_v39, %v4383_v5  ;;  %v2099_v47 = vshll.u32 %v4445_v62, 16  ;;  %v1821_v5 = vrot.slane %v4387_v58, 1 }
  0xc2   : > { %1354 = vrot.lane.b32.xlu0 %v1313_v7, %s3695_s18  ;;  %1241 = vrot.lane.b32.xlu1 %v1190_v23, %s3696_s19  ;;  %v1336_v7 = vrot.slane %v4338_v14, 1  ;;  %v1597_v23 = vshrl.u32 %v3196_v17, 16  ;;  %v1685_v51 = vrot.slane %v1683_v11, 1  ;;  %v4461_v11 = vld [vmem:[#allocation2 + $0x50] ss:$0 sps:$4 sm:$0x11]  }
  0xc3   : > { %v1690_v39 = vrot.slane %v1688_v34, 1  ;;  %v1824_v58 = vrot.slane %v4413_v33, 1  ;;  %v854_v34 = vld [vmem:[#allocation2 + $0xa8] sm:$0xf]  ;;  %v5108_v12 = vrot.slane %v4461_v11, 1 }
  0xc4   : > { %v4408_v45 = vpop.permute.xlu1 %1233  ;;  %v4415_v54 = vpop.permute.xlu0 %1730 }
  0xc6   : > { %1464 = vrot.lane.b32.xlu0 %v4371_v44, %s3697_s20  ;;  %1368 = vrot.lane.b32.xlu1 %v1334_v32, %s3695_s18  ;;  %v1337_v44 = vsel %vm1295_vm2, %v1335_v28, %v1336_v7  ;;  %v1602_v32 = vor.u32 %v1601_v36, %v1597_v23  ;;  %v1606_v28 = vrot.slane %v1604_v18, 1  ;;  %v1681_v7 = vshrl.u32 %v4411_v42, 16  ;;  %v826_v36 = vld [vmem:[#allocation2 + $0xa8] sm:$0xe] }
  0xc7   : > { %v1820_v18 = vrot.slane %v3227_v43, 1  ;;  %v1823_v43 = vrot.slane %v3228_v19, 1 }
  0xc8   : > { %v4431_v14 = vpop.permute.xlu1 %1744  ;;  %v4435_v13 = vpop.permute.xlu0 %1856  ;;  %v1607_v23 = vsel %vm1022_vm6, %v1602_v32, %v1606_v28  ;;  %v3236_v28 = vcombine.low %v826_v36, %v4421_v1 }
  0xc9   : > { %v1822_v10 = vsel %vm1295_vm2, %v1820_v18, %v1821_v5  ;;  %v882_v18 = vld [vmem:[#allocation2 + $0x48] sm:$0xe] }
  0xca   : > { %1466 = vrot.lane.b32.xlu0 %v3196_v17, %s3697_s20  ;;  %1370 = vrot.lane.b32.xlu1 %v1337_v44, %s3695_s18  ;;  %v692_v17 = vsel %vm3850_vm9, %v517_v40, %v691_v35  ;;  %v1686_v44 = vor.u32 %v1685_v51, %v1681_v7  ;;  %v1697_v40 = vrot.slane %v1695_v53, 1  ;;  %v2097_v7 = vshrl.u32 %v4445_v62, 16 }
  0xcb   : > { %693 = vst [vmem:[#allocation2 + $0xbc] sm:$0x1] %v692_v17  ;;  %v1700_v17 = vshll.u32 %v4452_v8, 16  ;;  %v2101_v51 = vrot.slane %v2099_v47, 1  ;;  %v2104_v53 = vshll.u32 %v4461_v11, 16  ;;  %v2435_v47 = vsel %vm2433_vm13, %v2402_v59, %v4240_v52 }
  0xcc   : > { %v4449_v2 = vpop.permute.xlu0 %1858  ;;  %v4457_v41 = vpop.permute.xlu1 %1746  ;;  %v1691_v33 = vsel %vm1022_vm6, %v1686_v44, %v1690_v39  ;;  %v2404_v44 = vsel %vm2400_vm12, %v3888_v55, %v4393_v63  ;;  %v1825_v39 = vsel %vm1295_vm2, %v1823_v43, %v1824_v58  ;;  %v1847_v59 = vrot.slane %v3236_v28, 1  ;;  %v4523_v58 = vld [vmem:[#allocation2 + $0x54] sm:$0xe]  ;;  %v4526_v28 = vld [vmem:[#allocation2 + $0x5c] ss:$0 sps:$4 sm:$0x11]  }
  0xcd   : > { %v1702_v1 = vrot.slane %v1700_v17, 1  ;;  %v3275_v17 = vcombine.low %v882_v18, %v4427_v9  ;;  %v2468_v43 = vsel %vm2466_vm14, %v2435_v47, %v4303_v38  ;;  %v4549_v47 = vld [vmem:[#allocation2 + $0xb0] ss:$0 sps:$4 sm:$0x11]   ;;  %v2336_v11 = vrot.slane %v4526_v28, 1 }
  0xce   : > { %1736 = vrot.lane.b32.xlu0 %v1595_v46, %s3698_s21  ;;  %1480 = vrot.lane.b32.xlu1 %v4411_v42, %s3697_s20  ;;  %v1693_v46 = vshrl.u32 %v3204_v31, 16  ;;  %v3235_v42 = vcombine.low %v825_v56, %v4402_v25  ;;  %v4483_v25 = vld [vmem:[#allocation2 + $0x58] sm:$0xf] }
  0xcf   : > { %v4504_v52 = vcombine.low %v840_v57, %v4483_v25  ;;  %v2501_v57 = vsel %vm2499_vm15, %v2468_v43, %v4398_v26 }
  0xd0   : > { %v4467_v35 = vpop.permute.xlu0 %1968  ;;  %v4474_v32 = vpop.permute.xlu1 %1872  ;;  %v1698_v56 = vor.u32 %v1697_v40, %v1693_v46  ;;  %v1844_v5 = vrot.slane %v3235_v42, 1  ;;  %v2106_v46 = vrot.slane %v2104_v53, 1  ;;  %v2437_v42 = vsel %vm2433_vm13, %v2404_v44, %v4350_v50  ;;  %v258_v50 = vld [vmem:[%s3798_s17 + $0x78] sm:$0xf] }
  0xd1   : > { %v2111_v9 = vshll.u32 %v4504_v52, 16  ;;  %v4561_v44 = vld [vmem:[#allocation2 + $0xb8] sm:$0xf] }
  0xd2   : > { %1738 = vrot.lane.b32.xlu0 %v1607_v23, %s3698_s21  ;;  %1482 = vrot.lane.b32.xlu1 %v3204_v31, %s3697_s20  ;;  %v4488_v23 = vld [vmem:[#allocation2 + $0xac] sm:$0xf]  ;;  %v2418_v31 = vsel %vm2400_vm12, %v3910_v24, %v4380_v61  ;;  %v1848_v24 = vrot.slane %v4452_v8, 1  ;;  %v2102_v61 = vor.u32 %v2101_v51, %v2097_v7  ;;  %v1703_v40 = vsel %vm1022_vm6, %v1698_v56, %v1702_v1 }
  0xd3   : > { %v4509_v20 = vcombine.low %v854_v34, %v4488_v23  ;;  %v2451_v55 = vsel %vm2433_vm13, %v2418_v31, %v4356_v48  ;;  %v1846_v48 = vsel %vm1295_vm2, %v1844_v5, %v1845_v49  ;;  %v713_v49 = vld [vmem:[#allocation2 + $0x48] sm:$0xf]  ;;  %v4537_v34 = vld [vmem:[#allocation2 + $0x4c] sm:$0xf]  ;;  %v4546_v56 = vrot.slane %v3275_v17, 1 }
  0xd4   : > { %v4485_v19 = vpop.permute.xlu0 %1970  ;;  %v4495_v36 = vpop.permute.xlu1 %1874  ;;  %v2484_v7 = vsel %vm2466_vm14, %v2451_v55, %v4301_v37  ;;  %v1849_v51 = vsel %vm1295_vm2, %v1847_v59, %v1848_v24  ;;  %v4534_v38 = vsel %vm1022_vm6, %v2102_v61, %v2106_v46  ;;  %v4554_v31 = vsel %vm2400_vm12, %v3905_v6, %v4408_v45  ;;  %v856_v5 = vld [vmem:[#allocation2 + $0xb4] sm:$0xf]  ;;  %v4572_v61 = vld [vmem:[#allocation2 + $0x50] ss:$0 sps:$4 sm:$0x11]  }
  0xd5   : > { %v2195_v53 = vshll.u32 %v4509_v20, 16  ;;  %v2534_v59 = vsel %vm2532_vm1, %v2501_v57, %v4435_v13  ;;  %v2113_v6 = vrot.slane %v2111_v9, 1  ;;  %v2116_v45 = vshll.u32 %v4526_v28, 16  ;;  %v729_v13 = vld [vmem:[#allocation2 + $0xa8] sm:$0xf] }
  0xd6   : > { %1864 = vrot.lane.b32.xlu0 %v1822_v10, %s3699_s22  ;;  %1752 = vrot.lane.b32.xlu1 %v1691_v33, %s3698_s21  ;;  %v259_v10 = vld [vmem:[%s3798_s17 + $0x7c] sm:$0xf]  ;;  %v2470_v33 = vsel %vm2466_vm14, %v2437_v42, %v4327_v30  ;;  %v2109_v30 = vshrl.u32 %v4504_v52, 16  ;;  %v4570_v24 = vcombine.low %v713_v49, %v4537_v34  ;;  %v2567_v55 = vsel %vm2565_vm3, %v2534_v59, %v4467_v35  ;;  %v715_v9 = vld [vmem:[#allocation2 + $0x54] sm:$0xf] }
  0xd7   : > { %v2503_v46 = vsel %vm2499_vm15, %v2470_v33, %v4415_v54  ;;  %v522_v17 = vshll.u32 %v258_v50, 16  ;;  %v4581_v43 = vcombine.low %v856_v5, %v4561_v44  ;;  %v4583_v49 = vld [vmem:[#allocation2 + $0x58] sm:$0xf]  ;;  %v527_v57 = vshrl.u32 %v259_v10, 16  ;;  %v4587_v59 = vld [vmem:[#allocation2 + $0xac] sm:$0xf] }
  0xd8   : > { %v2241_v63 = vpop.permute.xlu0 %2240  ;;  %v4517_v8 = vpop.permute.xlu1 %1984  ;;  %v530_v26 = vshll.u32 %v259_v10, 16  ;;  %v2197_v35 = vrot.slane %v2195_v53, 1  ;;  %v2118_v5 = vrot.slane %v2116_v45, 1  ;;  %v694_v10 = vld [vmem:[#allocation2 + $0xc0] sm:$0xf]  ;;  %v1103_v53 = vshll.u32 %v4572_v61, 16 }
  0xd9   : > { %v529_v1 = vrot.slane %v527_v57, 7  ;;  %v4606_v45 = vcombine.low %v729_v13, %v4587_v59 }
  0xda   : > { %1866 = vrot.lane.b32.xlu0 %v1825_v39, %s3699_s22  ;;  %1754 = vrot.lane.b32.xlu1 %v1703_v40, %s3698_s21  ;;  %v2193_v39 = vshrl.u32 %v4509_v20, 16  ;;  %v519_v40 = vshrl.u32 %v258_v50, 16 }
  0xdb   : > { %v1192_v28 = vshrl.u32 %v4606_v45, 16 }
  0xdc   : > { %v4544_v37 = vpop.permute.xlu0 %2242  ;;  %v4556_v18 = vpop.permute.xlu1 %1986  ;;  %v521_v50 = vrot.slane %v519_v40, 7 }
  0xde   : > { %1976 = vrot.lane.b32.xlu0 %v4445_v62, %s3700_s23  ;;  %1880 = vrot.lane.b32.xlu1 %v1846_v48, %s3699_s22  ;;  %v2600_v62 = vsel %vm2598_vm4, %v2567_v55, %v2241_v63  ;;  %v2200_v48 = vshll.u32 %v4549_v47, 16  ;;  %v2114_v63 = vor.u32 %v2113_v6, %v2109_v30  ;;  %v1098_v55 = vshll.u32 %v4570_v24, 16  ;;  %v4603_v6 = vld [vmem:[#allocation2 + $0xbc] ss:$0 sps:$4 sm:$0x11]  }
  0xdf   : > { %v525_v40 = vrot.slane %v521_v50, 4  ;;  %v2207_v30 = vshll.u32 %v4581_v43, 16 }
  0xe0   : > { %v2369_v42 = vpop.permute.xlu0 %2368  ;;  %v2257_v54 = vpop.permute.xlu1 %2256  ;;  %v2119_v13 = vsel %vm1022_vm6, %v2114_v63, %v2118_v5  ;;  %v1100_v3 = vrot.slane %v1098_v55, 1 }
  0xe1   : > { %v2633_v33 = vsel %vm2631_vm5, %v2600_v62, %v2369_v42  ;;  %v4596_v62 = vcombine.low %v715_v9, %v4583_v49  ;;  %v524_v42 = vor.u32 %v522_v17, %v521_v50  ;;  %v2202_v9 = vrot.slane %v2200_v48, 1 }
  0xe2   : > { %1978 = vrot.lane.b32.xlu0 %v4504_v52, %s3700_s23  ;;  %3491 = vmatprep.mubr.msk.bf16.mxu0 %vm2686_vm10, %v2633_v33  ;;  %v2517_v52 = vsel %vm2499_vm15, %v2484_v7, %v4431_v14  ;;  %v2198_v33 = vor.u32 %v2197_v35, %v2193_v39  ;;  %v1096_v17 = vshrl.u32 %v4570_v24, 16  ;;  %v2536_v14 = vsel %vm2532_vm1, %v2503_v46, %v4449_v2  ;;  %v890_v7 = vld [vmem:[#allocation2 + $0xa8] sm:$0xe]  ;;  %v698_v39 = vld [vmem:[#allocation2 + $0xc8] sm:$0x1] }
  0xe3   : > { %1882 = vrot.lane.b32.xlu1 %v1849_v51, %s3699_s22  ;;  %v532_v51 = vor.u32 %v530_v26, %v529_v1  ;;  %v695_v50 = vsel %vm3811_vm7, %v524_v42, %v694_v10  ;;  %v2550_v35 = vsel %vm2532_vm1, %v2517_v52, %v4474_v32  ;;  %v2569_v22 = vsel %vm2565_vm3, %v2536_v14, %v4485_v19  ;;  %v4644_v42 = vld [vmem:[#allocation2 + $0x5c] ss:$0 sps:$4 sm:$0x11]   ;;  %v4669_v14 = vld [vmem:[#allocation2 + $0xb8] sm:$0xf] }
  0xe4   : > { %v4600_v4 = vpop.permute.xlu0 %1219  ;;  %v4608_v57 = vpop.permute.xlu1 %2258  ;;  %696 = vst [vmem:[#allocation2 + $0xc0] sm:$0xf] %v695_v50  ;;  %v2205_v2 = vshrl.u32 %v4581_v43, 16  ;;  %v2583_v27 = vsel %vm2565_vm3, %v2550_v35, %v4517_v8  ;;  %v2602_v46 = vsel %vm2598_vm4, %v2569_v22, %v4544_v37  ;;  %v2209_v63 = vrot.slane %v2207_v30, 1  ;;  %v731_v50 = vld [vmem:[#allocation2 + $0xb4] sm:$0xf] }
  0xe5   : > { %v533_v26 = vsel %vm3819_vm8, %v525_v40, %v532_v51  ;;  %v2212_v32 = vshll.u32 %v4603_v6, 16  ;;  %v2616_v19 = vsel %vm2598_vm4, %v2583_v27, %v2257_v54  ;;  %v3283_v5 = vcombine.low %v890_v7, %v4488_v23  ;;  %v4655_v40 = vld [vmem:[#allocation2 + $0xb0] ss:$0 sps:$4 sm:$0x11]  }
  0xe6   : > { %2248 = vrot.lane.b32.xlu0 %v4534_v38, %s3701_s26  ;;  %697 = vst.msk [vmem:[#allocation2 + $0xc4] sm:$0xf] %vm172_vm0, %v533_v26  ;;  %v534_v38 = vrot.slane %v529_v1, 4  ;;  %v2453_v8 = vsel %vm2433_vm13, %v4554_v31, %v4376_v0  ;;  %v1101_v10 = vor.u32 %v1100_v3, %v1096_v17  ;;  %v1105_v54 = vrot.slane %v1103_v53, 1  ;;  %v891_v26 = vld [vmem:[#allocation2 + $0xb4] sm:$0xe] }
  0xe7   : > { %1992 = vrot.lane.b32.xlu1 %v4509_v20, %s3700_s23  ;;  %v2334_v0 = vsel %vm1295_vm2, %v4546_v56, %v5108_v12  ;;  %v2203_v23 = vsel %vm1022_vm6, %v2198_v33, %v2202_v9  ;;  %v1110_v31 = vshll.u32 %v4596_v62, 16  ;;  %v1194_v3 = vshll.u32 %v4606_v45, 16 }
  0xe8   : > { %v2371_v48 = vpop.permute.xlu0 %2370  ;;  %v2385_v55 = vpop.permute.xlu1 %2384  ;;  %v699_v1 = vsel %vm3850_vm9, %v534_v38, %v698_v39  ;;  %v2210_v52 = vor.u32 %v2209_v63, %v2205_v2  ;;  %v2214_v30 = vrot.slane %v2212_v32, 1  ;;  %v2486_v56 = vsel %vm2466_vm14, %v2453_v8, %v4335_v29  ;;  %v755_v29 = vld [vmem:[#allocation2 + $0x48] sm:$0xe]  ;;  %v4702_v8 = vld [vmem:[#allocation2 + $0xbc] ss:$0 sps:$4 sm:$0x11]  }
  0xe9   : > { %v2635_v20 = vsel %vm2631_vm5, %v2602_v46, %v2371_v48  ;;  %v2649_v37 = vsel %vm2631_vm5, %v2616_v19, %v2385_v55  ;;  %700 = vst [vmem:[#allocation2 + $0xc8] sm:$0x1] %v699_v1  ;;  %v2356_v9 = vrot.slane %v3283_v5, 1  ;;  %v1108_v17 = vshrl.u32 %v4596_v62, 16  ;;  %v756_v1 = vld [vmem:[#allocation2 + $0x54] sm:$0xe] }
  0xea   : > { %2250 = vrot.lane.b32.xlu0 %v2119_v13, %s3701_s26  ;;  %3492 = vmatmul.mubr.msk.bf16.vlgmr.msra.gmra.mrb[0].mxu0 %vm2686_vm10, %v2635_v20  ;;  %v2519_v7 = vsel %vm2499_vm15, %v2486_v56, %v4457_v41  ;;  %v1112_v39 = vrot.slane %v1110_v31, 1  ;;  %v1196_v35 = vrot.slane %v1194_v3, 1  ;;  %v1199_v22 = vshll.u32 %v4655_v40, 16  ;;  %v777_v3 = vld [vmem:[#allocation2 + $0x54] sm:$0xf] }
  0xeb   : > { %1994 = vrot.lane.b32.xlu1 %v4581_v43, %s3700_s23  ;;  %3507 = vmatprep.mubr.msk.bf16.mxu1 %vm2686_vm10, %v2649_v37  ;;  %v5109_v43 = vcombine.low %v4523_v58, %v4483_v25  ;;  %v1106_v25 = vsel %vm1022_vm6, %v1101_v10, %v1105_v54  ;;  %v1115_v58 = vshll.u32 %v4644_v42, 16  ;;  %v2552_v13 = vsel %vm2532_vm1, %v2519_v7, %v4495_v36 }
  0xec   : > { %v4658_v53 = vpop.permute.xlu0 %1221  ;;  %v4666_v33 = vpop.permute.xlu1 %1235  ;;  %v2585_v41 = vsel %vm2565_vm3, %v2552_v13, %v4556_v18  ;;  %v2215_v38 = vsel %vm1022_vm6, %v2210_v52, %v2214_v30  ;;  %v2357_v27 = vrot.slane %v4549_v47, 1  ;;  %v4688_v46 = vcombine.low %v731_v50, %v4669_v14  ;;  %v779_v13 = vld [vmem:[#allocation2 + $0x60] sm:$0xf] }
  0xed   : > { %v2335_v51 = vrot.slane %v5109_v43, 1  ;;  %v2618_v36 = vsel %vm2598_vm4, %v2585_v41, %v4608_v57  ;;  %v3284_v63 = vcombine.low %v891_v26, %v4561_v44  ;;  %v3181_v19 = vcombine.low %v755_v29, %v4537_v34  ;;  %v4731_v26 = vld [vmem:[#allocation2 + $0x64] sm:$0xf]  ;;  %v4739_v41 = vld [vmem:[#allocation2 + $0x5c] ss:$0 sps:$4 sm:$0x11]  }
  0xee   : > { %2376 = vrot.lane.b32.xlu0 %v2334_v0, %s3702_s27  ;;  %v1113_v47 = vor.u32 %v1112_v39, %v1108_v17  ;;  %v1117_v5 = vrot.slane %v1115_v58, 1  ;;  %v1197_v20 = vor.u32 %v1196_v35, %v1192_v28  ;;  %v1201_v55 = vrot.slane %v1199_v22, 1  ;;  %v764_v35 = vld [vmem:[#allocation2 + $0xb4] sm:$0xe] }
  0xef   : > { %2264 = vrot.lane.b32.xlu1 %v2203_v23, %s3701_s26  ;;  %v2337_v18 = vsel %vm1295_vm2, %v2335_v51, %v2336_v11  ;;  %v2358_v44 = vsel %vm1295_vm2, %v2356_v9, %v2357_v27  ;;  %v1206_v37 = vshll.u32 %v4688_v46, 16  ;;  %v1314_v34 = vrot.slane %v3181_v19, 1  ;;  %v763_v9 = vld [vmem:[#allocation2 + $0xa8] sm:$0xe]  ;;  %v4748_v19 = vld [vmem:[#allocation2 + $0xb8] sm:$0xf] }
  0xf0   : > { %v4683_v2 = vpop.permute.xlu0 %1348  ;;  %v2387_v48 = vpop.permute.xlu1 %2386  ;;  %v1315_v54 = vrot.slane %v4572_v61, 1  ;;  %v1118_v12 = vsel %vm1022_vm6, %v1113_v47, %v1117_v5  ;;  %v1202_v0 = vsel %vm1022_vm6, %v1197_v20, %v1201_v55  ;;  %v2359_v23 = vrot.slane %v3284_v63, 1  ;;  %v4718_v61 = vld [vmem:[#allocation2 + $0x58] sm:$0xf] }
  0xf1   : > { %v2651_v32 = vsel %vm2631_vm5, %v2618_v36, %v2387_v48  ;;  %v3182_v31 = vcombine.low %v756_v1, %v4583_v49  ;;  %v2360_v30 = vrot.slane %v4603_v6, 1  ;;  %v1204_v43 = vshrl.u32 %v4688_v46, 16  ;;  %v4751_v47 = vld [vmem:[#allocation2 + $0x68] ss:$0 sps:$4 sm:$0x11]  }
  0xf2   : > { %1227 = vrot.lane.b32.xlu0 %v1106_v25, %s3696_s19  ;;  %3508 = vmatmul.mubr.msk.bf16.vlgmr.msra.gmra.mrb[0].mxu1 %vm2686_vm10, %v2651_v32  ;;  %v1208_v51 = vrot.slane %v1206_v37, 1  ;;  %v1211_v11 = vshll.u32 %v4702_v8, 16  ;;  %v1316_v49 = vsel %vm1295_vm2, %v1314_v34, %v1315_v54  ;;  %v1318_v50 = vrot.slane %v4644_v42, 1 }
  0xf3   : > { %2266 = vrot.lane.b32.xlu1 %v2215_v38, %s3701_s26  ;;  %v1317_v17 = vrot.slane %v3182_v31, 1  ;;  %v3197_v6 = vcombine.low %v777_v3, %v4718_v61  ;;  %v2361_v25 = vsel %vm1295_vm2, %v2359_v23, %v2360_v30  ;;  %v3189_v29 = vcombine.low %v763_v9, %v4587_v59  ;;  %v819_v31 = vld [vmem:[#allocation2 + $0x54] sm:$0xe] }
  0xf4   : > { %v4699_v57 = vpop.permute.xlu0 %1350  ;;  %v4705_v10 = vpop.permute.xlu1 %1237  ;;  %v1209_v58 = vor.u32 %v1208_v51, %v1204_v43  ;;  %v1213_v28 = vrot.slane %v1211_v11, 1  ;;  %v3198_v22 = vcombine.low %v779_v13, %v4731_v26  ;;  %v1339_v48 = vrot.slane %v4655_v40, 1  ;;  %v4767_v11 = vld [vmem:[#allocation2 + $0xbc] ss:$0 sps:$4 sm:$0x11]  }
  0xf5   : > { %v1319_v42 = vsel %vm1295_vm2, %v1317_v17, %v1318_v50  ;;  %v1611_v38 = vshll.u32 %v3197_v6, 16  ;;  %v1338_v36 = vrot.slane %v3189_v29, 1  ;;  %v3190_v63 = vcombine.low %v764_v35, %v4669_v14  ;;  %v820_v13 = vld [vmem:[#allocation2 + $0x60] sm:$0xe] }
  0xf6   : > { %2378 = vrot.lane.b32.xlu0 %v2337_v18, %s3702_s27  ;;  %v1214_v59 = vsel %vm1022_vm6, %v1209_v58, %v1213_v28  ;;  %v793_v18 = vld [vmem:[#allocation2 + $0xb4] sm:$0xf]  ;;  %v1609_v5 = vshrl.u32 %v3197_v6, 16  ;;  %v1616_v55 = vshll.u32 %v4739_v41, 16  ;;  %v1342_v37 = vrot.slane %v4702_v8, 1 }
  0xf7   : > { %2392 = vrot.lane.b32.xlu1 %v2358_v44, %s3702_s27  ;;  %v1613_v20 = vrot.slane %v1611_v38, 1  ;;  %v1623_v44 = vshll.u32 %v3198_v22, 16  ;;  %v1340_v40 = vsel %vm1295_vm2, %v1338_v36, %v1339_v48  ;;  %v1341_v14 = vrot.slane %v3190_v63, 1 }
  0xf8   : > { %v4713_v52 = vpop.permute.xlu0 %1460  ;;  %v4720_v56 = vpop.permute.xlu1 %1364  ;;  %v3205_v34 = vcombine.low %v793_v18, %v4748_v19  ;;  %v1621_v23 = vshrl.u32 %v3198_v22, 16  ;;  %v1618_v30 = vrot.slane %v1616_v55, 1  ;;  %v1628_v51 = vshll.u32 %v4751_v47, 16  ;;  %v4791_v55 = vld [vmem:[#allocation2 + $0x64] sm:$0xf] }
  0xf9   : > { %v1614_v3 = vor.u32 %v1613_v20, %v1609_v5  ;;  %v1625_v43 = vrot.slane %v1623_v44, 1  ;;  %v1343_v9 = vsel %vm1295_vm2, %v1341_v14, %v1342_v37  ;;  %v1712_v29 = vshll.u32 %v4767_v11, 16 }
  0xfa   : > { %1229 = vrot.lane.b32.xlu0 %v1118_v12, %s3696_s19  ;;  %v795_v12 = vld [vmem:[#allocation2 + $0xc0] sm:$0xf]  ;;  %v1707_v17 = vshll.u32 %v3205_v34, 16  ;;  %v1630_v28 = vrot.slane %v1628_v51, 1  ;;  %v1827_v5 = vrot.slane %v4739_v41, 1 }
  0xfb   : > { %1243 = vrot.lane.b32.xlu1 %v1202_v0, %s3696_s19  ;;  %v4762_v0 = vld [vmem:[#allocation2 + $0xc4] sm:$0xf]  ;;  %v1626_v58 = vor.u32 %v1625_v43, %v1621_v23  ;;  %v1714_v20 = vrot.slane %v1712_v29, 1  ;;  %v827_v23 = vld [vmem:[#allocation2 + $0xb4] sm:$0xe]  ;;  %v1851_v29 = vrot.slane %v4767_v11, 1 }
  0xfc   : > { %v4727_v7 = vpop.permute.xlu0 %1462  ;;  %v4733_v39 = vpop.permute.xlu1 %1366  ;;  %v1709_v38 = vrot.slane %v1707_v17, 1  ;;  %v844_v43 = vld [vmem:[#allocation2 + $0x6c] sm:$0xf]  ;;  %v4802_v51 = vld [vmem:[#allocation2 + $0x70] sm:$0xf] }
  0xfd   : > { %v1631_v63 = vsel %vm1022_vm6, %v1626_v58, %v1630_v28  ;;  %v828_v28 = vld [vmem:[#allocation2 + $0xc0] sm:$0xe] }
  0xfe   : > { %1356 = vrot.lane.b32.xlu0 %v1316_v49, %s3695_s18  ;;  %v3206_v49 = vcombine.low %v795_v12, %v4762_v0 }
  0xff   : > { %2394 = vrot.lane.b32.xlu1 %v2361_v25, %s3702_s27  ;;  %v1619_v25 = vsel %vm1022_vm6, %v1614_v3, %v1618_v30  ;;  %v1830_v3 = vrot.slane %v4751_v47, 1  ;;  %v3237_v30 = vcombine.low %v827_v23, %v4748_v19 }
 0x100   : > { %v4741_v27 = vpop.permute.xlu0 %1732  ;;  %v4746_v32 = vpop.permute.xlu1 %1476  ;;  %v1719_v36 = vshll.u32 %v3206_v49, 16  ;;  %v1717_v14 = vshrl.u32 %v3206_v49, 16 }
 0x101   : > { %v1850_v47 = vrot.slane %v3237_v30, 1  ;;  %v4839_v30 = vld [vmem:[#allocation2 + $0xd0] sm:$0xf] }
 0x102   : > { %1358 = vrot.lane.b32.xlu0 %v1319_v42, %s3695_s18  ;;  %v1705_v42 = vshrl.u32 %v3205_v34, 16  ;;  %v1721_v37 = vrot.slane %v1719_v36, 1 }
 0x103   : > { %1245 = vrot.lane.b32.xlu1 %v1214_v59, %s3696_s19  ;;  %v4782_v59 = vld [vmem:[#allocation2 + $0xc8] ss:$0 sps:$4 sm:$0x11]  }
 0x104   : > { %v4755_v1 = vpop.permute.xlu0 %1734  ;;  %v4760_v54 = vpop.permute.xlu1 %1478  ;;  %v1724_v12 = vshll.u32 %v4782_v59, 16 }
 0x106   : > { %1468 = vrot.lane.b32.xlu0 %v3197_v6, %s3697_s20  ;;  %v3229_v6 = vcombine.low %v819_v31, %v4718_v61  ;;  %v3230_v61 = vcombine.low %v820_v13, %v4731_v26  ;;  %v4814_v13 = vld [vmem:[#allocation2 + $0x68] ss:$0 sps:$4 sm:$0x11]  }
 0x107   : > { %1372 = vrot.lane.b32.xlu1 %v1340_v40, %s3695_s18  ;;  %v1710_v40 = vor.u32 %v1709_v38, %v1705_v42 }
 0x108   : > { %v4769_v8 = vpop.permute.xlu0 %1860  ;;  %v4773_v50 = vpop.permute.xlu1 %1748  ;;  %v1826_v18 = vrot.slane %v3229_v6, 1  ;;  %v1722_v6 = vor.u32 %v1721_v37, %v1717_v14 }
 0x109   : > { %v1715_v17 = vsel %vm1022_vm6, %v1710_v40, %v1714_v20  ;;  %v4826_v20 = vld [vmem:[#allocation2 + $0x74] ss:$0 sps:$4 sm:$0x11]  }
 0x10a   : > { %1470 = vrot.lane.b32.xlu0 %v3198_v22, %s3697_s20  ;;  %v842_v22 = vld [vmem:[#allocation2 + $0x60] sm:$0xf]  ;;  %v1828_v41 = vsel %vm1295_vm2, %v1826_v18, %v1827_v5  ;;  %v4820_v18 = vld [vmem:[#allocation2 + $0xc4] sm:$0xf]  ;;  %v2406_v5 = vsel %vm2400_vm12, %v4003_v21, %v4600_v4 }
 0x10b   : > { %1374 = vrot.lane.b32.xlu1 %v1343_v9, %s3695_s18  ;;  %v3245_v26 = vcombine.low %v842_v22, %v4791_v55  ;;  %v2439_v14 = vsel %vm2433_vm13, %v2406_v5, %v4683_v2 }
 0x10c   : > { %v4780_v35 = vpop.permute.xlu0 %1862  ;;  %v4784_v48 = vpop.permute.xlu1 %1750  ;;  %v2472_v23 = vsel %vm2466_vm14, %v2439_v14, %v4713_v52 }
 0x10d   : > { %v2123_v42 = vshll.u32 %v3245_v26, 16  ;;  %v2121_v11 = vshrl.u32 %v3245_v26, 16  ;;  %v2505_v2 = vsel %vm2499_vm15, %v2472_v23, %v4741_v27 }
 0x10e   : > { %1740 = vrot.lane.b32.xlu0 %v1619_v25, %s3698_s21  ;;  %v1726_v25 = vrot.slane %v1724_v12, 1  ;;  %v2128_v12 = vshll.u32 %v4814_v13, 16 }
 0x10f   : > { %1484 = vrot.lane.b32.xlu1 %v3205_v34, %s3697_s20  ;;  %v1829_v34 = vrot.slane %v3230_v61, 1  ;;  %v3238_v61 = vcombine.low %v828_v28, %v4762_v0  ;;  %v1852_v0 = vsel %vm1295_vm2, %v1850_v47, %v1851_v29  ;;  %v2125_v37 = vrot.slane %v2123_v42, 1 }
 0x110   : > { %v1973_v44 = vpop.permute.xlu0 %1972  ;;  %v4794_v31 = vpop.permute.xlu1 %1876  ;;  %v1727_v36 = vsel %vm1022_vm6, %v1722_v6, %v1726_v25  ;;  %v2140_v25 = vshll.u32 %v4826_v20, 16  ;;  %v2130_v47 = vrot.slane %v2128_v12, 1 }
 0x111   : > { %v1831_v19 = vsel %vm1295_vm2, %v1829_v34, %v1830_v3  ;;  %v1853_v4 = vrot.slane %v3238_v61, 1  ;;  %v860_v3 = vld [vmem:[#allocation2 + $0xcc] sm:$0xf] }
 0x112   : > { %1742 = vrot.lane.b32.xlu0 %v1631_v63, %s3698_s21  ;;  %v858_v63 = vld [vmem:[#allocation2 + $0xc0] sm:$0xf]  ;;  %v4852_v27 = vcombine.low %v860_v3, %v4839_v30 }
 0x113   : > { %1486 = vrot.lane.b32.xlu1 %v3206_v49, %s3697_s20  ;;  %v3246_v49 = vcombine.low %v844_v43, %v4802_v51  ;;  %v3253_v34 = vcombine.low %v858_v63, %v4820_v18 }
 0x114   : > { %v4804_v9 = vpop.permute.xlu0 %1974  ;;  %v4807_v58 = vpop.permute.xlu1 %1878 }
 0x115   : > { %v2135_v40 = vshll.u32 %v3246_v49, 16  ;;  %v2133_v52 = vshrl.u32 %v3246_v49, 16  ;;  %v2219_v61 = vshll.u32 %v3253_v34, 16 }
 0x116   : > { %1868 = vrot.lane.b32.xlu0 %v1828_v41, %s3699_s22  ;;  %v1854_v41 = vrot.slane %v4782_v59, 1  ;;  %v884_v59 = vld [vmem:[#allocation2 + $0x60] sm:$0xe] }
 0x117   : > { %1756 = vrot.lane.b32.xlu1 %v1715_v17, %s3698_s21  ;;  %v2538_v17 = vsel %vm2532_vm1, %v2505_v2, %v4769_v8  ;;  %v2137_v6 = vrot.slane %v2135_v40, 1  ;;  %v2408_v8 = vsel %vm2400_vm12, %v4037_v16, %v4658_v53  ;;  %v3277_v5 = vcombine.low %v884_v59, %v4791_v55  ;;  %v885_v40 = vld [vmem:[#allocation2 + $0x6c] sm:$0xe] }
 0x118   : > { %v2245_v38 = vpop.permute.xlu0 %2244  ;;  %v4818_v22 = vpop.permute.xlu1 %1988  ;;  %v2571_v28 = vsel %vm2565_vm3, %v2538_v17, %v1973_v44  ;;  %v1855_v42 = vsel %vm1295_vm2, %v1853_v4, %v1854_v41  ;;  %v2142_v53 = vrot.slane %v2140_v25, 1  ;;  %v2441_v14 = vsel %vm2433_vm13, %v2408_v8, %v4699_v57 }
 0x119   : > { %v2138_v16 = vor.u32 %v2137_v6, %v2133_v52  ;;  %v2221_v12 = vrot.slane %v2219_v61, 1  ;;  %v2338_v3 = vrot.slane %v3277_v5, 1  ;;  %v3278_v2 = vcombine.low %v885_v40, %v4802_v51 }
 0x11a   : > { %1870 = vrot.lane.b32.xlu0 %v1831_v19, %s3699_s22  ;;  %v2126_v19 = vor.u32 %v2125_v37, %v2121_v11  ;;  %v2422_v11 = vsel %vm2400_vm12, %v4040_v60, %v4666_v33  ;;  %v4873_v37 = vld [vmem:[#allocation2 + $0xd4] ss:$0 sps:$4 sm:$0x11]   ;;  %v2231_v60 = vshll.u32 %v4852_v27, 16  ;;  %v2229_v52 = vshrl.u32 %v4852_v27, 16 }
 0x11b   : > { %1758 = vrot.lane.b32.xlu1 %v1727_v36, %s3698_s21  ;;  %v4859_v36 = vld [vmem:[#allocation2 + $0xc8] ss:$0 sps:$4 sm:$0x11]   ;;  %v2455_v33 = vsel %vm2433_vm13, %v2422_v11, %v4720_v56  ;;  %v2143_v17 = vsel %vm1022_vm6, %v2138_v16, %v2142_v53  ;;  %v2341_v8 = vrot.slane %v3278_v2, 1 }
 0x11c   : > { %v4835_v21 = vpop.permute.xlu0 %2246  ;;  %v4843_v43 = vpop.permute.xlu1 %1990  ;;  %v2131_v55 = vsel %vm1022_vm6, %v2126_v19, %v2130_v47  ;;  %v2224_v57 = vshll.u32 %v4859_v36, 16  ;;  %v2488_v23 = vsel %vm2466_vm14, %v2455_v33, %v4746_v32  ;;  %v2233_v51 = vrot.slane %v2231_v60, 1  ;;  %v892_v19 = vld [vmem:[#allocation2 + $0xc0] sm:$0xe] }
 0x11d   : > { %v2521_v56 = vsel %vm2499_vm15, %v2488_v23, %v4773_v50  ;;  %v2236_v50 = vshll.u32 %v4873_v37, 16 }
 0x11e   : > { %1980 = vrot.lane.b32.xlu0 %v3245_v26, %s3700_s23  ;;  %v2604_v26 = vsel %vm2598_vm4, %v2571_v28, %v2245_v38  ;;  %v2339_v38 = vrot.slane %v4814_v13, 1  ;;  %v2554_v32 = vsel %vm2532_vm1, %v2521_v56, %v4794_v31  ;;  %v2226_v28 = vrot.slane %v2224_v57, 1 }
 0x11f   : > { %1884 = vrot.lane.b32.xlu1 %v1852_v0, %s3699_s22  ;;  %v2217_v0 = vshrl.u32 %v3253_v34, 16  ;;  %v2238_v5 = vrot.slane %v2236_v50, 1 }
 0x120   : > { %v2373_v29 = vpop.permute.xlu0 %2372  ;;  %v2261_v63 = vpop.permute.xlu1 %2260 }
 0x121   : > { %v2637_v44 = vsel %vm2631_vm5, %v2604_v26, %v2373_v29  ;;  %v2222_v59 = vor.u32 %v2221_v12, %v2217_v0  ;;  %v2342_v26 = vrot.slane %v4826_v20, 1  ;;  %v3285_v29 = vcombine.low %v892_v19, %v4820_v18 }
 0x122   : > { %1982 = vrot.lane.b32.xlu0 %v3246_v49, %s3700_s23  ;;  %3495 = vmatprep.mubr.msk.bf16.mxu0 %vm2686_vm10, %v2637_v44  ;;  %v2474_v49 = vsel %vm2466_vm14, %v2441_v14, %v4727_v7  ;;  %v2366_v0 = vrot.slane %v4873_v37, 1 }
 0x123   : > { %1886 = vrot.lane.b32.xlu1 %v1855_v42, %s3699_s22  ;;  %v2507_v4 = vsel %vm2499_vm15, %v2474_v49, %v4755_v1  ;;  %v2227_v44 = vsel %vm1022_vm6, %v2222_v59, %v2226_v28 }
 0x124   : > { %v4880_v13 = vpop.permute.xlu0 %1223  ;;  %v2263_v41 = vpop.permute.xlu1 %2262  ;;  %v2540_v7 = vsel %vm2532_vm1, %v2507_v4, %v4780_v35  ;;  %v2587_v35 = vsel %vm2565_vm3, %v2554_v32, %v4818_v22  ;;  %v2424_v22 = vsel %vm2400_vm12, %v4073_v15, %v4705_v10  ;;  %v893_v15 = vld [vmem:[#allocation2 + $0xcc] sm:$0xe] }
 0x125   : > { %v2573_v1 = vsel %vm2565_vm3, %v2540_v7, %v4804_v9  ;;  %v2620_v31 = vsel %vm2598_vm4, %v2587_v35, %v2261_v63  ;;  %v2457_v42 = vsel %vm2433_vm13, %v2424_v22, %v4733_v39  ;;  %v2234_v63 = vor.u32 %v2233_v51, %v2229_v52  ;;  %v5110_v35 = vld [vmem:[#allocation3_spill] sm:$0xff] }
 0x126   : > { %2252 = vrot.lane.b32.xlu0 %v2131_v55, %s3701_s26  ;;  %v2606_v6 = vsel %vm2598_vm4, %v2573_v1, %v4835_v21  ;;  %v2340_v21 = vsel %vm1295_vm2, %v2338_v3, %v2339_v38  ;;  %v2490_v10 = vsel %vm2466_vm14, %v2457_v42, %v4760_v54  ;;  %v2343_v39 = vsel %vm1295_vm2, %v2341_v8, %v2342_v26 }
 0x127   : > { %1996 = vrot.lane.b32.xlu1 %v3253_v34, %s3700_s23  ;;  %v2523_v11 = vsel %vm2499_vm15, %v2490_v10, %v4784_v48  ;;  %v3286_v20 = vcombine.low %v893_v15, %v4839_v30  ;;  %v2239_v54 = vsel %vm1022_vm6, %v2234_v63, %v2238_v5  ;;  %v2362_v38 = vrot.slane %v3285_v29, 1  ;;  %v5112_v29 = vld [vmem:[#allocation4_spill] sm:$0xff] }
 0x128   : > { %v2375_v25 = vpop.permute.xlu0 %2374  ;;  %v2389_v9 = vpop.permute.xlu1 %2388  ;;  %v2556_v18 = vsel %vm2532_vm1, %v2523_v11, %v4807_v58  ;;  %v2363_v48 = vrot.slane %v4859_v36, 1 }
 0x129   : > { %v2639_v47 = vsel %vm2631_vm5, %v2606_v6, %v2375_v25  ;;  %v2653_v34 = vsel %vm2631_vm5, %v2620_v31, %v2389_v9  ;;  %v2589_v16 = vsel %vm2565_vm3, %v2556_v18, %v4843_v43  ;;  %v2365_v55 = vrot.slane %v3286_v20, 1 }
 0x12a   : > { %2254 = vrot.lane.b32.xlu0 %v2143_v17, %s3701_s26  ;;  %3496 = vmatmul.mubr.msk.bf16.gmra.mrb[4].mxu0 %vm2686_vm10, %v2639_v47  ;;  %v2622_v40 = vsel %vm2598_vm4, %v2589_v16, %v2263_v41  ;;  %v2364_v43 = vsel %vm1295_vm2, %v2362_v38, %v2363_v48  ;;  %v2410_v6 = vsel %vm2400_vm12, %v5110_v35, %v4880_v13 }
 0x12b   : > { %1998 = vrot.lane.b32.xlu1 %v4852_v27, %s3700_s23  ;;  %3511 = vmatprep.mubr.msk.bf16.mxu1 %vm2686_vm10, %v2653_v34  ;;  %v2367_v33 = vsel %vm1295_vm2, %v2365_v55, %v2366_v0  ;;  %v5111_v34 = vld [vmem:[#allocation5_spill] sm:$0xff] }
 0x12c   : > { %v1226_v61 = vpop.permute.xlu0 %1225  ;;  %v1240_v27 = vpop.permute.xlu1 %1239 }
 0x12d   : > { %v2412_v8 = vsel %vm2400_vm12, %v5111_v34, %v1226_v61  ;;  %v2426_v42 = vsel %vm2400_vm12, %v5112_v29, %v1240_v27 }
 0x12e   : > { %2380 = vrot.lane.b32.xlu0 %v2340_v21, %s3702_s27 }
 0x12f   : > { %2268 = vrot.lane.b32.xlu1 %v2227_v44, %s3701_s26 }
 0x130   : > { %v1353_v53 = vpop.permute.xlu0 %1352  ;;  %v2391_v14 = vpop.permute.xlu1 %2390 }
 0x131   : > { %v2655_v58 = vsel %vm2631_vm5, %v2622_v40, %v2391_v14  ;;  %v2443_v25 = vsel %vm2433_vm13, %v2410_v6, %v1353_v53 }
 0x132   : > { %2382 = vrot.lane.b32.xlu0 %v2343_v39, %s3702_s27  ;;  %3512 = vmatmul.mubr.msk.bf16.gmra.mrb[4].mxu1 %vm2686_vm10, %v2655_v58  ;;  %v5113_v58 = vld [vmem:[#allocation6_spill] sm:$0xff] }
 0x133   : > { %2270 = vrot.lane.b32.xlu1 %v2239_v54, %s3701_s26 }
 0x134   : > { %v1355_v30 = vpop.permute.xlu0 %1354  ;;  %v1242_v60 = vpop.permute.xlu1 %1241 }
 0x135   : > { %v2445_v44 = vsel %vm2433_vm13, %v2412_v8, %v1355_v30  ;;  %v2428_v30 = vsel %vm2400_vm12, %v5113_v58, %v1242_v60 }
 0x137   : > { %2396 = vrot.lane.b32.xlu1 %v2364_v43, %s3702_s27 }
 0x138   : > { %v1465_v36 = vpop.permute.xlu0 %1464  ;;  %v1369_v49 = vpop.permute.xlu1 %1368 }
 0x139   : > { %v2476_v59 = vsel %vm2466_vm14, %v2443_v25, %v1465_v36  ;;  %v2459_v63 = vsel %vm2433_vm13, %v2426_v42, %v1369_v49 }
 0x13b   : > { %2398 = vrot.lane.b32.xlu1 %v2367_v33, %s3702_s27 }
 0x13c   : > { %v1467_v12 = vpop.permute.xlu0 %1466  ;;  %v1371_v57 = vpop.permute.xlu1 %1370 }
 0x13d   : > { %v2478_v5 = vsel %vm2466_vm14, %v2445_v44, %v1467_v12  ;;  %v2461_v43 = vsel %vm2433_vm13, %v2428_v30, %v1371_v57 }
 0x140   : > { %v1737_v23 = vpop.permute.xlu0 %1736  ;;  %v1481_v4 = vpop.permute.xlu1 %1480 }
 0x141   : > { %v2509_v19 = vsel %vm2499_vm15, %v2476_v59, %v1737_v23  ;;  %v2492_v61 = vsel %vm2466_vm14, %v2459_v63, %v1481_v4 }
 0x144   : > { %v1739_v41 = vpop.permute.xlu0 %1738  ;;  %v1483_v3 = vpop.permute.xlu1 %1482 }
 0x145   : > { %v2511_v10 = vsel %vm2499_vm15, %v2478_v5, %v1739_v41  ;;  %v2494_v0 = vsel %vm2466_vm14, %v2461_v43, %v1483_v3 }
 0x148   : > { %v1865_v2 = vpop.permute.xlu0 %1864  ;;  %v1753_v56 = vpop.permute.xlu1 %1752 }
 0x149   : > { %v2542_v47 = vsel %vm2532_vm1, %v2509_v19, %v1865_v2  ;;  %v2525_v18 = vsel %vm2499_vm15, %v2492_v61, %v1753_v56 }
 0x14c   : > { %v1867_v7 = vpop.permute.xlu0 %1866  ;;  %v1755_v17 = vpop.permute.xlu1 %1754 }
 0x14d   : > { %v2544_v39 = vsel %vm2532_vm1, %v2511_v10, %v1867_v7  ;;  %v2527_v33 = vsel %vm2499_vm15, %v2494_v0, %v1755_v17 }
 0x150   : > { %v1977_v37 = vpop.permute.xlu0 %1976  ;;  %v1881_v52 = vpop.permute.xlu1 %1880 }
 0x151   : > { %v2575_v9 = vsel %vm2565_vm3, %v2542_v47, %v1977_v37  ;;  %v2558_v20 = vsel %vm2532_vm1, %v2525_v18, %v1881_v52 }
 0x154   : > { %v1979_v32 = vpop.permute.xlu0 %1978 }
 0x155   : > { %v1883_v1 = vpop.permute.xlu1 %1882  ;;  %v2577_v27 = vsel %vm2565_vm3, %v2544_v39, %v1979_v32 }
 0x156   : > { %v2560_v49 = vsel %vm2532_vm1, %v2527_v33, %v1883_v1 }
 0x158   : > { %v2249_v51 = vpop.permute.xlu0 %2248 }
 0x159   : > { %v1993_v50 = vpop.permute.xlu1 %1992  ;;  %v2608_v22 = vsel %vm2598_vm4, %v2575_v9, %v2249_v51 }
 0x15a   : > { %v2591_v16 = vsel %vm2565_vm3, %v2558_v20, %v1993_v50 }
 0x15c   : > { %v2251_v28 = vpop.permute.xlu0 %2250 }
 0x15d   : > { %v1995_v31 = vpop.permute.xlu1 %1994  ;;  %v2610_v53 = vsel %vm2598_vm4, %v2577_v27, %v2251_v28 }
 0x15e   : > { %v2593_v12 = vsel %vm2565_vm3, %v2560_v49, %v1995_v31 }
 0x160   : > { %v2377_v21 = vpop.permute.xlu0 %2376 }
 0x161   : > { %v2641_v13 = vsel %vm2631_vm5, %v2608_v22, %v2377_v21  ;;  %v2265_v26 = vpop.permute.xlu1 %2264 }
 0x162   : > { %3499 = vmatprep.mubr.msk.bf16.mxu0 %vm2686_vm10, %v2641_v13  ;;  %v2624_v38 = vsel %vm2598_vm4, %v2591_v16, %v2265_v26 }
 0x164   : > { %v1228_v15 = vpop.permute.xlu0 %1227 }
 0x165   : > { %v2267_v11 = vpop.permute.xlu1 %2266  ;;  %v2414_v9 = vsel %vm2400_vm12, %v4570_v24, %v1228_v15 }
 0x166   : > { %v2626_v4 = vsel %vm2598_vm4, %v2593_v12, %v2267_v11 }
 0x168   : > { %v2379_v54 = vpop.permute.xlu0 %2378 }
 0x169   : > { %v2643_v48 = vsel %vm2631_vm5, %v2610_v53, %v2379_v54  ;;  %v2393_v40 = vpop.permute.xlu1 %2392 }
 0x16a   : > { %v2657_v14 = vsel %vm2631_vm5, %v2624_v38, %v2393_v40  ;;  %3500 = vmatmul.mubr.msk.bf16.gmra.mrb[8].mxu0 %vm2686_vm10, %v2643_v48 }
 0x16b   : > { %3515 = vmatprep.mubr.msk.bf16.mxu1 %vm2686_vm10, %v2657_v14 }
 0x16c   : > { %v1230_v55 = vpop.permute.xlu0 %1229 }
 0x16d   : > { %v1244_v36 = vpop.permute.xlu1 %1243  ;;  %v2416_v8 = vsel %vm2400_vm12, %v4596_v62, %v1230_v55 }
 0x16e   : > { %v2430_v11 = vsel %vm2400_vm12, %v4606_v45, %v1244_v36 }
 0x170   : > { %v1357_v23 = vpop.permute.xlu0 %1356 }
 0x171   : > { %v2395_v41 = vpop.permute.xlu1 %2394  ;;  %v2447_v34 = vsel %vm2433_vm13, %v2414_v9, %v1357_v23  ;;  %v5030_v23 = vld [vmem:[%s5092_s2] ss:$0 sm:$0xff] }
 0x172   : > { %v2659_v60 = vsel %vm2631_vm5, %v2626_v4, %v2395_v41 }
 0x173   : > { %3516 = vmatmul.mubr.msk.bf16.gmra.mrb[8].mxu1 %vm2686_vm10, %v2659_v60 }
 0x174   : > { %v1359_v2 = vpop.permute.xlu0 %1358 }
 0x175   : > { %v1246_v57 = vpop.permute.xlu1 %1245  ;;  %v2449_v42 = vsel %vm2433_vm13, %v2416_v8, %v1359_v2 }
 0x176   : > { %v2432_v48 = vsel %vm2400_vm12, %v4688_v46, %v1246_v57 }
 0x178   : > { %v1469_v56 = vpop.permute.xlu0 %1468 }
 0x179   : > { %v1373_v7 = vpop.permute.xlu1 %1372  ;;  %v2480_v22 = vsel %vm2466_vm14, %v2447_v34, %v1469_v56 }
 0x17a   : > { %v2463_v39 = vsel %vm2433_vm13, %v2430_v11, %v1373_v7 }
 0x17c   : > { %v1471_v3 = vpop.permute.xlu0 %1470 }
 0x17d   : > { %v1375_v37 = vpop.permute.xlu1 %1374  ;;  %v2482_v63 = vsel %vm2466_vm14, %v2449_v42, %v1471_v3 }
 0x17e   : > { %v2465_v40 = vsel %vm2433_vm13, %v2432_v48, %v1375_v37 }
 0x180   : > { %v1741_v52 = vpop.permute.xlu0 %1740 }
 0x181   : > { %v1485_v17 = vpop.permute.xlu1 %1484  ;;  %v2513_v13 = vsel %vm2499_vm15, %v2480_v22, %v1741_v52 }
 0x182   : > { %v2496_v16 = vsel %vm2466_vm14, %v2463_v39, %v1485_v17 }
 0x184   : > { %v1743_v32 = vpop.permute.xlu0 %1742 }
 0x185   : > { %v1487_v1 = vpop.permute.xlu1 %1486  ;;  %v2515_v15 = vsel %vm2499_vm15, %v2482_v63, %v1743_v32 }
 0x186   : > { %v2498_v58 = vsel %vm2466_vm14, %v2465_v40, %v1487_v1 }
 0x188   : > { %v1869_v51 = vpop.permute.xlu0 %1868 }
 0x189   : > { %v1757_v50 = vpop.permute.xlu1 %1756  ;;  %v2546_v29 = vsel %vm2532_vm1, %v2513_v13, %v1869_v51 }
 0x18a   : > { %v2529_v38 = vsel %vm2499_vm15, %v2496_v16, %v1757_v50 }
 0x18c   : > { %v1871_v35 = vpop.permute.xlu0 %1870 }
 0x18d   : > { %v1759_v6 = vpop.permute.xlu1 %1758  ;;  %v2548_v10 = vsel %vm2532_vm1, %v2515_v15, %v1871_v35 }
 0x18e   : > { %v2531_v55 = vsel %vm2499_vm15, %v2498_v58, %v1759_v6 }
 0x190   : > { %v1981_v25 = vpop.permute.xlu0 %1980 }
 0x191   : > { %v1885_v59 = vpop.permute.xlu1 %1884  ;;  %v2579_v44 = vsel %vm2565_vm3, %v2546_v29, %v1981_v25 }
 0x192   : > { %v2562_v45 = vsel %vm2532_vm1, %v2529_v38, %v1885_v59 }
 0x194   : > { %v1983_v28 = vpop.permute.xlu0 %1982 }
 0x195   : > { %v1887_v19 = vpop.permute.xlu1 %1886  ;;  %v2581_v18 = vsel %vm2565_vm3, %v2548_v10, %v1983_v28 }
 0x196   : > { %v2564_v36 = vsel %vm2532_vm1, %v2531_v55, %v1887_v19 }
 0x198   : > { %v2253_v31 = vpop.permute.xlu0 %2252 }
 0x199   : > { %v1997_v47 = vpop.permute.xlu1 %1996  ;;  %v2612_v24 = vsel %vm2598_vm4, %v2579_v44, %v2253_v31 }
 0x19a   : > { %v2595_v14 = vsel %vm2565_vm3, %v2562_v45, %v1997_v47 }
 0x19c   : > { %v2255_v21 = vpop.permute.xlu0 %2254 }
 0x19d   : > { %v1999_v26 = vpop.permute.xlu1 %1998  ;;  %v2614_v20 = vsel %vm2598_vm4, %v2581_v18, %v2255_v21 }
 0x19e   : > { %v2597_v46 = vsel %vm2565_vm3, %v2564_v36, %v1999_v26 }
 0x1a0   : > { %v2381_v5 = vpop.permute.xlu0 %2380 }
 0x1a1   : > { %v2645_v62 = vsel %vm2631_vm5, %v2612_v24, %v2381_v5  ;;  %v2269_v61 = vpop.permute.xlu1 %2268 }
 0x1a2   : > { %3503 = vmatprep.mubr.msk.bf16.mxu0 %vm2686_vm10, %v2645_v62  ;;  %v2628_v30 = vsel %vm2598_vm4, %v2595_v14, %v2269_v61 }
 0x1a4   : > { %v2383_v27 = vpop.permute.xlu0 %2382 }
 0x1a5   : > { %v2647_v53 = vsel %vm2631_vm5, %v2614_v20, %v2383_v27  ;;  %v2271_v54 = vpop.permute.xlu1 %2270 }
 0x1a6   : > { %3504 = vmatmul.mubr.msk.bf16.gmra.mrb[12].mxu0 %vm2686_vm10, %v2647_v53  ;;  %v2630_v33 = vsel %vm2598_vm4, %v2597_v46, %v2271_v54 }
 0x1a9   : > { %v2397_v43 = vpop.permute.xlu1 %2396 }
 0x1aa   : > { %v2661_v0 = vsel %vm2631_vm5, %v2628_v30, %v2397_v43 }
 0x1ab   : > { %3519 = vmatprep.mubr.msk.bf16.mxu1 %vm2686_vm10, %v2661_v0 }
 0x1ad   : > { %v2399_v49 = vpop.permute.xlu1 %2398 }
 0x1ae   : > { %v2663_v12 = vsel %vm2631_vm5, %v2630_v33, %v2399_v49 }
 0x1af   : > { %3520 = vmatmul.mubr.msk.bf16.gmra.mrb[12].mxu1 %vm2686_vm10, %v2663_v12 }
 0x1bd   : > { %v3493_v4 = vpop.f32.mrb[0].mxu0 }
 0x1be   : > { %v2769_v41 = vadd.f32 %v3493_v4, %v5030_v23  ;;  %v2760_v60 = vpop.f32.mrb[1].mxu0 }
 0x1bf   : > { %v2761_v2 = vadd.f32 %v5030_v23, %v2760_v60  ;;  %v3494_v57 = vpop.f32.mrb[2].mxu0 }
 0x1c0   : > { %v2772_v56 = vadd.f32 %v3494_v57, %v5030_v23  ;;  %v2763_v7 = vpop.f32.mrb[3].mxu0  ;;  %v2889_v37 = vmax.f32 %v2769_v41, 0.0 }
 0x1c1   : > { %v2764_v3 = vadd.f32 %v5030_v23, %v2763_v7  ;;  %v2887_v17 = vmax.f32 %v2761_v2, 0.0 }
 0x1c2   : > { %v2890_v52 = vmax.f32 %v2772_v56, 0.0 }
 0x1c3   : > { %v2888_v32 = vmax.f32 %v2764_v3, 0.0 }
 0x1c4   : > { %v3382_v1 = vpack.c.bf16 %v2890_v52, %v2889_v37 }
 0x1c5   : > { %v3377_v51 = vpack.c.bf16 %v2888_v32, %v2887_v17  ;;  %v3509_v50 = vpop.f32.mrb[0].mxu1 }
 0x1c6   : > { %3454 = vst [vmem:[%s5041_s7 + $0x8] sm:$0xff] %v3382_v1   ;;  %v2833_v35 = vadd.f32 %v3509_v50, %v5030_v23  ;;  %v2824_v6 = vpop.f32.mrb[1].mxu1 }
 0x1c7   : > { %3378 = vst [vmem:[%s5041_s7] sm:$0xff] %v3377_v51   ;;  %v2825_v25 = vadd.f32 %v5030_v23, %v2824_v6  ;;  %v3510_v59 = vpop.f32.mrb[2].mxu1 }
 0x1c8   : > { %v2836_v28 = vadd.f32 %v3510_v59, %v5030_v23  ;;  %v2827_v19 = vpop.f32.mrb[3].mxu1  ;;  %v2905_v47 = vmax.f32 %v2833_v35, 0.0 }
 0x1c9   : > { %v2828_v31 = vadd.f32 %v5030_v23, %v2827_v19  ;;  %v2903_v34 = vmax.f32 %v2825_v25, 0.0 }
 0x1ca   : > { %v2906_v9 = vmax.f32 %v2836_v28, 0.0 }
 0x1cb   : > { %v2904_v8 = vmax.f32 %v2828_v31, 0.0 }
 0x1cc   : > { %v3422_v22 = vpack.c.bf16 %v2906_v9, %v2905_v47 }
 0x1cd   : > { %v3417_v21 = vpack.c.bf16 %v2904_v8, %v2903_v34 }
 0x1ce   : > { %3462 = vst [vmem:[%s5041_s7 + $0x48] sm:$0xff] %v3422_v22  }
 0x1cf   : > { %3461 = vst [vmem:[%s5041_s7 + $0x40] sm:$0xff] %v3417_v21  }
 0x1fd   : > { %v3497_v13 = vpop.f32.mrb[4].mxu0 }
 0x1fe   : > { %v2785_v26 = vadd.f32 %v3497_v13, %v5030_v23  ;;  %v2776_v29 = vpop.f32.mrb[5].mxu0 }
 0x1ff   : > { %v2777_v42 = vadd.f32 %v5030_v23, %v2776_v29  ;;  %v3498_v44 = vpop.f32.mrb[6].mxu0 }
 0x200   : > { %v2788_v63 = vadd.f32 %v3498_v44, %v5030_v23  ;;  %v2779_v24 = vpop.f32.mrb[7].mxu0  ;;  %v2893_v15 = vmax.f32 %v2785_v26, 0.0 }
 0x201   : > { %v2780_v5 = vadd.f32 %v5030_v23, %v2779_v24  ;;  %v2891_v61 = vmax.f32 %v2777_v42, 0.0 }
 0x202   : > { %v2894_v62 = vmax.f32 %v2788_v63, 0.0 }
 0x203   : > { %v2892_v10 = vmax.f32 %v2780_v5, 0.0 }
 0x204   : > { %v3392_v11 = vpack.c.bf16 %v2894_v62, %v2893_v15 }
 0x205   : > { %v3387_v18 = vpack.c.bf16 %v2892_v10, %v2891_v61  ;;  %v3513_v39 = vpop.f32.mrb[4].mxu1 }
 0x206   : > { %3456 = vst [vmem:[%s5041_s7 + $0x18] sm:$0xff] %v3392_v11   ;;  %v2849_v20 = vadd.f32 %v3513_v39, %v5030_v23  ;;  %v2840_v27 = vpop.f32.mrb[5].mxu1 }
 0x207   : > { %3455 = vst [vmem:[%s5041_s7 + $0x10] sm:$0xff] %v3387_v18   ;;  %v2841_v16 = vadd.f32 %v5030_v23, %v2840_v27  ;;  %v3514_v53 = vpop.f32.mrb[6].mxu1 }
 0x208   : > { %v2852_v54 = vadd.f32 %v3514_v53, %v5030_v23  ;;  %v2843_v38 = vpop.f32.mrb[7].mxu1  ;;  %v2909_v45 = vmax.f32 %v2849_v20, 0.0 }
 0x209   : > { %v2844_v48 = vadd.f32 %v5030_v23, %v2843_v38  ;;  %v2907_v14 = vmax.f32 %v2841_v16, 0.0 }
 0x20a   : > { %v2910_v40 = vmax.f32 %v2852_v54, 0.0 }
 0x20b   : > { %v2908_v58 = vmax.f32 %v2844_v48, 0.0 }
 0x20c   : > { %v3432_v30 = vpack.c.bf16 %v2910_v40, %v2909_v45 }
 0x20d   : > { %v3427_v43 = vpack.c.bf16 %v2908_v58, %v2907_v14 }
 0x20e   : > { %3464 = vst [vmem:[%s5041_s7 + $0x58] sm:$0xff] %v3432_v30  }
 0x20f   : > { %3463 = vst [vmem:[%s5041_s7 + $0x50] sm:$0xff] %v3427_v43  }
 0x23d   : > { %v3501_v55 = vpop.f32.mrb[8].mxu0 }
 0x23e   : > { %v2801_v0 = vadd.f32 %v3501_v55, %v5030_v23  ;;  %v2792_v36 = vpop.f32.mrb[9].mxu0 }
 0x23f   : > { %v2793_v46 = vadd.f32 %v5030_v23, %v2792_v36  ;;  %v3502_v33 = vpop.f32.mrb[10].mxu0 }
 0x240   : > { %v2804_v49 = vadd.f32 %v3502_v33, %v5030_v23  ;;  %v2795_v12 = vpop.f32.mrb[11].mxu0  ;;  %v2897_v41 = vmax.f32 %v2801_v0, 0.0 }
 0x241   : > { %v2796_v4 = vadd.f32 %v5030_v23, %v2795_v12  ;;  %v2895_v2 = vmax.f32 %v2793_v46, 0.0 }
 0x242   : > { %v2898_v60 = vmax.f32 %v2804_v49, 0.0 }
 0x243   : > { %v2896_v57 = vmax.f32 %v2796_v4, 0.0 }
 0x244   : > { %v3402_v56 = vpack.c.bf16 %v2898_v60, %v2897_v41 }
 0x245   : > { %v3397_v7 = vpack.c.bf16 %v2896_v57, %v2895_v2 }
 0x246   : > { %3458 = vst [vmem:[%s5041_s7 + $0x28] sm:$0xff] %v3402_v56   ;;  %v3517_v3 = vpop.f32.mrb[8].mxu1 }
 0x247   : > { %3457 = vst [vmem:[%s5041_s7 + $0x20] sm:$0xff] %v3397_v7   ;;  %v2865_v37 = vadd.f32 %v3517_v3, %v5030_v23  ;;  %v2856_v52 = vpop.f32.mrb[9].mxu1 }
 0x248   : > { %v2857_v17 = vadd.f32 %v5030_v23, %v2856_v52  ;;  %v3518_v32 = vpop.f32.mrb[10].mxu1 }
 0x249   : > { %v2868_v1 = vadd.f32 %v3518_v32, %v5030_v23  ;;  %v2859_v51 = vpop.f32.mrb[11].mxu1  ;;  %v2913_v35 = vmax.f32 %v2865_v37, 0.0 }
 0x24a   : > { %v2860_v50 = vadd.f32 %v5030_v23, %v2859_v51  ;;  %v2911_v25 = vmax.f32 %v2857_v17, 0.0 }
 0x24b   : > { %v2914_v6 = vmax.f32 %v2868_v1, 0.0 }
 0x24c   : > { %v2912_v59 = vmax.f32 %v2860_v50, 0.0 }
 0x24d   : > { %v3442_v28 = vpack.c.bf16 %v2914_v6, %v2913_v35 }
 0x24e   : > { %v3437_v19 = vpack.c.bf16 %v2912_v59, %v2911_v25 }
 0x24f   : > { %3466 = vst [vmem:[%s5041_s7 + $0x68] sm:$0xff] %v3442_v28  }
 0x250   : > { %3465 = vst [vmem:[%s5041_s7 + $0x60] sm:$0xff] %v3437_v19  }
 0x279   : > { %v3505_v31 = vpop.f32.mrb[12].mxu0 }
 0x27a   : > { %v2817_v47 = vadd.f32 %v3505_v31, %v5030_v23  ;;  %v2808_v9 = vpop.f32.mrb[13].mxu0 }
 0x27b   : > { %v2809_v34 = vadd.f32 %v5030_v23, %v2808_v9  ;;  %v3506_v8 = vpop.f32.mrb[14].mxu0 }
 0x27c   : > { %v2820_v22 = vadd.f32 %v3506_v8, %v5030_v23  ;;  %v2811_v21 = vpop.f32.mrb[15].mxu0  ;;  %v2901_v26 = vmax.f32 %v2817_v47, 0.0 }
 0x27d   : > { %v2812_v13 = vadd.f32 %v5030_v23, %v2811_v21  ;;  %v2899_v42 = vmax.f32 %v2809_v34, 0.0 }
 0x27e   : > { %v2902_v29 = vmax.f32 %v2820_v22, 0.0 }
 0x27f   : > { %v2900_v44 = vmax.f32 %v2812_v13, 0.0 }
 0x280   : > { %v3412_v63 = vpack.c.bf16 %v2902_v29, %v2901_v26 }
 0x281   : > { %v3407_v24 = vpack.c.bf16 %v2900_v44, %v2899_v42 }
 0x282   : > { %3460 = vst [vmem:[%s5041_s7 + $0x38] sm:$0xff] %v3412_v63   ;;  %v3521_v5 = vpop.f32.mrb[12].mxu1 }
 0x283   : > { %3459 = vst [vmem:[%s5041_s7 + $0x30] sm:$0xff] %v3407_v24   ;;  %v2881_v15 = vadd.f32 %v3521_v5, %v5030_v23  ;;  %v2872_v62 = vpop.f32.mrb[13].mxu1 }
 0x284   : > { %v2873_v61 = vadd.f32 %v5030_v23, %v2872_v62  ;;  %v3522_v10 = vpop.f32.mrb[14].mxu1 }
 0x285   : > { %v2884_v11 = vadd.f32 %v3522_v10, %v5030_v23  ;;  %v2875_v18 = vpop.f32.mrb[15].mxu1  ;;  %v2917_v20 = vmax.f32 %v2881_v15, 0.0 }
 0x286   : > { %v2876_v39 = vadd.f32 %v5030_v23, %v2875_v18  ;;  %v2915_v16 = vmax.f32 %v2873_v61, 0.0 }
 0x287   : > { %v2918_v27 = vmax.f32 %v2884_v11, 0.0 }
 0x288   : > { %v2916_v53 = vmax.f32 %v2876_v39, 0.0 }
 0x289   : > { %v3452_v54 = vpack.c.bf16 %v2918_v27, %v2917_v20 }
 0x28a   : > { %v3447_v38 = vpack.c.bf16 %v2916_v53, %v2915_v16 }
 0x28b   : > { %3468 = vst [vmem:[%s5041_s7 + $0x78] sm:$0xff] %v3452_v54  }
 0x28c   : > { %3467 = vst [vmem:[%s5041_s7 + $0x70] sm:$0xff] %v3447_v38  }
 0x28d PF: > { %s13_s12 = sadd.s32 1, %s3692_s12  }
 0x28e   : > { %p10_p4 = scmp.ge.s32.totalorder %s13_s12, 4  }
 0x290   :  { %12 = sbr.rel (!%p10_p4) target bundleno = 1 (0x1), region = 64 }

// kernel: _lambda_.4
= control target key start
LH: loop header
LB: loop body
LE: loop exit
PB: predicated region body
PF: predicated region fallthrough
CT: control target
= control target key end

     0   :  { %s6991_s12 = smov 0   ;;  %s8998_s0 = inlined_call_operand.vmem [shape: bf16[2,16,16,128], index: 0, kind: input, shape index: {}]   ;;  %s8999_s1 = inlined_call_operand.vmem [shape: bf16[1152,128], index: 1, kind: input, shape index: {}]   ;;  %s9000_s2 = inlined_call_operand.vmem [shape: f32[1,128], index: 2, kind: input, shape index: {}]   ;;  %s9001_s3 = inlined_call_operand.vmem [shape: bf16[2,8,8,128], index: 3, kind: output, shape index: {}]  }
   0x1 LB: > { %s5833_s13 = sadd.s32 4294967295, %s6967_s12   ;;  %p5837_p0 = scmp.ge.s32.totalorder %s6967_s12, 1  ;;  %s6967_s12 = sphi %s6991_s12, %s13_s12  }
   0x2   : > { %p137_p1 = scmp.lt.s32.totalorder %s6967_s12, 3 }
   0x4   : > { %p138_p2 = pnand %p5837_p0, %p137_p1 }
   0x6   : > { %141 = sbr.rel (%p138_p2) target bundleno = 882 (0x372), region = 32 }
   0xd   : > { %v6737_v0 = vld [vmem:[%s8999_s1 + $0x40] sm:$0xff]   ;;  %v6969_v2 = vmov 0   ;;  %v6739_v3 = vld [vmem:[%s8999_s1 + $0x48] sm:$0xff]   ;;  %v6741_v5 = vld [vmem:[%s8999_s1 + $0x50] sm:$0xff]   ;;  %p161_p3 = scmp.lt.s32.totalorder %s5833_s13, 1  ;;  %vm582_vm0 = vcmask 1043456  }
   0xe   : > { %v6738_v1 = vld [vmem:[%s8999_s1] sm:$0xff]   ;;  %172 = vst [vmem:[#allocation2] sm:$0xf] %v6969_v2  ;;  %173 = vst [vmem:[#allocation2 + $0x4] sm:$0xf] %v6969_v2  ;;  %6191 = vmatprep.subr.bf16.mxu0 %v6737_v0  ;;  %6711 = vmatprep.subr.bf16.mxu1 %v6737_v0  ;;  %v6740_v4 = vld [vmem:[%s8999_s1 + $0x8] sm:$0xff]  }
   0xf   : > { %174 = vst [vmem:[#allocation2 + $0x8] sm:$0x1] %v6969_v2  ;;  %175 = vst [vmem:[#allocation2 + $0xc] sm:$0xf] %v6969_v2  ;;  %6192 = vmatpush3.bf16.msra.mxu0 %v6738_v1  ;;  %6719 = vmatpush3.bf16.msra.mxu1 %v6738_v1  ;;  %v6742_v6 = vld [vmem:[%s8999_s1 + $0x10] sm:$0xff]   ;;  %v6743_v7 = vld [vmem:[%s8999_s1 + $0x58] sm:$0xff]  }
  0x10   : > { %176 = vst [vmem:[#allocation2 + $0x10] sm:$0xf] %v6969_v2  ;;  %177 = vst [vmem:[#allocation2 + $0x14] sm:$0x1] %v6969_v2  ;;  %6193 = vmatprep.subr.bf16.mxu0 %v6739_v3  ;;  %6712 = vmatprep.subr.bf16.mxu1 %v6739_v3  ;;  %s9073_s13 = smov (!%p161_p3, %s5833_s13), 1  ;;  %v6744_v8 = vld [vmem:[%s8999_s1 + $0x18] sm:$0xff]  }
  0x11   : > { %178 = vst [vmem:[#allocation2 + $0x18] sm:$0xf] %v6969_v2  ;;  %179 = vst [vmem:[#allocation2 + $0x1c] sm:$0xf] %v6969_v2  ;;  %v6745_v9 = vld [vmem:[%s8999_s1 + $0x60] sm:$0xff]   ;;  %s6125_s5 = sshll.u32 %s9073_s13, 7 }
  0x12   : > { %180 = vst [vmem:[#allocation2 + $0x20] sm:$0x1] %v6969_v2  ;;  %181 = vst [vmem:[#allocation2 + $0x24] sm:$0xf] %v6969_v2  ;;  %v6746_v10 = vld [vmem:[%s8999_s1 + $0x20] sm:$0xff]   ;;  %v6747_v11 = vld [vmem:[%s8999_s1 + $0x68] sm:$0xff]   ;;  %s7042_s14 = scalar_lea.vmem %s8998_s0, %s6125_s5 }
  0x13   : > { %182 = vst [vmem:[#allocation2 + $0x28] sm:$0xf] %v6969_v2  ;;  %183 = vst [vmem:[#allocation2 + $0x2c] sm:$0x1] %v6969_v2  ;;  %6194 = vmatpush3.bf16.msra.mxu0 %v6740_v4  ;;  %6720 = vmatpush3.bf16.msra.mxu1 %v6740_v4  ;;  %vm589_vm1 = vcmask 1040384   ;;  %v6748_v18 = vld [vmem:[%s8999_s1 + $0x28] sm:$0xff]  }
  0x14   : > { %184 = vst [vmem:[#allocation2 + $0x30] sm:$0xf] %v6969_v2  ;;  %185 = vst [vmem:[#allocation2 + $0x34] sm:$0xf] %v6969_v2  ;;  %6195 = vmatprep.subr.bf16.mxu0 %v6741_v5  ;;  %6713 = vmatprep.subr.bf16.mxu1 %v6741_v5  ;;  %v248_v16 = vld [vmem:[%s7042_s14 + $0x58] sm:$0xf] }
  0x15   : > { %186 = vst [vmem:[#allocation2 + $0x38] sm:$0x1] %v6969_v2  ;;  %187 = vst [vmem:[#allocation2 + $0x3c] sm:$0xf] %v6969_v2  ;;  %v699_v12 = vld [vmem:[#allocation2] sm:$0xf] }
  0x16   : > { %188 = vst [vmem:[#allocation2 + $0x40] sm:$0xf] %v6969_v2  ;;  %189 = vst [vmem:[#allocation2 + $0x44] sm:$0x1] %v6969_v2  ;;  %v7044_v13 = vld [vmem:[#allocation2 + $0x4] sm:$0xf] }
  0x17   : > { %190 = vst [vmem:[#allocation2 + $0x48] sm:$0xf] %v6969_v2  ;;  %191 = vst [vmem:[#allocation2 + $0x4c] sm:$0xf] %v6969_v2  ;;  %6196 = vmatpush3.bf16.msra.mxu0 %v6742_v6  ;;  %6721 = vmatpush3.bf16.msra.mxu1 %v6742_v6  ;;  %v7047_v14 = vcombine.low %v699_v12, %v7044_v13  ;;  %v249_v17 = vld [vmem:[%s7042_s14 + $0x5c] sm:$0xf] }
  0x18   : > { %192 = vst [vmem:[#allocation2 + $0x50] sm:$0x1] %v6969_v2  ;;  %193 = vst [vmem:[#allocation2 + $0x54] sm:$0xf] %v6969_v2  ;;  %6197 = vmatprep.subr.bf16.mxu0 %v6743_v7  ;;  %6714 = vmatprep.subr.bf16.mxu1 %v6743_v7  ;;  %vm258_vm2 = vsmask.f32 256 }
  0x19   : > { %194 = vst [vmem:[#allocation2 + $0x58] sm:$0xf] %v6969_v2  ;;  %195 = vst [vmem:[#allocation2 + $0x5c] sm:$0x1] %v6969_v2  ;;  %vm1036_vm3 = vsmask.f32 7424 }
  0x1a   : > { %196 = vst [vmem:[#allocation2 + $0x60] sm:$0xf] %v6969_v2  ;;  %197 = vst [vmem:[#allocation2 + $0x64] sm:$0xf] %v6969_v2  ;;  %v1038_v19 = vshrl.u32 %v7047_v14, 16  ;;  %v1040_v20 = vshll.u32 %v7047_v14, 16 }
  0x1b   : > { %198 = vst [vmem:[#allocation2 + $0x68] sm:$0x1] %v6969_v2  ;;  %199 = vst [vmem:[#allocation2 + $0x6c] sm:$0xf] %v6969_v2  ;;  %6198 = vmatpush3.bf16.msra.mxu0 %v6744_v8  ;;  %6722 = vmatpush3.bf16.msra.mxu1 %v6744_v8  ;;  %v6749_v22 = vld [vmem:[%s8999_s1 + $0x70] sm:$0xff]   ;;  %v449_v23 = vshrl.u32 %v248_v16, 16 }
  0x1c   : > { %200 = vst [vmem:[#allocation2 + $0x70] sm:$0xf] %v6969_v2  ;;  %201 = vst [vmem:[#allocation2 + $0x74] sm:$0x1] %v6969_v2  ;;  %6199 = vmatprep.subr.bf16.mxu0 %v6745_v9  ;;  %6715 = vmatprep.subr.bf16.mxu1 %v6745_v9  ;;  %vm259_vm4 = vsmask.f32 4368 }
  0x1d   : > { %202 = vst [vmem:[#allocation2 + $0x78] sm:$0xf] %v6969_v2  ;;  %203 = vst [vmem:[#allocation2 + $0x7c] sm:$0xf] %v6969_v2  ;;  %v452_v24 = vshll.u32 %v248_v16, 16  ;;  %v457_v25 = vshrl.u32 %v249_v17, 16 }
  0x1e   : > { %204 = vst [vmem:[#allocation2 + $0x80] sm:$0x1] %v6969_v2  ;;  %205 = vst [vmem:[#allocation2 + $0x84] sm:$0xf] %v6969_v2  ;;  %v6750_v27 = vld [vmem:[%s8999_s1 + $0x30] sm:$0xff]   ;;  %v1042_v28 = vrot.slane %v1040_v20, 1 }
  0x1f   : > { %206 = vst [vmem:[#allocation2 + $0x88] sm:$0xf] %v6969_v2  ;;  %207 = vst [vmem:[#allocation2 + $0x8c] sm:$0x1] %v6969_v2  ;;  %6200 = vmatpush3.bf16.msra.mxu0 %v6746_v10  ;;  %6723 = vmatpush3.bf16.msra.mxu1 %v6746_v10  ;;  %v460_v31 = vshll.u32 %v249_v17, 16  ;;  %v6751_v33 = vld [vmem:[%s8999_s1 + $0x78] sm:$0xff]  }
  0x20   : > { %208 = vst [vmem:[#allocation2 + $0x90] sm:$0xf] %v6969_v2  ;;  %209 = vst [vmem:[#allocation2 + $0x94] sm:$0xf] %v6969_v2  ;;  %6201 = vmatprep.subr.bf16.mxu0 %v6747_v11  ;;  %6716 = vmatprep.subr.bf16.mxu1 %v6747_v11  ;;  %vm583_vm7 = vsmask.f32 7938  ;;  %v1043_v38 = vor.u32 %v1042_v28, %v1038_v19 }
  0x21   : > { %210 = vst [vmem:[#allocation2 + $0x98] sm:$0x1] %v6969_v2  ;;  %211 = vst [vmem:[#allocation2 + $0x9c] sm:$0xf] %v6969_v2  ;;  %v451_v34 = vrot.slane %v449_v23, 7  ;;  %v459_v35 = vrot.slane %v457_v25, 7 }
  0x22   : > { %212 = vst [vmem:[#allocation2 + $0xa0] sm:$0xf] %v6969_v2  ;;  %213 = vst [vmem:[#allocation2 + $0xa4] sm:$0x1] %v6969_v2  ;;  %v6752_v44 = vld [vmem:[%s8999_s1 + $0x38] sm:$0xff]   ;;  %v6757_v48 = vld [vmem:[%s8999_s1 + $0xc0] sm:$0xff]  }
  0x23   : > { %214 = vst [vmem:[#allocation2 + $0xa8] sm:$0xf] %v6969_v2  ;;  %215 = vst [vmem:[#allocation2 + $0xac] sm:$0xf] %v6969_v2  ;;  %6202 = vmatpush3.bf16.msra.mxu0 %v6748_v18  ;;  %6724 = vmatpush3.bf16.msra.mxu1 %v6748_v18  ;;  %v454_v39 = vor.u32 %v452_v24, %v451_v34  ;;  %v455_v40 = vrot.slane %v451_v34, 4  ;;  %v462_v41 = vor.u32 %v460_v31, %v459_v35  ;;  %v6760_v49 = vld [vmem:[%s8999_s1 + $0x140] sm:$0xff]  }
  0x24   : > { %216 = vst [vmem:[#allocation2 + $0xb0] sm:$0x1] %v6969_v2  ;;  %217 = vst [vmem:[#allocation2 + $0xb4] sm:$0xf] %v6969_v2  ;;  %6203 = vmatprep.subr.bf16.mxu0 %v6749_v22  ;;  %6717 = vmatprep.subr.bf16.mxu1 %v6749_v22  ;;  %v464_v42 = vrot.slane %v459_v35, 4  ;;  %v6762_v52 = vld [vmem:[%s8999_s1 + $0x100] sm:$0xff]  }
  0x25   : > { %218 = vst [vmem:[#allocation2 + $0xb8] sm:$0xf] %v6969_v2  ;;  %219 = vst [vmem:[#allocation2 + $0xbc] sm:$0x1] %v6969_v2  ;;  %v226_v50 = vld [vmem:[%s7042_s14] sm:$0xf] }
  0x26   : > { %220 = vst [vmem:[#allocation2 + $0xc0] sm:$0xf] %v6969_v2  ;;  %221 = vst [vmem:[#allocation2 + $0xc4] sm:$0xf] %v6969_v2  ;;  %v227_v51 = vld [vmem:[%s7042_s14 + $0x4] sm:$0xf] }
  0x27   : > { %222 = vst [vmem:[#allocation2 + $0xc8] sm:$0x1] %v6969_v2  ;;  %223 = vst [vmem:[#allocation2 + $0xcc] sm:$0xf] %v6969_v2  ;;  %v664_v32 = vld [vmem:[#allocation2 + $0x90] sm:$0xf]  ;;  %6204 = vmatpush3.bf16.msra.mxu0 %v6750_v27  ;;  %6725 = vmatpush3.bf16.msra.mxu1 %v6750_v27 }
  0x28   : > { %224 = vst [vmem:[#allocation2 + $0xd0] sm:$0xf] %v6969_v2  ;;  %225 = vst [vmem:[#allocation2 + $0xd4] sm:$0x1] %v6969_v2  ;;  %v668_v37 = vld [vmem:[#allocation2 + $0x98] sm:$0x1]  ;;  %6205 = vmatprep.subr.bf16.mxu0 %v6751_v33  ;;  %6718 = vmatprep.subr.bf16.mxu1 %v6751_v33 }
  0x29   : > { %v7049_v15 = vld [vmem:[#allocation2 + $0x8] ss:$0 sps:$4 sm:$0x11]   ;;  %vm7064_vm5 = vmand %vm589_vm1, %vm258_vm2  ;;  %v262_v53 = vshrl.u32 %v226_v50, 16  ;;  %v265_v54 = vshll.u32 %v226_v50, 16  ;;  %v270_v55 = vshrl.u32 %v227_v51, 16 }
  0x2a   : > { %v1045_v21 = vshll.u32 %v7049_v15, 16  ;;  %vm7072_vm6 = vmor %vm258_vm2, %vm259_vm4  ;;  %v669_v47 = vsel %vm7064_vm5, %v464_v42, %v668_v37  ;;  %v273_v56 = vshll.u32 %v227_v51, 16  ;;  %v585_v57 = vld [vmem:[#allocation2 + $0xc] sm:$0xf]  ;;  %v250_v58 = vld [vmem:[%s7042_s14 + $0x60] sm:$0xf] }
  0x2b   : > { %vm7080_vm8 = vmand %vm582_vm0, %vm583_vm7  ;;  %v463_v45 = vsel %vm7072_vm6, %v455_v40, %v462_v41  ;;  %670 = vst [vmem:[#allocation2 + $0x98] sm:$0x1] %v669_v47  ;;  %v251_v59 = vld [vmem:[%s7042_s14 + $0x64] sm:$0xf]  ;;  %6206 = vmatpush3.bf16.msra.mxu0 %v6752_v44  ;;  %6726 = vmatpush3.bf16.msra.mxu1 %v6752_v44  ;;  %v264_v60 = vrot.slane %v262_v53, 7  ;;  %v272_v61 = vrot.slane %v270_v55, 7 }
  0x2c   : > { %v1047_v29 = vrot.slane %v1045_v21, 1  ;;  %v665_v46 = vsel %vm7080_vm8, %v454_v39, %v664_v32  ;;  %667 = vst [vmem:[#allocation2 + $0x94] sm:$0xf] %v463_v45  ;;  %v591_v62 = vld [vmem:[#allocation2 + $0x14] sm:$0x1]  ;;  %v466_v63 = vshrl.u32 %v250_v58, 16  ;;  %6303 = vmatprep.subr.bf16.mxu1 %v6757_v48  ;;  %6415 = vmatprep.subr.bf16.mxu0 %v6760_v49 }
  0x2d   : > { %666 = vst [vmem:[#allocation2 + $0x90] sm:$0xf] %v665_v46  ;;  %v469_v0 = vshll.u32 %v250_v58, 16  ;;  %v474_v1 = vshrl.u32 %v251_v59, 16  ;;  %v477_v2 = vshll.u32 %v251_v59, 16  ;;  %v267_v3 = vor.u32 %v265_v54, %v264_v60  ;;  %v6758_v35 = vld [vmem:[%s8999_s1 + $0x80] sm:$0xff]  }
  0x2e   : > { %v1048_v43 = vsel %vm1036_vm3, %v1043_v38, %v1047_v29  ;;  %v268_v4 = vrot.slane %v264_v60, 4  ;;  %v275_v5 = vor.u32 %v273_v56, %v272_v61  ;;  %v277_v6 = vrot.slane %v272_v61, 4  ;;  %v671_v17 = vld [vmem:[#allocation2 + $0x9c] sm:$0xf]  ;;  %v675_v18 = vld [vmem:[#allocation2 + $0xa4] sm:$0x1] }
  0x2f   : > { %2901 = vmatprep.mubr.bf16.mxu0 %v1048_v43  ;;  %v586_v12 = vsel %vm7080_vm8, %v267_v3, %v585_v57  ;;  %v476_v19 = vrot.slane %v474_v1, 7  ;;  %v228_v28 = vld [vmem:[%s7042_s14 + $0x8] sm:$0xf]  ;;  %v229_v32 = vld [vmem:[%s7042_s14 + $0xc] sm:$0xf]  ;;  %vm1293_vm9 = vcmask 1046528  }
  0x30   : > { %2902 = vmatmul.mubr.bf16.vlgmr.msra.gmra.mrb[0].mxu0 %v7047_v14  ;;  %v276_v11 = vsel %vm7072_vm6, %v268_v4, %v275_v5  ;;  %v592_v16 = vsel %vm7064_vm5, %v277_v6, %v591_v62  ;;  %587 = vst [vmem:[#allocation2 + $0xc] sm:$0xf] %v586_v12  ;;  %v468_v14 = vrot.slane %v466_v63, 7  ;;  %v279_v33 = vshrl.u32 %v228_v28, 16  ;;  %v594_v41 = vld [vmem:[#allocation2 + $0x18] sm:$0xf] }
  0x31   : > { %6416 = vmatpush3.bf16.msra.mxu0 %v6762_v52  ;;  %588 = vst [vmem:[#allocation2 + $0x10] sm:$0xf] %v276_v11  ;;  %593 = vst [vmem:[#allocation2 + $0x14] sm:$0x1] %v592_v16  ;;  %v479_v25 = vor.u32 %v477_v2, %v476_v19  ;;  %v481_v27 = vrot.slane %v476_v19, 4  ;;  %v282_v34 = vshll.u32 %v228_v28, 16 }
  0x32   : > { %v6756_v10 = vld [vmem:[#allocation2 + $0x98] ss:$0 sps:$4 sm:$0x11]   ;;  %v471_v23 = vor.u32 %v469_v0, %v468_v14  ;;  %v472_v24 = vrot.slane %v468_v14, 4  ;;  %v287_v40 = vshrl.u32 %v229_v32, 16  ;;  %v6759_v43 = vld [vmem:[%s8999_s1 + $0xc8] sm:$0xff]  }
  0x33   : > { %v724_v8 = vld [vmem:[#allocation2 + $0x94] sm:$0xf]  ;;  %v1189_v22 = vshll.u32 %v6756_v10, 16  ;;  %v676_v39 = vsel %vm7064_vm5, %v481_v27, %v675_v18  ;;  %v281_v44 = vrot.slane %v279_v33, 7  ;;  %v290_v45 = vshll.u32 %v229_v32, 16  ;;  %v6776_v62 = vld [vmem:[%s8999_s1 + $0x148] sm:$0xff]  }
  0x34   : > { %v723_v7 = vld [vmem:[#allocation2 + $0x90] sm:$0xf]  ;;  %v480_v37 = vsel %vm7072_vm6, %v472_v24, %v479_v25  ;;  %v672_v38 = vsel %vm7080_vm8, %v471_v23, %v671_v17  ;;  %677 = vst [vmem:[#allocation2 + $0xa4] sm:$0x1] %v676_v39  ;;  %v252_v46 = vld [vmem:[%s7042_s14 + $0x68] sm:$0xf]  ;;  %6417 = vmatprep.subr.bf16.mxu0 %v6776_v62 }
  0x35   : > { %v5854_v9 = vcombine.low %v723_v7, %v724_v8  ;;  %v1191_v31 = vrot.slane %v1189_v22, 1  ;;  %673 = vst [vmem:[#allocation2 + $0x9c] sm:$0xf] %v672_v38  ;;  %674 = vst [vmem:[#allocation2 + $0xa0] sm:$0xf] %v480_v37  ;;  %v289_v48 = vrot.slane %v287_v40, 7  ;;  %v284_v56 = vor.u32 %v282_v34, %v281_v44 }
  0x36   : > { %v253_v47 = vld [vmem:[%s7042_s14 + $0x6c] sm:$0xf]  ;;  %v598_v49 = vld [vmem:[#allocation2 + $0x20] sm:$0x1]  ;;  %v483_v50 = vshrl.u32 %v252_v46, 16  ;;  %v486_v51 = vshll.u32 %v252_v46, 16 }
  0x37   : > { %v1182_v20 = vshrl.u32 %v5854_v9, 16  ;;  %v1184_v21 = vshll.u32 %v5854_v9, 16  ;;  %v491_v52 = vshrl.u32 %v253_v47, 16  ;;  %v701_v54 = vld [vmem:[#allocation2 + $0xc] sm:$0xf]  ;;  %v285_v59 = vrot.slane %v281_v44, 4 }
  0x38   : > { %v7131_v55 = vld [vmem:[#allocation2 + $0x10] sm:$0xf]  ;;  %v7134_v58 = vld [vmem:[#allocation2 + $0x14] ss:$0 sps:$4 sm:$0x11]   ;;  %v292_v60 = vor.u32 %v290_v45, %v289_v48  ;;  %v294_v61 = vrot.slane %v289_v48, 4  ;;  %v595_v0 = vsel %vm7080_vm8, %v284_v56, %v594_v41 }
  0x39   : > { %v1186_v29 = vrot.slane %v1184_v21, 1  ;;  %v5843_v57 = vcombine.low %v701_v54, %v7131_v55  ;;  %v6761_v63 = vld [vmem:[%s8999_s1 + $0x88] sm:$0xff]   ;;  %v485_v1 = vrot.slane %v483_v50, 7  ;;  %v493_v2 = vrot.slane %v491_v52, 7  ;;  %596 = vst [vmem:[#allocation2 + $0x18] sm:$0xf] %v595_v0 }
  0x3a   : > { %v494_v3 = vshll.u32 %v253_v47, 16  ;;  %v678_v4 = vld [vmem:[#allocation2 + $0xa8] sm:$0xf]  ;;  %v1057_v7 = vshll.u32 %v7134_v58, 16  ;;  %v293_v8 = vsel %vm7072_vm6, %v285_v59, %v292_v60  ;;  %v6767_v11 = vld [vmem:[%s8999_s1 + $0xd0] sm:$0xff]   ;;  %v599_v12 = vsel %vm7064_vm5, %v294_v61, %v598_v49  ;;  %v6769_v34 = vld [vmem:[%s8999_s1 + $0xd8] sm:$0xff]  }
  0x3b   : > { %v1187_v42 = vor.u32 %v1186_v29, %v1182_v20  ;;  %v1050_v5 = vshrl.u32 %v5843_v57, 16  ;;  %v1052_v6 = vshll.u32 %v5843_v57, 16  ;;  %v6778_v10 = vld [vmem:[%s8999_s1 + $0x108] sm:$0xff]   ;;  %597 = vst [vmem:[#allocation2 + $0x1c] sm:$0xf] %v293_v8  ;;  %v488_v16 = vor.u32 %v486_v51, %v485_v1  ;;  %v6768_v22 = vld [vmem:[%s8999_s1 + $0x90] sm:$0xff]  }
  0x3c   : > { %v489_v17 = vrot.slane %v485_v1, 4  ;;  %v496_v18 = vor.u32 %v494_v3, %v493_v2  ;;  %v1059_v19 = vrot.slane %v1057_v7, 1  ;;  %v725_v20 = vld [vmem:[#allocation2 + $0x9c] sm:$0xf]  ;;  %v726_v21 = vld [vmem:[#allocation2 + $0xa0] sm:$0xf]  ;;  %6418 = vmatpush3.bf16.msra.mxu0 %v6778_v10 }
  0x3d   : > { %v1192_v53 = vsel %vm1036_vm3, %v1187_v42, %v1191_v31  ;;  %v1054_v14 = vrot.slane %v1052_v6, 1  ;;  %600 = vst [vmem:[#allocation2 + $0x20] sm:$0x1] %v599_v12  ;;  %v5855_v23 = vcombine.low %v725_v20, %v726_v21  ;;  %v6766_v24 = vld [vmem:[#allocation2 + $0xa4] ss:$0 sps:$4 sm:$0x11]   ;;  %v679_v28 = vsel %vm7080_vm8, %v488_v16, %v678_v4 }
  0x3e   : > { %2997 = vmatprep.mubr.bf16.mxu1 %v1192_v53  ;;  %v497_v25 = vsel %vm7072_vm6, %v489_v17, %v496_v18  ;;  %v498_v27 = vrot.slane %v493_v2, 4  ;;  %680 = vst [vmem:[#allocation2 + $0xa8] sm:$0xf] %v679_v28  ;;  %v1201_v33 = vshll.u32 %v6766_v24, 16  ;;  %v6770_v38 = vld [vmem:[%s8999_s1 + $0x98] sm:$0xff]   ;;  %v6775_v42 = vld [vmem:[%s8999_s1 + $0xe0] sm:$0xff]  }
  0x3f   : > { %2998 = vmatmul.mubr.bf16.vlgmr.msra.gmra.mrb[0].mxu1 %v5854_v9  ;;  %v682_v9 = vld [vmem:[#allocation2 + $0xb0] sm:$0x1]  ;;  %v1055_v29 = vor.u32 %v1054_v14, %v1050_v5  ;;  %681 = vst [vmem:[#allocation2 + $0xac] sm:$0xf] %v497_v25  ;;  %v1194_v31 = vshrl.u32 %v5855_v23, 16  ;;  %v1196_v32 = vshll.u32 %v5855_v23, 16 }
  0x40   : > { %6304 = vmatpush3.bf16.msra.mxu1 %v6758_v35  ;;  %v683_v35 = vsel %vm7064_vm5, %v498_v27, %v682_v9  ;;  %v1203_v40 = vrot.slane %v1201_v33, 1  ;;  %v703_v41 = vld [vmem:[#allocation2 + $0x18] sm:$0xf]  ;;  %v230_v44 = vld [vmem:[%s7042_s14 + $0x10] sm:$0xf]  ;;  %v6779_v61 = vld [vmem:[%s8999_s1 + $0xe8] sm:$0xff]  }
  0x41   : > { %6305 = vmatprep.subr.bf16.mxu1 %v6759_v43  ;;  %v1060_v37 = vsel %vm1036_vm3, %v1055_v29, %v1059_v19  ;;  %684 = vst [vmem:[#allocation2 + $0xb0] sm:$0x1] %v683_v35  ;;  %v1198_v39 = vrot.slane %v1196_v32, 1  ;;  %v296_v48 = vshrl.u32 %v230_v44, 16  ;;  %v231_v49 = vld [vmem:[%s7042_s14 + $0x14] sm:$0xf] }
  0x42   : > { %2909 = vmatprep.mubr.bf16.mxu0 %v1060_v37  ;;  %v7174_v43 = vld [vmem:[#allocation2 + $0x1c] sm:$0xf]  ;;  %v299_v50 = vshll.u32 %v230_v44, 16  ;;  %v601_v59 = vld [vmem:[#allocation2 + $0x24] sm:$0xf]  ;;  %v307_v0 = vshll.u32 %v231_v49, 16 }
  0x43   : > { %2910 = vmatmul.mubr.bf16.gmra.mrb[4].mxu0 %v5843_v57  ;;  %v1199_v45 = vor.u32 %v1198_v39, %v1194_v31  ;;  %v5844_v46 = vcombine.low %v703_v41, %v7174_v43  ;;  %v6777_v57 = vld [vmem:[%s8999_s1 + $0xa0] sm:$0xff]   ;;  %v298_v62 = vrot.slane %v296_v48, 7  ;;  %v605_v4 = vld [vmem:[#allocation2 + $0x2c] sm:$0x1]  ;;  %v6788_v9 = vld [vmem:[%s8999_s1 + $0x150] sm:$0xff]   ;;  %vm4410_vm10 = vcmask 1041408  }
  0x44   : > { %6306 = vmatpush3.bf16.msra.mxu1 %v6761_v63  ;;  %v7178_v47 = vld [vmem:[#allocation2 + $0x20] ss:$0 sps:$4 sm:$0x11]   ;;  %v304_v63 = vshrl.u32 %v231_v49, 16  ;;  %v254_v16 = vld [vmem:[%s7042_s14 + $0x70] sm:$0xf]  ;;  %6419 = vmatprep.subr.bf16.mxu0 %v6788_v9 }
  0x45   : > { %6307 = vmatprep.subr.bf16.mxu1 %v6767_v11  ;;  %v1204_v51 = vsel %vm1036_vm3, %v1199_v45, %v1203_v40  ;;  %v1062_v52 = vshrl.u32 %v5844_v46, 16  ;;  %v1064_v53 = vshll.u32 %v5844_v46, 16  ;;  %v1069_v54 = vshll.u32 %v7178_v47, 16  ;;  %v727_v56 = vld [vmem:[#allocation2 + $0xa8] sm:$0xf]  ;;  %v6785_v27 = vld [vmem:[%s8999_s1 + $0xf0] sm:$0xff]  }
  0x46   : > { %3005 = vmatprep.mubr.bf16.mxu1 %v1204_v51  ;;  %v728_v60 = vld [vmem:[#allocation2 + $0xac] sm:$0xf]  ;;  %v301_v6 = vor.u32 %v299_v50, %v298_v62  ;;  %v302_v7 = vrot.slane %v298_v62, 4  ;;  %v306_v8 = vrot.slane %v304_v63, 7  ;;  %v255_v17 = vld [vmem:[%s7042_s14 + $0x74] sm:$0xf] }
  0x47   : > { %3006 = vmatmul.mubr.bf16.gmra.mrb[4].mxu1 %v5855_v23  ;;  %v1066_v1 = vrot.slane %v1064_v53, 1  ;;  %v1071_v2 = vrot.slane %v1069_v54, 1  ;;  %v5856_v3 = vcombine.low %v727_v56, %v728_v60  ;;  %v6780_v14 = vld [vmem:[%s8999_s1 + $0xa8] sm:$0xff]   ;;  %v500_v24 = vshrl.u32 %v254_v16, 16  ;;  %v685_v33 = vld [vmem:[#allocation2 + $0xb4] sm:$0xf] }
  0x48   : > { %6308 = vmatpush3.bf16.msra.mxu1 %v6768_v22  ;;  %v6774_v5 = vld [vmem:[#allocation2 + $0xb0] ss:$0 sps:$4 sm:$0x11]   ;;  %v309_v19 = vor.u32 %v307_v0, %v306_v8  ;;  %v311_v20 = vrot.slane %v306_v8, 4  ;;  %v602_v21 = vsel %vm7080_vm8, %v301_v6, %v601_v59  ;;  %v503_v25 = vshll.u32 %v254_v16, 16  ;;  %v6796_v63 = vld [vmem:[%s8999_s1 + $0x1c0] sm:$0xff]  }
  0x49   : > { %6309 = vmatprep.subr.bf16.mxu1 %v6769_v34  ;;  %v1067_v10 = vor.u32 %v1066_v1, %v1062_v52  ;;  %v1206_v11 = vshrl.u32 %v5856_v3, 16  ;;  %v1208_v12 = vshll.u32 %v5856_v3, 16  ;;  %v1213_v18 = vshll.u32 %v6774_v5, 16  ;;  %603 = vst [vmem:[#allocation2 + $0x24] sm:$0xf] %v602_v21  ;;  %v6786_v34 = vld [vmem:[%s8999_s1 + $0xb0] sm:$0xff]  }
  0x4a   : > { %v310_v29 = vsel %vm7072_vm6, %v302_v7, %v309_v19  ;;  %v606_v31 = vsel %vm7064_vm5, %v311_v20, %v605_v4  ;;  %v508_v32 = vshrl.u32 %v255_v17, 16  ;;  %v502_v37 = vrot.slane %v500_v24, 7  ;;  %v689_v39 = vld [vmem:[#allocation2 + $0xbc] sm:$0x1]  ;;  %v6790_v41 = vld [vmem:[%s8999_s1 + $0x110] sm:$0xff]   ;;  %s6126_s18 = sshll.u32 %s9073_s13, 5 }
  0x4b   : > { %v1072_v22 = vsel %vm1036_vm3, %v1067_v10, %v1071_v2  ;;  %v1210_v23 = vrot.slane %v1208_v12, 1  ;;  %v1215_v28 = vrot.slane %v1213_v18, 1  ;;  %604 = vst [vmem:[#allocation2 + $0x28] sm:$0xf] %v310_v29  ;;  %607 = vst [vmem:[#allocation2 + $0x2c] sm:$0x1] %v606_v31  ;;  %6420 = vmatpush3.bf16.msra.mxu0 %v6790_v41  ;;  %s8394_s20 = scalar_lea.vmem %s9001_s3, %s6126_s18 }
  0x4c   : > { %6310 = vmatpush3.bf16.msra.mxu1 %v6770_v38  ;;  %2917 = vmatprep.mubr.bf16.mxu0 %v1072_v22  ;;  %v511_v38 = vshll.u32 %v255_v17, 16  ;;  %v510_v40 = vrot.slane %v508_v32, 7  ;;  %v505_v44 = vor.u32 %v503_v25, %v502_v37  ;;  %v506_v45 = vrot.slane %v502_v37, 4  ;;  %v232_v51 = vld [vmem:[%s7042_s14 + $0x18] sm:$0xf]  ;;  %v6812_v37 = vld [vmem:[%s8999_s1 + $0x160] sm:$0xff]  }
  0x4d   : > { %6311 = vmatprep.subr.bf16.mxu1 %v6775_v42  ;;  %v1211_v35 = vor.u32 %v1210_v23, %v1206_v11  ;;  %2918 = vmatmul.mubr.bf16.gmra.mrb[8].mxu0 %v5844_v46  ;;  %v6787_v46 = vld [vmem:[%s8999_s1 + $0xf8] sm:$0xff]   ;;  %v313_v59 = vshrl.u32 %v232_v51, 16  ;;  %v316_v60 = vshll.u32 %v232_v51, 16  ;;  %v608_v5 = vld [vmem:[#allocation2 + $0x30] sm:$0xf]  ;;  %v1295_v24 = vrot.slane %v7049_v15, 1 }
  0x4e   : > { %v513_v48 = vor.u32 %v511_v38, %v510_v40  ;;  %v515_v49 = vrot.slane %v510_v40, 4  ;;  %v686_v50 = vsel %vm7080_vm8, %v505_v44, %v685_v33  ;;  %v233_v52 = vld [vmem:[%s7042_s14 + $0x1c] sm:$0xf]  ;;  %v612_v8 = vld [vmem:[#allocation2 + $0x38] sm:$0x1]  ;;  %vm5691_vm11 = vcmask 1041409  }
  0x4f   : > { %v1216_v42 = vsel %vm1036_vm3, %v1211_v35, %v1215_v28  ;;  %687 = vst [vmem:[#allocation2 + $0xb4] sm:$0xf] %v686_v50  ;;  %v324_v62 = vshll.u32 %v233_v52, 16  ;;  %v315_v1 = vrot.slane %v313_v59, 7  ;;  %v747_v9 = vld [vmem:[#allocation2] sm:$0xe] }
  0x50   : > { %6312 = vmatpush3.bf16.msra.mxu1 %v6777_v57  ;;  %3013 = vmatprep.mubr.bf16.mxu1 %v1216_v42  ;;  %v705_v53 = vld [vmem:[#allocation2 + $0x24] sm:$0xf]  ;;  %v514_v54 = vsel %vm7072_vm6, %v506_v45, %v513_v48  ;;  %v690_v56 = vsel %vm7064_vm5, %v515_v49, %v689_v39  ;;  %v6789_v57 = vld [vmem:[%s8999_s1 + $0xb8] sm:$0xff]   ;;  %v5874_v28 = vcombine.low %v747_v9, %v7044_v13  ;;  %v763_v41 = vld [vmem:[#allocation2 + $0xc] sm:$0xf]  ;;  %vm5693_vm12 = vcmask 1042434  }
  0x51   : > { %6313 = vmatprep.subr.bf16.mxu1 %v6779_v61  ;;  %3014 = vmatmul.mubr.bf16.gmra.mrb[8].mxu1 %v5856_v3  ;;  %688 = vst [vmem:[#allocation2 + $0xb8] sm:$0xf] %v514_v54  ;;  %691 = vst [vmem:[#allocation2 + $0xbc] sm:$0x1] %v690_v56  ;;  %v321_v61 = vshrl.u32 %v233_v52, 16  ;;  %v318_v6 = vor.u32 %v316_v60, %v315_v1  ;;  %v319_v7 = vrot.slane %v315_v1, 4 }
  0x52   : > { %v7231_v0 = vld [vmem:[#allocation2 + $0x28] sm:$0xf]  ;;  %v7234_v3 = vld [vmem:[#allocation2 + $0x2c] ss:$0 sps:$4 sm:$0x11]   ;;  %v6803_v10 = vld [vmem:[%s8999_s1 + $0x158] sm:$0xff]  }
  0x53   : > { %v5845_v2 = vcombine.low %v705_v53, %v7231_v0  ;;  %v323_v4 = vrot.slane %v321_v61, 7  ;;  %v1081_v16 = vshll.u32 %v7234_v3, 16  ;;  %v6804_v18 = vld [vmem:[%s8999_s1 + $0x118] sm:$0xff]   ;;  %v609_v19 = vsel %vm7080_vm8, %v318_v6, %v608_v5  ;;  %6421 = vmatprep.subr.bf16.mxu0 %v6803_v10  ;;  %v235_v35 = vld [vmem:[%s7042_s14 + $0x24] sm:$0xf]  ;;  %v6824_v49 = vld [vmem:[%s8999_s1 + $0x168] sm:$0xff]  }
  0x54   : > { %6314 = vmatpush3.bf16.msra.mxu1 %v6780_v14  ;;  %610 = vst [vmem:[#allocation2 + $0x30] sm:$0xf] %v609_v19  ;;  %6422 = vmatpush3.bf16.msra.mxu0 %v6804_v18  ;;  %v1294_v33 = vrot.slane %v5874_v28, 1  ;;  %v6813_v13 = vld [vmem:[%s8999_s1 + $0x120] sm:$0xff]   ;;  %v7260_v42 = vld [vmem:[#allocation2 + $0x10] sm:$0xf] }
  0x55   : > { %6315 = vmatprep.subr.bf16.mxu1 %v6785_v27  ;;  %v1074_v11 = vshrl.u32 %v5845_v2, 16  ;;  %v1076_v12 = vshll.u32 %v5845_v2, 16  ;;  %v326_v17 = vor.u32 %v324_v62, %v323_v4  ;;  %v328_v14 = vrot.slane %v323_v4, 4  ;;  %6423 = vmatprep.subr.bf16.mxu0 %v6812_v37  ;;  %v615_v61 = vld [vmem:[#allocation2 + $0x3c] sm:$0xf] }
  0x56   : > { %v1083_v21 = vrot.slane %v1081_v16, 1  ;;  %v729_v22 = vld [vmem:[#allocation2 + $0xb4] sm:$0xf]  ;;  %v7263_v44 = vsel %vm1293_vm9, %v1294_v33, %v1295_v24  ;;  %v338_v48 = vshrl.u32 %v235_v35, 16  ;;  %v341_v52 = vshll.u32 %v235_v35, 16  ;;  %v6826_v33 = vld [vmem:[%s8999_s1 + $0x128] sm:$0xff]  }
  0x57   : > { %v1078_v20 = vrot.slane %v1076_v12, 1  ;;  %v327_v23 = vsel %vm7072_vm6, %v319_v7, %v326_v17  ;;  %v613_v27 = vsel %vm7064_vm5, %v328_v14, %v612_v8  ;;  %v7271_v60 = vcombine.low %v763_v41, %v7260_v42  ;;  %v619_v62 = vld [vmem:[#allocation2 + $0x44] sm:$0x1]  ;;  %v236_v17 = vld [vmem:[%s7042_s14 + $0x28] sm:$0xf] }
  0x58   : > { %6316 = vmatpush3.bf16.msra.mxu1 %v6786_v34  ;;  %v730_v25 = vld [vmem:[#allocation2 + $0xb8] sm:$0xf]  ;;  %611 = vst [vmem:[#allocation2 + $0x34] sm:$0xf] %v327_v23  ;;  %614 = vst [vmem:[#allocation2 + $0x38] sm:$0x1] %v613_v27  ;;  %6424 = vmatpush3.bf16.msra.mxu0 %v6813_v13 }
  0x59   : > { %6317 = vmatprep.subr.bf16.mxu1 %v6787_v46  ;;  %v1079_v29 = vor.u32 %v1078_v20, %v1074_v11  ;;  %v5857_v31 = vcombine.low %v729_v22, %v730_v25  ;;  %v6784_v32 = vld [vmem:[#allocation2 + $0xbc] ss:$0 sps:$4 sm:$0x11]   ;;  %v234_v34 = vld [vmem:[%s7042_s14 + $0x20] sm:$0xf]  ;;  %v340_v56 = vrot.slane %v338_v48, 7  ;;  %6425 = vmatprep.subr.bf16.mxu0 %v6824_v49 }
  0x5a   : > { %v1225_v40 = vshll.u32 %v6784_v32, 16  ;;  %v330_v45 = vshrl.u32 %v234_v34, 16  ;;  %v333_v46 = vshll.u32 %v234_v34, 16  ;;  %v237_v18 = vld [vmem:[%s7042_s14 + $0x2c] sm:$0xf]  ;;  %v350_v22 = vshll.u32 %v236_v17, 16 }
  0x5b   : > { %v1084_v15 = vsel %vm1036_vm3, %v1079_v29, %v1083_v21  ;;  %v1218_v38 = vshrl.u32 %v5857_v31, 16  ;;  %v1220_v39 = vshll.u32 %v5857_v31, 16  ;;  %v707_v53 = vld [vmem:[#allocation2 + $0x30] sm:$0xf]  ;;  %v343_v5 = vor.u32 %v341_v52, %v340_v56  ;;  %v748_v20 = vld [vmem:[#allocation2 + $0xc] sm:$0xe] }
  0x5c   : > { %6318 = vmatpush3.bf16.msra.mxu1 %v6789_v57  ;;  %2925 = vmatprep.mubr.bf16.mxu0 %v1084_v15  ;;  %v1227_v51 = vrot.slane %v1225_v40, 1  ;;  %v332_v54 = vrot.slane %v330_v45, 7  ;;  %v345_v7 = vrot.slane %v340_v56, 4  ;;  %v347_v21 = vshrl.u32 %v236_v17, 16  ;;  %v765_v23 = vld [vmem:[#allocation2 + $0x18] sm:$0xf] }
  0x5d   : > { %6527 = vmatprep.subr.bf16.mxu1 %v6796_v63  ;;  %v1222_v50 = vrot.slane %v1220_v39, 1  ;;  %2926 = vmatmul.mubr.bf16.gmra.mrb[12].mxu0 %v5845_v2  ;;  %v7287_v24 = vld [vmem:[#allocation2 + $0x1c] sm:$0xf]  ;;  %v355_v25 = vshrl.u32 %v237_v18, 16  ;;  %v358_v27 = vshll.u32 %v237_v18, 16  ;;  %v6797_v29 = vld [vmem:[%s8999_s1 + $0x180] sm:$0xff]   ;;  %v5875_v34 = vcombine.low %v748_v20, %v7131_v55 }
  0x5e   : > { %v335_v2 = vor.u32 %v333_v46, %v332_v54  ;;  %v336_v4 = vrot.slane %v332_v54, 4  ;;  %v620_v16 = vsel %vm7064_vm5, %v345_v7, %v619_v62  ;;  %v349_v32 = vrot.slane %v347_v21, 7  ;;  %v622_v37 = vld [vmem:[#allocation2 + $0x48] sm:$0xf]  ;;  %v626_v15 = vld [vmem:[#allocation2 + $0x50] sm:$0x1]  ;;  %6426 = vmatpush3.bf16.msra.mxu0 %v6826_v33 }
  0x5f   : > { %v1223_v57 = vor.u32 %v1222_v50, %v1218_v38  ;;  %v7268_v59 = vld [vmem:[#allocation2 + $0x34] sm:$0xf]  ;;  %v7274_v1 = vld [vmem:[#allocation2 + $0x38] ss:$0 sps:$4 sm:$0x11]   ;;  %v357_v35 = vrot.slane %v355_v25, 7 }
  0x60   : > { %v5846_v63 = vcombine.low %v707_v53, %v7268_v59  ;;  %v1093_v10 = vshll.u32 %v7274_v1, 16  ;;  %v344_v11 = vsel %vm7072_vm6, %v336_v4, %v343_v5  ;;  %v616_v12 = vsel %vm7080_vm8, %v335_v2, %v615_v61  ;;  %621 = vst [vmem:[#allocation2 + $0x44] sm:$0x1] %v620_v16  ;;  %v6810_v39 = vld [vmem:[%s8999_s1 + $0x1c8] sm:$0xff]   ;;  %v749_v45 = vld [vmem:[#allocation2 + $0x18] sm:$0xe] }
  0x61   : > { %v1228_v6 = vsel %vm1036_vm3, %v1223_v57, %v1227_v51  ;;  %618 = vst [vmem:[#allocation2 + $0x40] sm:$0xf] %v344_v11  ;;  %617 = vst [vmem:[#allocation2 + $0x3c] sm:$0xf] %v616_v12  ;;  %v1301_v38 = vrot.slane %v7178_v47, 1  ;;  %v352_v41 = vor.u32 %v350_v22, %v349_v32  ;;  %v353_v13 = vrot.slane %v349_v32, 4 }
  0x62   : > { %3021 = vmatprep.mubr.bf16.mxu1 %v1228_v6  ;;  %v1086_v8 = vshrl.u32 %v5846_v63, 16  ;;  %v1088_v9 = vshll.u32 %v5846_v63, 16  ;;  %v1095_v19 = vrot.slane %v1093_v10, 1  ;;  %v6833_v55 = vld [vmem:[%s8999_s1 + $0x170] sm:$0xff]   ;;  %v360_v46 = vor.u32 %v358_v27, %v357_v35  ;;  %v6811_v52 = vld [vmem:[%s8999_s1 + $0x188] sm:$0xff]   ;;  %v6840_v22 = vld [vmem:[%s8999_s1 + $0x1d8] sm:$0xff]  }
  0x63   : > { %3022 = vmatmul.mubr.bf16.gmra.mrb[12].mxu1 %v5857_v31  ;;  %v1298_v31 = vrot.slane %v7134_v58, 1  ;;  %v7303_v58 = vcombine.low %v765_v23, %v7287_v24  ;;  %v362_v48 = vrot.slane %v357_v35, 4  ;;  %v1304_v49 = vrot.slane %v7234_v3, 1  ;;  %6427 = vmatprep.subr.bf16.mxu0 %v6833_v55  ;;  %v767_v61 = vld [vmem:[#allocation2 + $0x24] sm:$0xf]  ;;  %v6825_v4 = vld [vmem:[%s8999_s1 + $0x1d0] sm:$0xff]  }
  0x64   : > { %v1090_v14 = vrot.slane %v1088_v9, 1  ;;  %3062 = vmatprep.mubr.bf16.mxu1 %v7271_v60  ;;  %v623_v51 = vsel %vm7080_vm8, %v352_v41, %v622_v37  ;;  %v1297_v54 = vrot.slane %v5875_v34, 1  ;;  %v361_v56 = vsel %vm7072_vm6, %v353_v13, %v360_v46  ;;  %v7321_v62 = vld [vmem:[#allocation2 + $0x28] sm:$0xf]  ;;  %v238_v6 = vld [vmem:[%s7042_s14 + $0x30] sm:$0xf] }
  0x65   : > { %624 = vst [vmem:[#allocation2 + $0x48] sm:$0xf] %v623_v51  ;;  %v627_v57 = vsel %vm7064_vm5, %v362_v48, %v626_v15  ;;  %625 = vst [vmem:[#allocation2 + $0x4c] sm:$0xf] %v361_v56  ;;  %v5876_v5 = vcombine.low %v749_v45, %v7174_v43  ;;  %v239_v7 = vld [vmem:[%s7042_s14 + $0x34] sm:$0xf]  ;;  %v7339_v20 = vcombine.low %v767_v61, %v7321_v62 }
  0x66   : > { %v1091_v28 = vor.u32 %v1090_v14, %v1086_v8  ;;  %628 = vst [vmem:[#allocation2 + $0x50] sm:$0x1] %v627_v57  ;;  %v364_v11 = vshrl.u32 %v238_v6, 16  ;;  %v1299_v12 = vsel %vm1293_vm9, %v1297_v54, %v1298_v31  ;;  %v367_v16 = vshll.u32 %v238_v6, 16  ;;  %v6827_v21 = vld [vmem:[%s8999_s1 + $0x190] sm:$0xff]   ;;  %v6848_v13 = vld [vmem:[%s8999_s1 + $0x138] sm:$0xff]  }
  0x67   : > { %v7327_v2 = vld [vmem:[#allocation2 + $0x44] ss:$0 sps:$4 sm:$0x11]   ;;  %v372_v17 = vshrl.u32 %v239_v7, 16  ;;  %v375_v18 = vshll.u32 %v239_v7, 16  ;;  %v1300_v32 = vrot.slane %v5876_v5, 1 }
  0x68   : > { %v1096_v40 = vsel %vm1036_vm3, %v1091_v28, %v1095_v19  ;;  %v7309_v50 = vld [vmem:[#allocation2 + $0x40] sm:$0xf]  ;;  %v709_v53 = vld [vmem:[#allocation2 + $0x3c] sm:$0xf]  ;;  %v1105_v10 = vshll.u32 %v7327_v2, 16  ;;  %v366_v43 = vrot.slane %v364_v11, 7 }
  0x69   : > { %2933 = vmatprep.mubr.bf16.mxu0 %v1096_v40  ;;  %v374_v23 = vrot.slane %v372_v17, 7  ;;  %v629_v25 = vld [vmem:[#allocation2 + $0x54] sm:$0xf]  ;;  %v633_v27 = vld [vmem:[#allocation2 + $0x5c] sm:$0x1]  ;;  %v6853_v61 = vld [vmem:[%s8999_s1 + $0x1e0] sm:$0xff]   ;;  %v1302_v7 = vsel %vm1293_vm9, %v1300_v32, %v1301_v38 }
  0x6a   : > { %2934 = vmatmul.mubr.bf16.gmra.mrb[16].mxu0 %v5846_v63  ;;  %v6834_v63 = vld [vmem:[%s8999_s1 + $0x130] sm:$0xff]   ;;  %v1107_v19 = vrot.slane %v1105_v10, 1  ;;  %v6847_v28 = vld [vmem:[%s8999_s1 + $0x178] sm:$0xff]   ;;  %v369_v33 = vor.u32 %v367_v16, %v366_v43  ;;  %v370_v34 = vrot.slane %v366_v43, 4  ;;  %v750_v35 = vld [vmem:[#allocation2 + $0x24] sm:$0xe] }
  0x6b   : > { %3063 = vmatmul.mubr.bf16.vlgmr.msra.gmra.mrb[16].mxu1 %v7263_v44  ;;  %v5847_v44 = vcombine.low %v709_v53, %v7309_v50  ;;  %6428 = vmatpush3.bf16.msra.mxu0 %v6834_v63  ;;  %v377_v15 = vor.u32 %v375_v18, %v374_v23  ;;  %v769_v40 = vld [vmem:[#allocation2 + $0x30] sm:$0xf]  ;;  %v5877_v41 = vcombine.low %v750_v35, %v7231_v0  ;;  %v240_v51 = vld [vmem:[%s7042_s14 + $0x38] sm:$0xf]  ;;  %v7371_v54 = vld [vmem:[#allocation2 + $0x34] sm:$0xf] }
  0x6c   : > { %6528 = vmatpush3.bf16.msra.mxu1 %v6797_v29  ;;  %3070 = vmatprep.mubr.bf16.mxu1 %v7303_v58  ;;  %v711_v31 = vld [vmem:[#allocation2 + $0x48] sm:$0xf]  ;;  %v7350_v37 = vld [vmem:[#allocation2 + $0x4c] sm:$0xf]  ;;  %v630_v48 = vsel %vm7080_vm8, %v369_v33, %v629_v25  ;;  %v6841_v0 = vld [vmem:[%s8999_s1 + $0x198] sm:$0xff]   ;;  %v381_v57 = vshrl.u32 %v240_v51, 16  ;;  %v7382_v16 = vcombine.low %v769_v40, %v7371_v54 }
  0x6d   : > { %6529 = vmatprep.subr.bf16.mxu1 %v6810_v39  ;;  %v1098_v8 = vshrl.u32 %v5847_v44, 16  ;;  %v1100_v9 = vshll.u32 %v5847_v44, 16  ;;  %v379_v39 = vrot.slane %v374_v23, 4  ;;  %6429 = vmatprep.subr.bf16.mxu0 %v6847_v28  ;;  %v5848_v55 = vcombine.low %v711_v31, %v7350_v37  ;;  %v7358_v46 = vld [vmem:[#allocation2 + $0x50] ss:$0 sps:$4 sm:$0x11]  }
  0x6e   : > { %631 = vst [vmem:[#allocation2 + $0x54] sm:$0xf] %v630_v48  ;;  %v241_v56 = vld [vmem:[%s7042_s14 + $0x3c] sm:$0xf]  ;;  %v1117_v5 = vshll.u32 %v7358_v46, 16  ;;  %v384_v6 = vshll.u32 %v240_v51, 16 }
  0x6f   : > { %v1102_v14 = vrot.slane %v1100_v9, 1  ;;  %v634_v53 = vsel %vm7064_vm5, %v379_v39, %v633_v27  ;;  %v1110_v63 = vshrl.u32 %v5848_v55, 16  ;;  %v389_v9 = vshrl.u32 %v241_v56, 16  ;;  %6430 = vmatpush3.bf16.msra.mxu0 %v6848_v13  ;;  %v636_v17 = vld [vmem:[#allocation2 + $0x60] sm:$0xf] }
  0x70   : > { %6530 = vmatpush3.bf16.msra.mxu1 %v6811_v52  ;;  %v378_v52 = vsel %vm7072_vm6, %v370_v34, %v377_v15  ;;  %635 = vst [vmem:[#allocation2 + $0x5c] sm:$0x1] %v634_v53  ;;  %v392_v10 = vshll.u32 %v241_v56, 16  ;;  %v6854_v18 = vld [vmem:[%s8999_s1 + $0x1a0] sm:$0xff]   ;;  %v640_v38 = vld [vmem:[#allocation2 + $0x68] sm:$0x1] }
  0x71   : > { %6531 = vmatprep.subr.bf16.mxu1 %v6825_v4  ;;  %v1103_v29 = vor.u32 %v1102_v14, %v1098_v8  ;;  %v1112_v4 = vshll.u32 %v5848_v55, 16  ;;  %632 = vst [vmem:[#allocation2 + $0x58] sm:$0xf] %v378_v52  ;;  %v383_v8 = vrot.slane %v381_v57, 7  ;;  %v751_v31 = vld [vmem:[#allocation2 + $0x30] sm:$0xe] }
  0x72   : > { %v1307_v40 = vrot.slane %v7274_v1, 1  ;;  %v243_v48 = vld [vmem:[%s7042_s14 + $0x44] sm:$0xf]  ;;  %v643_v57 = vld [vmem:[#allocation2 + $0x6c] sm:$0xf]  ;;  %vm5695_vm13 = vcmask 1043459  }
  0x73   : > { %3071 = vmatmul.mubr.bf16.gmra.mrb[20].mxu1 %v1299_v12  ;;  %v1108_v45 = vsel %vm1036_vm3, %v1103_v29, %v1107_v19  ;;  %v1114_v11 = vrot.slane %v1112_v4, 1  ;;  %v1119_v12 = vrot.slane %v1117_v5, 1  ;;  %v386_v14 = vor.u32 %v384_v6, %v383_v8  ;;  %v773_v5 = vld [vmem:[#allocation2 + $0x48] sm:$0xf]  ;;  %v7413_v6 = vld [vmem:[#allocation2 + $0x4c] sm:$0xf] }
  0x74   : > { %3078 = vmatprep.mubr.bf16.mxu1 %v7339_v20  ;;  %6532 = vmatpush3.bf16.msra.mxu1 %v6827_v21  ;;  %v387_v47 = vrot.slane %v383_v8, 4  ;;  %v391_v19 = vrot.slane %v389_v9, 7  ;;  %v771_v21 = vld [vmem:[#allocation2 + $0x3c] sm:$0xf]  ;;  %v406_v3 = vshrl.u32 %v243_v48, 16  ;;  %vm5697_vm14 = vcmask 1044484  }
  0x75   : > { %2941 = vmatprep.mubr.bf16.mxu0 %v1108_v45  ;;  %6533 = vmatprep.subr.bf16.mxu1 %v6840_v22  ;;  %v1115_v43 = vor.u32 %v1114_v11, %v1110_v63  ;;  %v7387_v22 = vld [vmem:[#allocation2 + $0x40] sm:$0xf]  ;;  %v637_v27 = vsel %vm7080_vm8, %v386_v14, %v636_v17  ;;  %v713_v29 = vld [vmem:[#allocation2 + $0x54] sm:$0xf]  ;;  %v5878_v45 = vcombine.low %v751_v31, %v7268_v59  ;;  %v752_v11 = vld [vmem:[#allocation2 + $0x3c] sm:$0xe] }
  0x76   : > { %2942 = vmatmul.mubr.bf16.gmra.mrb[20].mxu0 %v5847_v44  ;;  %v1303_v44 = vrot.slane %v5877_v41, 1  ;;  %v394_v23 = vor.u32 %v392_v10, %v391_v19  ;;  %v396_v25 = vrot.slane %v391_v19, 4  ;;  %638 = vst [vmem:[#allocation2 + $0x60] sm:$0xf] %v637_v27  ;;  %v242_v41 = vld [vmem:[%s7042_s14 + $0x40] sm:$0xf]  ;;  %v7408_v13 = vcombine.low %v771_v21, %v7387_v22 }
  0x77   : > { %v1120_v28 = vsel %vm1036_vm3, %v1115_v43, %v1119_v12  ;;  %v7400_v15 = vld [vmem:[#allocation2 + $0x5c] ss:$0 sps:$4 sm:$0x11]   ;;  %v401_v51 = vshll.u32 %v242_v41, 16  ;;  %v408_v4 = vrot.slane %v406_v3, 7  ;;  %v7418_v59 = vld [vmem:[%s8999_s1 + $0x200] sm:$0xff]   ;;  %v7439_v27 = vcombine.low %v773_v5, %v7413_v6 }
  0x78   : > { %6534 = vmatpush3.bf16.msra.mxu1 %v6841_v0  ;;  %2949 = vmatprep.mubr.bf16.mxu0 %v1120_v28  ;;  %v7393_v32 = vld [vmem:[#allocation2 + $0x58] sm:$0xf]  ;;  %v395_v33 = vsel %vm7072_vm6, %v387_v47, %v394_v23  ;;  %v641_v34 = vsel %vm7064_vm5, %v396_v25, %v640_v38  ;;  %v1305_v39 = vsel %vm1293_vm9, %v1303_v44, %v1304_v49  ;;  %v1129_v53 = vshll.u32 %v7400_v15, 16  ;;  %v6864_v23 = vld [vmem:[%s8999_s1 + $0x1e8] sm:$0xff]  }
  0x79   : > { %6535 = vmatprep.subr.bf16.mxu1 %v6853_v61  ;;  %v5849_v35 = vcombine.low %v713_v29, %v7393_v32  ;;  %639 = vst [vmem:[#allocation2 + $0x64] sm:$0xf] %v395_v33  ;;  %642 = vst [vmem:[#allocation2 + $0x68] sm:$0x1] %v641_v34  ;;  %v409_v49 = vshll.u32 %v243_v48, 16  ;;  %v1306_v8 = vrot.slane %v5878_v45, 1  ;;  %6663 = vmatprep.subr.bf16.mxu0 %v7418_v59 }
  0x7a   : > { %v647_v61 = vld [vmem:[#allocation2 + $0x74] sm:$0x1]  ;;  %v1131_v1 = vrot.slane %v1129_v53, 1  ;;  %v413_v17 = vrot.slane %v408_v4, 4  ;;  %v5879_v28 = vcombine.low %v752_v11, %v7309_v50  ;;  %v244_v29 = vld [vmem:[%s7042_s14 + $0x48] sm:$0xf] }
  0x7b   : > { %3079 = vmatmul.mubr.bf16.gmra.mrb[24].mxu1 %v1302_v7  ;;  %v1122_v0 = vshrl.u32 %v5849_v35, 16  ;;  %v1124_v52 = vshll.u32 %v5849_v35, 16  ;;  %v411_v44 = vor.u32 %v409_v49, %v408_v4  ;;  %v1308_v25 = vsel %vm1293_vm9, %v1306_v8, %v1307_v40  ;;  %v245_v31 = vld [vmem:[%s7042_s14 + $0x4c] sm:$0xf]  ;;  %v650_v40 = vld [vmem:[#allocation2 + $0x78] sm:$0xf] }
  0x7c   : > { %3086 = vmatprep.mubr.bf16.mxu1 %v7382_v16  ;;  %6536 = vmatpush3.bf16.msra.mxu1 %v6854_v18  ;;  %v648_v21 = vsel %vm7064_vm5, %v413_v17, %v647_v61  ;;  %v418_v45 = vshll.u32 %v244_v29, 16  ;;  %v423_v48 = vshrl.u32 %v245_v31, 16  ;;  %v654_v53 = vld [vmem:[#allocation2 + $0x80] sm:$0x1]  ;;  %v7449_v49 = vld [vmem:[#allocation2 + $0x58] sm:$0xf] }
  0x7d   : > { %v1126_v63 = vrot.slane %v1124_v52, 1  ;;  %v715_v7 = vld [vmem:[#allocation2 + $0x60] sm:$0xf]  ;;  %649 = vst [vmem:[#allocation2 + $0x74] sm:$0x1] %v648_v21  ;;  %6537 = vmatprep.subr.bf16.mxu1 %v6864_v23  ;;  %v1309_v61 = vrot.slane %v5879_v28, 1 }
  0x7e   : > { %2950 = vmatmul.mubr.bf16.gmra.mrb[24].mxu0 %v5848_v55  ;;  %v398_v55 = vshrl.u32 %v242_v41, 16  ;;  %v415_v41 = vshrl.u32 %v244_v29, 16  ;;  %v425_v3 = vrot.slane %v423_v48, 7  ;;  %v753_v4 = vld [vmem:[#allocation2 + $0x48] sm:$0xe]  ;;  %v1551_v36 = vshrl.u32 %v7408_v13, 16 }
  0x7f   : > { %v1127_v12 = vor.u32 %v1126_v63, %v1122_v0  ;;  %v246_v23 = vld [vmem:[%s7042_s14 + $0x50] sm:$0xf]  ;;  %vm5699_vm15 = vcmask 1045509   ;;  %vm5701_vm0 = vcmask 1046534   ;;  %vm5703_vm1 = vcmask 1047559  }
  0x80   : > { %v400_v56 = vrot.slane %v398_v55, 7  ;;  %v7422_v18 = vld [vmem:[#allocation2 + $0x64] sm:$0xf]  ;;  %v7428_v38 = vld [vmem:[#allocation2 + $0x68] ss:$0 sps:$4 sm:$0x11]  }
  0x81   : > { %v1132_v47 = vsel %vm1036_vm3, %v1127_v12, %v1131_v1  ;;  %v5850_v19 = vcombine.low %v715_v7, %v7422_v18  ;;  %v426_v55 = vshll.u32 %v245_v31, 16  ;;  %v417_v50 = vrot.slane %v415_v41, 7 }
  0x82   : > { %v403_v9 = vor.u32 %v401_v51, %v400_v56  ;;  %v404_v10 = vrot.slane %v400_v56, 4  ;;  %2957 = vmatprep.mubr.bf16.mxu0 %v1132_v47  ;;  %v6865_v51 = vld [vmem:[%s8999_s1 + $0x1a8] sm:$0xff]   ;;  %v775_v56 = vld [vmem:[#allocation2 + $0x54] sm:$0xf]  ;;  %v430_v8 = vrot.slane %v425_v3, 4  ;;  %v1313_v47 = vrot.slane %v7358_v46, 1 }
  0x83   : > { %3087 = vmatmul.mubr.bf16.gmra.mrb[28].mxu1 %v1305_v39  ;;  %v1134_v33 = vshrl.u32 %v5850_v19, 16  ;;  %v1136_v34 = vshll.u32 %v5850_v19, 16  ;;  %v1141_v39 = vshll.u32 %v7428_v38, 16  ;;  %v420_v63 = vor.u32 %v418_v45, %v417_v50  ;;  %v6876_v46 = vld [vmem:[%s8999_s1 + $0x1b0] sm:$0xff]  }
  0x84   : > { %3094 = vmatprep.mubr.bf16.mxu1 %v7408_v13  ;;  %v644_v14 = vsel %vm7080_vm8, %v403_v9, %v643_v57  ;;  %v412_v43 = vsel %vm7072_vm6, %v404_v10, %v411_v44  ;;  %v421_v1 = vrot.slane %v417_v50, 4  ;;  %6538 = vmatpush3.bf16.msra.mxu1 %v6865_v51  ;;  %v428_v7 = vor.u32 %v426_v55, %v425_v3  ;;  %v7462_v17 = vld [vmem:[#allocation2 + $0x74] ss:$0 sps:$4 sm:$0x11]   ;;  %v657_v55 = vld [vmem:[#allocation2 + $0x84] sm:$0xf] }
  0x85   : > { %645 = vst [vmem:[#allocation2 + $0x6c] sm:$0xf] %v644_v14  ;;  %646 = vst [vmem:[#allocation2 + $0x70] sm:$0xf] %v412_v43  ;;  %v1138_v0 = vrot.slane %v1136_v34, 1  ;;  %v1143_v52 = vrot.slane %v1141_v39, 1  ;;  %v5880_v9 = vcombine.low %v753_v4, %v7350_v37  ;;  %v651_v12 = vsel %vm7080_vm8, %v420_v63, %v650_v40 }
  0x86   : > { %2958 = vmatmul.mubr.bf16.gmra.mrb[28].mxu0 %v5849_v35  ;;  %v1310_v35 = vrot.slane %v7327_v2, 1  ;;  %v6875_v2 = vld [vmem:[%s8999_s1 + $0x1f0] sm:$0xff]   ;;  %v429_v37 = vsel %vm7072_vm6, %v421_v1, %v428_v7  ;;  %652 = vst [vmem:[#allocation2 + $0x78] sm:$0xf] %v651_v12  ;;  %v655_v14 = vsel %vm7064_vm5, %v430_v8, %v654_v53  ;;  %v7471_v21 = vcombine.low %v775_v56, %v7449_v49  ;;  %v661_v40 = vld [vmem:[#allocation2 + $0x8c] sm:$0x1] }
  0x87   : > { %v1139_v57 = vor.u32 %v1138_v0, %v1134_v33  ;;  %6539 = vmatprep.subr.bf16.mxu1 %v6875_v2  ;;  %653 = vst [vmem:[#allocation2 + $0x7c] sm:$0xf] %v429_v37  ;;  %656 = vst [vmem:[#allocation2 + $0x80] sm:$0x1] %v655_v14  ;;  %v1153_v31 = vshll.u32 %v7462_v17, 16  ;;  %v1312_v33 = vrot.slane %v5880_v9, 1 }
  0x88   : > { %v1311_v43 = vsel %vm1293_vm9, %v1309_v61, %v1310_v35  ;;  %v432_v34 = vshrl.u32 %v246_v23, 16  ;;  %v777_v51 = vld [vmem:[#allocation2 + $0x60] sm:$0xf]  ;;  %v7480_v50 = vld [vmem:[#allocation2 + $0x64] sm:$0xf]  ;;  %6540 = vmatpush3.bf16.msra.mxu1 %v6876_v46  ;;  %v1316_v37 = vrot.slane %v7400_v15, 1 }
  0x89   : > { %v1144_v10 = vsel %vm1036_vm3, %v1139_v57, %v1143_v52  ;;  %v1155_v48 = vrot.slane %v1153_v31, 1  ;;  %v754_v53 = vld [vmem:[#allocation2 + $0x54] sm:$0xe]  ;;  %v1314_v7 = vsel %vm1293_vm9, %v1312_v33, %v1313_v47  ;;  %v7488_v8 = vcombine.low %v777_v51, %v7480_v50  ;;  %v811_v14 = vld [vmem:[#allocation2 + $0xc] sm:$0xe] }
  0x8a   : > { %2965 = vmatprep.mubr.bf16.mxu0 %v1144_v10  ;;  %v434_v0 = vrot.slane %v432_v34, 7  ;;  %v5881_v3 = vcombine.low %v754_v53, %v7393_v32  ;;  %v5922_v46 = vcombine.low %v811_v14, %v7260_v42  ;;  %v1505_v42 = vshll.u32 %v7271_v60, 16 }
  0x8b   : > { %3095 = vmatmul.mubr.bf16.gmra.mrb[32].mxu1 %v1308_v25  ;;  %v247_v25 = vld [vmem:[%s7042_s14 + $0x54] sm:$0xf] }
  0x8c   : > { %3102 = vmatprep.mubr.bf16.mxu1 %v7439_v27  ;;  %v717_v5 = vld [vmem:[#allocation2 + $0x6c] sm:$0xf]  ;;  %v7457_v11 = vld [vmem:[#allocation2 + $0x70] sm:$0xf]  ;;  %v440_v39 = vshrl.u32 %v247_v25, 16  ;;  %v443_v41 = vshll.u32 %v247_v25, 16 }
  0x8d   : > { %v5851_v44 = vcombine.low %v717_v5, %v7457_v11  ;;  %v719_v56 = vld [vmem:[#allocation2 + $0x78] sm:$0xf]  ;;  %v438_v61 = vrot.slane %v434_v0, 4  ;;  %v1315_v25 = vrot.slane %v5881_v3, 1  ;;  %v7502_v33 = vld [vmem:[#allocation2 + $0x70] sm:$0xf] }
  0x8e   : > { %2966 = vmatmul.mubr.bf16.gmra.mrb[32].mxu0 %v5850_v19  ;;  %v435_v19 = vshll.u32 %v246_v23, 16  ;;  %v442_v52 = vrot.slane %v440_v39, 7  ;;  %v7484_v5 = vld [vmem:[#allocation2 + $0x7c] sm:$0xf]  ;;  %v781_v3 = vld [vmem:[#allocation2 + $0x78] sm:$0xf] }
  0x8f   : > { %v1146_v28 = vshrl.u32 %v5851_v44, 16  ;;  %v1148_v29 = vshll.u32 %v5851_v44, 16  ;;  %v5852_v9 = vcombine.low %v719_v56, %v7484_v5  ;;  %v7491_v2 = vld [vmem:[#allocation2 + $0x80] ss:$0 sps:$4 sm:$0x11]   ;;  %v6886_v56 = vld [vmem:[%s8999_s1 + $0x1f8] sm:$0xff]  }
  0x90   : > { %v437_v57 = vor.u32 %v435_v19, %v434_v0  ;;  %v445_v63 = vor.u32 %v443_v41, %v442_v52  ;;  %v447_v1 = vrot.slane %v442_v52, 4  ;;  %v1165_v23 = vshll.u32 %v7491_v2, 16  ;;  %v6851_v19 = vld [vmem:[#allocation2 + $0x14] ss:$0 sps:$4 sm:$0x11]   ;;  %6541 = vmatprep.subr.bf16.mxu1 %v6886_v56 }
  0x91   : > { %v1150_v45 = vrot.slane %v1148_v29, 1  ;;  %v1158_v47 = vshrl.u32 %v5852_v9, 16  ;;  %v1758_v0 = vrot.slane %v5922_v46, 1  ;;  %v1510_v14 = vshll.u32 %v6851_v19, 16 }
  0x92   : > { %v446_v32 = vsel %vm7072_vm6, %v438_v61, %v445_v63  ;;  %v658_v10 = vsel %vm7080_vm8, %v437_v57, %v657_v55  ;;  %v662_v12 = vsel %vm7064_vm5, %v447_v1, %v661_v40  ;;  %v1167_v31 = vrot.slane %v1165_v23, 1  ;;  %v7523_v61 = vld [vmem:[#allocation2 + $0x7c] sm:$0xf]  ;;  %v756_v63 = vld [vmem:[#allocation2 + $0x6c] sm:$0xe] }
  0x93   : > { %3103 = vmatmul.mubr.bf16.gmra.mrb[36].mxu1 %v1311_v43  ;;  %v1151_v35 = vor.u32 %v1150_v45, %v1146_v28  ;;  %659 = vst [vmem:[#allocation2 + $0x84] sm:$0xf] %v658_v10  ;;  %660 = vst [vmem:[#allocation2 + $0x88] sm:$0xf] %v446_v32  ;;  %v1160_v43 = vshll.u32 %v5852_v9, 16  ;;  %v1317_v45 = vsel %vm1293_vm9, %v1315_v25, %v1316_v37  ;;  %v1319_v57 = vrot.slane %v7428_v38, 1 }
  0x94   : > { %3110 = vmatprep.mubr.bf16.mxu1 %v7471_v21  ;;  %663 = vst [vmem:[#allocation2 + $0x8c] sm:$0x1] %v662_v12  ;;  %v779_v28 = vld [vmem:[#allocation2 + $0x6c] sm:$0xf]  ;;  %v812_v32 = vld [vmem:[#allocation2 + $0x18] sm:$0xe]  ;;  %v5883_v23 = vcombine.low %v756_v63, %v7457_v11 }
  0x95   : > { %v1156_v4 = vsel %vm1036_vm3, %v1151_v35, %v1155_v48  ;;  %v1162_v29 = vrot.slane %v1160_v43, 1  ;;  %v7510_v48 = vcombine.low %v779_v28, %v7502_v33  ;;  %v1503_v10 = vshrl.u32 %v7271_v60, 16  ;;  %v6858_v43 = vld [vmem:[#allocation2 + $0x20] ss:$0 sps:$4 sm:$0x11]  }
  0x96   : > { %2973 = vmatprep.mubr.bf16.mxu0 %v1156_v4  ;;  %v1507_v12 = vrot.slane %v1505_v42, 1  ;;  %v5923_v25 = vcombine.low %v812_v32, %v7287_v24  ;;  %v1517_v60 = vshll.u32 %v7303_v58, 16  ;;  %v1512_v46 = vrot.slane %v1510_v14, 1  ;;  %v785_v32 = vld [vmem:[#allocation2 + $0x90] sm:$0xf] }
  0x97   : > { %2974 = vmatmul.mubr.bf16.gmra.mrb[36].mxu0 %v5851_v44  ;;  %v755_v44 = vld [vmem:[#allocation2 + $0x60] sm:$0xe]  ;;  %v1163_v34 = vor.u32 %v1162_v29, %v1158_v47  ;;  %v7531_v47 = vcombine.low %v781_v3, %v7523_v61  ;;  %v1322_v11 = vrot.slane %v7462_v17, 1  ;;  %v1762_v24 = vrot.slane %v6858_v43, 1 }
  0x98   : > { %v5882_v55 = vcombine.low %v755_v44, %v7422_v18  ;;  %v1508_v44 = vor.u32 %v1507_v12, %v1503_v10  ;;  %v1519_v42 = vrot.slane %v1517_v60, 1  ;;  %v1529_v17 = vshll.u32 %v7339_v20, 16  ;;  %v7562_v12 = vld [vmem:[#allocation2 + $0x94] sm:$0xf] }
  0x99   : > { %v1168_v15 = vsel %vm1036_vm3, %v1163_v34, %v1167_v31  ;;  %v813_v31 = vld [vmem:[#allocation2 + $0x24] sm:$0xe]  ;;  %v1321_v34 = vrot.slane %v5883_v23, 1  ;;  %v1527_v14 = vshrl.u32 %v7339_v20, 16  ;;  %v6888_v20 = vld [vmem:[%s8999_s1 + $0x218] sm:$0xff]  }
  0x9a   : > { %v721_v39 = vld [vmem:[#allocation2 + $0x84] sm:$0xf]  ;;  %v7506_v41 = vld [vmem:[#allocation2 + $0x88] sm:$0xf]  ;;  %2981 = vmatprep.mubr.bf16.mxu0 %v1168_v15  ;;  %v1318_v18 = vrot.slane %v5882_v55, 1  ;;  %v5924_v55 = vcombine.low %v813_v31, %v7321_v62 }
  0x9b   : > { %3111 = vmatmul.mubr.bf16.gmra.mrb[40].mxu1 %v1314_v7  ;;  %v5853_v40 = vcombine.low %v721_v39, %v7506_v41  ;;  %v7514_v51 = vld [vmem:[#allocation2 + $0x8c] ss:$0 sps:$4 sm:$0x11]   ;;  %v1759_v7 = vrot.slane %v6851_v19, 1  ;;  %v1761_v19 = vrot.slane %v5923_v25, 1 }
  0x9c   : > { %3118 = vmatprep.mubr.bf16.mxu1 %v7488_v8  ;;  %v1177_v35 = vshll.u32 %v7514_v51, 16  ;;  %v1320_v38 = vsel %vm1293_vm9, %v1318_v18, %v1319_v57  ;;  %v757_v15 = vld [vmem:[#allocation2 + $0x78] sm:$0xe]  ;;  %v783_v39 = vld [vmem:[#allocation2 + $0x84] sm:$0xf]  ;;  %v1764_v63 = vrot.slane %v5924_v55, 1 }
  0x9d   : > { %v1170_v52 = vshrl.u32 %v5853_v40, 16  ;;  %v1172_v53 = vshll.u32 %v5853_v40, 16  ;;  %v1760_v29 = vsel %vm1293_vm9, %v1758_v0, %v1759_v7  ;;  %v1513_v0 = vsel %vm1036_vm3, %v1508_v44, %v1512_v46  ;;  %v814_v62 = vld [vmem:[#allocation2 + $0x30] sm:$0xe]  ;;  %v256_v55 = vld [vmem:[%s7042_s14 + $0x78] sm:$0xf] }
  0x9e   : > { %v1179_v4 = vrot.slane %v1177_v35, 1  ;;  %v6862_v35 = vld [vmem:[#allocation2 + $0x2c] ss:$0 sps:$4 sm:$0x11]   ;;  %v5884_v3 = vcombine.low %v757_v15, %v7484_v5  ;;  %v1763_v56 = vsel %vm1293_vm9, %v1761_v19, %v1762_v24  ;;  %v6877_v5 = vld [vmem:[%s8999_s1 + $0x210] sm:$0xff]   ;;  %v5925_v10 = vcombine.low %v814_v62, %v7371_v54 }
  0x9f   : > { %2982 = vmatmul.mubr.bf16.gmra.mrb[40].mxu0 %v5852_v9  ;;  %v1174_v1 = vrot.slane %v1172_v53, 1  ;;  %v6887_v9 = vld [vmem:[%s8999_s1 + $0x1b8] sm:$0xff]   ;;  %v1522_v53 = vshll.u32 %v6858_v43, 16  ;;  %v1534_v43 = vshll.u32 %v6862_v35, 16 }
  0xa0   : > { %6542 = vmatpush3.bf16.msra.mxu1 %v6887_v9  ;;  %v1324_v7 = vrot.slane %v5884_v3, 1  ;;  %v1325_v9 = vrot.slane %v7491_v2, 1  ;;  %v7568_v2 = vcombine.low %v785_v32, %v7562_v12  ;;  %v6869_v25 = vld [vmem:[#allocation2 + $0x38] ss:$0 sps:$4 sm:$0x11]   ;;  %v1767_v31 = vrot.slane %v5925_v10, 1 }
  0xa1   : > { %v1175_v37 = vor.u32 %v1174_v1, %v1170_v52  ;;  %v1323_v52 = vsel %vm1293_vm9, %v1321_v34, %v1322_v11  ;;  %v1524_v1 = vrot.slane %v1522_v53, 1  ;;  %v1536_v46 = vrot.slane %v1534_v43, 1  ;;  %v7577_v11 = vld [vmem:[#allocation2 + $0xa0] sm:$0xf]  ;;  %v6903_v10 = vld [vmem:[%s8999_s1 + $0x228] sm:$0xff]  }
  0xa2   : > { %v1326_v23 = vsel %vm1293_vm9, %v1324_v7, %v1325_v9  ;;  %v1328_v34 = vrot.slane %v7514_v51, 1  ;;  %v1768_v19 = vrot.slane %v6869_v25, 1  ;;  %v1539_v51 = vshrl.u32 %v7382_v16, 16  ;;  %v6896_v53 = vld [vmem:[%s8999_s1 + $0x220] sm:$0xff]  }
  0xa3   : > { %3119 = vmatmul.mubr.bf16.gmra.mrb[44].mxu1 %v1317_v45  ;;  %v1180_v28 = vsel %vm1036_vm3, %v1175_v37, %v1179_v4  ;;  %v7540_v45 = vld [vmem:[#allocation2 + $0x88] sm:$0xf]  ;;  %v1765_v4 = vrot.slane %v6862_v35, 1  ;;  %v758_v37 = vld [vmem:[#allocation2 + $0x84] sm:$0xe]  ;;  %v1546_v3 = vshll.u32 %v6869_v25, 16 }
  0xa4   : > { %3126 = vmatprep.mubr.bf16.mxu1 %v7510_v48  ;;  %2989 = vmatprep.mubr.bf16.mxu0 %v1180_v28  ;;  %v7550_v18 = vcombine.low %v783_v39, %v7540_v45  ;;  %v5885_v54 = vcombine.low %v758_v37, %v7506_v41  ;;  %v1541_v28 = vshll.u32 %v7382_v16, 16  ;;  %v787_v41 = vld [vmem:[#allocation2 + $0x9c] sm:$0xf]  ;;  %v759_v39 = vld [vmem:[#allocation2 + $0x90] sm:$0xe]  ;;  %v1553_v7 = vshll.u32 %v7408_v13, 16 }
  0xa5   : > { %v1766_v60 = vsel %vm1293_vm9, %v1764_v63, %v1765_v4  ;;  %v6873_v62 = vld [vmem:[#allocation2 + $0x44] ss:$0 sps:$4 sm:$0x11]   ;;  %v692_v4 = vld [vmem:[#allocation2 + $0xc0] sm:$0xf]  ;;  %v6917_v13 = vld [vmem:[%s8999_s1 + $0x238] sm:$0xff]  }
  0xa6   : > { %v1327_v24 = vrot.slane %v5885_v54, 1  ;;  %v1543_v35 = vrot.slane %v1541_v28, 1  ;;  %v6954_v25 = vld [vmem:[#allocation2 + $0x98] ss:$0 sps:$4 sm:$0x11]  }
  0xa7   : > { %2990 = vmatmul.mubr.bf16.gmra.mrb[44].mxu0 %v5853_v40  ;;  %v1515_v40 = vshrl.u32 %v7303_v58, 16  ;;  %v6866_v58 = vld [vmem:[%s8999_s1 + $0x208] sm:$0xff]   ;;  %v1331_v54 = vrot.slane %v6954_v25, 1 }
  0xa8   : > { %3223 = vmatprep.mubr.bf16.mxu0 %v1760_v29  ;;  %v815_v29 = vld [vmem:[#allocation2 + $0x3c] sm:$0xe]  ;;  %v1544_v37 = vor.u32 %v1543_v35, %v1539_v51  ;;  %v6880_v51 = vld [vmem:[#allocation2 + $0x50] ss:$0 sps:$4 sm:$0x11]  }
  0xa9   : > { %v1520_v57 = vor.u32 %v1519_v42, %v1515_v40  ;;  %v5926_v15 = vcombine.low %v815_v29, %v7387_v22  ;;  %v257_v42 = vld [vmem:[%s7042_s14 + $0x7c] sm:$0xf]  ;;  %v1329_v22 = vsel %vm1293_vm9, %v1327_v24, %v1328_v34  ;;  %v789_v29 = vld [vmem:[#allocation2 + $0xa8] sm:$0xf]  ;;  %v1558_v24 = vshll.u32 %v6873_v62, 16 }
  0xaa   : > { %v6956_v35 = vld [vmem:[#allocation2 + $0xa4] ss:$0 sps:$4 sm:$0x11]  }
  0xab   : > { %3127 = vmatmul.mubr.bf16.gmra.mrb[48].mxu1 %v1320_v38  ;;  %v1531_v38 = vrot.slane %v1529_v17, 1  ;;  %v525_v17 = vshrl.u32 %v257_v42, 16 }
  0xac   : > { %3134 = vmatprep.mubr.bf16.mxu1 %v7531_v47 }
  0xad   : > { %v1532_v44 = vor.u32 %v1531_v38, %v1527_v14  ;;  %v1548_v14 = vrot.slane %v1546_v3, 1  ;;  %v1770_v38 = vrot.slane %v5926_v15, 1  ;;  %v6955_v15 = vld [vmem:[#allocation2 + $0xa0] sm:$0xf]  ;;  %v1334_v3 = vrot.slane %v6956_v35, 1 }
  0xaf   : > { %3224 = vmatmul.mubr.bf16.vlgmr.msra.gmra.mrb[48].mxu0 %v1513_v0  ;;  %v1537_v40 = vsel %vm1036_vm3, %v1532_v44, %v1536_v46  ;;  %v517_v0 = vshrl.u32 %v256_v55, 16  ;;  %v816_v44 = vld [vmem:[#allocation2 + $0x48] sm:$0xe]  ;;  %v6910_v46 = vld [vmem:[%s8999_s1 + $0x230] sm:$0xff]   ;;  %v1549_v34 = vsel %vm1036_vm3, %v1544_v37, %v1548_v14 }
  0xb0   : > { %6664 = vmatpush3.bf16.msra.mxu0 %v7418_v59  ;;  %3231 = vmatprep.mubr.bf16.mxu0 %v1763_v56  ;;  %v1525_v59 = vsel %vm1036_vm3, %v1520_v57, %v1524_v1  ;;  %v528_v56 = vshll.u32 %v257_v42, 16  ;;  %v6953_v57 = vld [vmem:[#allocation2 + $0x94] sm:$0xf]  ;;  %v7593_v1 = vrot.slane %v525_v17, 7  ;;  %v1565_v42 = vshll.u32 %v7439_v27, 16 }
  0xb1   : > { %6665 = vmatprep.subr.bf16.mxu0 %v6866_v58  ;;  %v5886_v16 = vcombine.low %v759_v39, %v6953_v57  ;;  %v519_v63 = vrot.slane %v517_v0, 7  ;;  %v817_v0 = vld [vmem:[#allocation2 + $0x54] sm:$0xe]  ;;  %v761_v57 = vld [vmem:[#allocation2 + $0xa8] sm:$0xe] }
  0xb2   : > { %v530_v43 = vor.u32 %v528_v56, %v7593_v1  ;;  %v791_v17 = vld [vmem:[#allocation2 + $0xb4] sm:$0xf] }
  0xb3   : > { %3135 = vmatmul.mubr.bf16.gmra.mrb[52].mxu1 %v1323_v52  ;;  %v520_v52 = vshll.u32 %v256_v55, 16  ;;  %v523_v32 = vrot.slane %v519_v63, 4  ;;  %v5927_v55 = vcombine.low %v816_v44, %v7413_v6  ;;  %v762_v44 = vld [vmem:[#allocation2 + $0xb4] sm:$0xe] }
  0xb4   : > { %3142 = vmatprep.mubr.bf16.mxu1 %v7550_v18  ;;  %6666 = vmatpush3.bf16.msra.mxu0 %v6866_v58  ;;  %v7590_v58 = vcombine.low %v787_v41, %v7577_v11  ;;  %v1555_v41 = vrot.slane %v1553_v7, 1  ;;  %v5928_v7 = vcombine.low %v817_v0, %v7449_v49  ;;  %v818_v49 = vld [vmem:[#allocation2 + $0x60] sm:$0xe] }
  0xb5   : > { %6667 = vmatprep.subr.bf16.mxu0 %v6877_v5  ;;  %v522_v9 = vor.u32 %v520_v52, %v519_v63  ;;  %v1773_v56 = vrot.slane %v5927_v55, 1  ;;  %v1567_v63 = vrot.slane %v1565_v42, 1 }
  0xb6   : > { %v1556_v52 = vor.u32 %v1555_v41, %v1551_v36 }
  0xb7   : > { %3232 = vmatmul.mubr.bf16.gmra.mrb[52].mxu0 %v1525_v59  ;;  %v1771_v59 = vrot.slane %v6873_v62, 1  ;;  %v693_v28 = vsel %vm7080_vm8, %v522_v9, %v692_v4  ;;  %v7623_v62 = vld [vmem:[#allocation2 + $0xb8] sm:$0xf]  ;;  %v7626_v4 = vld [vmem:[#allocation2 + $0x1c] sm:$0xf]  ;;  %v1570_v9 = vshll.u32 %v6880_v51, 16 }
  0xb8   : > { %3239 = vmatprep.mubr.bf16.mxu0 %v1766_v60  ;;  %6668 = vmatpush3.bf16.msra.mxu0 %v6877_v5  ;;  %v1769_v5 = vsel %vm1293_vm9, %v1767_v31, %v1768_v19  ;;  %v7603_v60 = vld [vmem:[#allocation2 + $0xac] sm:$0xf]  ;;  %v760_v31 = vld [vmem:[#allocation2 + $0x9c] sm:$0xe]  ;;  %694 = vst [vmem:[#allocation2 + $0xc0] sm:$0xf] %v693_v28  ;;  %v7632_v14 = vcombine.low %v791_v17, %v7623_v62 }
  0xb9   : > { %6669 = vmatprep.subr.bf16.mxu0 %v6888_v20  ;;  %v7614_v30 = vcombine.low %v789_v29, %v7603_v60  ;;  %v5887_v39 = vcombine.low %v760_v31, %v6955_v15  ;;  %v1776_v28 = vrot.slane %v5928_v7, 1  ;;  %v6958_v31 = vld [vmem:[#allocation2 + $0xb0] ss:$0 sps:$4 sm:$0x11]   ;;  %v830_v15 = vld [vmem:[#allocation2 + $0x24] sm:$0xf] }
  0xbb   : > { %3143 = vmatmul.mubr.bf16.gmra.mrb[56].mxu1 %v1326_v23  ;;  %v1330_v23 = vrot.slane %v5886_v16, 1  ;;  %v1333_v6 = vrot.slane %v5887_v39, 1  ;;  %v1563_v16 = vshrl.u32 %v7439_v27, 16  ;;  %v7646_v39 = vld [vmem:[#allocation2 + $0x28] sm:$0xf] }
  0xbc   : > { %3150 = vmatprep.mubr.bf16.mxu1 %v7568_v2  ;;  %6670 = vmatpush3.bf16.msra.mxu0 %v6888_v20  ;;  %v531_v20 = vsel %vm7072_vm6, %v523_v32, %v530_v43  ;;  %v6884_v32 = vld [vmem:[#allocation2 + $0x5c] ss:$0 sps:$4 sm:$0x11]  }
  0xbd   : > { %6671 = vmatprep.subr.bf16.mxu0 %v6896_v53  ;;  %695 = vst [vmem:[#allocation2 + $0xc4] sm:$0xf] %v531_v20  ;;  %v1332_v19 = vsel %vm1293_vm9, %v1330_v23, %v1331_v54  ;;  %v1335_v37 = vsel %vm1293_vm9, %v1333_v6, %v1334_v3  ;;  %v1577_v23 = vshll.u32 %v7471_v21, 16  ;;  %v1568_v25 = vor.u32 %v1567_v63, %v1563_v16  ;;  %v6959_v6 = vld [vmem:[#allocation2 + $0xb8] sm:$0xf] }
  0xbe   : > { %v1572_v54 = vrot.slane %v1570_v9, 1  ;;  %v1777_v29 = vrot.slane %v6884_v32, 1  ;;  %v1337_v20 = vrot.slane %v6958_v31, 1  ;;  %v1582_v42 = vshll.u32 %v6884_v32, 16 }
  0xbf   : > { %3240 = vmatmul.mubr.bf16.gmra.mrb[56].mxu0 %v1537_v40  ;;  %v1772_v40 = vsel %vm1293_vm9, %v1770_v38, %v1771_v59  ;;  %v6957_v38 = vld [vmem:[#allocation2 + $0xac] sm:$0xf]  ;;  %v793_v36 = vld [vmem:[#allocation2 + $0xc0] sm:$0xf]  ;;  %v5889_v35 = vcombine.low %v762_v44, %v6959_v6 }
  0xc0   : > { %3247 = vmatprep.mubr.bf16.mxu0 %v1769_v5  ;;  %6672 = vmatpush3.bf16.msra.mxu0 %v6896_v53  ;;  %v1560_v53 = vrot.slane %v1558_v24, 1  ;;  %v828_v5 = vld [vmem:[#allocation2 + $0x18] sm:$0xf]  ;;  %v5888_v43 = vcombine.low %v761_v57, %v6957_v38  ;;  %v5929_v24 = vcombine.low %v818_v49, %v7480_v50  ;;  %v1573_v55 = vsel %vm1036_vm3, %v1568_v25, %v1572_v54  ;;  %v6960_v9 = vld [vmem:[#allocation2 + $0xbc] ss:$0 sps:$4 sm:$0x11]  }
  0xc1   : > { %6673 = vmatprep.subr.bf16.mxu0 %v6903_v10  ;;  %v7636_v59 = vcombine.low %v828_v5, %v7626_v4  ;;  %v1584_v16 = vrot.slane %v1582_v42, 1  ;;  %v1339_v7 = vrot.slane %v5889_v35, 1  ;;  %v1340_v32 = vrot.slane %v6960_v9, 1  ;;  %v7662_v38 = vld [vmem:[#allocation2 + $0x2c] ss:$0 sps:$4 sm:$0x11]  }
  0xc2   : > { %v1779_v63 = vrot.slane %v5929_v24, 1  ;;  %v1587_v54 = vshrl.u32 %v7488_v8, 16  ;;  %v1986_v24 = vshll.u32 %v7662_v38, 16 }
  0xc3   : > { %3151 = vmatmul.mubr.bf16.gmra.mrb[60].mxu1 %v1329_v22  ;;  %v1774_v22 = vrot.slane %v6880_v51, 1  ;;  %v1579_v51 = vrot.slane %v1577_v23, 1  ;;  %v1967_v50 = vshrl.u32 %v7636_v59, 16  ;;  %v7665_v23 = vld [vmem:[#allocation2 + $0x34] sm:$0xf] }
  0xc4   : > { %3158 = vmatprep.mubr.bf16.mxu1 %v7590_v58  ;;  %6674 = vmatpush3.bf16.msra.mxu0 %v6903_v10  ;;  %v1561_v10 = vsel %vm1036_vm3, %v1556_v52, %v1560_v53  ;;  %v7642_v41 = vld [vmem:[#allocation2 + $0xc4] sm:$0xf]  ;;  %v6891_v53 = vld [vmem:[#allocation2 + $0x68] ss:$0 sps:$4 sm:$0x11]   ;;  %v1988_v6 = vrot.slane %v1986_v24, 1 }
  0xc5   : > { %6675 = vmatprep.subr.bf16.mxu0 %v6910_v46  ;;  %v1775_v27 = vsel %vm1293_vm9, %v1773_v56, %v1774_v22  ;;  %v7653_v52 = vcombine.low %v793_v36, %v7642_v41  ;;  %v7658_v56 = vcombine.low %v830_v15, %v7646_v39  ;;  %v1589_v22 = vshll.u32 %v7488_v8, 16  ;;  %v820_v8 = vld [vmem:[#allocation2 + $0x78] sm:$0xe] }
  0xc6   : > { %v1780_v5 = vrot.slane %v6891_v53, 1  ;;  %v1594_v44 = vshll.u32 %v6891_v53, 16  ;;  %v1601_v15 = vshll.u32 %v7510_v48, 16 }
  0xc7   : > { %3248 = vmatmul.mubr.bf16.gmra.mrb[60].mxu0 %v1549_v34  ;;  %v7640_v34 = vld [vmem:[#allocation2 + $0x20] ss:$0 sps:$4 sm:$0x11]  }
  0xc8   : > { %3255 = vmatprep.mubr.bf16.mxu0 %v1772_v40  ;;  %6676 = vmatpush3.bf16.msra.mxu0 %v6910_v46  ;;  %v1336_v46 = vrot.slane %v5888_v43, 1  ;;  %v1575_v40 = vshrl.u32 %v7471_v21, 16  ;;  %v1974_v17 = vshll.u32 %v7640_v34, 16  ;;  %v819_v21 = vld [vmem:[#allocation2 + $0x6c] sm:$0xe]  ;;  %v1981_v43 = vshll.u32 %v7658_v56, 16 }
  0xc9   : > { %6677 = vmatprep.subr.bf16.mxu0 %v6917_v13  ;;  %v5930_v49 = vcombine.low %v819_v21, %v7502_v33  ;;  %v1781_v31 = vsel %vm1293_vm9, %v1779_v63, %v1780_v5  ;;  %v696_v21 = vld [vmem:[#allocation2 + $0xc8] sm:$0x1] }
  0xca   : > { %v1338_v0 = vsel %vm1293_vm9, %v1336_v46, %v1337_v20  ;;  %v1580_v57 = vor.u32 %v1579_v51, %v1575_v40  ;;  %v1341_v20 = vsel %vm1293_vm9, %v1339_v7, %v1340_v32  ;;  %v1979_v46 = vshrl.u32 %v7658_v56, 16 }
  0xcb   : > { %3159 = vmatmul.mubr.bf16.gmra.mrb[64].mxu1 %v1332_v19  ;;  %v1969_v19 = vshll.u32 %v7636_v59, 16  ;;  %v1596_v51 = vrot.slane %v1594_v44, 1  ;;  %v1782_v42 = vrot.slane %v5930_v49, 1 }
  0xcc   : > { %3166 = vmatprep.mubr.bf16.mxu1 %v7614_v30  ;;  %6678 = vmatpush3.bf16.msra.mxu0 %v6917_v13  ;;  %v1778_v13 = vsel %vm1293_vm9, %v1776_v28, %v1777_v29  ;;  %v1585_v25 = vsel %vm1036_vm3, %v1580_v57, %v1584_v16  ;;  %v1591_v28 = vrot.slane %v1589_v22, 1  ;;  %v6893_v29 = vld [vmem:[#allocation2 + $0x74] ss:$0 sps:$4 sm:$0x11]   ;;  %v1603_v22 = vrot.slane %v1601_v15, 1 }
  0xcd   : > { %v1971_v3 = vrot.slane %v1969_v19, 1  ;;  %v1983_v19 = vrot.slane %v1981_v43, 1  ;;  %v1606_v57 = vshll.u32 %v6893_v29, 16  ;;  %v6897_v16 = vld [vmem:[#allocation2 + $0x80] ss:$0 sps:$4 sm:$0x11]  }
  0xce   : > { %v1592_v40 = vor.u32 %v1591_v28, %v1587_v54  ;;  %v821_v43 = vld [vmem:[#allocation2 + $0x84] sm:$0xe]  ;;  %v1611_v54 = vshrl.u32 %v7531_v47, 16  ;;  %v876_v28 = vld [vmem:[#allocation2 + $0x18] sm:$0xe] }
  0xcf   : > { %3256 = vmatmul.mubr.bf16.gmra.mrb[64].mxu0 %v1561_v10  ;;  %v1972_v10 = vor.u32 %v1971_v3, %v1967_v50  ;;  %v1984_v53 = vor.u32 %v1983_v19, %v1979_v46  ;;  %v5931_v50 = vcombine.low %v820_v8, %v7523_v61  ;;  %v834_v3 = vld [vmem:[#allocation2 + $0x3c] sm:$0xf]  ;;  %v1608_v49 = vrot.slane %v1606_v57, 1  ;;  %v7701_v19 = vld [vmem:[#allocation2 + $0x4c] sm:$0xf] }
  0xd0   : > { %3263 = vmatprep.mubr.bf16.mxu0 %v1775_v27  ;;  %v832_v27 = vld [vmem:[#allocation2 + $0x30] sm:$0xf]  ;;  %v1597_v5 = vsel %vm1036_vm3, %v1592_v40, %v1596_v51  ;;  %v5970_v24 = vcombine.low %v876_v28, %v7626_v4  ;;  %v1618_v8 = vshll.u32 %v6897_v16, 16  ;;  %v5932_v40 = vcombine.low %v821_v43, %v7540_v45 }
  0xd1   : > { %v7676_v33 = vcombine.low %v832_v27, %v7665_v23  ;;  %v1989_v61 = vsel %vm1036_vm3, %v1984_v53, %v1988_v6  ;;  %v1785_v26 = vrot.slane %v5931_v50, 1  ;;  %v1625_v57 = vshll.u32 %v7550_v18, 16 }
  0xd2   : > { %v2222_v6 = vrot.slane %v5970_v24, 1  ;;  %v1620_v45 = vrot.slane %v1618_v8, 1 }
  0xd3   : > { %3167 = vmatmul.mubr.bf16.gmra.mrb[68].mxu1 %v1335_v37  ;;  %v1976_v37 = vrot.slane %v1974_v17, 1  ;;  %v1993_v35 = vshll.u32 %v7676_v33, 16  ;;  %v7684_v17 = vld [vmem:[#allocation2 + $0x40] sm:$0xf]  ;;  %v1991_v32 = vshrl.u32 %v7676_v33, 16  ;;  %v1627_v28 = vrot.slane %v1625_v57, 1 }
  0xd4   : > { %3174 = vmatprep.mubr.bf16.mxu1 %v7632_v14 }
  0xd5   : > { %v1977_v36 = vsel %vm1036_vm3, %v1972_v10, %v1976_v37  ;;  %v1995_v10 = vrot.slane %v1993_v35, 1  ;;  %v1613_v37 = vshll.u32 %v7531_v47, 16  ;;  %v2223_v47 = vrot.slane %v7640_v34, 1  ;;  %v878_v35 = vld [vmem:[#allocation2 + $0x30] sm:$0xe] }
  0xd7   : > { %3264 = vmatmul.mubr.bf16.gmra.mrb[68].mxu0 %v1573_v55  ;;  %v532_v55 = vrot.slane %v7593_v1, 4  ;;  %v1599_v1 = vshrl.u32 %v7510_v48, 16  ;;  %v7695_v48 = vcombine.low %v834_v3, %v7684_v17  ;;  %v1996_v44 = vor.u32 %v1995_v10, %v1991_v32 }
  0xd8   : > { %3271 = vmatprep.mubr.bf16.mxu0 %v1778_v13  ;;  %v1783_v13 = vrot.slane %v6893_v29, 1 }
  0xd9   : > { %v697_v63 = vsel %vm7064_vm5, %v532_v55, %v696_v21  ;;  %v1604_v27 = vor.u32 %v1603_v22, %v1599_v1  ;;  %v2005_v46 = vshll.u32 %v7695_v48, 16  ;;  %v2226_v55 = vrot.slane %v7662_v38, 1  ;;  %v879_v38 = vld [vmem:[#allocation2 + $0x3c] sm:$0xe] }
  0xda   : > { %v1784_v7 = vsel %vm1293_vm9, %v1782_v42, %v1783_v13  ;;  %698 = vst [vmem:[#allocation2 + $0xc8] sm:$0x1] %v697_v63  ;;  %v6900_v42 = vld [vmem:[#allocation2 + $0x8c] ss:$0 sps:$4 sm:$0x11]   ;;  %v2003_v50 = vshrl.u32 %v7695_v48, 16  ;;  %v7716_v1 = vsel %vm1293_vm9, %v2222_v6, %v2223_v47  ;;  %v5972_v63 = vcombine.low %v878_v35, %v7665_v23 }
  0xdb   : > { %3175 = vmatmul.mubr.bf16.gmra.mrb[72].mxu1 %v1338_v0  ;;  %v7680_v0 = vld [vmem:[#allocation2 + $0x38] ss:$0 sps:$4 sm:$0x11]   ;;  %v1609_v51 = vsel %vm1036_vm3, %v1604_v27, %v1608_v49  ;;  %v2007_v34 = vrot.slane %v2005_v46, 1  ;;  %v5973_v32 = vcombine.low %v879_v38, %v7684_v17  ;;  %v838_v27 = vld [vmem:[#allocation2 + $0x54] sm:$0xf] }
  0xdc   : > { %3182 = vmatprep.mubr.bf16.mxu1 %v7653_v52  ;;  %v1998_v9 = vshll.u32 %v7680_v0, 16  ;;  %v2228_v49 = vrot.slane %v5972_v63, 1  ;;  %v6904_v17 = vld [vmem:[#allocation2 + $0x98] ss:$0 sps:$4 sm:$0x11]  }
  0xdd   : > { %v2008_v43 = vor.u32 %v2007_v34, %v2003_v50  ;;  %v823_v47 = vld [vmem:[#allocation2 + $0x9c] sm:$0xe]  ;;  %v7752_v35 = vld [vmem:[#allocation2 + $0x64] sm:$0xf] }
  0xde   : > { %v2000_v29 = vrot.slane %v1998_v9, 1  ;;  %v7725_v9 = vld [vmem:[#allocation2 + $0x50] ss:$0 sps:$4 sm:$0x11]  }
  0xdf   : > { %3272 = vmatmul.mubr.bf16.gmra.mrb[72].mxu0 %v1585_v25  ;;  %v1786_v25 = vrot.slane %v6897_v16, 1  ;;  %v822_v16 = vld [vmem:[#allocation2 + $0x90] sm:$0xe]  ;;  %v2022_v46 = vshll.u32 %v7725_v9, 16 }
  0xe0   : > { %3279 = vmatprep.mubr.bf16.mxu0 %v1781_v31  ;;  %v6906_v31 = vld [vmem:[#allocation2 + $0x44] ss:$0 sps:$4 sm:$0x11]  }
  0xe1   : > { %v1787_v13 = vsel %vm1293_vm9, %v1785_v26, %v1786_v25  ;;  %v2010_v3 = vshll.u32 %v6906_v31, 16  ;;  %v2232_v10 = vrot.slane %v6906_v31, 1  ;;  %v2231_v25 = vrot.slane %v5973_v32, 1 }
  0xe3   : > { %3183 = vmatmul.mubr.bf16.gmra.mrb[76].mxu1 %v1341_v20  ;;  %v877_v20 = vld [vmem:[#allocation2 + $0x24] sm:$0xe]  ;;  %v2012_v26 = vrot.slane %v2010_v3, 1 }
  0xe4   : > { %3384 = vmatprep.mubr.bf16.mxu1 %v1977_v36  ;;  %v836_v36 = vld [vmem:[#allocation2 + $0x48] sm:$0xf]  ;;  %v5971_v15 = vcombine.low %v877_v20, %v7646_v39  ;;  %v2001_v39 = vsel %vm1036_vm3, %v1996_v44, %v2000_v29  ;;  %v1630_v29 = vshll.u32 %v6900_v42, 16 }
  0xe5   : > { %v7711_v53 = vcombine.low %v836_v36, %v7701_v19  ;;  %v2013_v24 = vsel %vm1036_vm3, %v2008_v43, %v2012_v26 }
  0xe6   : > { %v2225_v4 = vrot.slane %v5971_v15, 1  ;;  %v1637_v15 = vshll.u32 %v7568_v2, 16  ;;  %v1632_v8 = vrot.slane %v1630_v29, 1  ;;  %v842_v29 = vld [vmem:[#allocation2 + $0x6c] sm:$0xf] }
  0xe7   : > { %3280 = vmatmul.mubr.bf16.gmra.mrb[76].mxu0 %v1597_v5  ;;  %v2229_v5 = vrot.slane %v7680_v0, 1  ;;  %v7731_v0 = vld [vmem:[#allocation2 + $0x58] sm:$0xf]  ;;  %v2015_v31 = vshrl.u32 %v7711_v53, 16 }
  0xe8   : > { %3287 = vmatprep.mubr.bf16.mxu0 %v1784_v7  ;;  %v7719_v22 = vsel %vm1293_vm9, %v2225_v4, %v2226_v55  ;;  %v1788_v7 = vrot.slane %v5932_v40, 1  ;;  %v1792_v40 = vrot.slane %v6904_v17, 1  ;;  %v840_v4 = vld [vmem:[#allocation2 + $0x60] sm:$0xf]  ;;  %v1639_v34 = vrot.slane %v1637_v15, 1 }
  0xe9   : > { %v7735_v20 = vsel %vm1293_vm9, %v2228_v49, %v2229_v5  ;;  %v6911_v15 = vld [vmem:[#allocation2 + $0xb0] ss:$0 sps:$4 sm:$0x11]  }
  0xeb   : > { %3385 = vmatmul.mubr.bf16.vlgmr.msra.gmra.mrb[80].mxu1 %v7636_v59  ;;  %v1615_v59 = vrot.slane %v1613_v37, 1  ;;  %v1789_v37 = vrot.slane %v6900_v42, 1  ;;  %v2024_v42 = vrot.slane %v2022_v46, 1 }
  0xec   : > { %3392 = vmatprep.mubr.bf16.mxu1 %v1989_v61  ;;  %v2017_v61 = vshll.u32 %v7711_v53, 16 }
  0xed   : > { %v1616_v21 = vor.u32 %v1615_v59, %v1611_v54  ;;  %v1623_v54 = vshrl.u32 %v7550_v18, 16  ;;  %v1790_v36 = vsel %vm1293_vm9, %v1788_v7, %v1789_v37  ;;  %v7745_v18 = vcombine.low %v838_v27, %v7731_v0  ;;  %v824_v37 = vld [vmem:[#allocation2 + $0xa8] sm:$0xe] }
  0xee   : > { %v2019_v44 = vrot.slane %v2017_v61, 1 }
  0xef   : > { %3288 = vmatmul.mubr.bf16.gmra.mrb[80].mxu0 %v1609_v51  ;;  %v1621_v23 = vsel %vm1036_vm3, %v1616_v21, %v1620_v45  ;;  %v1628_v59 = vor.u32 %v1627_v28, %v1623_v54  ;;  %v2029_v6 = vshll.u32 %v7745_v18, 16  ;;  %v1642_v21 = vshll.u32 %v6904_v17, 16  ;;  %v6907_v45 = vld [vmem:[#allocation2 + $0xa4] ss:$0 sps:$4 sm:$0x11]  }
  0xf0   : > { %3295 = vmatprep.mubr.bf16.mxu0 %v1787_v13  ;;  %v2020_v51 = vor.u32 %v2019_v44, %v2015_v31  ;;  %v7749_v13 = vld [vmem:[#allocation2 + $0x5c] ss:$0 sps:$4 sm:$0x11]   ;;  %v7773_v17 = vld [vmem:[#allocation2 + $0x70] sm:$0xf]  ;;  %v5935_v31 = vcombine.low %v824_v37, %v7603_v60  ;;  %v1654_v46 = vshll.u32 %v6907_v45, 16 }
  0xf1   : > { %v1633_v50 = vsel %vm1036_vm3, %v1628_v59, %v1632_v8  ;;  %v2031_v5 = vrot.slane %v2029_v6, 1  ;;  %v2034_v7 = vshll.u32 %v7749_v13, 16  ;;  %v1644_v27 = vrot.slane %v1642_v21, 1 }
  0xf2   : > { %v2025_v57 = vsel %vm1036_vm3, %v2020_v51, %v2024_v42  ;;  %v825_v51 = vld [vmem:[#allocation2 + $0xb4] sm:$0xe]  ;;  %v1656_v6 = vrot.slane %v1654_v46, 1 }
  0xf3   : > { %3393 = vmatmul.mubr.bf16.gmra.mrb[84].mxu1 %v7658_v56  ;;  %v5933_v56 = vcombine.low %v822_v16, %v7562_v12  ;;  %v7740_v12 = vsel %vm1293_vm9, %v2231_v25, %v2232_v10  ;;  %v2027_v16 = vshrl.u32 %v7745_v18, 16  ;;  %v1649_v10 = vshll.u32 %v7590_v58, 16 }
  0xf4   : > { %3400 = vmatprep.mubr.bf16.mxu1 %v2001_v39  ;;  %v5934_v39 = vcombine.low %v823_v47, %v7577_v11  ;;  %v7762_v11 = vcombine.low %v840_v4, %v7752_v35  ;;  %v2036_v54 = vrot.slane %v2034_v7, 1  ;;  %v1797_v4 = vrot.slane %v5935_v31, 1 }
  0xf5   : > { %v1791_v55 = vrot.slane %v5933_v56, 1  ;;  %v1795_v56 = vrot.slane %v6907_v45, 1  ;;  %v2032_v25 = vor.u32 %v2031_v5, %v2027_v16  ;;  %v1651_v44 = vrot.slane %v1649_v10, 1  ;;  %v844_v16 = vld [vmem:[#allocation2 + $0x78] sm:$0xf] }
  0xf6   : > { %v1794_v49 = vrot.slane %v5934_v39, 1  ;;  %v2041_v28 = vshll.u32 %v7762_v11, 16  ;;  %v2039_v47 = vshrl.u32 %v7762_v11, 16  ;;  %v1659_v10 = vshrl.u32 %v7614_v30, 16 }
  0xf7   : > { %3296 = vmatmul.mubr.bf16.gmra.mrb[84].mxu0 %v1621_v23  ;;  %v1793_v38 = vsel %vm1293_vm9, %v1791_v55, %v1792_v40  ;;  %v7770_v23 = vld [vmem:[#allocation2 + $0x68] ss:$0 sps:$4 sm:$0x11]   ;;  %v2037_v8 = vsel %vm1036_vm3, %v2032_v25, %v2036_v54  ;;  %v7783_v40 = vcombine.low %v842_v29, %v7773_v17 }
  0xf8   : > { %3303 = vmatprep.mubr.bf16.mxu0 %v1790_v36  ;;  %v2046_v59 = vshll.u32 %v7770_v23, 16  ;;  %v2043_v55 = vrot.slane %v2041_v28, 1 }
  0xfa   : > { %v2044_v21 = vor.u32 %v2043_v55, %v2039_v47 }
  0xfb   : > { %3401 = vmatmul.mubr.bf16.gmra.mrb[88].mxu1 %v7676_v33  ;;  %v1635_v33 = vshrl.u32 %v7568_v2, 16 }
  0xfc   : > { %3408 = vmatprep.mubr.bf16.mxu1 %v2013_v24  ;;  %v1796_v24 = vsel %vm1293_vm9, %v1794_v49, %v1795_v56  ;;  %v2051_v56 = vshrl.u32 %v7783_v40, 16 }
  0xfd   : > { %v1640_v26 = vor.u32 %v1639_v34, %v1635_v33  ;;  %v2048_v33 = vrot.slane %v2046_v59, 1 }
  0xff   : > { %3304 = vmatmul.mubr.bf16.gmra.mrb[88].mxu0 %v1633_v50  ;;  %v1645_v36 = vsel %vm1036_vm3, %v1640_v26, %v1644_v27  ;;  %v1798_v50 = vrot.slane %v6911_v15, 1  ;;  %v6914_v27 = vld [vmem:[#allocation2 + $0xbc] ss:$0 sps:$4 sm:$0x11]   ;;  %v2049_v49 = vsel %vm1036_vm3, %v2044_v21, %v2048_v33 }
 0x100   : > { %3311 = vmatprep.mubr.bf16.mxu0 %v1793_v38  ;;  %v7789_v38 = vld [vmem:[#allocation2 + $0x74] ss:$0 sps:$4 sm:$0x11]  }
 0x101   : > { %v2058_v54 = vshll.u32 %v7789_v38, 16 }
 0x103   : > { %v6207_v3 = vpop.f32.mrb[0].mxu0  ;;  %3409 = vmatmul.mubr.bf16.gmra.mrb[92].mxu1 %v7695_v48  ;;  %v1647_v48 = vshrl.u32 %v7590_v58, 16  ;;  %v1661_v58 = vshll.u32 %v7614_v30, 16  ;;  %v2060_v59 = vrot.slane %v2058_v54, 1 }
 0x104   : > { %v6208_v63 = vpop.f32.mrb[1].mxu0  ;;  %3416 = vmatprep.mubr.bf16.mxu1 %v2025_v57  ;;  %v2053_v57 = vshll.u32 %v7783_v40, 16 }
 0x105   : > { %v7764_v61 = vadd.f32 %v6208_v63, %v6207_v3  ;;  %v6210_v2 = vpop.f32.mrb[2].mxu0  ;;  %v1652_v42 = vor.u32 %v1651_v44, %v1647_v48  ;;  %v7792_v63 = vld [vmem:[#allocation2 + $0x7c] sm:$0xf]  ;;  %v1663_v37 = vrot.slane %v1661_v58, 1  ;;  %v1671_v58 = vshrl.u32 %v7632_v14, 16 }
 0x106   : > { %v6211_v32 = vpop.f32.mrb[3].mxu0  ;;  %v7801_v26 = vcombine.low %v844_v16, %v7792_v63  ;;  %v2055_v25 = vrot.slane %v2053_v57, 1  ;;  %v7808_v44 = vld [vmem:[#allocation2 + $0x80] ss:$0 sps:$4 sm:$0x11]  }
 0x107   : > { %v7768_v43 = vadd.f32 %v6211_v32, %v6210_v2  ;;  %3312 = vmatmul.mubr.bf16.gmra.mrb[92].mxu0 %v1645_v36  ;;  %v1657_v7 = vsel %vm1036_vm3, %v1652_v42, %v1656_v6  ;;  %v1666_v2 = vshll.u32 %v6911_v15, 16  ;;  %v1799_v32 = vsel %vm1293_vm9, %v1797_v4, %v1798_v50  ;;  %v826_v36 = vld [vmem:[#allocation2 + $0xc0] sm:$0xe]  ;;  %v6918_v57 = vld [vmem:[#allocation2 + $0xc8] ss:$0 sps:$4 sm:$0x11]  }
 0x108   : > { %3319 = vmatprep.mubr.bf16.mxu0 %v1796_v24  ;;  %v1664_v30 = vor.u32 %v1663_v37, %v1659_v10  ;;  %v2065_v46 = vshll.u32 %v7801_v26, 16  ;;  %v1801_v24 = vrot.slane %v6914_v27, 1  ;;  %v2056_v15 = vor.u32 %v2055_v25, %v2051_v56 }
 0x109   : > { %v1668_v28 = vrot.slane %v1666_v2, 1  ;;  %v1678_v42 = vshll.u32 %v6914_v27, 16  ;;  %v2063_v50 = vshrl.u32 %v7801_v26, 16  ;;  %v5937_v21 = vcombine.low %v826_v36, %v7642_v41 }
 0x10a   : > { %v2067_v33 = vrot.slane %v2065_v46, 1  ;;  %v2061_v16 = vsel %vm1036_vm3, %v2056_v15, %v2060_v59  ;;  %v1804_v54 = vrot.slane %v6918_v57, 1 }
 0x10b   : > { %3417 = vmatmul.mubr.bf16.gmra.mrb[96].mxu1 %v7711_v53  ;;  %v5936_v53 = vcombine.low %v825_v51, %v7623_v62  ;;  %v1673_v62 = vshll.u32 %v7632_v14, 16  ;;  %v1669_v4 = vsel %vm1036_vm3, %v1664_v30, %v1668_v28  ;;  %v1680_v37 = vrot.slane %v1678_v42, 1  ;;  %v848_v30 = vld [vmem:[#allocation2 + $0x90] sm:$0xf] }
 0x10c   : > { %3424 = vmatprep.mubr.bf16.mxu1 %v2037_v8  ;;  %v1803_v25 = vrot.slane %v5937_v21, 1 }
 0x10d   : > { %v1800_v31 = vrot.slane %v5936_v53, 1  ;;  %v1675_v51 = vrot.slane %v1673_v62, 1  ;;  %v7833_v62 = vld [vmem:[#allocation2 + $0x8c] ss:$0 sps:$4 sm:$0x11]  }
 0x10f   : > { %3320 = vmatmul.mubr.bf16.gmra.mrb[96].mxu0 %v1657_v7  ;;  %v1676_v10 = vor.u32 %v1675_v51, %v1671_v58  ;;  %v2082_v51 = vshll.u32 %v7833_v62, 16 }
 0x110   : > { %3327 = vmatprep.mubr.bf16.mxu0 %v1799_v32  ;;  %v1685_v32 = vshll.u32 %v7653_v52, 16 }
 0x112   : > { %v6279_v60 = vpop.f32.mrb[0].mxu1  ;;  %v1687_v46 = vrot.slane %v1685_v32, 1 }
 0x113   : > { %v6280_v39 = vpop.f32.mrb[1].mxu1  ;;  %3425 = vmatmul.mubr.bf16.gmra.mrb[100].mxu1 %v7745_v18  ;;  %v7813_v18 = vld [vmem:[#allocation2 + $0x88] sm:$0xf] }
 0x114   : > { %v7787_v34 = vadd.f32 %v6280_v39, %v6279_v60  ;;  %v6282_v3 = vpop.f32.mrb[2].mxu1  ;;  %3432 = vmatprep.mubr.bf16.mxu1 %v2049_v49  ;;  %v846_v60 = vld [vmem:[#allocation2 + $0x84] sm:$0xf]  ;;  %v2068_v49 = vor.u32 %v2067_v33, %v2063_v50 }
 0x115   : > { %v6283_v45 = vpop.f32.mrb[3].mxu1  ;;  %v7825_v53 = vcombine.low %v846_v60, %v7813_v18  ;;  %v1805_v60 = vsel %vm1293_vm9, %v1803_v25, %v1804_v54 }
 0x116   : > { %v7794_v5 = vadd.f32 %v6283_v45, %v6282_v3  ;;  %v6213_v29 = vpop.f32.mrb[4].mxu0  ;;  %v2070_v3 = vshll.u32 %v7808_v44, 16  ;;  %v1802_v45 = vsel %vm1293_vm9, %v1800_v31, %v1801_v24  ;;  %v7836_v31 = vld [vmem:[#allocation2 + $0x94] sm:$0xf]  ;;  %v1690_v24 = vshll.u32 %v6918_v57, 16 }
 0x117   : > { %v6214_v48 = vpop.f32.mrb[5].mxu0  ;;  %3328 = vmatmul.mubr.bf16.gmra.mrb[100].mxu0 %v1669_v4  ;;  %v2077_v28 = vshll.u32 %v7825_v53, 16  ;;  %v7847_v4 = vcombine.low %v848_v30, %v7836_v31  ;;  %v7854_v57 = vld [vmem:[#allocation2 + $0x98] ss:$0 sps:$4 sm:$0x11]  }
 0x118   : > { %v7811_v8 = vadd.f32 %v6214_v48, %v6213_v29  ;;  %v6216_v47 = vpop.f32.mrb[6].mxu0  ;;  %3335 = vmatprep.mubr.bf16.mxu0 %v1802_v45  ;;  %v2072_v56 = vrot.slane %v2070_v3, 1  ;;  %v1681_v48 = vsel %vm1036_vm3, %v1676_v10, %v1680_v37  ;;  %v1692_v3 = vrot.slane %v1690_v24, 1  ;;  %v850_v37 = vld [vmem:[#allocation2 + $0x9c] sm:$0xf] }
 0x119   : > { %v6217_v55 = vpop.f32.mrb[7].mxu0  ;;  %v2079_v58 = vrot.slane %v2077_v28, 1  ;;  %v2089_v32 = vshll.u32 %v7847_v4, 16  ;;  %v2087_v25 = vshrl.u32 %v7847_v4, 16  ;;  %v7873_v24 = vld [vmem:[#allocation2 + $0xac] sm:$0xf] }
 0x11a   : > { %v7816_v6 = vadd.f32 %v6217_v55, %v6216_v47  ;;  %v6285_v39 = vpop.f32.mrb[4].mxu1  ;;  %v2073_v15 = vsel %vm1036_vm3, %v2068_v49, %v2072_v56  ;;  %v2075_v55 = vshrl.u32 %v7825_v53, 16  ;;  %v2094_v49 = vshll.u32 %v7854_v57, 16 }
 0x11b   : > { %v6286_v14 = vpop.f32.mrb[5].mxu1  ;;  %3433 = vmatmul.mubr.bf16.gmra.mrb[104].mxu1 %v7762_v11  ;;  %v1683_v11 = vshrl.u32 %v7653_v52, 16  ;;  %v2091_v54 = vrot.slane %v2089_v32, 1 }
 0x11c   : > { %v7827_v7 = vadd.f32 %v6286_v14, %v6285_v39  ;;  %v6288_v2 = vpop.f32.mrb[6].mxu1  ;;  %3440 = vmatprep.mubr.bf16.mxu1 %v2061_v16  ;;  %v2080_v14 = vor.u32 %v2079_v58, %v2075_v55 }
 0x11d   : > { %v6289_v41 = vpop.f32.mrb[7].mxu1  ;;  %v1688_v33 = vor.u32 %v1687_v46, %v1683_v11  ;;  %v2092_v30 = vor.u32 %v2091_v54, %v2087_v25  ;;  %v880_v11 = vld [vmem:[#allocation2 + $0x48] sm:$0xe] }
 0x11e   : > { %v7831_v27 = vadd.f32 %v6289_v41, %v6288_v2  ;;  %v2084_v2 = vrot.slane %v2082_v51, 1  ;;  %v7859_v41 = vld [vmem:[#allocation2 + $0xa0] sm:$0xf] }
 0x11f   : > { %3336 = vmatmul.mubr.bf16.gmra.mrb[104].mxu0 %v1681_v48  ;;  %v7866_v28 = vcombine.low %v850_v37, %v7859_v41  ;;  %v2096_v48 = vrot.slane %v2094_v49, 1 }
 0x120   : > { %v6219_v29 = vpop.f32.mrb[8].mxu0  ;;  %3343 = vmatprep.mubr.bf16.mxu0 %v1805_v60  ;;  %v2085_v56 = vsel %vm1036_vm3, %v2080_v14, %v2084_v2  ;;  %v7890_v14 = vld [vmem:[#allocation2 + $0xb0] ss:$0 sps:$4 sm:$0x11]  }
 0x121   : > { %v6220_v36 = vpop.f32.mrb[9].mxu0  ;;  %v2101_v46 = vshll.u32 %v7866_v28, 16 }
 0x122   : > { %v7841_v59 = vadd.f32 %v6220_v36, %v6219_v29  ;;  %v6222_v47 = vpop.f32.mrb[10].mxu0  ;;  %v7870_v29 = vld [vmem:[#allocation2 + $0xa4] ss:$0 sps:$4 sm:$0x11]   ;;  %v852_v36 = vld [vmem:[#allocation2 + $0xa8] sm:$0xf] }
 0x123   : > { %v6223_v42 = vpop.f32.mrb[11].mxu0  ;;  %3441 = vmatmul.mubr.bf16.gmra.mrb[108].mxu1 %v7783_v40  ;;  %v1693_v40 = vsel %vm1036_vm3, %v1688_v33, %v1692_v3  ;;  %v2106_v55 = vshll.u32 %v7870_v29, 16  ;;  %v2103_v58 = vrot.slane %v2101_v46, 1  ;;  %v7880_v51 = vcombine.low %v852_v36, %v7873_v24  ;;  %v881_v33 = vld [vmem:[#allocation2 + $0x54] sm:$0xe] }
 0x124   : > { %v6291_v52 = vpop.f32.mrb[8].mxu1  ;;  %v7849_v39 = vadd.f32 %v6223_v42, %v6222_v47  ;;  %3448 = vmatprep.mubr.bf16.mxu1 %v2073_v15  ;;  %v5974_v47 = vcombine.low %v880_v11, %v7701_v19  ;;  %v2235_v19 = vrot.slane %v7725_v9, 1  ;;  %v7894_v9 = vld [vmem:[#allocation2 + $0xb8] sm:$0xf] }
 0x125   : > { %v6292_v50 = vpop.f32.mrb[9].mxu1  ;;  %v2108_v32 = vrot.slane %v2106_v55, 1  ;;  %v2113_v37 = vshll.u32 %v7880_v51, 16  ;;  %v2111_v46 = vshrl.u32 %v7880_v51, 16 }
 0x126   : > { %v7852_v21 = vadd.f32 %v6292_v50, %v6291_v52  ;;  %v6294_v45 = vpop.f32.mrb[10].mxu1  ;;  %v2234_v3 = vrot.slane %v5974_v47, 1 }
 0x127   : > { %v6295_v16 = vpop.f32.mrb[11].mxu1  ;;  %3344 = vmatmul.mubr.bf16.gmra.mrb[108].mxu0 %v1693_v40  ;;  %v854_v40 = vld [vmem:[#allocation2 + $0xb4] sm:$0xf]  ;;  %v2115_v36 = vrot.slane %v2113_v37, 1 }
 0x128   : > { %v7857_v10 = vadd.f32 %v6295_v16, %v6294_v45  ;;  %6679 = vmatprep.mubr.bf16.mxu0 %v7716_v1  ;;  %v2099_v1 = vshrl.u32 %v7866_v28, 16  ;;  %v882_v16 = vld [vmem:[#allocation2 + $0x60] sm:$0xe]  ;;  %v2236_v54 = vsel %vm1293_vm9, %v2234_v3, %v2235_v19 }
 0x129   : > { %v2116_v19 = vor.u32 %v2115_v36, %v2111_v46 }
 0x12a   : > { %v2104_v2 = vor.u32 %v2103_v58, %v2099_v1  ;;  %v884_v1 = vld [vmem:[#allocation2 + $0x78] sm:$0xe]  ;;  %v7912_v58 = vld [vmem:[#allocation2 + $0xbc] ss:$0 sps:$4 sm:$0x11]  }
 0x12b   : > { %3449 = vmatmul.mubr.bf16.gmra.mrb[112].mxu1 %v7801_v26  ;;  %v2097_v26 = vsel %vm1036_vm3, %v2092_v30, %v2096_v48  ;;  %v2118_v30 = vshll.u32 %v7890_v14, 16 }
 0x12c   : > { %3456 = vmatprep.mubr.bf16.mxu1 %v2085_v56  ;;  %v2109_v11 = vsel %vm1036_vm3, %v2104_v2, %v2108_v32 }
 0x12f   : > { %6680 = vmatmul.mubr.bf16.vlgmr.msra.gmra.mrb[112].mxu0 %v7719_v22 }
 0x130   : > { %v6225_v15 = vpop.f32.mrb[12].mxu0  ;;  %6683 = vmatprep.mubr.bf16.mxu0 %v7735_v20  ;;  %v5976_v20 = vcombine.low %v882_v16, %v7752_v35  ;;  %v2238_v35 = vrot.slane %v7749_v13, 1  ;;  %v856_v16 = vld [vmem:[#allocation2 + $0xc0] sm:$0xf] }
 0x131   : > { %v6226_v60 = vpop.f32.mrb[13].mxu0 }
 0x132   : > { %v7882_v42 = vadd.f32 %v6226_v60, %v6225_v15  ;;  %v6228_v52 = vpop.f32.mrb[14].mxu0  ;;  %v2240_v55 = vrot.slane %v5976_v20, 1  ;;  %v2241_v60 = vrot.slane %v7770_v23, 1  ;;  %v7921_v23 = vld [vmem:[%s9000_s2] ss:$0 sm:$0xff] }
 0x133   : > { %3457 = vmatmul.mubr.bf16.gmra.mrb[116].mxu1 %v7825_v53  ;;  %v6229_v50 = vpop.f32.mrb[15].mxu0  ;;  %v5975_v53 = vcombine.low %v881_v33, %v7731_v0  ;;  %v7904_v0 = vcombine.low %v854_v40, %v7894_v9  ;;  %v5978_v40 = vcombine.low %v884_v1, %v7792_v63  ;;  %v2907_v63 = vadd.f32 %v7768_v43, %v7921_v23 }
 0x134   : > { %3464 = vmatprep.mubr.bf16.mxu1 %v2097_v26  ;;  %v7888_v45 = vadd.f32 %v6229_v50, %v6228_v52  ;;  %v883_v26 = vld [vmem:[#allocation2 + $0x6c] sm:$0xe]  ;;  %v2120_v50 = vrot.slane %v2118_v30, 1  ;;  %v2247_v1 = vrot.slane %v7808_v44, 1 }
 0x135   : > { %v2237_v47 = vrot.slane %v5975_v53, 1  ;;  %v2125_v33 = vshll.u32 %v7904_v0, 16  ;;  %v5977_v53 = vcombine.low %v883_v26, %v7773_v17  ;;  %v2123_v30 = vshrl.u32 %v7904_v0, 16 }
 0x136   : > { %v6297_v22 = vpop.f32.mrb[12].mxu1  ;;  %v2121_v36 = vsel %vm1036_vm3, %v2116_v19, %v2120_v50  ;;  %v2246_v26 = vrot.slane %v5978_v40, 1  ;;  %v885_v19 = vld [vmem:[#allocation2 + $0x84] sm:$0xe] }
 0x137   : > { %v6298_v49 = vpop.f32.mrb[13].mxu1  ;;  %6684 = vmatmul.mubr.bf16.gmra.mrb[116].mxu0 %v7740_v12  ;;  %v2239_v13 = vsel %vm1293_vm9, %v2237_v47, %v2238_v35  ;;  %v2127_v47 = vrot.slane %v2125_v33, 1  ;;  %v7947_v50 = vld [vmem:[#allocation2 + $0xc8] ss:$0 sps:$4 sm:$0x11]  }
 0x138   : > { %v7897_v56 = vadd.f32 %v6298_v49, %v6297_v22  ;;  %v6300_v25 = vpop.f32.mrb[14].mxu1  ;;  %6687 = vmatprep.mubr.bf16.mxu0 %v2236_v54  ;;  %v2242_v22 = vsel %vm1293_vm9, %v2240_v55, %v2241_v60  ;;  %v2904_v49 = vadd.f32 %v7764_v61, %v7921_v23  ;;  %v2243_v55 = vrot.slane %v5977_v53, 1 }
 0x139   : > { %v6301_v48 = vpop.f32.mrb[15].mxu1  ;;  %v2244_v60 = vrot.slane %v7789_v38, 1  ;;  %v2128_v43 = vor.u32 %v2127_v47, %v2123_v30  ;;  %v2248_v44 = vsel %vm1293_vm9, %v2246_v26, %v2247_v1  ;;  %v887_v26 = vld [vmem:[#allocation2 + $0x9c] sm:$0xe] }
 0x13a   : > { %v7906_v15 = vadd.f32 %v6301_v48, %v6300_v25  ;;  %v2130_v48 = vshll.u32 %v7912_v58, 16 }
 0x13b   : > { %3465 = vmatmul.mubr.bf16.gmra.mrb[120].mxu1 %v7847_v4  ;;  %v7916_v4 = vld [vmem:[#allocation2 + $0xc4] sm:$0xf]  ;;  %v2245_v38 = vsel %vm1293_vm9, %v2243_v55, %v2244_v60  ;;  %v2250_v60 = vrot.slane %v7833_v62, 1 }
 0x13c   : > { %3472 = vmatprep.mubr.bf16.mxu1 %v2109_v11  ;;  %v7936_v17 = vcombine.low %v856_v16, %v7916_v4  ;;  %v2132_v33 = vrot.slane %v2130_v48, 1  ;;  %v7950_v16 = vld [vmem:[#allocation2 + $0xd0] sm:$0xf] }
 0x13d   : > { %v6231_v52 = vpop.f32.mrb[16].mxu0 }
 0x13e   : > { %v6319_v3 = vpop.f32.mrb[16].mxu1  ;;  %v6232_v12 = vpop.f32.mrb[17].mxu0  ;;  %v2133_v30 = vsel %vm1036_vm3, %v2128_v43, %v2132_v33  ;;  %v2135_v48 = vshrl.u32 %v7936_v17, 16  ;;  %v2253_v43 = vrot.slane %v7854_v57, 1  ;;  %v888_v33 = vld [vmem:[#allocation2 + $0xa8] sm:$0xe] }
 0x13f   : > { %v6320_v2 = vpop.f32.mrb[17].mxu1  ;;  %v7923_v32 = vadd.f32 %v6232_v12, %v6231_v52  ;;  %v6234_v37 = vpop.f32.mrb[18].mxu0  ;;  %6688 = vmatmul.mubr.bf16.gmra.mrb[120].mxu0 %v2239_v13  ;;  %v2137_v13 = vshll.u32 %v7936_v17, 16 }
 0x140   : > { %v6321_v20 = vadd.f32 %v6320_v2, %v6319_v3  ;;  %v6322_v25 = vpop.f32.mrb[18].mxu1  ;;  %v6235_v54 = vpop.f32.mrb[19].mxu0  ;;  %6691 = vmatprep.mubr.bf16.mxu0 %v2242_v22  ;;  %v886_v3 = vld [vmem:[#allocation2 + $0x90] sm:$0xe]  ;;  %v2912_v22 = vadd.f32 %v7811_v8, %v7921_v23 }
 0x141   : > { %v6323_v11 = vpop.f32.mrb[19].mxu1  ;;  %v7932_v46 = vadd.f32 %v6235_v54, %v6234_v37  ;;  %v5979_v37 = vcombine.low %v885_v19, %v7813_v18  ;;  %v2915_v18 = vadd.f32 %v7816_v6, %v7921_v23 }
 0x142   : > { %v7940_v61 = vadd.f32 %v6321_v20, %v2904_v49  ;;  %v6324_v35 = vadd.f32 %v6323_v11, %v6322_v25  ;;  %v5980_v49 = vcombine.low %v886_v3, %v7836_v31  ;;  %v2142_v20 = vshll.u32 %v7947_v50, 16 }
 0x143   : > { %3473 = vmatmul.mubr.bf16.gmra.mrb[124].mxu1 %v7866_v28  ;;  %v858_v28 = vld [vmem:[#allocation2 + $0xcc] sm:$0xf]  ;;  %v2139_v11 = vrot.slane %v2137_v13, 1  ;;  %v2249_v55 = vrot.slane %v5979_v37, 1  ;;  %v2920_v37 = vadd.f32 %v7841_v59, %v7921_v23 }
 0x144   : > { %v7945_v52 = vadd.f32 %v6324_v35, %v2907_v63  ;;  %3480 = vmatprep.mubr.bf16.mxu1 %v2121_v36  ;;  %v7962_v36 = vcombine.low %v858_v28, %v7950_v16  ;;  %v2252_v6 = vrot.slane %v5980_v49, 1  ;;  %v7977_v28 = vld [vmem:[#allocation2 + $0xd4] ss:$0 sps:$4 sm:$0x11]  }
 0x145   : > { %v2140_v13 = vor.u32 %v2139_v11, %v2135_v48  ;;  %v2251_v62 = vsel %vm1293_vm9, %v2249_v55, %v2250_v60  ;;  %v2154_v48 = vshll.u32 %v7977_v28, 16  ;;  %v2256_v60 = vrot.slane %v7870_v29, 1 }
 0x146   : > { %v6325_v12 = vpop.f32.mrb[20].mxu1 }
 0x147   : > { %v6326_v2 = vpop.f32.mrb[21].mxu1  ;;  %6692 = vmatmul.mubr.bf16.gmra.mrb[124].mxu0 %v2245_v38 }
 0x148   : > { %v6327_v53 = vadd.f32 %v6326_v2, %v6325_v12  ;;  %v6328_v40 = vpop.f32.mrb[22].mxu1  ;;  %6695 = vmatprep.mubr.bf16.mxu0 %v2248_v44  ;;  %v2144_v12 = vrot.slane %v2142_v20, 1  ;;  %v5981_v44 = vcombine.low %v887_v26, %v7859_v41  ;;  %v2923_v41 = vadd.f32 %v7849_v39, %v7921_v23 }
 0x149   : > { %v6237_v25 = vpop.f32.mrb[20].mxu0  ;;  %v6329_v54 = vpop.f32.mrb[23].mxu1  ;;  %v2259_v39 = vrot.slane %v7890_v14, 1 }
 0x14a   : > { %v7966_v8 = vadd.f32 %v6327_v53, %v2912_v22  ;;  %v6238_v47 = vpop.f32.mrb[21].mxu0  ;;  %v6330_v63 = vadd.f32 %v6329_v54, %v6328_v40  ;;  %v2254_v53 = vsel %vm1293_vm9, %v2252_v6, %v2253_v43  ;;  %v5982_v40 = vcombine.low %v888_v33, %v7873_v24  ;;  %v889_v6 = vld [vmem:[#allocation2 + $0xb4] sm:$0xe] }
 0x14b   : > { %v7968_v31 = vadd.f32 %v6238_v47, %v6237_v25  ;;  %v6240_v35 = vpop.f32.mrb[22].mxu0  ;;  %3481 = vmatmul.mubr.bf16.gmra.mrb[128].mxu1 %v7880_v51  ;;  %v2149_v51 = vshll.u32 %v7962_v36, 16  ;;  %v2145_v25 = vsel %vm1036_vm3, %v2140_v13, %v2144_v12  ;;  %v2147_v54 = vshrl.u32 %v7962_v36, 16  ;;  %v890_v12 = vld [vmem:[#allocation2 + $0xc0] sm:$0xe] }
 0x14c   : > { %v7972_v1 = vadd.f32 %v6330_v63, %v2915_v18  ;;  %v6241_v19 = vpop.f32.mrb[23].mxu0  ;;  %3488 = vmatprep.mubr.bf16.mxu1 %v2133_v30  ;;  %v2255_v55 = vrot.slane %v5981_v44, 1  ;;  %v2156_v33 = vrot.slane %v2154_v48, 1  ;;  %v5983_v29 = vcombine.low %v889_v6, %v7894_v9  ;;  %v891_v48 = vld [vmem:[#allocation2 + $0xcc] sm:$0xe] }
 0x14d   : > { %v7975_v3 = vadd.f32 %v6241_v19, %v6240_v35  ;;  %v2151_v30 = vrot.slane %v2149_v51, 1  ;;  %v2258_v19 = vrot.slane %v5982_v40, 1 }
 0x14e   : > { %v6331_v38 = vpop.f32.mrb[24].mxu1  ;;  %v2261_v9 = vrot.slane %v5983_v29, 1  ;;  %v2944_v29 = vadd.f32 %v7968_v31, %v7921_v23 }
 0x14f   : > { %v6332_v2 = vpop.f32.mrb[25].mxu1  ;;  %6696 = vmatmul.mubr.bf16.gmra.mrb[128].mxu0 %v2251_v62  ;;  %v2152_v43 = vor.u32 %v2151_v30, %v2147_v54  ;;  %v2260_v14 = vsel %vm1293_vm9, %v2258_v19, %v2259_v39 }
 0x150   : > { %v6333_v22 = vadd.f32 %v6332_v2, %v6331_v38  ;;  %v6334_v57 = vpop.f32.mrb[26].mxu1  ;;  %6699 = vmatprep.mubr.bf16.mxu0 %v2254_v53  ;;  %v2257_v38 = vsel %vm1293_vm9, %v2255_v55, %v2256_v60  ;;  %v5985_v60 = vcombine.low %v891_v48, %v7950_v16  ;;  %v2268_v16 = vrot.slane %v7977_v28, 1 }
 0x151   : > { %v6243_v49 = vpop.f32.mrb[24].mxu0  ;;  %v6335_v20 = vpop.f32.mrb[27].mxu1 }
 0x152   : > { %v7991_v11 = vadd.f32 %v6333_v22, %v2920_v37  ;;  %v6244_v59 = vpop.f32.mrb[25].mxu0  ;;  %v6336_v18 = vadd.f32 %v6335_v20, %v6334_v57  ;;  %v2157_v37 = vsel %vm1036_vm3, %v2152_v43, %v2156_v33  ;;  %v5984_v22 = vcombine.low %v890_v12, %v7916_v4 }
 0x153   : > { %v7993_v47 = vadd.f32 %v6244_v59, %v6243_v49  ;;  %v6246_v24 = vpop.f32.mrb[26].mxu0  ;;  %3489 = vmatmul.mubr.bf16.gmra.mrb[132].mxu1 %v7904_v0  ;;  %v2928_v0 = vadd.f32 %v7882_v42, %v7921_v23  ;;  %v2931_v57 = vadd.f32 %v7888_v45, %v7921_v23  ;;  %v2265_v45 = vrot.slane %v7947_v50, 1 }
 0x154   : > { %v7996_v63 = vadd.f32 %v6336_v18, %v2923_v41  ;;  %v6247_v35 = vpop.f32.mrb[27].mxu0  ;;  %3496 = vmatprep.mubr.bf16.mxu1 %v2145_v25  ;;  %v2262_v25 = vrot.slane %v7912_v58, 1  ;;  %v2264_v30 = vrot.slane %v5984_v22, 1  ;;  %v2939_v50 = vadd.f32 %v7932_v46, %v7921_v23 }
 0x155   : > { %v8000_v26 = vadd.f32 %v6247_v35, %v6246_v24  ;;  %v2936_v24 = vadd.f32 %v7923_v32, %v7921_v23  ;;  %v2267_v12 = vrot.slane %v5985_v60, 1  ;;  %v2947_v22 = vadd.f32 %v7975_v3, %v7921_v23 }
 0x156   : > { %v6337_v13 = vpop.f32.mrb[28].mxu1  ;;  %v2263_v35 = vsel %vm1293_vm9, %v2261_v9, %v2262_v25  ;;  %v2266_v19 = vsel %vm1293_vm9, %v2264_v30, %v2265_v45  ;;  %v2952_v45 = vadd.f32 %v7993_v47, %v7921_v23 }
 0x157   : > { %v6338_v51 = vpop.f32.mrb[29].mxu1  ;;  %6700 = vmatmul.mubr.bf16.gmra.mrb[132].mxu0 %v2257_v38 }
 0x158   : > { %v6339_v62 = vadd.f32 %v6338_v51, %v6337_v13  ;;  %v6340_v2 = vpop.f32.mrb[30].mxu1  ;;  %6703 = vmatprep.mubr.bf16.mxu0 %v2260_v14 }
 0x159   : > { %v6341_v44 = vpop.f32.mrb[31].mxu1  ;;  %v6249_v42 = vpop.f32.mrb[28].mxu0 }
 0x15a   : > { %v8011_v53 = vadd.f32 %v6339_v62, %v2928_v0  ;;  %v6342_v40 = vadd.f32 %v6341_v44, %v6340_v2  ;;  %v6250_v49 = vpop.f32.mrb[29].mxu0  ;;  %v2269_v44 = vsel %vm1293_vm9, %v2267_v12, %v2268_v16 }
 0x15b   : > { %3497 = vmatmul.mubr.bf16.gmra.mrb[136].mxu1 %v7936_v17  ;;  %v8017_v54 = vadd.f32 %v6250_v49, %v6249_v42  ;;  %v6252_v4 = vpop.f32.mrb[30].mxu0 }
 0x15c   : > { %v8014_v20 = vadd.f32 %v6342_v40, %v2931_v57  ;;  %3504 = vmatprep.mubr.bf16.mxu1 %v2157_v37  ;;  %v6253_v41 = vpop.f32.mrb[31].mxu0 }
 0x15d   : > { %v8020_v18 = vadd.f32 %v6253_v41, %v6252_v4  ;;  %v2960_v47 = vadd.f32 %v8017_v54, %v7921_v23 }
 0x15e   : > { %v6343_v59 = vpop.f32.mrb[32].mxu1 }
 0x15f   : > { %v6344_v17 = vpop.f32.mrb[33].mxu1  ;;  %6704 = vmatmul.mubr.bf16.gmra.mrb[136].mxu0 %v2263_v35 }
 0x160   : > { %v6345_v55 = vadd.f32 %v6344_v17, %v6343_v59  ;;  %v6346_v58 = vpop.f32.mrb[34].mxu1  ;;  %6707 = vmatprep.mubr.bf16.mxu0 %v2266_v19  ;;  %v2955_v17 = vadd.f32 %v8000_v26, %v7921_v23  ;;  %v2963_v26 = vadd.f32 %v8020_v18, %v7921_v23 }
 0x161   : > { %v6347_v39 = vpop.f32.mrb[35].mxu1  ;;  %v6255_v33 = vpop.f32.mrb[32].mxu0 }
 0x162   : > { %v8029_v6 = vadd.f32 %v6345_v55, %v2936_v24  ;;  %v6348_v43 = vadd.f32 %v6347_v39, %v6346_v58  ;;  %v6256_v32 = vpop.f32.mrb[33].mxu0 }
 0x163   : > { %3505 = vmatmul.mubr.bf16.gmra.mrb[140].mxu1 %v7962_v36  ;;  %v6257_v51 = vadd.f32 %v6256_v32, %v6255_v33  ;;  %v6258_v0 = vpop.f32.mrb[34].mxu0 }
 0x164   : > { %v8032_v13 = vadd.f32 %v6348_v43, %v2939_v50  ;;  %v6259_v38 = vpop.f32.mrb[35].mxu0 }
 0x165   : > { %v6260_v2 = vadd.f32 %v6259_v38, %v6258_v0 }
 0x166   : > { %v6349_v62 = vpop.f32.mrb[36].mxu1 }
 0x167   : > { %v6350_v46 = vpop.f32.mrb[37].mxu1  ;;  %6708 = vmatmul.mubr.bf16.gmra.mrb[140].mxu0 %v2269_v44 }
 0x168   : > { %v6351_v14 = vadd.f32 %v6350_v46, %v6349_v62  ;;  %v6352_v36 = vpop.f32.mrb[38].mxu1 }
 0x169   : > { %v6353_v37 = vpop.f32.mrb[39].mxu1 }
 0x16a   : > { %v8040_v57 = vadd.f32 %v6351_v14, %v2944_v29  ;;  %v6354_v28 = vadd.f32 %v6353_v37, %v6352_v36  ;;  %v6261_v40 = vpop.f32.mrb[36].mxu0  ;;  %v2968_v37 = vadd.f32 %v6257_v51, %v7921_v23 }
 0x16b   : > { %v6262_v49 = vpop.f32.mrb[37].mxu0 }
 0x16c   : > { %v8042_v42 = vadd.f32 %v6354_v28, %v2947_v22  ;;  %v6263_v9 = vadd.f32 %v6262_v49, %v6261_v40  ;;  %v6264_v25 = vpop.f32.mrb[38].mxu0 }
 0x16d   : > { %v6265_v31 = vpop.f32.mrb[39].mxu0 }
 0x16e   : > { %v6355_v4 = vpop.f32.mrb[40].mxu1  ;;  %v6266_v48 = vadd.f32 %v6265_v31, %v6264_v25  ;;  %v2976_v51 = vadd.f32 %v6263_v9, %v7921_v23 }
 0x16f   : > { %v6356_v30 = vpop.f32.mrb[41].mxu1 }
 0x170   : > { %v6357_v41 = vadd.f32 %v6356_v30, %v6355_v4  ;;  %v6358_v59 = vpop.f32.mrb[42].mxu1  ;;  %v2971_v4 = vadd.f32 %v6260_v2, %v7921_v23 }
 0x171   : > { %v6359_v3 = vpop.f32.mrb[43].mxu1 }
 0x172   : > { %v8048_v24 = vadd.f32 %v6357_v41, %v2952_v45  ;;  %v6360_v35 = vadd.f32 %v6359_v3, %v6358_v59  ;;  %v6267_v58 = vpop.f32.mrb[40].mxu0 }
 0x173   : > { %v6268_v60 = vpop.f32.mrb[41].mxu0 }
 0x174   : > { %v8050_v55 = vadd.f32 %v6360_v35, %v2955_v17  ;;  %v6269_v19 = vadd.f32 %v6268_v60, %v6267_v58  ;;  %v6270_v50 = vpop.f32.mrb[42].mxu0 }
 0x175   : > { %v6271_v33 = vpop.f32.mrb[43].mxu0 }
 0x176   : > { %v6361_v39 = vpop.f32.mrb[44].mxu1  ;;  %v6272_v16 = vadd.f32 %v6271_v33, %v6270_v50  ;;  %v2979_v50 = vadd.f32 %v6266_v48, %v7921_v23  ;;  %v2984_v48 = vadd.f32 %v6269_v19, %v7921_v23 }
 0x177   : > { %v6362_v43 = vpop.f32.mrb[45].mxu1 }
 0x178   : > { %v6363_v32 = vadd.f32 %v6362_v43, %v6361_v39  ;;  %v6364_v12 = vpop.f32.mrb[46].mxu1 }
 0x179   : > { %v6365_v0 = vpop.f32.mrb[47].mxu1 }
 0x17a   : > { %v8056_v38 = vadd.f32 %v6363_v32, %v2960_v47  ;;  %v6366_v62 = vadd.f32 %v6365_v0, %v6364_v12  ;;  %v6273_v29 = vpop.f32.mrb[44].mxu0 }
 0x17b   : > { %v6274_v14 = vpop.f32.mrb[45].mxu0 }
 0x17c   : > { %v8058_v46 = vadd.f32 %v6366_v62, %v2963_v26  ;;  %v6275_v54 = vadd.f32 %v6274_v14, %v6273_v29  ;;  %v6276_v22 = vpop.f32.mrb[46].mxu0 }
 0x17d   : > { %v6277_v49 = vpop.f32.mrb[47].mxu0 }
 0x17e   : > { %v6367_v44 = vpop.f32.mrb[48].mxu1  ;;  %v6278_v18 = vadd.f32 %v6277_v49, %v6276_v22  ;;  %v2987_v22 = vadd.f32 %v6272_v16, %v7921_v23  ;;  %v2992_v16 = vadd.f32 %v6275_v54, %v7921_v23 }
 0x17f   : > { %v6368_v36 = vpop.f32.mrb[49].mxu1 }
 0x180   : > { %v6369_v28 = vadd.f32 %v6368_v36, %v6367_v44  ;;  %v6370_v40 = vpop.f32.mrb[50].mxu1 }
 0x181   : > { %v6371_v25 = vpop.f32.mrb[51].mxu1 }
 0x182   : > { %v8062_v31 = vadd.f32 %v6369_v28, %v2968_v37  ;;  %v6372_v30 = vadd.f32 %v6371_v25, %v6370_v40  ;;  %v6431_v41 = vpop.f32.mrb[48].mxu0 }
 0x183   : > { %v6432_v3 = vpop.f32.mrb[49].mxu0 }
 0x184   : > { %v8064_v45 = vadd.f32 %v6372_v30, %v2971_v4  ;;  %v6433_v35 = vadd.f32 %v6432_v3, %v6431_v41  ;;  %v6434_v58 = vpop.f32.mrb[50].mxu0 }
 0x185   : > { %v6435_v43 = vpop.f32.mrb[51].mxu0 }
 0x186   : > { %v6373_v59 = vpop.f32.mrb[52].mxu1  ;;  %v8069_v47 = vadd.f32 %v6433_v35, %v7940_v61  ;;  %v6436_v33 = vadd.f32 %v6435_v43, %v6434_v58 }
 0x187   : > { %v6374_v17 = vpop.f32.mrb[53].mxu1 }
 0x188   : > { %v6375_v60 = vadd.f32 %v6374_v17, %v6373_v59  ;;  %v6376_v39 = vpop.f32.mrb[54].mxu1  ;;  %v8074_v0 = vadd.f32 %v6436_v33, %v7945_v52 }
 0x189   : > { %v6377_v2 = vpop.f32.mrb[55].mxu1 }
 0x18a   : > { %v8071_v32 = vadd.f32 %v6375_v60, %v2976_v51  ;;  %v6378_v12 = vadd.f32 %v6377_v2, %v6376_v39  ;;  %v6437_v9 = vpop.f32.mrb[52].mxu0  ;;  %v2995_v60 = vadd.f32 %v6278_v18, %v7921_v23  ;;  %v3000_v18 = vadd.f32 %v7787_v34, %v7921_v23 }
 0x18b   : > { %v6438_v29 = vpop.f32.mrb[53].mxu0 }
 0x18c   : > { %v8076_v26 = vadd.f32 %v6378_v12, %v2979_v50  ;;  %v6439_v14 = vadd.f32 %v6438_v29, %v6437_v9  ;;  %v6440_v36 = vpop.f32.mrb[54].mxu0 }
 0x18d   : > { %v6441_v28 = vpop.f32.mrb[55].mxu0 }
 0x18e   : > { %v6379_v62 = vpop.f32.mrb[56].mxu1  ;;  %v8081_v49 = vadd.f32 %v6439_v14, %v7966_v8  ;;  %v6442_v52 = vadd.f32 %v6441_v28, %v6440_v36 }
 0x18f   : > { %v6380_v44 = vpop.f32.mrb[57].mxu1 }
 0x190   : > { %v6381_v37 = vadd.f32 %v6380_v44, %v6379_v62  ;;  %v6382_v61 = vpop.f32.mrb[58].mxu1  ;;  %v8086_v30 = vadd.f32 %v6442_v52, %v7972_v1 }
 0x191   : > { %v6383_v40 = vpop.f32.mrb[59].mxu1 }
 0x192   : > { %v8083_v25 = vadd.f32 %v6381_v37, %v2984_v48  ;;  %v6384_v4 = vadd.f32 %v6383_v40, %v6382_v61  ;;  %v6443_v19 = vpop.f32.mrb[56].mxu0  ;;  %v3003_v37 = vadd.f32 %v7794_v5, %v7921_v23  ;;  %v3008_v5 = vadd.f32 %v7827_v7, %v7921_v23 }
 0x193   : > { %v6444_v3 = vpop.f32.mrb[57].mxu0 }
 0x194   : > { %v8088_v41 = vadd.f32 %v6384_v4, %v2987_v22  ;;  %v6445_v51 = vadd.f32 %v6444_v3, %v6443_v19  ;;  %v6446_v35 = vpop.f32.mrb[58].mxu0 }
 0x195   : > { %v6447_v39 = vpop.f32.mrb[59].mxu0 }
 0x196   : > { %v6385_v59 = vpop.f32.mrb[60].mxu1  ;;  %v8093_v43 = vadd.f32 %v6445_v51, %v7991_v11  ;;  %v6448_v1 = vadd.f32 %v6447_v39, %v6446_v35 }
 0x197   : > { %v6386_v17 = vpop.f32.mrb[61].mxu1 }
 0x198   : > { %v6387_v58 = vadd.f32 %v6386_v17, %v6385_v59  ;;  %v6388_v8 = vpop.f32.mrb[62].mxu1  ;;  %v8098_v12 = vadd.f32 %v6448_v1, %v7996_v63 }
 0x199   : > { %v6389_v50 = vpop.f32.mrb[63].mxu1 }
 0x19a   : > { %v8095_v2 = vadd.f32 %v6387_v58, %v2992_v16  ;;  %v6390_v33 = vadd.f32 %v6389_v50, %v6388_v8  ;;  %v6449_v54 = vpop.f32.mrb[60].mxu0  ;;  %v3011_v58 = vadd.f32 %v7831_v27, %v7921_v23  ;;  %v3016_v27 = vadd.f32 %v7852_v21, %v7921_v23 }
 0x19b   : > { %v6450_v29 = vpop.f32.mrb[61].mxu0 }
 0x19c   : > { %v8100_v9 = vadd.f32 %v6390_v33, %v2995_v60  ;;  %v6451_v48 = vadd.f32 %v6450_v29, %v6449_v54  ;;  %v6452_v14 = vpop.f32.mrb[62].mxu0 }
 0x19d   : > { %v6453_v61 = vpop.f32.mrb[63].mxu0 }
 0x19e   : > { %v6391_v62 = vpop.f32.mrb[64].mxu1  ;;  %v8107_v63 = vadd.f32 %v6451_v48, %v8011_v53  ;;  %v6454_v28 = vadd.f32 %v6453_v61, %v6452_v14 }
 0x19f   : > { %v6392_v44 = vpop.f32.mrb[65].mxu1 }
 0x1a0   : > { %v6393_v11 = vadd.f32 %v6392_v44, %v6391_v62  ;;  %v6394_v36 = vpop.f32.mrb[66].mxu1  ;;  %v8112_v4 = vadd.f32 %v6454_v28, %v8014_v20 }
 0x1a1   : > { %v6395_v22 = vpop.f32.mrb[67].mxu1 }
 0x1a2   : > { %v8109_v40 = vadd.f32 %v6393_v11, %v3000_v18  ;;  %v6396_v52 = vadd.f32 %v6395_v22, %v6394_v36  ;;  %v6455_v19 = vpop.f32.mrb[64].mxu0  ;;  %v3019_v11 = vadd.f32 %v7857_v10, %v7921_v23  ;;  %v3024_v10 = vadd.f32 %v7897_v56, %v7921_v23 }
 0x1a3   : > { %v6456_v3 = vpop.f32.mrb[65].mxu0 }
 0x1a4   : > { %v8114_v34 = vadd.f32 %v6396_v52, %v3003_v37  ;;  %v6457_v16 = vadd.f32 %v6456_v3, %v6455_v19  ;;  %v6458_v51 = vpop.f32.mrb[66].mxu0 }
 0x1a5   : > { %v6459_v8 = vpop.f32.mrb[67].mxu0 }
 0x1a6   : > { %v6397_v59 = vpop.f32.mrb[68].mxu1  ;;  %v8121_v20 = vadd.f32 %v6457_v16, %v8029_v6  ;;  %v6460_v39 = vadd.f32 %v6459_v8, %v6458_v51 }
 0x1a7   : > { %v6398_v17 = vpop.f32.mrb[69].mxu1 }
 0x1a8   : > { %v6399_v53 = vadd.f32 %v6398_v17, %v6397_v59  ;;  %v6400_v35 = vpop.f32.mrb[70].mxu1  ;;  %v8126_v33 = vadd.f32 %v6460_v39, %v8032_v13 }
 0x1a9   : > { %v6401_v60 = vpop.f32.mrb[71].mxu1 }
 0x1aa   : > { %v8123_v50 = vadd.f32 %v6399_v53, %v3008_v5  ;;  %v6402_v1 = vadd.f32 %v6401_v60, %v6400_v35  ;;  %v6461_v54 = vpop.f32.mrb[68].mxu0  ;;  %v3027_v53 = vadd.f32 %v7906_v15, %v7921_v23 }
 0x1ab   : > { %v6462_v29 = vpop.f32.mrb[69].mxu0 }
 0x1ac   : > { %v8128_v7 = vadd.f32 %v6402_v1, %v3011_v58  ;;  %v6463_v18 = vadd.f32 %v6462_v29, %v6461_v54  ;;  %v6464_v48 = vpop.f32.mrb[70].mxu0 }
 0x1ad   : > { %v6465_v36 = vpop.f32.mrb[71].mxu0 }
 0x1ae   : > { %v6403_v62 = vpop.f32.mrb[72].mxu1  ;;  %v8135_v13 = vadd.f32 %v6463_v18, %v8040_v57  ;;  %v6466_v61 = vadd.f32 %v6465_v36, %v6464_v48 }
 0x1af   : > { %v6404_v44 = vpop.f32.mrb[73].mxu1 }
 0x1b0   : > { %v6405_v6 = vadd.f32 %v6404_v44, %v6403_v62  ;;  %v6406_v14 = vpop.f32.mrb[74].mxu1  ;;  %v8140_v52 = vadd.f32 %v6466_v61, %v8042_v42 }
 0x1b1   : > { %v6407_v37 = vpop.f32.mrb[75].mxu1 }
 0x1b2   : > { %v8137_v22 = vadd.f32 %v6405_v6, %v3016_v27  ;;  %v6408_v28 = vadd.f32 %v6407_v37, %v6406_v14  ;;  %v6467_v19 = vpop.f32.mrb[72].mxu0 }
 0x1b3   : > { %v6468_v3 = vpop.f32.mrb[73].mxu0 }
 0x1b4   : > { %v8142_v21 = vadd.f32 %v6408_v28, %v3019_v11  ;;  %v6469_v5 = vadd.f32 %v6468_v3, %v6467_v19  ;;  %v6470_v16 = vpop.f32.mrb[74].mxu0 }
 0x1b5   : > { %v6471_v35 = vpop.f32.mrb[75].mxu0 }
 0x1b6   : > { %v6409_v59 = vpop.f32.mrb[76].mxu1  ;;  %v8149_v42 = vadd.f32 %v6469_v5, %v8048_v24  ;;  %v6472_v8 = vadd.f32 %v6471_v35, %v6470_v16 }
 0x1b7   : > { %v6410_v17 = vpop.f32.mrb[77].mxu1 }
 0x1b8   : > { %v6411_v57 = vadd.f32 %v6410_v17, %v6409_v59  ;;  %v6412_v51 = vpop.f32.mrb[78].mxu1  ;;  %v8154_v1 = vadd.f32 %v6472_v8, %v8050_v55 }
 0x1b9   : > { %v6413_v58 = vpop.f32.mrb[79].mxu1 }
 0x1ba   : > { %v8151_v60 = vadd.f32 %v6411_v57, %v3024_v10  ;;  %v6414_v39 = vadd.f32 %v6413_v58, %v6412_v51  ;;  %v6473_v54 = vpop.f32.mrb[76].mxu0 }
 0x1bb   : > { %v6474_v29 = vpop.f32.mrb[77].mxu0 }
 0x1bc   : > { %v8156_v56 = vadd.f32 %v6414_v39, %v3027_v53  ;;  %v6475_v27 = vadd.f32 %v6474_v29, %v6473_v54  ;;  %v6476_v15 = vpop.f32.mrb[78].mxu0 }
 0x1bd   : > { %v6477_v48 = vpop.f32.mrb[79].mxu0 }
 0x1be   : > { %v6543_v62 = vpop.f32.mrb[80].mxu1  ;;  %v8159_v6 = vadd.f32 %v6475_v27, %v8056_v38  ;;  %v6478_v14 = vadd.f32 %v6477_v48, %v6476_v15 }
 0x1bf   : > { %v6544_v44 = vpop.f32.mrb[81].mxu1 }
 0x1c0   : > { %v6545_v23 = vadd.f32 %v6544_v44, %v6543_v62  ;;  %v6546_v18 = vpop.f32.mrb[82].mxu1  ;;  %v8165_v36 = vadd.f32 %v6478_v14, %v8058_v46 }
 0x1c1   : > { %v6547_v24 = vpop.f32.mrb[83].mxu1 }
 0x1c2   : > { %v6548_v11 = vadd.f32 %v6547_v24, %v6546_v18  ;;  %v8162_v55 = vadd.f32 %v6545_v23, %v8069_v47  ;;  %v6479_v61 = vpop.f32.mrb[80].mxu0 }
 0x1c3   : > { %v6480_v19 = vpop.f32.mrb[81].mxu0 }
 0x1c4   : > { %v8168_v37 = vadd.f32 %v6548_v11, %v8074_v0  ;;  %v6481_v3 = vadd.f32 %v6480_v19, %v6479_v61  ;;  %v6482_v17 = vpop.f32.mrb[82].mxu0 }
 0x1c5   : > { %v6483_v5 = vpop.f32.mrb[83].mxu0 }
 0x1c6   : > { %v6549_v28 = vpop.f32.mrb[84].mxu1  ;;  %v8171_v57 = vadd.f32 %v6481_v3, %v8062_v31  ;;  %v6484_v47 = vadd.f32 %v6483_v5, %v6482_v17 }
 0x1c7   : > { %v6550_v59 = vpop.f32.mrb[85].mxu1 }
 0x1c8   : > { %v6551_v10 = vadd.f32 %v6550_v59, %v6549_v28  ;;  %v6552_v38 = vpop.f32.mrb[86].mxu1  ;;  %9008 = vst [vmem:[#allocation3_spill] sm:$0xff] %v8171_v57  ;;  %v8177_v0 = vadd.f32 %v6484_v47, %v8064_v45 }
 0x1c9   : > { %v6553_v16 = vpop.f32.mrb[87].mxu1 }
 0x1ca   : > { %v6554_v51 = vadd.f32 %v6553_v16, %v6552_v38  ;;  %v8174_v46 = vadd.f32 %v6551_v10, %v8081_v49  ;;  %9009 = vst [vmem:[#allocation4_spill] sm:$0xff] %v8177_v0  ;;  %v6485_v35 = vpop.f32.mrb[84].mxu0 }
 0x1cb   : > { %v6486_v8 = vpop.f32.mrb[85].mxu0 }
 0x1cc   : > { %v8180_v53 = vadd.f32 %v6554_v51, %v8086_v30  ;;  %v6487_v54 = vadd.f32 %v6486_v8, %v6485_v35  ;;  %v6488_v62 = vpop.f32.mrb[86].mxu0 }
 0x1cd   : > { %v6489_v44 = vpop.f32.mrb[87].mxu0 }
 0x1ce   : > { %v6555_v58 = vpop.f32.mrb[88].mxu1  ;;  %v8183_v15 = vadd.f32 %v6487_v54, %v8071_v32  ;;  %v6490_v49 = vadd.f32 %v6489_v44, %v6488_v62 }
 0x1cf   : > { %v6556_v39 = vpop.f32.mrb[89].mxu1 }
 0x1d0   : > { %v6557_v29 = vadd.f32 %v6556_v39, %v6555_v58  ;;  %v6558_v31 = vpop.f32.mrb[90].mxu1  ;;  %9010 = vst [vmem:[#allocation5_spill] sm:$0xff] %v8183_v15  ;;  %v8189_v30 = vadd.f32 %v6490_v49, %v8076_v26 }
 0x1d1   : > { %v6559_v27 = vpop.f32.mrb[91].mxu1 }
 0x1d2   : > { %v6560_v23 = vadd.f32 %v6559_v27, %v6558_v31  ;;  %v8186_v45 = vadd.f32 %v6557_v29, %v8093_v43  ;;  %9011 = vst [vmem:[#allocation6_spill] sm:$0xff] %v8189_v30  ;;  %v6491_v48 = vpop.f32.mrb[88].mxu0 }
 0x1d3   : > { %v6492_v14 = vpop.f32.mrb[89].mxu0 }
 0x1d4   : > { %v8192_v18 = vadd.f32 %v6560_v23, %v8098_v12  ;;  %v6493_v61 = vadd.f32 %v6492_v14, %v6491_v48  ;;  %v6494_v28 = vpop.f32.mrb[90].mxu0 }
 0x1d5   : > { %v6495_v59 = vpop.f32.mrb[91].mxu0 }
 0x1d6   : > { %v6561_v24 = vpop.f32.mrb[92].mxu1  ;;  %v8195_v17 = vadd.f32 %v6493_v61, %v8083_v25  ;;  %v6496_v43 = vadd.f32 %v6495_v59, %v6494_v28 }
 0x1d7   : > { %v6562_v11 = vpop.f32.mrb[93].mxu1 }
 0x1d8   : > { %v6563_v19 = vadd.f32 %v6562_v11, %v6561_v24  ;;  %v6564_v32 = vpop.f32.mrb[94].mxu1  ;;  %9012 = vst [vmem:[#allocation7_spill] sm:$0xff] %v8195_v17  ;;  %v8201_v12 = vadd.f32 %v6496_v43, %v8088_v41 }
 0x1d9   : > { %v6565_v3 = vpop.f32.mrb[95].mxu1 }
 0x1da   : > { %v6566_v10 = vadd.f32 %v6565_v3, %v6564_v32  ;;  %v8198_v26 = vadd.f32 %v6563_v19, %v8107_v63  ;;  %9013 = vst [vmem:[#allocation8_spill] sm:$0xff] %v8201_v12  ;;  %v6497_v5 = vpop.f32.mrb[92].mxu0 }
 0x1db   : > { %v6498_v47 = vpop.f32.mrb[93].mxu0 }
 0x1dc   : > { %v8204_v38 = vadd.f32 %v6566_v10, %v8112_v4  ;;  %v6499_v35 = vadd.f32 %v6498_v47, %v6497_v5  ;;  %v6500_v58 = vpop.f32.mrb[94].mxu0 }
 0x1dd   : > { %v6501_v39 = vpop.f32.mrb[95].mxu0 }
 0x1de   : > { %v6567_v16 = vpop.f32.mrb[96].mxu1  ;;  %v8207_v62 = vadd.f32 %v6499_v35, %v8095_v2  ;;  %v6502_v63 = vadd.f32 %v6501_v39, %v6500_v58 }
 0x1df   : > { %v6568_v51 = vpop.f32.mrb[97].mxu1 }
 0x1e0   : > { %v6569_v8 = vadd.f32 %v6568_v51, %v6567_v16  ;;  %v6570_v25 = vpop.f32.mrb[98].mxu1  ;;  %9014 = vst [vmem:[#allocation9_spill] sm:$0xff] %v8207_v62  ;;  %v8213_v4 = vadd.f32 %v6502_v63, %v8100_v9 }
 0x1e1   : > { %v6571_v54 = vpop.f32.mrb[99].mxu1 }
 0x1e2   : > { %v6572_v29 = vadd.f32 %v6571_v54, %v6570_v25  ;;  %v8210_v41 = vadd.f32 %v6569_v8, %v8121_v20  ;;  %9015 = vst [vmem:[#allocation10_spill] sm:$0xff] %v8213_v4  ;;  %v6503_v44 = vpop.f32.mrb[96].mxu0 }
 0x1e3   : > { %v6504_v49 = vpop.f32.mrb[97].mxu0 }
 0x1e4   : > { %v8216_v31 = vadd.f32 %v6572_v29, %v8126_v33  ;;  %v6505_v48 = vadd.f32 %v6504_v49, %v6503_v44  ;;  %v6506_v24 = vpop.f32.mrb[98].mxu0 }
 0x1e5   : > { %v6507_v11 = vpop.f32.mrb[99].mxu0 }
 0x1e6   : > { %v6573_v27 = vpop.f32.mrb[100].mxu1  ;;  %v8219_v28 = vadd.f32 %v6505_v48, %v8109_v40  ;;  %v6508_v20 = vadd.f32 %v6507_v11, %v6506_v24 }
 0x1e7   : > { %v6574_v23 = vpop.f32.mrb[101].mxu1 }
 0x1e8   : > { %v6575_v14 = vadd.f32 %v6574_v23, %v6573_v27  ;;  %v6576_v2 = vpop.f32.mrb[102].mxu1  ;;  %9016 = vst [vmem:[#allocation11_spill] sm:$0xff] %v8219_v28  ;;  %v8225_v33 = vadd.f32 %v6508_v20, %v8114_v34 }
 0x1e9   : > { %v6577_v61 = vpop.f32.mrb[103].mxu1 }
 0x1ea   : > { %v6578_v19 = vadd.f32 %v6577_v61, %v6576_v2  ;;  %v8222_v9 = vadd.f32 %v6575_v14, %v8135_v13  ;;  %9017 = vst [vmem:[#allocation12_spill] sm:$0xff] %v8225_v33  ;;  %v6509_v59 = vpop.f32.mrb[100].mxu0 }
 0x1eb   : > { %v6510_v43 = vpop.f32.mrb[101].mxu0 }
 0x1ec   : > { %v8228_v32 = vadd.f32 %v6578_v19, %v8140_v52  ;;  %v6511_v5 = vadd.f32 %v6510_v43, %v6509_v59  ;;  %v6512_v16 = vpop.f32.mrb[102].mxu0  ;;  %v6970_v19 = vmov 1983009808  }
 0x1ed   : > { %v6513_v51 = vpop.f32.mrb[103].mxu0  ;;  %v3740_v59 = vunpack.c.l.s4 %v6970_v19 }
 0x1ee   : > { %v6579_v3 = vpop.f32.mrb[104].mxu1  ;;  %v8231_v58 = vadd.f32 %v6511_v5, %v8123_v50  ;;  %v6514_v13 = vadd.f32 %v6513_v51, %v6512_v16 }
 0x1ef   : > { %v6580_v10 = vpop.f32.mrb[105].mxu1  ;;  %v3741_v51 = vunpack.c.0.s8 %v3740_v59 }
 0x1f0   : > { %v6581_v47 = vadd.f32 %v6580_v10, %v6579_v3  ;;  %v6582_v40 = vpop.f32.mrb[106].mxu1  ;;  %9018 = vst [vmem:[#allocation13_spill] sm:$0xff] %v8231_v58  ;;  %v8237_v52 = vadd.f32 %v6514_v13, %v8128_v7  ;;  %v3742_v3 = vlaneseq }
 0x1f1   : > { %v6583_v35 = vpop.f32.mrb[107].mxu1 }
 0x1f2   : > { %v6584_v8 = vadd.f32 %v6583_v35, %v6582_v40  ;;  %v8234_v34 = vadd.f32 %v6581_v47, %v8149_v42  ;;  %9019 = vst [vmem:[#allocation14_spill] sm:$0xff] %v8237_v52  ;;  %v6515_v39 = vpop.f32.mrb[104].mxu0  ;;  %v3743_v35 = vshrl.u32 %v3742_v3, 7 }
 0x1f3   : > { %v6516_v63 = vpop.f32.mrb[105].mxu0 }
 0x1f4   : > { %v8240_v25 = vadd.f32 %v6584_v8, %v8154_v1  ;;  %v6517_v44 = vadd.f32 %v6516_v63, %v6515_v39  ;;  %v6518_v27 = vpop.f32.mrb[106].mxu0  ;;  %v8265_v63 = vsub.s32 %v3741_v51, %v3743_v35 }
 0x1f5   : > { %v6519_v23 = vpop.f32.mrb[107].mxu0 }
 0x1f6   : > { %v6585_v54 = vpop.f32.mrb[108].mxu1  ;;  %v8243_v24 = vadd.f32 %v6517_v44, %v8137_v22  ;;  %v6520_v42 = vadd.f32 %v6519_v23, %v6518_v27 }
 0x1f7   : > { %v6586_v29 = vpop.f32.mrb[109].mxu1 }
 0x1f8   : > { %v6587_v49 = vadd.f32 %v6586_v29, %v6585_v54  ;;  %v6588_v50 = vpop.f32.mrb[110].mxu1  ;;  %9020 = vst [vmem:[#allocation15_spill] sm:$0xff] %v8243_v24  ;;  %v8249_v1 = vadd.f32 %v6520_v42, %v8142_v21 }
 0x1f9   : > { %v6589_v48 = vpop.f32.mrb[111].mxu1 }
 0x1fa   : > { %v6590_v14 = vadd.f32 %v6589_v48, %v6588_v50  ;;  %v8246_v7 = vadd.f32 %v6587_v49, %v8159_v6  ;;  %9021 = vst [vmem:[#allocation16_spill] sm:$0xff] %v8249_v1  ;;  %v6521_v11 = vpop.f32.mrb[108].mxu0 }
 0x1fb   : > { %v6522_v20 = vpop.f32.mrb[109].mxu0 }
 0x1fc   : > { %v8252_v2 = vadd.f32 %v6590_v14, %v8165_v36  ;;  %v6523_v22 = vadd.f32 %v6522_v20, %v6521_v11  ;;  %v6524_v10 = vpop.f32.mrb[110].mxu0 }
 0x1fd   : > { %v6525_v6 = vpop.f32.mrb[111].mxu0 }
 0x1fe   : > { %v6591_v61 = vpop.f32.mrb[112].mxu1  ;;  %v8257_v21 = vadd.f32 %v6523_v22, %v8151_v60  ;;  %v6526_v40 = vadd.f32 %v6525_v6, %v6524_v10 }
 0x1ff   : > { %v6592_v43 = vpop.f32.mrb[113].mxu1 }
 0x200   : > { %v8254_v5 = vadd.f32 %v6592_v43, %v6591_v61  ;;  %v6594_v16 = vpop.f32.mrb[114].mxu1  ;;  %9023 = vst [vmem:[#allocation18_spill] sm:$0xff] %v8257_v21  ;;  %v8262_v13 = vadd.f32 %v6526_v40, %v8156_v56 }
 0x201   : > { %v6595_v47 = vpop.f32.mrb[115].mxu1 }
 0x202   : > { %9022 = vst [vmem:[#allocation17_spill] sm:$0xff] %v8254_v5  ;;  %v8259_v36 = vadd.f32 %v6595_v47, %v6594_v16  ;;  %9025 = vst [vmem:[#allocation20_spill] sm:$0xff] %v8262_v13  ;;  %v6681_v8 = vpop.f32.mrb[112].mxu0 }
 0x203   : > { %v3556_v54 = vadd.f32 %v6681_v8, %v8174_v46  ;;  %v3547_v29 = vpop.f32.mrb[113].mxu0 }
 0x204   : > { %9024 = vst [vmem:[#allocation19_spill] sm:$0xff] %v8259_v36  ;;  %v3548_v27 = vadd.f32 %v3547_v29, %v8162_v55  ;;  %v6682_v60 = vpop.f32.mrb[114].mxu0 }
 0x205   : > { %v3676_v23 = vmax.f32 %v3556_v54, 0.0  ;;  %v3559_v48 = vadd.f32 %v6682_v60, %v8180_v53  ;;  %v3550_v42 = vpop.f32.mrb[115].mxu0 }
 0x206   : > { %v6597_v39 = vpop.f32.mrb[116].mxu1  ;;  %v3674_v14 = vmax.f32 %v3548_v27, 0.0  ;;  %v3551_v11 = vadd.f32 %v3550_v42, %v8168_v37 }
 0x207   : > { %v6598_v44 = vpop.f32.mrb[117].mxu1  ;;  %v3772_v61 = vcombine.high %v3676_v23, %v3676_v23  ;;  %v3779_v20 = vrot.slane %v3676_v23, %v8265_v63  ;;  %v8275_v19 = vmax.f32 %v3559_v48, 0.0 }
 0x208   : > { %v8268_v49 = vadd.f32 %v6598_v44, %v6597_v39  ;;  %v6600_v50 = vpop.f32.mrb[118].mxu1  ;;  %v3738_v55 = vcombine.high %v3674_v14, %v3674_v14  ;;  %v3745_v59 = vrot.slane %v3674_v14, %v8265_v63  ;;  %v8278_v3 = vmax.f32 %v3551_v11, 0.0 }
 0x209   : > { %v6601_v56 = vpop.f32.mrb[119].mxu1  ;;  %v3786_v53 = vrot.slane %v3772_v61, %v8265_v63  ;;  %v3787_v43 = vcombine.high %v3779_v20, %v3779_v20  ;;  %v4467_v22 = vsel %vm4410_vm10, %v3779_v20, -inf }
 0x20a   : > { %9026 = vst [vmem:[#allocation21_spill] sm:$0xff] %v8268_v49  ;;  %v8272_v46 = vadd.f32 %v6601_v56, %v6600_v50  ;;  %v4468_v10 = vrot.slane %v4467_v22, 4  ;;  %v3752_v16 = vrot.slane %v3738_v55, %v8265_v63  ;;  %v3753_v6 = vcombine.high %v3745_v59, %v3745_v59  ;;  %v8286_v40 = vpop.f32.mrb[116].mxu0 }
 0x20b   : > { %v4411_v47 = vsel %vm4410_vm10, %v3745_v59, -inf  ;;  %v3788_v35 = vcombine.high %v3786_v53, %v3786_v53  ;;  %v4474_v8 = vsel %vm4410_vm10, %v3787_v43, -inf  ;;  %v4481_v39 = vsel %vm4410_vm10, %v3786_v53, -inf  ;;  %v8292_v29 = vpop.f32.mrb[117].mxu0 }
 0x20c   : > { %9027 = vst [vmem:[#allocation22_spill] sm:$0xff] %v8272_v46  ;;  %v4412_v54 = vrot.slane %v4411_v47, 4  ;;  %v4469_v27 = vmax.f32 %v4467_v22, %v4468_v10  ;;  %v4475_v60 = vrot.slane %v4474_v8, 4  ;;  %v4482_v50 = vrot.slane %v4481_v39, 4  ;;  %v8296_v48 = vpop.f32.mrb[118].mxu0 }
 0x20d   : > { %v3754_v23 = vcombine.high %v3752_v16, %v3752_v16  ;;  %v4488_v56 = vsel %vm4410_vm10, %v3788_v35, -inf  ;;  %v4418_v11 = vsel %vm4410_vm10, %v3753_v6, -inf  ;;  %v4425_v61 = vsel %vm4410_vm10, %v3752_v16, -inf  ;;  %v8303_v20 = vpop.f32.mrb[119].mxu0 }
 0x20e   : > { %v8288_v51 = vpop.f32.mrb[120].mxu1  ;;  %v4413_v14 = vmax.f32 %v4411_v47, %v4412_v54  ;;  %v4470_v59 = vrot.slane %v4469_v27, 2  ;;  %v4476_v53 = vmax.f32 %v4474_v8, %v4475_v60  ;;  %v4483_v43 = vmax.f32 %v4481_v39, %v4482_v50 }
 0x20f   : > { %v8294_v44 = vpop.f32.mrb[121].mxu1  ;;  %v4489_v22 = vrot.slane %v4488_v56, 4  ;;  %v4419_v37 = vrot.slane %v4418_v11, 4  ;;  %v4426_v13 = vrot.slane %v4425_v61, 4  ;;  %v4432_v1 = vsel %vm4410_vm10, %v3754_v23, -inf }
 0x210   : > { %v8298_v42 = vpop.f32.mrb[122].mxu1  ;;  %v4414_v10 = vrot.slane %v4413_v14, 2  ;;  %v4471_v24 = vmax.f32 %v4469_v27, %v4470_v59  ;;  %v4477_v35 = vrot.slane %v4476_v53, 2  ;;  %v4484_v47 = vrot.slane %v4483_v43, 2 }
 0x211   : > { %v8305_v55 = vpop.f32.mrb[123].mxu1  ;;  %v4490_v54 = vmax.f32 %v4488_v56, %v4489_v22  ;;  %v4420_v21 = vmax.f32 %v4418_v11, %v4419_v37  ;;  %v4427_v16 = vmax.f32 %v4425_v61, %v4426_v13  ;;  %v4433_v33 = vrot.slane %v4432_v1, 4 }
 0x212   : > { %v4415_v6 = vmax.f32 %v4413_v14, %v4414_v10  ;;  %v4472_v52 = vrot.slane %v4471_v24, 1  ;;  %v4478_v28 = vmax.f32 %v4476_v53, %v4477_v35  ;;  %v4485_v58 = vmax.f32 %v4483_v43, %v4484_v47  ;;  %v8308_v8 = vpop.f32.mrb[120].mxu0 }
 0x213   : > { %v4491_v12 = vrot.slane %v4490_v54, 2  ;;  %v4421_v50 = vrot.slane %v4420_v21, 2  ;;  %v4428_v4 = vrot.slane %v4427_v16, 2  ;;  %v4434_v23 = vmax.f32 %v4432_v1, %v4433_v33  ;;  %v8312_v27 = vpop.f32.mrb[121].mxu0 }
 0x214   : > { %v4416_v60 = vrot.slane %v4415_v6, 1  ;;  %v4473_v56 = vmax.f32 %v4471_v24, %v4472_v52  ;;  %v4479_v37 = vrot.slane %v4478_v28, 1  ;;  %v4486_v13 = vrot.slane %v4485_v58, 1  ;;  %v8316_v11 = vpop.f32.mrb[122].mxu0 }
 0x215   : > { %v4492_v14 = vmax.f32 %v4490_v54, %v4491_v12  ;;  %v4422_v43 = vmax.f32 %v4420_v21, %v4421_v50  ;;  %v4429_v22 = vmax.f32 %v4427_v16, %v4428_v4  ;;  %v4435_v10 = vrot.slane %v4434_v23, 2  ;;  %v8320_v35 = vpop.f32.mrb[123].mxu0 }
 0x216   : > { %v8310_v39 = vpop.f32.mrb[124].mxu1  ;;  %v4417_v53 = vmax.f32 %v4415_v6, %v4416_v60  ;;  %v4480_v33 = vmax.f32 %v4478_v28, %v4479_v37  ;;  %v4487_v1 = vmax.f32 %v4485_v58, %v4486_v13  ;;  %v3796_v52 = vrot.slane %v8275_v19, %v8265_v63 }
 0x217   : > { %v8314_v59 = vpop.f32.mrb[125].mxu1  ;;  %v4493_v17 = vrot.slane %v4492_v14, 1  ;;  %v4423_v12 = vrot.slane %v4422_v43, 1  ;;  %v4430_v24 = vrot.slane %v4429_v22, 1  ;;  %v4436_v54 = vmax.f32 %v4434_v23, %v4435_v10 }
 0x218   : > { %v8318_v61 = vpop.f32.mrb[126].mxu1  ;;  %v5307_v62 = vmax.f32 %v4417_v53, %v4473_v56  ;;  %v9028_v4 = vcombine.high %v8275_v19, %v8275_v19  ;;  %v3804_v16 = vcombine.high %v3796_v52, %v3796_v52  ;;  %v4495_v28 = vsel %vm4410_vm10, %v3796_v52, -inf }
 0x219   : > { %v8322_v47 = vpop.f32.mrb[127].mxu1  ;;  %v4494_v6 = vmax.f32 %v4492_v14, %v4493_v17  ;;  %v4424_v58 = vmax.f32 %v4422_v43, %v4423_v12  ;;  %v4431_v60 = vmax.f32 %v4429_v22, %v4430_v24  ;;  %v4437_v50 = vrot.slane %v4436_v54, 1 }
 0x21a   : > { %v3803_v21 = vrot.slane %v9028_v4, %v8265_v63  ;;  %v6127_v37 = vpack.c.bf16 %v5307_v62, %v5307_v62  ;;  %v4496_v36 = vrot.slane %v4495_v28, 4  ;;  %v4502_v0 = vsel %vm4410_vm10, %v3804_v16, -inf  ;;  %v8333_v56 = vpop.f32.mrb[124].mxu0 }
 0x21b   : > { %v4438_v17 = vmax.f32 %v4436_v54, %v4437_v50  ;;  %v5308_v14 = vmax.f32 %v4424_v58, %v4480_v33  ;;  %v5309_v53 = vmax.f32 %v4431_v60, %v4487_v1  ;;  %v8335_v10 = vpop.f32.mrb[125].mxu0  ;;  %v4503_v52 = vrot.slane %v4502_v0, 4 }
 0x21c   : > { %v3805_v13 = vcombine.high %v3803_v21, %v3803_v21  ;;  %v4509_v23 = vsel %vm4410_vm10, %v3803_v21, -inf  ;;  %v5627_v19 = vunpack.c.l.b16 %v6127_v37  ;;  %v4497_v4 = vmax.f32 %v4495_v28, %v4496_v36  ;;  %v8338_v62 = vpop.f32.mrb[126].mxu0 }
 0x21d   : > { %v4510_v43 = vrot.slane %v4509_v23, 4  ;;  %v5310_v12 = vmax.f32 %v4438_v17, %v4494_v6  ;;  %v6128_v24 = vpack.c.bf16 %v5308_v14, %v5308_v14  ;;  %v6129_v16 = vpack.c.bf16 %v5309_v53, %v5309_v53  ;;  %v8340_v46 = vpop.f32.mrb[127].mxu0 }
 0x21e   : > { %v4516_v22 = vsel %vm4410_vm10, %v3805_v13, -inf  ;;  %v4498_v54 = vrot.slane %v4497_v4, 2  ;;  %v4504_v33 = vmax.f32 %v4502_v0, %v4503_v52  ;;  %v3755_v58 = vcombine.high %v8278_v3, %v8278_v3 }
 0x21f   : > { %v4517_v21 = vrot.slane %v4516_v22, 4  ;;  %v4511_v1 = vmax.f32 %v4509_v23, %v4510_v43  ;;  %v6130_v36 = vpack.c.bf16 %v5310_v12, %v5310_v12  ;;  %v5628_v28 = vunpack.c.l.b16 %v6128_v24 }
 0x220   : > { %v5629_v60 = vunpack.c.l.b16 %v6129_v16  ;;  %v4499_v37 = vmax.f32 %v4497_v4, %v4498_v54  ;;  %v4505_v13 = vrot.slane %v4504_v33, 2  ;;  %v3762_v6 = vrot.slane %v8278_v3, %v8265_v63 }
 0x221   : > { %v4518_v50 = vmax.f32 %v4516_v22, %v4517_v21  ;;  %v4512_v30 = vrot.slane %v4511_v1, 2  ;;  %v5630_v17 = vunpack.c.l.b16 %v6130_v36  ;;  %v5692_v14 = vsel %vm5691_vm11, %v5628_v28, %v5627_v19 }
 0x222   : > { %v3769_v0 = vrot.slane %v3755_v58, %v8265_v63  ;;  %v5694_v23 = vsel %vm5693_vm12, %v5629_v60, %v5692_v14  ;;  %v4500_v52 = vrot.slane %v4499_v37, 1  ;;  %v4506_v43 = vmax.f32 %v4504_v33, %v4505_v13 }
 0x223   : > { %v4519_v53 = vrot.slane %v4518_v50, 2  ;;  %v4513_v12 = vmax.f32 %v4511_v1, %v4512_v30  ;;  %v3770_v16 = vcombine.high %v3762_v6, %v3762_v6  ;;  %v4439_v4 = vsel %vm4410_vm10, %v3762_v6, -inf  ;;  %v8353_v1 = vpop.f32.mrb[128].mxu1 }
 0x224   : > { %v3771_v22 = vcombine.high %v3769_v0, %v3769_v0  ;;  %v4501_v21 = vmax.f32 %v4499_v37, %v4500_v52  ;;  %v4507_v54 = vrot.slane %v4506_v43, 1  ;;  %v4440_v3 = vrot.slane %v4439_v4, 4  ;;  %9029 = vst [vmem:[#allocation23_spill] sm:$0xff] %v8353_v1 }
 0x225   : > { %v4520_v24 = vmax.f32 %v4518_v50, %v4519_v53  ;;  %v4514_v5 = vrot.slane %v4513_v12, 1  ;;  %v4446_v19 = vsel %vm4410_vm10, %v3770_v16, -inf  ;;  %v4453_v28 = vsel %vm4410_vm10, %v3769_v0, -inf }
 0x226   : > { %v4460_v58 = vsel %vm4410_vm10, %v3771_v22, -inf  ;;  %v4508_v60 = vmax.f32 %v4506_v43, %v4507_v54  ;;  %v4441_v33 = vmax.f32 %v4439_v4, %v4440_v3  ;;  %v4447_v30 = vrot.slane %v4446_v19, 4 }
 0x227   : > { %v4521_v36 = vrot.slane %v4520_v24, 1  ;;  %v4515_v14 = vmax.f32 %v4513_v12, %v4514_v5  ;;  %v4454_v13 = vrot.slane %v4453_v28, 4  ;;  %v4461_v6 = vrot.slane %v4460_v58, 4 }
 0x228   : > { %v8356_v37 = vsel %vm5695_vm13, %v5630_v17, %v5694_v23  ;;  %v4442_v53 = vrot.slane %v4441_v33, 2  ;;  %v4448_v52 = vmax.f32 %v4446_v19, %v4447_v30  ;;  %v3572_v16 = vadd.f32 %v8286_v40, %v8198_v26 }
 0x229   : > { %v4522_v50 = vmax.f32 %v4520_v24, %v4521_v36  ;;  %v3564_v0 = vadd.f32 %v8292_v29, %v8186_v45  ;;  %v4455_v43 = vmax.f32 %v4453_v28, %v4454_v13  ;;  %v4462_v5 = vmax.f32 %v4460_v58, %v4461_v6 }
 0x22a   : > { %v3575_v12 = vadd.f32 %v8296_v48, %v8204_v38  ;;  %v3567_v24 = vadd.f32 %v8303_v20, %v8192_v18  ;;  %v4443_v22 = vmax.f32 %v4441_v33, %v4442_v53  ;;  %v4449_v4 = vrot.slane %v4448_v52, 2 }
 0x22b   : > { %v3680_v17 = vmax.f32 %v3572_v16, 0.0  ;;  %v3678_v23 = vmax.f32 %v3564_v0, 0.0  ;;  %v4456_v54 = vrot.slane %v4455_v43, 2  ;;  %v4463_v3 = vrot.slane %v4462_v5, 2 }
 0x22c   : > { %v8366_v36 = vmax.f32 %v3575_v12, 0.0  ;;  %v8368_v26 = vmax.f32 %v3567_v24, 0.0  ;;  %v4444_v45 = vrot.slane %v4443_v22, 1  ;;  %v4450_v40 = vmax.f32 %v4448_v52, %v4449_v4 }
 0x22d   : > { %v3840_v29 = vcombine.high %v3680_v17, %v3680_v17  ;;  %v3847_v19 = vrot.slane %v3680_v17, %v8265_v63  ;;  %v4457_v38 = vmax.f32 %v4455_v43, %v4456_v54  ;;  %v4464_v48 = vmax.f32 %v4462_v5, %v4463_v3 }
 0x22e   : > { %v3806_v18 = vcombine.high %v3678_v23, %v3678_v23  ;;  %v8372_v20 = vrot.slane %v3678_v23, %v8265_v63  ;;  %v4445_v28 = vmax.f32 %v4443_v22, %v4444_v45  ;;  %v4451_v58 = vrot.slane %v4450_v40, 1 }
 0x22f   : > { %v3854_v33 = vrot.slane %v3840_v29, %v8265_v63  ;;  %v3855_v30 = vcombine.high %v3847_v19, %v3847_v19  ;;  %v4458_v13 = vrot.slane %v4457_v38, 1  ;;  %v4465_v6 = vrot.slane %v4464_v48, 1 }
 0x230   : > { %v4579_v53 = vsel %vm4410_vm10, %v3847_v19, -inf  ;;  %v3820_v52 = vrot.slane %v3806_v18, %v8265_v63  ;;  %v4452_v16 = vmax.f32 %v4450_v40, %v4451_v58  ;;  %v5311_v0 = vmax.f32 %v4445_v28, %v4501_v21 }
 0x231   : > { %v3856_v43 = vcombine.high %v3854_v33, %v3854_v33  ;;  %v4580_v5 = vrot.slane %v4579_v53, 4  ;;  %v4459_v12 = vmax.f32 %v4457_v38, %v4458_v13  ;;  %v4466_v24 = vmax.f32 %v4464_v48, %v4465_v6 }
 0x232   : > { %v4586_v22 = vsel %vm4410_vm10, %v3855_v30, -inf  ;;  %v4593_v4 = vsel %vm4410_vm10, %v3854_v33, -inf  ;;  %v5312_v17 = vmax.f32 %v4452_v16, %v4508_v60  ;;  %v6131_v23 = vpack.c.bf16 %v5311_v0, %v5311_v0 }
 0x233   : > { %v4581_v54 = vmax.f32 %v4579_v53, %v4580_v5  ;;  %v4587_v3 = vrot.slane %v4586_v22, 4  ;;  %v5313_v45 = vmax.f32 %v4459_v12, %v4515_v14  ;;  %v5314_v29 = vmax.f32 %v4466_v24, %v4522_v50 }
 0x234   : > { %v4594_v19 = vrot.slane %v4593_v4, 4  ;;  %v4600_v18 = vsel %vm4410_vm10, %v3856_v43, -inf  ;;  %v6132_v40 = vpack.c.bf16 %v5312_v17, %v5312_v17  ;;  %v5631_v21 = vunpack.c.l.b16 %v6131_v23 }
 0x235   : > { %v4582_v28 = vrot.slane %v4581_v54, 2  ;;  %v4588_v58 = vmax.f32 %v4586_v22, %v4587_v3  ;;  %v6133_v38 = vpack.c.bf16 %v5313_v45, %v5313_v45  ;;  %v6134_v48 = vpack.c.bf16 %v5314_v29, %v5314_v29  ;;  %v8386_v22 = vpop.f32.mrb[128].mxu0 }
 0x236   : > { %v4595_v13 = vmax.f32 %v4593_v4, %v4594_v19  ;;  %v4601_v30 = vrot.slane %v4600_v18, 4  ;;  %v5632_v6 = vunpack.c.l.b16 %v6132_v40  ;;  %v5698_v60 = vsel %vm5697_vm14, %v5631_v21, %v8356_v37  ;;  %9030 = vst [vmem:[#allocation24_spill] sm:$0xff] %v8386_v22 }
 0x237   : > { %v4583_v33 = vmax.f32 %v4581_v54, %v4582_v28  ;;  %v4589_v53 = vrot.slane %v4588_v58, 2  ;;  %v5633_v14 = vunpack.c.l.b16 %v6133_v38  ;;  %v5634_v50 = vunpack.c.l.b16 %v6134_v48  ;;  %v8389_v54 = vpop.f32.mrb[129].mxu1 }
 0x238   : > { %v4596_v16 = vrot.slane %v4595_v13, 2  ;;  %v4602_v0 = vmax.f32 %v4600_v18, %v4601_v30  ;;  %v5700_v43 = vsel %vm5699_vm15, %v5632_v6, %v5698_v60  ;;  %v3821_v24 = vcombine.high %v8372_v20, %v8372_v20  ;;  %9031 = vst [vmem:[#allocation25_spill] sm:$0xff] %v8389_v54 }
 0x239   : > { %v4584_v5 = vrot.slane %v4583_v33, 1  ;;  %v4590_v12 = vmax.f32 %v4588_v58, %v4589_v53  ;;  %v5702_v4 = vsel %vm5701_vm0, %v5633_v14, %v5700_v43  ;;  %v3822_v23 = vcombine.high %v3820_v52, %v3820_v52 }
 0x23a   : > { %v4597_v17 = vmax.f32 %v4595_v13, %v4596_v16  ;;  %v4603_v37 = vrot.slane %v4602_v0, 2  ;;  %v5704_v3 = vsel %vm5703_vm1, %v5634_v50, %v5702_v4  ;;  %v4523_v19 = vsel %vm4410_vm10, %v8372_v20, -inf }
 0x23b   : > { %v4585_v45 = vmax.f32 %v4583_v33, %v4584_v5  ;;  %v4591_v29 = vrot.slane %v4590_v12, 1  ;;  %v5754_v18 = vpack.c.b16 %v5704_v3, %v5704_v3  ;;  %v4524_v28 = vrot.slane %v4523_v19, 4 }
 0x23c   : > { %v4598_v40 = vrot.slane %v4597_v17, 1  ;;  %v4604_v21 = vmax.f32 %v4602_v0, %v4603_v37  ;;  %v4530_v38 = vsel %vm4410_vm10, %v3821_v24, -inf  ;;  %v4537_v48 = vsel %vm4410_vm10, %v3820_v52, -inf }
 0x23d   : > { %v4592_v58 = vmax.f32 %v4590_v12, %v4591_v29  ;;  %v4544_v13 = vsel %vm4410_vm10, %v3822_v23, -inf  ;;  %5770 = vst [vmem:[%s8394_s20] sm:$0xf] %v5754_v18  ;;  %v4525_v60 = vmax.f32 %v4523_v19, %v4524_v28  ;;  %v4531_v33 = vrot.slane %v4530_v38, 4 }
 0x23e   : > { %v4599_v30 = vmax.f32 %v4597_v17, %v4598_v40  ;;  %v4605_v6 = vrot.slane %v4604_v21, 1  ;;  %v4538_v53 = vrot.slane %v4537_v48, 4  ;;  %v4545_v14 = vrot.slane %v4544_v13, 4  ;;  %v8415_v40 = vpop.f32.mrb[129].mxu0 }
 0x23f   : > { %v3857_v20 = vcombine.high %v8366_v36, %v8366_v36  ;;  %v3864_v50 = vrot.slane %v8366_v36, %v8265_v63  ;;  %v4526_v0 = vrot.slane %v4525_v60, 2  ;;  %v4532_v43 = vmax.f32 %v4530_v38, %v4531_v33  ;;  %9032 = vst [vmem:[#allocation26_spill] sm:$0xff] %v8415_v40 }
 0x240   : > { %v4606_v16 = vmax.f32 %v4604_v21, %v4605_v6  ;;  %v3823_v52 = vcombine.high %v8368_v26, %v8368_v26  ;;  %v4539_v5 = vmax.f32 %v4537_v48, %v4538_v53  ;;  %v4546_v12 = vmax.f32 %v4544_v13, %v4545_v14 }
 0x241   : > { %v3871_v24 = vrot.slane %v3857_v20, %v8265_v63  ;;  %v3872_v4 = vcombine.high %v3864_v50, %v3864_v50  ;;  %v4527_v17 = vmax.f32 %v4525_v60, %v4526_v0  ;;  %v4533_v37 = vrot.slane %v4532_v43, 2  ;;  %v8422_v0 = vpop.f32.mrb[130].mxu0 }
 0x242   : > { %v4607_v23 = vsel %vm4410_vm10, %v3864_v50, -inf  ;;  %v8413_v3 = vrot.slane %v8368_v26, %v8265_v63  ;;  %v4540_v36 = vrot.slane %v4539_v5, 2  ;;  %v4547_v29 = vrot.slane %v4546_v12, 2  ;;  %v8420_v50 = vpop.f32.mrb[130].mxu1  ;;  %9034 = vst [vmem:[#allocation28_spill] sm:$0xff] %v8422_v0 }
 0x243   : > { %v3873_v19 = vcombine.high %v3871_v24, %v3871_v24  ;;  %v4608_v18 = vrot.slane %v4607_v23, 4  ;;  %v4528_v21 = vrot.slane %v4527_v17, 1  ;;  %v4534_v28 = vmax.f32 %v4532_v43, %v4533_v37  ;;  %9033 = vst [vmem:[#allocation27_spill] sm:$0xff] %v8420_v50 }
 0x244   : > { %v4614_v38 = vsel %vm4410_vm10, %v3872_v4, -inf  ;;  %v4621_v48 = vsel %vm4410_vm10, %v3871_v24, -inf  ;;  %v4541_v13 = vmax.f32 %v4539_v5, %v4540_v36  ;;  %v4548_v6 = vmax.f32 %v4546_v12, %v4547_v29  ;;  %v8424_v4 = vpop.f32.mrb[131].mxu1 }
 0x245   : > { %v4609_v60 = vmax.f32 %v4607_v23, %v4608_v18  ;;  %v4615_v33 = vrot.slane %v4614_v38, 4  ;;  %v4529_v53 = vmax.f32 %v4527_v17, %v4528_v21  ;;  %v4535_v14 = vrot.slane %v4534_v28, 1  ;;  %9035 = vst [vmem:[#allocation29_spill] sm:$0xff] %v8424_v4 }
 0x246   : > { %v4622_v26 = vrot.slane %v4621_v48, 4  ;;  %v4628_v20 = vsel %vm4410_vm10, %v3873_v19, -inf  ;;  %v4542_v40 = vrot.slane %v4541_v13, 1  ;;  %v4549_v57 = vrot.slane %v4548_v6, 1 }
 0x247   : > { %v4610_v43 = vrot.slane %v4609_v60, 2  ;;  %v4616_v37 = vmax.f32 %v4614_v38, %v4615_v33  ;;  %v4536_v24 = vmax.f32 %v4534_v28, %v4535_v14  ;;  %v5315_v5 = vmax.f32 %v4529_v53, %v4585_v45 }
 0x248   : > { %v4623_v12 = vmax.f32 %v4621_v48, %v4622_v26  ;;  %v4629_v23 = vrot.slane %v4628_v20, 4  ;;  %v4543_v36 = vmax.f32 %v4541_v13, %v4542_v40  ;;  %v4550_v17 = vmax.f32 %v4548_v6, %v4549_v57 }
 0x249   : > { %v4611_v29 = vmax.f32 %v4609_v60, %v4610_v43  ;;  %v4617_v18 = vrot.slane %v4616_v37, 2  ;;  %v5316_v21 = vmax.f32 %v4536_v24, %v4592_v58  ;;  %v6135_v19 = vpack.c.bf16 %v5315_v5, %v5315_v5 }
 0x24a   : > { %v4624_v22 = vrot.slane %v4623_v12, 2  ;;  %v4630_v50 = vmax.f32 %v4628_v20, %v4629_v23  ;;  %v5317_v54 = vmax.f32 %v4543_v36, %v4599_v30  ;;  %v5318_v0 = vmax.f32 %v4550_v17, %v4606_v16 }
 0x24b   : > { %v4612_v1 = vrot.slane %v4611_v29, 1  ;;  %v4618_v49 = vmax.f32 %v4616_v37, %v4617_v18  ;;  %v6136_v15 = vpack.c.bf16 %v5316_v21, %v5316_v21  ;;  %v5635_v38 = vunpack.c.l.b16 %v6135_v19 }
 0x24c   : > { %v4625_v33 = vmax.f32 %v4623_v12, %v4624_v22  ;;  %v4631_v4 = vrot.slane %v4630_v50, 2  ;;  %v6137_v28 = vpack.c.bf16 %v5317_v54, %v5317_v54  ;;  %v6138_v45 = vpack.c.bf16 %v5318_v0, %v5318_v0 }
 0x24d   : > { %v8426_v48 = vmax.f32 %v4611_v29, %v4612_v1  ;;  %v4619_v40 = vrot.slane %v4618_v49, 1  ;;  %v5636_v57 = vunpack.c.l.b16 %v6136_v15  ;;  %v3837_v58 = vrot.slane %v3823_v52, %v8265_v63 }
 0x24e   : > { %v4626_v13 = vrot.slane %v4625_v33, 1  ;;  %v4632_v6 = vmax.f32 %v4630_v50, %v4631_v4  ;;  %v5637_v60 = vunpack.c.l.b16 %v6137_v28  ;;  %v5638_v53 = vunpack.c.l.b16 %v6138_v45 }
 0x24f   : > { %v4620_v30 = vmax.f32 %v4618_v49, %v4619_v40  ;;  %v3838_v16 = vcombine.high %v8413_v3, %v8413_v3  ;;  %v5705_v14 = vsel %vm5691_vm11, %v5636_v57, %v5635_v38  ;;  %v3839_v54 = vcombine.high %v3837_v58, %v3837_v58 }
 0x250   : > { %v4627_v22 = vmax.f32 %v4625_v33, %v4626_v13  ;;  %v4633_v26 = vrot.slane %v4632_v6, 1  ;;  %v5706_v1 = vsel %vm5693_vm12, %v5637_v60, %v5705_v14  ;;  %v4551_v15 = vsel %vm4410_vm10, %v8413_v3, -inf }
 0x251   : > { %v4558_v20 = vsel %vm4410_vm10, %v3838_v16, -inf  ;;  %v4565_v52 = vsel %vm4410_vm10, %v3837_v58, -inf  ;;  %v4552_v0 = vrot.slane %v4551_v15, 4  ;;  %v4572_v37 = vsel %vm4410_vm10, %v3839_v54, -inf }
 0x252   : > { %v4634_v50 = vmax.f32 %v4632_v6, %v4633_v26  ;;  %v4559_v49 = vrot.slane %v4558_v20, 4  ;;  %v4566_v43 = vrot.slane %v4565_v52, 4  ;;  %v8439_v4 = vsel %vm5695_vm13, %v5638_v53, %v5706_v1 }
 0x253   : > { %v3588_v24 = vadd.f32 %v8308_v8, %v8222_v9  ;;  %v8445_v5 = vadd.f32 %v8294_v44, %v8288_v51  ;;  %v4553_v3 = vmax.f32 %v4551_v15, %v4552_v0  ;;  %v4573_v36 = vrot.slane %v4572_v37, 4  ;;  %v8455_v9 = vpop.f32.mrb[131].mxu0 }
 0x254   : > { %v4560_v12 = vmax.f32 %v4558_v20, %v4559_v49  ;;  %v4567_v23 = vmax.f32 %v4565_v52, %v4566_v43  ;;  %v3580_v29 = vadd.f32 %v8312_v27, %v8210_v41  ;;  %v3591_v18 = vadd.f32 %v8316_v11, %v8228_v32 }
 0x255   : > { %v3684_v17 = vmax.f32 %v3588_v24, 0.0  ;;  %v8453_v21 = vadd.f32 %v8305_v55, %v8298_v42  ;;  %v4554_v8 = vrot.slane %v4553_v3, 2  ;;  %v4574_v19 = vmax.f32 %v4572_v37, %v4573_v36 }
 0x256   : > { %v4561_v51 = vrot.slane %v4560_v12, 2  ;;  %v4568_v44 = vrot.slane %v4567_v23, 2  ;;  %v3682_v28 = vmax.f32 %v3580_v29, 0.0  ;;  %v8458_v45 = vmax.f32 %v3591_v18, 0.0 }
 0x257   : > { %v3908_v38 = vcombine.high %v3684_v17, %v3684_v17  ;;  %v3915_v33 = vrot.slane %v3684_v17, %v8265_v63  ;;  %v4555_v41 = vmax.f32 %v4553_v3, %v4554_v8  ;;  %v4575_v32 = vrot.slane %v4574_v19, 2 }
 0x258   : > { %v4562_v27 = vmax.f32 %v4560_v12, %v4561_v51  ;;  %v4569_v40 = vmax.f32 %v4567_v23, %v4568_v44  ;;  %v3874_v57 = vcombine.high %v3682_v28, %v3682_v28 }
 0x259   : > { %v3922_v11 = vrot.slane %v3908_v38, %v8265_v63  ;;  %v3923_v42 = vcombine.high %v3915_v33, %v3915_v33  ;;  %v4691_v55 = vsel %vm4410_vm10, %v3915_v33, -inf  ;;  %v4556_v13 = vrot.slane %v4555_v41, 1 }
 0x25a   : > { %v4563_v6 = vrot.slane %v4562_v27, 1  ;;  %v4570_v58 = vrot.slane %v4569_v40, 1  ;;  %v4576_v60 = vmax.f32 %v4574_v19, %v4575_v32  ;;  %v4692_v16 = vrot.slane %v4691_v55, 4 }
 0x25b   : > { %v3924_v53 = vcombine.high %v3922_v11, %v3922_v11  ;;  %v4698_v14 = vsel %vm4410_vm10, %v3923_v42, -inf  ;;  %v4705_v26 = vsel %vm4410_vm10, %v3922_v11, -inf  ;;  %v4557_v54 = vmax.f32 %v4555_v41, %v4556_v13 }
 0x25c   : > { %v4564_v1 = vmax.f32 %v4562_v27, %v4563_v6  ;;  %v4571_v15 = vmax.f32 %v4569_v40, %v4570_v58  ;;  %v4577_v20 = vrot.slane %v4576_v60, 1  ;;  %v4693_v52 = vmax.f32 %v4691_v55, %v4692_v16 }
 0x25d   : > { %v4699_v0 = vrot.slane %v4698_v14, 4  ;;  %v4706_v49 = vrot.slane %v4705_v26, 4  ;;  %v4712_v43 = vsel %vm4410_vm10, %v3924_v53, -inf  ;;  %v5319_v24 = vmax.f32 %v4557_v54, %v8426_v48 }
 0x25e   : > { %v4578_v37 = vmax.f32 %v4576_v60, %v4577_v20  ;;  %v5320_v3 = vmax.f32 %v4564_v1, %v4620_v30  ;;  %v5321_v12 = vmax.f32 %v4571_v15, %v4627_v22  ;;  %v4694_v23 = vrot.slane %v4693_v52, 2 }
 0x25f   : > { %v4700_v36 = vmax.f32 %v4698_v14, %v4699_v0  ;;  %v4707_v17 = vmax.f32 %v4705_v26, %v4706_v49  ;;  %v4713_v29 = vrot.slane %v4712_v43, 4  ;;  %v6139_v8 = vpack.c.bf16 %v5319_v24, %v5319_v24 }
 0x260   : > { %v5322_v18 = vmax.f32 %v4578_v37, %v4634_v50  ;;  %v6140_v51 = vpack.c.bf16 %v5320_v3, %v5320_v3  ;;  %v6141_v44 = vpack.c.bf16 %v5321_v12, %v5321_v12  ;;  %v4695_v19 = vmax.f32 %v4693_v52, %v4694_v23 }
 0x261   : > { %v4701_v38 = vrot.slane %v4700_v36, 2  ;;  %v4708_v33 = vrot.slane %v4707_v17, 2  ;;  %v4714_v41 = vmax.f32 %v4712_v43, %v4713_v29  ;;  %v5639_v40 = vunpack.c.l.b16 %v6139_v8 }
 0x262   : > { %v6142_v27 = vpack.c.bf16 %v5322_v18, %v5322_v18  ;;  %v5640_v32 = vunpack.c.l.b16 %v6140_v51  ;;  %v5641_v11 = vunpack.c.l.b16 %v6141_v44  ;;  %v4696_v42 = vrot.slane %v4695_v19, 1 }
 0x263   : > { %v4702_v48 = vmax.f32 %v4700_v36, %v4701_v38  ;;  %v4709_v30 = vmax.f32 %v4707_v17, %v4708_v33  ;;  %v4715_v22 = vrot.slane %v4714_v41, 2  ;;  %v5708_v13 = vsel %vm5697_vm14, %v5639_v40, %v8439_v4 }
 0x264   : > { %v5642_v55 = vunpack.c.l.b16 %v6142_v27  ;;  %v3881_v50 = vrot.slane %v3682_v28, %v8265_v63  ;;  %v3888_v6 = vrot.slane %v3874_v57, %v8265_v63  ;;  %v5709_v58 = vsel %vm5699_vm15, %v5640_v32, %v5708_v13 }
 0x265   : > { %v8471_v60 = vmax.f32 %v4695_v19, %v4696_v42  ;;  %v4703_v53 = vrot.slane %v4702_v48, 1  ;;  %v4710_v16 = vrot.slane %v4709_v30, 1  ;;  %v5710_v14 = vsel %vm5701_vm0, %v5641_v11, %v5709_v58 }
 0x266   : > { %v4716_v26 = vmax.f32 %v4714_v41, %v4715_v22  ;;  %v3889_v54 = vcombine.high %v3881_v50, %v3881_v50  ;;  %v3890_v1 = vcombine.high %v3888_v6, %v3888_v6  ;;  %v5711_v15 = vsel %vm5703_vm1, %v5642_v55, %v5710_v14 }
 0x267   : > { %v4704_v20 = vmax.f32 %v4702_v48, %v4703_v53  ;;  %v8475_v4 = vmax.f32 %v4709_v30, %v4710_v16  ;;  %v4635_v28 = vsel %vm4410_vm10, %v3881_v50, -inf  ;;  %v5755_v57 = vpack.c.b16 %v5711_v15, %v5711_v15  ;;  %v8501_v15 = vpop.f32.mrb[132].mxu0 }
 0x268   : > { %v4717_v52 = vrot.slane %v4716_v26, 1  ;;  %v4636_v0 = vrot.slane %v4635_v28, 4  ;;  %v4642_v49 = vsel %vm4410_vm10, %v3889_v54, -inf  ;;  %v4649_v37 = vsel %vm4410_vm10, %v3888_v6, -inf }
 0x269   : > { %v4643_v43 = vrot.slane %v4642_v49, 4  ;;  %v4656_v24 = vsel %vm4410_vm10, %v3890_v1, -inf  ;;  %v3925_v3 = vcombine.high %v8458_v45, %v8458_v45  ;;  %5771 = vst [vmem:[%s8394_s20 + $0x4] sm:$0xf] %v5755_v57  ;;  %v4650_v36 = vrot.slane %v4649_v37, 4  ;;  %v8499_v1 = vpop.f32.mrb[132].mxu1 }
 0x26a   : > { %v4718_v12 = vmax.f32 %v4716_v26, %v4717_v52  ;;  %v4637_v23 = vmax.f32 %v4635_v28, %v4636_v0  ;;  %v4657_v17 = vrot.slane %v4656_v24, 4  ;;  %v3932_v18 = vrot.slane %v8458_v45, %v8265_v63 }
 0x26b   : > { %v4644_v29 = vmax.f32 %v4642_v49, %v4643_v43  ;;  %v3939_v8 = vrot.slane %v3925_v3, %v8265_v63  ;;  %v8489_v51 = vadd.f32 %v8320_v35, %v8216_v31  ;;  %v4651_v19 = vmax.f32 %v4649_v37, %v4650_v36  ;;  %v8503_v49 = vpop.f32.mrb[133].mxu1  ;;  %v8505_v43 = vpop.f32.mrb[133].mxu0 }
 0x26c   : > { %v4638_v44 = vrot.slane %v4637_v23, 2  ;;  %v4658_v38 = vmax.f32 %v4656_v24, %v4657_v17  ;;  %v8493_v33 = vadd.f32 %v8333_v56, %v8246_v7  ;;  %v3940_v27 = vcombine.high %v3932_v18, %v3932_v18  ;;  %v8508_v36 = vpop.f32.mrb[134].mxu1  ;;  %v8510_v17 = vpop.f32.mrb[134].mxu0 }
 0x26d   : > { %v4645_v41 = vrot.slane %v4644_v29, 2  ;;  %v3941_v40 = vcombine.high %v3939_v8, %v3939_v8  ;;  %v4719_v32 = vsel %vm4410_vm10, %v3932_v18, -inf  ;;  %v4652_v45 = vrot.slane %v4651_v19, 2 }
 0x26e   : > { %v4639_v11 = vmax.f32 %v4637_v23, %v4638_v44  ;;  %v4659_v42 = vrot.slane %v4658_v38, 2  ;;  %v4720_v48 = vrot.slane %v4719_v32, 4  ;;  %v4726_v31 = vsel %vm4410_vm10, %v3940_v27, -inf }
 0x26f   : > { %v4646_v30 = vmax.f32 %v4644_v29, %v4645_v41  ;;  %v4733_v35 = vsel %vm4410_vm10, %v3939_v8, -inf  ;;  %v4740_v22 = vsel %vm4410_vm10, %v3941_v40, -inf  ;;  %v4653_v13 = vmax.f32 %v4651_v19, %v4652_v45  ;;  %v8512_v19 = vpop.f32.mrb[135].mxu1 }
 0x270   : > { %v4640_v55 = vrot.slane %v4639_v11, 1  ;;  %v4660_v7 = vmax.f32 %v4658_v38, %v4659_v42  ;;  %v4721_v56 = vmax.f32 %v4719_v32, %v4720_v48  ;;  %v4727_v6 = vrot.slane %v4726_v31, 4  ;;  %v8514_v38 = vpop.f32.mrb[135].mxu0 }
 0x271   : > { %v4647_v50 = vrot.slane %v4646_v30, 1  ;;  %v4734_v58 = vrot.slane %v4733_v35, 4  ;;  %v4741_v53 = vrot.slane %v4740_v22, 4  ;;  %v4654_v14 = vrot.slane %v4653_v13, 1 }
 0x272   : > { %v4641_v16 = vmax.f32 %v4639_v11, %v4640_v55  ;;  %v4661_v26 = vrot.slane %v4660_v7, 1  ;;  %v4722_v54 = vrot.slane %v4721_v56, 2  ;;  %v4728_v57 = vmax.f32 %v4726_v31, %v4727_v6 }
 0x273   : > { %v4648_v28 = vmax.f32 %v4646_v30, %v4647_v50  ;;  %v4735_v52 = vmax.f32 %v4733_v35, %v4734_v58  ;;  %v4742_v0 = vmax.f32 %v4740_v22, %v4741_v53  ;;  %v4655_v37 = vmax.f32 %v4653_v13, %v4654_v14 }
 0x274   : > { %v4662_v24 = vmax.f32 %v4660_v7, %v4661_v26  ;;  %v5323_v3 = vmax.f32 %v4641_v16, %v8471_v60  ;;  %v4723_v23 = vmax.f32 %v4721_v56, %v4722_v54  ;;  %v4729_v18 = vrot.slane %v4728_v57, 2 }
 0x275   : > { %v5324_v29 = vmax.f32 %v4648_v28, %v4704_v20  ;;  %v4736_v8 = vrot.slane %v4735_v52, 2  ;;  %v4743_v44 = vrot.slane %v4742_v0, 2  ;;  %v5325_v41 = vmax.f32 %v4655_v37, %v8475_v4 }
 0x276   : > { %v5326_v27 = vmax.f32 %v4662_v24, %v4718_v12  ;;  %v6143_v40 = vpack.c.bf16 %v5323_v3, %v5323_v3  ;;  %v4724_v32 = vrot.slane %v4723_v23, 1  ;;  %v4730_v60 = vmax.f32 %v4728_v57, %v4729_v18 }
 0x277   : > { %v6144_v11 = vpack.c.bf16 %v5324_v29, %v5324_v29  ;;  %v4737_v45 = vmax.f32 %v4735_v52, %v4736_v8  ;;  %v4744_v42 = vmax.f32 %v4742_v0, %v4743_v44  ;;  %v6145_v48 = vpack.c.bf16 %v5325_v41, %v5325_v41  ;;  %v8546_v8 = vpop.f32.mrb[136].mxu1 }
 0x278   : > { %v6146_v30 = vpack.c.bf16 %v5326_v27, %v5326_v27  ;;  %v5643_v31 = vunpack.c.l.b16 %v6143_v40  ;;  %v8517_v20 = vmax.f32 %v4723_v23, %v4724_v32  ;;  %v4731_v22 = vrot.slane %v4730_v60, 1 }
 0x279   : > { %v5644_v35 = vunpack.c.l.b16 %v6144_v11  ;;  %v4738_v55 = vrot.slane %v4737_v45, 1  ;;  %v4745_v13 = vrot.slane %v4744_v42, 1  ;;  %v5645_v7 = vunpack.c.l.b16 %v6145_v48 }
 0x27a   : > { %v5646_v56 = vunpack.c.l.b16 %v6146_v30  ;;  %v3683_v4 = vmax.f32 %v8489_v51, 0.0  ;;  %v3688_v12 = vmax.f32 %v8493_v33, 0.0  ;;  %v8522_v6 = vmax.f32 %v4730_v60, %v4731_v22 }
 0x27b   : > { %v5712_v50 = vsel %vm5691_vm11, %v5644_v35, %v5643_v31  ;;  %v8524_v58 = vmax.f32 %v4737_v45, %v4738_v55  ;;  %v8526_v53 = vmax.f32 %v4744_v42, %v4745_v13  ;;  %v8536_v33 = vadd.f32 %v8314_v59, %v8310_v39  ;;  %v8548_v39 = vpop.f32.mrb[136].mxu0 }
 0x27c   : > { %v5713_v16 = vsel %vm5693_vm12, %v5645_v7, %v5712_v50  ;;  %v3891_v14 = vcombine.high %v3683_v4, %v3683_v4  ;;  %v3898_v26 = vrot.slane %v3683_v4, %v8265_v63  ;;  %v3976_v54 = vcombine.high %v3688_v12, %v3688_v12 }
 0x27d   : > { %v8531_v28 = vsel %vm5695_vm13, %v5646_v56, %v5713_v16  ;;  %v3983_v51 = vrot.slane %v3688_v12, %v8265_v63  ;;  %v3596_v57 = vadd.f32 %v8335_v10, %v8234_v34  ;;  %v8556_v56 = vpop.f32.mrb[137].mxu1 }
 0x27e   : > { %v3905_v52 = vrot.slane %v3891_v14, %v8265_v63  ;;  %v3906_v0 = vcombine.high %v3898_v26, %v3898_v26  ;;  %v4663_v37 = vsel %vm4410_vm10, %v3898_v26, -inf  ;;  %v3990_v24 = vrot.slane %v3976_v54, %v8265_v63 }
 0x27f   : > { %v4664_v3 = vrot.slane %v4663_v37, 4  ;;  %v3991_v23 = vcombine.high %v3983_v51, %v3983_v51  ;;  %v4803_v29 = vsel %vm4410_vm10, %v3983_v51, -inf  ;;  %v8544_v18 = vmax.f32 %v3596_v57, 0.0 }
 0x280   : > { %v3907_v59 = vcombine.high %v3905_v52, %v3905_v52  ;;  %v4670_v34 = vsel %vm4410_vm10, %v3906_v0, -inf  ;;  %v4677_v10 = vsel %vm4410_vm10, %v3905_v52, -inf  ;;  %v3992_v44 = vcombine.high %v3990_v24, %v3990_v24 }
 0x281   : > { %v4665_v41 = vmax.f32 %v4663_v37, %v4664_v3  ;;  %v4671_v27 = vrot.slane %v4670_v34, 4  ;;  %v4678_v40 = vrot.slane %v4677_v10, 4  ;;  %v4804_v32 = vrot.slane %v4803_v29, 4 }
 0x282   : > { %v4684_v11 = vsel %vm4410_vm10, %v3907_v59, -inf  ;;  %v4810_v60 = vsel %vm4410_vm10, %v3991_v23, -inf  ;;  %v4817_v45 = vsel %vm4410_vm10, %v3990_v24, -inf  ;;  %v4824_v42 = vsel %vm4410_vm10, %v3992_v44, -inf }
 0x283   : > { %v4666_v48 = vrot.slane %v4665_v41, 2  ;;  %v4672_v30 = vmax.f32 %v4670_v34, %v4671_v27  ;;  %v4679_v31 = vmax.f32 %v4677_v10, %v4678_v40  ;;  %v4685_v35 = vrot.slane %v4684_v11, 4 }
 0x284   : > { %v4805_v22 = vmax.f32 %v4803_v29, %v4804_v32  ;;  %v4811_v55 = vrot.slane %v4810_v60, 4  ;;  %v4818_v13 = vrot.slane %v4817_v45, 4  ;;  %v4825_v7 = vrot.slane %v4824_v42, 4 }
 0x285   : > { %v4667_v4 = vmax.f32 %v4665_v41, %v4666_v48  ;;  %v4673_v12 = vrot.slane %v4672_v30, 2  ;;  %v4680_v50 = vrot.slane %v4679_v31, 2  ;;  %v4686_v16 = vmax.f32 %v4684_v11, %v4685_v35 }
 0x286   : > { %v4806_v14 = vrot.slane %v4805_v22, 2  ;;  %v4812_v26 = vmax.f32 %v4810_v60, %v4811_v55  ;;  %v4819_v54 = vmax.f32 %v4817_v45, %v4818_v13  ;;  %v4826_v51 = vmax.f32 %v4824_v42, %v4825_v7 }
 0x287   : > { %v4668_v57 = vrot.slane %v4667_v4, 1  ;;  %v4674_v52 = vmax.f32 %v4672_v30, %v4673_v12  ;;  %v4681_v0 = vmax.f32 %v4679_v31, %v4680_v50  ;;  %v4687_v37 = vrot.slane %v4686_v16, 2 }
 0x288   : > { %v4807_v24 = vmax.f32 %v4805_v22, %v4806_v14  ;;  %v4813_v3 = vrot.slane %v4812_v26, 2  ;;  %v4820_v23 = vrot.slane %v4819_v54, 2  ;;  %v4827_v29 = vrot.slane %v4826_v51, 2 }
 0x289   : > { %v4669_v59 = vmax.f32 %v4667_v4, %v4668_v57  ;;  %v4675_v34 = vrot.slane %v4674_v52, 1  ;;  %v4682_v10 = vrot.slane %v4681_v0, 1  ;;  %v4688_v44 = vmax.f32 %v4686_v16, %v4687_v37 }
 0x28a   : > { %v4808_v41 = vrot.slane %v4807_v24, 1  ;;  %v4814_v27 = vmax.f32 %v4812_v26, %v4813_v3  ;;  %v4821_v40 = vmax.f32 %v4819_v54, %v4820_v23  ;;  %v4828_v32 = vmax.f32 %v4826_v51, %v4827_v29  ;;  %v8572_v51 = vpop.f32.mrb[137].mxu0 }
 0x28b   : > { %v4676_v11 = vmax.f32 %v4674_v52, %v4675_v34  ;;  %v4683_v60 = vmax.f32 %v4681_v0, %v4682_v10  ;;  %v4689_v45 = vrot.slane %v4688_v44, 1  ;;  %v5327_v42 = vmax.f32 %v4669_v59, %v8517_v20  ;;  %v8587_v59 = vpop.f32.mrb[138].mxu1  ;;  %v8589_v34 = vpop.f32.mrb[138].mxu0 }
 0x28c   : > { %v8559_v48 = vmax.f32 %v4807_v24, %v4808_v41  ;;  %v4815_v30 = vrot.slane %v4814_v27, 1  ;;  %v4822_v31 = vrot.slane %v4821_v40, 1  ;;  %v4829_v35 = vrot.slane %v4828_v32, 1 }
 0x28d   : > { %v4690_v22 = vmax.f32 %v4688_v44, %v4689_v45  ;;  %v5328_v55 = vmax.f32 %v4676_v11, %v8522_v6  ;;  %v5329_v13 = vmax.f32 %v4683_v60, %v8524_v58  ;;  %v6147_v7 = vpack.c.bf16 %v5327_v42, %v5327_v42 }
 0x28e   : > { %v8563_v4 = vmax.f32 %v4814_v27, %v4815_v30  ;;  %v8565_v12 = vmax.f32 %v4821_v40, %v4822_v31  ;;  %v8567_v50 = vmax.f32 %v4828_v32, %v4829_v35  ;;  %v3942_v20 = vcombine.high %v8544_v18, %v8544_v18 }
 0x28f   : > { %v5330_v16 = vmax.f32 %v4690_v22, %v8526_v53  ;;  %v6148_v14 = vpack.c.bf16 %v5328_v55, %v5328_v55  ;;  %v6149_v26 = vpack.c.bf16 %v5329_v13, %v5329_v13  ;;  %v5647_v54 = vunpack.c.l.b16 %v6147_v7 }
 0x290   : > { %v3949_v6 = vrot.slane %v8544_v18, %v8265_v63  ;;  %v3956_v58 = vrot.slane %v3942_v20, %v8265_v63  ;;  %v3607_v57 = vadd.f32 %v8338_v62, %v8252_v2  ;;  %v8581_v52 = vadd.f32 %v8322_v47, %v8318_v61 }
 0x291   : > { %v6150_v0 = vpack.c.bf16 %v5330_v16, %v5330_v16  ;;  %v5648_v37 = vunpack.c.l.b16 %v6148_v14  ;;  %v5649_v53 = vunpack.c.l.b16 %v6149_v26  ;;  %v5715_v24 = vsel %vm5697_vm14, %v5647_v54, %v8531_v28 }
 0x292   : > { %v3957_v3 = vcombine.high %v3949_v6, %v3949_v6  ;;  %v3958_v23 = vcombine.high %v3956_v58, %v3956_v58  ;;  %v4747_v29 = vsel %vm4410_vm10, %v3949_v6, -inf  ;;  %v4761_v18 = vsel %vm4410_vm10, %v3956_v58, -inf  ;;  %v8602_v58 = vpop.f32.mrb[139].mxu1 }
 0x293   : > { %v5650_v2 = vunpack.c.l.b16 %v6150_v0  ;;  %v5716_v61 = vsel %vm5699_vm15, %v5648_v37, %v5715_v24  ;;  %v4748_v47 = vrot.slane %v4747_v29, 4  ;;  %v4762_v62 = vrot.slane %v4761_v18, 4 }
 0x294   : > { %v5717_v10 = vsel %vm5701_vm0, %v5649_v53, %v5716_v61  ;;  %v4754_v28 = vsel %vm4410_vm10, %v3957_v3, -inf  ;;  %v4768_v44 = vsel %vm4410_vm10, %v3958_v23, -inf  ;;  %v3689_v41 = vmax.f32 %v3607_v57, 0.0 }
 0x295   : > { %v5718_v27 = vsel %vm5703_vm1, %v5650_v2, %v5717_v10  ;;  %v4749_v40 = vmax.f32 %v4747_v29, %v4748_v47  ;;  %v4755_v32 = vrot.slane %v4754_v28, 4  ;;  %v4763_v11 = vmax.f32 %v4761_v18, %v4762_v62 }
 0x296   : > { %v5756_v60 = vpack.c.b16 %v5718_v27, %v5718_v27  ;;  %v4769_v45 = vrot.slane %v4768_v44, 4  ;;  %v3993_v42 = vcombine.high %v3689_v41, %v3689_v41  ;;  %v4000_v30 = vrot.slane %v3689_v41, %v8265_v63 }
 0x297   : > { %v4750_v31 = vrot.slane %v4749_v40, 2  ;;  %v4756_v35 = vmax.f32 %v4754_v28, %v4755_v32  ;;  %v4764_v22 = vrot.slane %v4763_v11, 2  ;;  %v3599_v55 = vadd.f32 %v8340_v46, %v8240_v25 }
 0x298   : > { %5772 = vst [vmem:[%s8394_s20 + $0x8] sm:$0xf] %v5756_v60  ;;  %v4770_v13 = vmax.f32 %v4768_v44, %v4769_v45  ;;  %v4007_v7 = vrot.slane %v3993_v42, %v8265_v63  ;;  %v4008_v20 = vcombine.high %v4000_v30, %v4000_v30  ;;  %v4831_v16 = vsel %vm4410_vm10, %v4000_v30, -inf }
 0x299   : > { %v4751_v14 = vmax.f32 %v4749_v40, %v4750_v31  ;;  %v4757_v26 = vrot.slane %v4756_v35, 2  ;;  %v4765_v54 = vmax.f32 %v4763_v11, %v4764_v22  ;;  %v4832_v6 = vrot.slane %v4831_v16, 4 }
 0x29a   : > { %v4771_v57 = vrot.slane %v4770_v13, 2  ;;  %v4009_v0 = vcombine.high %v4007_v7, %v4007_v7  ;;  %v4838_v37 = vsel %vm4410_vm10, %v4008_v20, -inf  ;;  %v4845_v53 = vsel %vm4410_vm10, %v4007_v7, -inf }
 0x29b   : > { %v4752_v25 = vrot.slane %v4751_v14, 1  ;;  %v4758_v46 = vmax.f32 %v4756_v35, %v4757_v26  ;;  %v4766_v24 = vrot.slane %v4765_v54, 1  ;;  %v4833_v3 = vmax.f32 %v4831_v16, %v4832_v6 }
 0x29c   : > { %v4772_v23 = vmax.f32 %v4770_v13, %v4771_v57  ;;  %v4839_v29 = vrot.slane %v4838_v37, 4  ;;  %v4846_v18 = vrot.slane %v4845_v53, 4  ;;  %v4852_v2 = vsel %vm4410_vm10, %v4009_v0, -inf }
 0x29d   : > { %v4753_v61 = vmax.f32 %v4751_v14, %v4752_v25  ;;  %v4759_v47 = vrot.slane %v4758_v46, 1  ;;  %v4767_v62 = vmax.f32 %v4765_v54, %v4766_v24  ;;  %v4834_v10 = vrot.slane %v4833_v3, 2  ;;  %v9037_v24 = vld [vmem:[#allocation21_spill] sm:$0xff] }
 0x29e   : > { %v4773_v28 = vrot.slane %v4772_v23, 1  ;;  %v4840_v44 = vmax.f32 %v4838_v37, %v4839_v29  ;;  %v4847_v41 = vmax.f32 %v4845_v53, %v4846_v18  ;;  %v4853_v27 = vrot.slane %v4852_v2, 4  ;;  %v9039_v29 = vld [vmem:[#allocation25_spill] sm:$0xff] }
 0x29f   : > { %v4760_v40 = vmax.f32 %v4758_v46, %v4759_v47  ;;  %v5331_v32 = vmax.f32 %v4753_v61, %v8559_v48  ;;  %v5333_v11 = vmax.f32 %v4767_v62, %v8565_v12  ;;  %v4835_v60 = vmax.f32 %v4833_v3, %v4834_v10 }
 0x2a0   : > { %v4774_v45 = vmax.f32 %v4772_v23, %v4773_v28  ;;  %v4841_v42 = vrot.slane %v4840_v44, 2  ;;  %v4848_v30 = vrot.slane %v4847_v41, 2  ;;  %v4854_v31 = vmax.f32 %v4852_v2, %v4853_v27  ;;  %v9038_v23 = vld [vmem:[#allocation23_spill] sm:$0xff] }
 0x2a1   : > { %v5332_v35 = vmax.f32 %v4760_v40, %v8563_v4  ;;  %v6151_v22 = vpack.c.bf16 %v5331_v32, %v5331_v32  ;;  %v6153_v13 = vpack.c.bf16 %v5333_v11, %v5333_v11  ;;  %v4836_v7 = vrot.slane %v4835_v60, 1  ;;  %v9036_v4 = vld [vmem:[#allocation5_spill] sm:$0xff]  ;;  %v9041_v40 = vld [vmem:[#allocation3_spill] sm:$0xff] }
 0x2a2   : > { %v5334_v20 = vmax.f32 %v4774_v45, %v8567_v50  ;;  %v4842_v16 = vmax.f32 %v4840_v44, %v4841_v42  ;;  %v4849_v14 = vmax.f32 %v4847_v41, %v4848_v30  ;;  %v4855_v26 = vrot.slane %v4854_v31, 2  ;;  %v9040_v44 = vld [vmem:[#allocation24_spill] sm:$0xff]  ;;  %v9042_v32 = vld [vmem:[#allocation17_spill] sm:$0xff]  ;;  %v9044_v45 = vld [vmem:[#allocation22_spill] sm:$0xff] }
 0x2a3   : > { %v6152_v54 = vpack.c.bf16 %v5332_v35, %v5332_v35  ;;  %v5651_v6 = vunpack.c.l.b16 %v6151_v22  ;;  %v5653_v48 = vunpack.c.l.b16 %v6153_v13  ;;  %v8611_v57 = vmax.f32 %v4835_v60, %v4836_v7  ;;  %v9043_v60 = vld [vmem:[#allocation6_spill] sm:$0xff]  ;;  %v8638_v13 = vpop.f32.mrb[139].mxu0 }
 0x2a4   : > { %v6154_v12 = vpack.c.bf16 %v5334_v20, %v5334_v20  ;;  %v4843_v0 = vrot.slane %v4842_v16, 1  ;;  %v4850_v37 = vrot.slane %v4849_v14, 1  ;;  %v4856_v53 = vmax.f32 %v4854_v31, %v4855_v26  ;;  %v9046_v26 = vld [vmem:[#allocation28_spill] sm:$0xff] }
 0x2a5   : > { %v5652_v25 = vunpack.c.l.b16 %v6152_v54  ;;  %v3687_v46 = vmax.f32 %v3599_v55, 0.0  ;;  %v3459_v3 = vadd.f32 %v9037_v24, %v9036_v4  ;;  %v8617_v50 = vadd.f32 %v9039_v29, %v9038_v23 }
 0x2a6   : > { %v5654_v18 = vunpack.c.l.b16 %v6154_v12  ;;  %v8619_v2 = vmax.f32 %v4842_v16, %v4843_v0  ;;  %v8621_v61 = vmax.f32 %v4849_v14, %v4850_v37  ;;  %v4857_v47 = vrot.slane %v4856_v53, 1  ;;  %v9045_v16 = vld [vmem:[#allocation26_spill] sm:$0xff]  ;;  %v9047_v0 = vld [vmem:[#allocation27_spill] sm:$0xff]  ;;  %v9048_v37 = vld [vmem:[#allocation29_spill] sm:$0xff] }
 0x2a7   : > { %v5719_v62 = vsel %vm5691_vm11, %v5652_v25, %v5651_v6  ;;  %v3959_v10 = vcombine.high %v3687_v46, %v3687_v46  ;;  %v3966_v28 = vrot.slane %v3687_v46, %v8265_v63  ;;  %v3620_v55 = vadd.f32 %v9040_v44, %v3459_v3 }
 0x2a8   : > { %v5720_v41 = vsel %vm5693_vm12, %v5653_v48, %v5719_v62  ;;  %v8627_v27 = vmax.f32 %v4856_v53, %v4857_v47  ;;  %v3451_v11 = vadd.f32 %v9042_v32, %v9041_v40  ;;  %v3462_v42 = vadd.f32 %v9044_v45, %v9043_v60  ;;  %v8658_v32 = vpop.f32.mrb[140].mxu1 }
 0x2a9   : > { %v3973_v30 = vrot.slane %v3959_v10, %v8265_v63  ;;  %v3974_v31 = vcombine.high %v3966_v28, %v3966_v28  ;;  %v4775_v35 = vsel %vm4410_vm10, %v3966_v28, -inf  ;;  %v8636_v22 = vsel %vm5695_vm13, %v5654_v18, %v5720_v41 }
 0x2aa   : > { %v4776_v7 = vrot.slane %v4775_v35, 4  ;;  %v3692_v20 = vmax.f32 %v3620_v55, 0.0  ;;  %v3612_v14 = vadd.f32 %v9045_v16, %v3451_v11  ;;  %v3623_v54 = vadd.f32 %v9046_v26, %v3462_v42  ;;  %v8660_v11 = vpop.f32.mrb[140].mxu0 }
 0x2ab   : > { %v3975_v6 = vcombine.high %v3973_v30, %v3973_v30  ;;  %v4782_v48 = vsel %vm4410_vm10, %v3974_v31, -inf  ;;  %v4789_v12 = vsel %vm4410_vm10, %v3973_v30, -inf  ;;  %v8646_v53 = vadd.f32 %v9048_v37, %v9047_v0  ;;  %9049 = vst [vmem:[#allocation5_spill] sm:$0xff] %v8660_v11  ;;  %v8662_v31 = vpop.f32.mrb[141].mxu1 }
 0x2ac   : > { %v4777_v25 = vmax.f32 %v4775_v35, %v4776_v7  ;;  %v4783_v46 = vrot.slane %v4782_v48, 4  ;;  %v4790_v4 = vrot.slane %v4789_v12, 4  ;;  %v4044_v24 = vcombine.high %v3692_v20, %v3692_v20 }
 0x2ad   : > { %v4796_v3 = vsel %vm4410_vm10, %v3975_v6, -inf  ;;  %v4051_v23 = vrot.slane %v3692_v20, %v8265_v63  ;;  %v8650_v29 = vmax.f32 %v3612_v14, 0.0  ;;  %v8652_v18 = vmax.f32 %v3623_v54, 0.0  ;;  %v8666_v14 = vpop.f32.mrb[141].mxu0 }
 0x2ae   : > { %v4778_v47 = vrot.slane %v4777_v25, 2  ;;  %v4784_v62 = vmax.f32 %v4782_v48, %v4783_v46  ;;  %v4791_v10 = vmax.f32 %v4789_v12, %v4790_v4  ;;  %v4797_v28 = vrot.slane %v4796_v3, 4  ;;  %9050 = vst [vmem:[#allocation21_spill] sm:$0xff] %v8666_v14 }
 0x2af   : > { %v4058_v44 = vrot.slane %v4044_v24, %v8265_v63  ;;  %v4059_v55 = vcombine.high %v4051_v23, %v4051_v23  ;;  %v4915_v41 = vsel %vm4410_vm10, %v4051_v23, -inf }
 0x2b0   : > { %v4779_v60 = vmax.f32 %v4777_v25, %v4778_v47  ;;  %v4785_v45 = vrot.slane %v4784_v62, 2  ;;  %v4792_v42 = vrot.slane %v4791_v10, 2  ;;  %v4798_v30 = vmax.f32 %v4796_v3, %v4797_v28 }
 0x2b1   : > { %v4060_v35 = vcombine.high %v4058_v44, %v4058_v44  ;;  %v4916_v7 = vrot.slane %v4915_v41, 4  ;;  %v4922_v20 = vsel %vm4410_vm10, %v4059_v55, -inf  ;;  %v4929_v16 = vsel %vm4410_vm10, %v4058_v44, -inf }
 0x2b2   : > { %v4780_v26 = vrot.slane %v4779_v60, 1  ;;  %v4786_v54 = vmax.f32 %v4784_v62, %v4785_v45  ;;  %v4793_v6 = vmax.f32 %v4791_v10, %v4792_v42  ;;  %v4799_v48 = vrot.slane %v4798_v30, 2 }
 0x2b3   : > { %v4917_v12 = vmax.f32 %v4915_v41, %v4916_v7  ;;  %v4923_v0 = vrot.slane %v4922_v20, 4  ;;  %v4930_v37 = vrot.slane %v4929_v16, 4  ;;  %v4936_v25 = vsel %vm4410_vm10, %v4060_v35, -inf }
 0x2b4   : > { %v4781_v46 = vmax.f32 %v4779_v60, %v4780_v26  ;;  %v4787_v4 = vrot.slane %v4786_v54, 1  ;;  %v4794_v24 = vrot.slane %v4793_v6, 1  ;;  %v4800_v3 = vmax.f32 %v4798_v30, %v4799_v48 }
 0x2b5   : > { %v4918_v23 = vrot.slane %v4917_v12, 2  ;;  %v4924_v47 = vmax.f32 %v4922_v20, %v4923_v0  ;;  %v4931_v28 = vmax.f32 %v4929_v16, %v4930_v37  ;;  %v4937_v55 = vrot.slane %v4936_v25, 4 }
 0x2b6   : > { %v4788_v44 = vmax.f32 %v4786_v54, %v4787_v4  ;;  %v4795_v40 = vmax.f32 %v4793_v6, %v4794_v24  ;;  %v4801_v14 = vrot.slane %v4800_v3, 1  ;;  %v5335_v62 = vmax.f32 %v4781_v46, %v8611_v57 }
 0x2b7   : > { %v4919_v10 = vmax.f32 %v4917_v12, %v4918_v23  ;;  %v4925_v45 = vrot.slane %v4924_v47, 2  ;;  %v4932_v41 = vrot.slane %v4931_v28, 2  ;;  %v4938_v42 = vmax.f32 %v4936_v25, %v4937_v55 }
 0x2b8   : > { %v4802_v7 = vmax.f32 %v4800_v3, %v4801_v14  ;;  %v5336_v35 = vmax.f32 %v4788_v44, %v8619_v2  ;;  %v5337_v60 = vmax.f32 %v4795_v40, %v8621_v61  ;;  %v6155_v26 = vpack.c.bf16 %v5335_v62, %v5335_v62  ;;  %v8692_v62 = vpop.f32.mrb[142].mxu0 }
 0x2b9   : > { %v4920_v30 = vrot.slane %v4919_v10, 1  ;;  %v4926_v48 = vmax.f32 %v4924_v47, %v4925_v45  ;;  %v4933_v20 = vmax.f32 %v4931_v28, %v4932_v41  ;;  %v4939_v16 = vrot.slane %v4938_v42, 2  ;;  %9052 = vst [vmem:[#allocation23_spill] sm:$0xff] %v8692_v62 }
 0x2ba   : > { %v5338_v54 = vmax.f32 %v4802_v7, %v8627_v27  ;;  %v6156_v6 = vpack.c.bf16 %v5336_v35, %v5336_v35  ;;  %v6157_v0 = vpack.c.bf16 %v5337_v60, %v5337_v60  ;;  %v5655_v37 = vunpack.c.l.b16 %v6155_v26 }
 0x2bb   : > { %v8673_v57 = vmax.f32 %v4919_v10, %v4920_v30  ;;  %v4927_v12 = vrot.slane %v4926_v48, 1  ;;  %v4934_v46 = vrot.slane %v4933_v20, 1  ;;  %v4940_v25 = vmax.f32 %v4938_v42, %v4939_v16 }
 0x2bc   : > { %v6158_v14 = vpack.c.bf16 %v5338_v54, %v5338_v54  ;;  %v5656_v4 = vunpack.c.l.b16 %v6156_v6  ;;  %v5657_v2 = vunpack.c.l.b16 %v6157_v0  ;;  %v5722_v61 = vsel %vm5697_vm14, %v5655_v37, %v8636_v22  ;;  %v8690_v22 = vpop.f32.mrb[142].mxu1 }
 0x2bd   : > { %v8677_v40 = vmax.f32 %v4926_v48, %v4927_v12  ;;  %v8679_v24 = vmax.f32 %v4933_v20, %v4934_v46  ;;  %v4941_v3 = vrot.slane %v4940_v25, 1  ;;  %v4017_v27 = vrot.slane %v8650_v29, %v8265_v63  ;;  %v8698_v7 = vpop.f32.mrb[143].mxu1 }
 0x2be   : > { %v5658_v23 = vunpack.c.l.b16 %v6158_v14  ;;  %v5723_v47 = vsel %vm5699_vm15, %v5656_v4, %v5722_v61  ;;  %v9051_v28 = vcombine.high %v8650_v29, %v8650_v29  ;;  %v4061_v44 = vcombine.high %v8652_v18, %v8652_v18 }
 0x2bf   : > { %v5724_v10 = vsel %vm5701_vm0, %v5657_v2, %v5723_v47  ;;  %v8695_v45 = vmax.f32 %v4940_v25, %v4941_v3  ;;  %v4025_v41 = vcombine.high %v4017_v27, %v4017_v27  ;;  %v4859_v42 = vsel %vm4410_vm10, %v4017_v27, -inf  ;;  %v8709_v27 = vpop.f32.mrb[143].mxu0 }
 0x2c0   : > { %v4024_v55 = vrot.slane %v9051_v28, %v8265_v63  ;;  %v5725_v29 = vsel %vm5703_vm1, %v5658_v23, %v5724_v10  ;;  %v4860_v60 = vrot.slane %v4859_v42, 4  ;;  %v4068_v16 = vrot.slane %v8652_v18, %v8265_v63  ;;  %9053 = vst [vmem:[#allocation25_spill] sm:$0xff] %v8709_v27 }
 0x2c1   : > { %v5757_v30 = vpack.c.b16 %v5725_v29, %v5725_v29  ;;  %v4866_v48 = vsel %vm4410_vm10, %v4025_v41, -inf  ;;  %v4075_v37 = vrot.slane %v4061_v44, %v8265_v63 }
 0x2c2   : > { %v4026_v35 = vcombine.high %v4024_v55, %v4024_v55  ;;  %v4873_v26 = vsel %vm4410_vm10, %v4024_v55, -inf  ;;  %v4861_v54 = vmax.f32 %v4859_v42, %v4860_v60  ;;  %v4867_v6 = vrot.slane %v4866_v48, 4 }
 0x2c3   : > { %v4874_v20 = vrot.slane %v4873_v26, 4  ;;  %5773 = vst [vmem:[%s8394_s20 + $0xc] sm:$0xf] %v5757_v30  ;;  %v4076_v25 = vcombine.high %v4068_v16, %v4068_v16  ;;  %v4943_v14 = vsel %vm4410_vm10, %v4068_v16, -inf  ;;  %v4077_v61 = vcombine.high %v4075_v37, %v4075_v37 }
 0x2c4   : > { %v4880_v0 = vsel %vm4410_vm10, %v4026_v35, -inf  ;;  %v4862_v4 = vrot.slane %v4861_v54, 2  ;;  %v4868_v2 = vmax.f32 %v4866_v48, %v4867_v6  ;;  %v4944_v3 = vrot.slane %v4943_v14, 4 }
 0x2c5   : > { %v4875_v12 = vmax.f32 %v4873_v26, %v4874_v20  ;;  %v4881_v46 = vrot.slane %v4880_v0, 4  ;;  %v4950_v47 = vsel %vm4410_vm10, %v4076_v25, -inf  ;;  %v4957_v28 = vsel %vm4410_vm10, %v4075_v37, -inf }
 0x2c6   : > { %v4863_v55 = vmax.f32 %v4861_v54, %v4862_v4  ;;  %v4869_v44 = vrot.slane %v4868_v2, 2  ;;  %v4945_v10 = vmax.f32 %v4943_v14, %v4944_v3  ;;  %v4951_v41 = vrot.slane %v4950_v47, 4 }
 0x2c7   : > { %v4876_v23 = vrot.slane %v4875_v12, 2  ;;  %v4882_v18 = vmax.f32 %v4880_v0, %v4881_v46  ;;  %v4958_v35 = vrot.slane %v4957_v28, 4  ;;  %v4964_v60 = vsel %vm4410_vm10, %v4077_v61, -inf }
 0x2c8   : > { %v4864_v26 = vrot.slane %v4863_v55, 1  ;;  %v4870_v30 = vmax.f32 %v4868_v2, %v4869_v44  ;;  %v4946_v48 = vrot.slane %v4945_v10, 2  ;;  %v4952_v20 = vmax.f32 %v4950_v47, %v4951_v41 }
 0x2c9   : > { %v4877_v42 = vmax.f32 %v4875_v12, %v4876_v23  ;;  %v4883_v29 = vrot.slane %v4882_v18, 2  ;;  %v4959_v0 = vmax.f32 %v4957_v28, %v4958_v35  ;;  %v4965_v46 = vrot.slane %v4964_v60, 4 }
 0x2ca   : > { %v4865_v25 = vmax.f32 %v4863_v55, %v4864_v26  ;;  %v4871_v27 = vrot.slane %v4870_v30, 1  ;;  %v4947_v37 = vmax.f32 %v4945_v10, %v4946_v48  ;;  %v4953_v54 = vrot.slane %v4952_v20, 2  ;;  %v9055_v48 = vld [vmem:[#allocation19_spill] sm:$0xff] }
 0x2cb   : > { %v4878_v16 = vrot.slane %v4877_v42, 1  ;;  %v4884_v6 = vmax.f32 %v4882_v18, %v4883_v29  ;;  %v4960_v3 = vrot.slane %v4959_v0, 2  ;;  %v4966_v12 = vmax.f32 %v4964_v60, %v4965_v46  ;;  %v9056_v46 = vld [vmem:[#allocation9_spill] sm:$0xff] }
 0x2cc   : > { %v4872_v23 = vmax.f32 %v4870_v30, %v4871_v27  ;;  %v5339_v62 = vmax.f32 %v4865_v25, %v8673_v57  ;;  %v4948_v61 = vrot.slane %v4947_v37, 1  ;;  %v4954_v11 = vmax.f32 %v4952_v20, %v4953_v54  ;;  %v9054_v30 = vld [vmem:[#allocation4_spill] sm:$0xff]  ;;  %v9057_v54 = vld [vmem:[#allocation7_spill] sm:$0xff] }
 0x2cd   : > { %v4879_v4 = vmax.f32 %v4877_v42, %v4878_v16  ;;  %v4885_v14 = vrot.slane %v4884_v6, 1  ;;  %v4961_v44 = vmax.f32 %v4959_v0, %v4960_v3  ;;  %v4967_v18 = vrot.slane %v4966_v12, 2 }
 0x2ce   : > { %v5340_v28 = vmax.f32 %v4872_v23, %v8677_v40  ;;  %v6159_v55 = vpack.c.bf16 %v5339_v62, %v5339_v62  ;;  %v8717_v41 = vmax.f32 %v4947_v37, %v4948_v61  ;;  %v4955_v10 = vrot.slane %v4954_v11, 1 }
 0x2cf   : > { %v4886_v2 = vmax.f32 %v4884_v6, %v4885_v14  ;;  %v5341_v47 = vmax.f32 %v4879_v4, %v8679_v24  ;;  %v4962_v35 = vrot.slane %v4961_v44, 1  ;;  %v4968_v27 = vmax.f32 %v4966_v12, %v4967_v18  ;;  %v9058_v14 = vld [vmem:[#allocation10_spill] sm:$0xff] }
 0x2d0   : > { %v6160_v60 = vpack.c.bf16 %v5340_v28, %v5340_v28  ;;  %v5659_v57 = vunpack.c.l.b16 %v6159_v55  ;;  %v8720_v26 = vmax.f32 %v4954_v11, %v4955_v10  ;;  %v3454_v24 = vadd.f32 %v9055_v48, %v9054_v30 }
 0x2d1   : > { %v5342_v42 = vmax.f32 %v4886_v2, %v8695_v45  ;;  %v6161_v29 = vpack.c.bf16 %v5341_v47, %v5341_v47  ;;  %v8724_v6 = vmax.f32 %v4961_v44, %v4962_v35  ;;  %v4969_v40 = vrot.slane %v4968_v27, 1  ;;  %v9059_v2 = vld [vmem:[#allocation8_spill] sm:$0xff] }
 0x2d2   : > { %v5660_v62 = vunpack.c.l.b16 %v6160_v60  ;;  %v3615_v0 = vadd.f32 %v8455_v9, %v3454_v24  ;;  %v3475_v45 = vadd.f32 %v8536_v33, %v9056_v46  ;;  %v6623_v25 = vadd.f32 %v8503_v49, %v8499_v1 }
 0x2d3   : > { %v6162_v20 = vpack.c.bf16 %v5342_v42, %v5342_v42  ;;  %v5661_v16 = vunpack.c.l.b16 %v6161_v29  ;;  %v8731_v11 = vmax.f32 %v4968_v27, %v4969_v40  ;;  %v3467_v4 = vadd.f32 %v8445_v5, %v9057_v54 }
 0x2d4   : > { %v3478_v3 = vadd.f32 %v8581_v52, %v9058_v14  ;;  %v5726_v12 = vsel %vm5691_vm11, %v5660_v62, %v5659_v57  ;;  %v3691_v23 = vmax.f32 %v3615_v0, 0.0  ;;  %v3636_v9 = vadd.f32 %v8501_v15, %v3475_v45 }
 0x2d5   : > { %v5662_v37 = vunpack.c.l.b16 %v6162_v20  ;;  %v8741_v33 = vadd.f32 %v8512_v19, %v8508_v36  ;;  %v5727_v1 = vsel %vm5693_vm12, %v5661_v16, %v5726_v12  ;;  %v3628_v49 = vadd.f32 %v8505_v43, %v3467_v4  ;;  %v9060_v43 = vld [vmem:[#allocation13_spill] sm:$0xff] }
 0x2d6   : > { %v3639_v61 = vadd.f32 %v8510_v17, %v3478_v3  ;;  %v3470_v5 = vadd.f32 %v8453_v21, %v9059_v2  ;;  %v4027_v47 = vcombine.high %v3691_v23, %v3691_v23  ;;  %v4034_v52 = vrot.slane %v3691_v23, %v8265_v63 }
 0x2d7   : > { %v8750_v44 = vsel %vm5695_vm13, %v5662_v37, %v5727_v1  ;;  %v3696_v15 = vmax.f32 %v3636_v9, 0.0  ;;  %v8752_v18 = vmax.f32 %v3628_v49, 0.0  ;;  %v8760_v28 = vadd.f32 %v6623_v25, %v9060_v43 }
 0x2d8   : > { %v8754_v36 = vmax.f32 %v3639_v61, 0.0  ;;  %v8757_v19 = vadd.f32 %v8514_v38, %v3470_v5  ;;  %v4041_v17 = vrot.slane %v4027_v47, %v8265_v63  ;;  %v4042_v21 = vcombine.high %v4034_v52, %v4034_v52 }
 0x2d9   : > { %v4887_v55 = vsel %vm4410_vm10, %v4034_v52, -inf  ;;  %v4112_v10 = vcombine.high %v3696_v15, %v3696_v15  ;;  %v4119_v29 = vrot.slane %v3696_v15, %v8265_v63  ;;  %v4078_v35 = vcombine.high %v8752_v18, %v8752_v18 }
 0x2da   : > { %v4888_v42 = vrot.slane %v4887_v55, 4  ;;  %v8769_v27 = vrot.slane %v8752_v18, %v8265_v63  ;;  %v4043_v38 = vcombine.high %v4041_v17, %v4041_v17  ;;  %v4894_v60 = vsel %vm4410_vm10, %v4042_v21, -inf }
 0x2db   : > { %v4901_v57 = vsel %vm4410_vm10, %v4041_v17, -inf  ;;  %v4126_v30 = vrot.slane %v4112_v10, %v8265_v63  ;;  %v4895_v24 = vrot.slane %v4894_v60, 4  ;;  %v4127_v16 = vcombine.high %v4119_v29, %v4119_v29 }
 0x2dc   : > { %v4889_v48 = vmax.f32 %v4887_v55, %v4888_v42  ;;  %v4902_v20 = vrot.slane %v4901_v57, 4  ;;  %v4908_v40 = vsel %vm4410_vm10, %v4043_v38, -inf  ;;  %v5027_v0 = vsel %vm4410_vm10, %v4119_v29, -inf }
 0x2dd   : > { %v4128_v62 = vcombine.high %v4126_v30, %v4126_v30  ;;  %v5041_v46 = vsel %vm4410_vm10, %v4126_v30, -inf  ;;  %v4896_v25 = vmax.f32 %v4894_v60, %v4895_v24  ;;  %v4909_v54 = vrot.slane %v4908_v40, 4 }
 0x2de   : > { %v4890_v45 = vrot.slane %v4889_v48, 2  ;;  %v4903_v37 = vmax.f32 %v4901_v57, %v4902_v20  ;;  %v5028_v4 = vrot.slane %v5027_v0, 4  ;;  %v5034_v14 = vsel %vm4410_vm10, %v4127_v16, -inf }
 0x2df   : > { %v5042_v3 = vrot.slane %v5041_v46, 4  ;;  %v5048_v12 = vsel %vm4410_vm10, %v4128_v62, -inf  ;;  %v4897_v9 = vrot.slane %v4896_v25, 2  ;;  %v4910_v49 = vmax.f32 %v4908_v40, %v4909_v54 }
 0x2e0   : > { %v4891_v23 = vmax.f32 %v4889_v48, %v4890_v45  ;;  %v4904_v1 = vrot.slane %v4903_v37, 2  ;;  %v5029_v61 = vmax.f32 %v5027_v0, %v5028_v4  ;;  %v5035_v2 = vrot.slane %v5034_v14, 4 }
 0x2e1   : > { %v5043_v5 = vmax.f32 %v5041_v46, %v5042_v3  ;;  %v5049_v47 = vrot.slane %v5048_v12, 4  ;;  %v4898_v15 = vmax.f32 %v4896_v25, %v4897_v9  ;;  %v4911_v17 = vrot.slane %v4910_v49, 2 }
 0x2e2   : > { %v4892_v52 = vrot.slane %v4891_v23, 1  ;;  %v4905_v43 = vmax.f32 %v4903_v37, %v4904_v1  ;;  %v5030_v21 = vrot.slane %v5029_v61, 2  ;;  %v5036_v55 = vmax.f32 %v5034_v14, %v5035_v2 }
 0x2e3   : > { %v5044_v10 = vrot.slane %v5043_v5, 2  ;;  %v5050_v42 = vmax.f32 %v5048_v12, %v5049_v47  ;;  %v4899_v38 = vrot.slane %v4898_v15, 1  ;;  %v4912_v57 = vmax.f32 %v4910_v49, %v4911_v17 }
 0x2e4   : > { %v4893_v29 = vmax.f32 %v4891_v23, %v4892_v52  ;;  %v4906_v60 = vrot.slane %v4905_v43, 1  ;;  %v5031_v30 = vmax.f32 %v5029_v61, %v5030_v21  ;;  %v5037_v48 = vrot.slane %v5036_v55, 2 }
 0x2e5   : > { %v5045_v24 = vmax.f32 %v5043_v5, %v5044_v10  ;;  %v5051_v20 = vrot.slane %v5050_v42, 2  ;;  %v4900_v16 = vmax.f32 %v4898_v15, %v4899_v38  ;;  %v4913_v62 = vrot.slane %v4912_v57, 1 }
 0x2e6   : > { %v4907_v40 = vmax.f32 %v4905_v43, %v4906_v60  ;;  %v5343_v0 = vmax.f32 %v4893_v29, %v8717_v41  ;;  %v5032_v46 = vrot.slane %v5031_v30, 1  ;;  %v5038_v45 = vmax.f32 %v5036_v55, %v5037_v48 }
 0x2e7   : > { %v5046_v25 = vrot.slane %v5045_v24, 1  ;;  %v5052_v37 = vmax.f32 %v5050_v42, %v5051_v20  ;;  %v4914_v54 = vmax.f32 %v4912_v57, %v4913_v62  ;;  %v5344_v4 = vmax.f32 %v4900_v16, %v8720_v26 }
 0x2e8   : > { %v5345_v14 = vmax.f32 %v4907_v40, %v8724_v6  ;;  %v6163_v3 = vpack.c.bf16 %v5343_v0, %v5343_v0  ;;  %v8782_v12 = vmax.f32 %v5031_v30, %v5032_v46  ;;  %v5039_v23 = vrot.slane %v5038_v45, 1 }
 0x2e9   : > { %v8784_v9 = vmax.f32 %v5045_v24, %v5046_v25  ;;  %v5053_v1 = vrot.slane %v5052_v37, 1  ;;  %v5346_v49 = vmax.f32 %v4914_v54, %v8731_v11  ;;  %v6164_v61 = vpack.c.bf16 %v5344_v4, %v5344_v4 }
 0x2ea   : > { %v6165_v41 = vpack.c.bf16 %v5345_v14, %v5345_v14  ;;  %v5663_v2 = vunpack.c.l.b16 %v6163_v3  ;;  %v8787_v5 = vmax.f32 %v5038_v45, %v5039_v23  ;;  %v4092_v26 = vrot.slane %v4078_v35, %v8265_v63 }
 0x2eb   : > { %v8789_v47 = vmax.f32 %v5052_v37, %v5053_v1  ;;  %v4093_v6 = vcombine.high %v8769_v27, %v8769_v27  ;;  %v6166_v52 = vpack.c.bf16 %v5346_v49, %v5346_v49  ;;  %v5664_v15 = vunpack.c.l.b16 %v6164_v61 }
 0x2ec   : > { %v5665_v43 = vunpack.c.l.b16 %v6165_v41  ;;  %v5729_v11 = vsel %vm5697_vm14, %v5663_v2, %v8750_v44  ;;  %v4094_v17 = vcombine.high %v4092_v26, %v4092_v26  ;;  %v4971_v21 = vsel %vm4410_vm10, %v8769_v27, -inf }
 0x2ed   : > { %v4978_v55 = vsel %vm4410_vm10, %v4093_v6, -inf  ;;  %v4985_v10 = vsel %vm4410_vm10, %v4092_v26, -inf  ;;  %v5666_v42 = vunpack.c.l.b16 %v6166_v52  ;;  %v5730_v18 = vsel %vm5699_vm15, %v5664_v15, %v5729_v11 }
 0x2ee   : > { %v4972_v35 = vrot.slane %v4971_v21, 4  ;;  %v4979_v29 = vrot.slane %v4978_v55, 4  ;;  %v5731_v38 = vsel %vm5701_vm0, %v5665_v43, %v5730_v18  ;;  %v4986_v60 = vrot.slane %v4985_v10, 4 }
 0x2ef   : > { %v4992_v57 = vsel %vm4410_vm10, %v4094_v17, -inf  ;;  %v4129_v44 = vcombine.high %v8754_v36, %v8754_v36  ;;  %v5732_v27 = vsel %vm5703_vm1, %v5666_v42, %v5731_v38  ;;  %v4136_v40 = vrot.slane %v8754_v36, %v8265_v63 }
 0x2f0   : > { %v4973_v30 = vmax.f32 %v4971_v21, %v4972_v35  ;;  %v4980_v48 = vmax.f32 %v4978_v55, %v4979_v29  ;;  %v4993_v24 = vrot.slane %v4992_v57, 4  ;;  %v5758_v20 = vpack.c.b16 %v5732_v27, %v5732_v27 }
 0x2f1   : > { %v4987_v16 = vmax.f32 %v4985_v10, %v4986_v60  ;;  %v4143_v62 = vrot.slane %v4129_v44, %v8265_v63  ;;  %v8813_v25 = vmax.f32 %v8757_v19, 0.0  ;;  %v4144_v54 = vcombine.high %v4136_v40, %v4136_v40 }
 0x2f2   : > { %v4974_v0 = vrot.slane %v4973_v30, 2  ;;  %v4981_v46 = vrot.slane %v4980_v48, 2  ;;  %v4994_v45 = vmax.f32 %v4992_v57, %v4993_v24  ;;  %5774 = vst [vmem:[%s8394_s20 + $0x10] sm:$0xf] %v5758_v20  ;;  %v5055_v14 = vsel %vm4410_vm10, %v4136_v40, -inf }
 0x2f3   : > { %v4988_v37 = vrot.slane %v4987_v16, 2  ;;  %v4145_v4 = vcombine.high %v4143_v62, %v4143_v62  ;;  %v5056_v49 = vrot.slane %v5055_v14, 4  ;;  %v5062_v36 = vsel %vm4410_vm10, %v4144_v54, -inf }
 0x2f4   : > { %v4975_v3 = vmax.f32 %v4973_v30, %v4974_v0  ;;  %v4982_v23 = vmax.f32 %v4980_v48, %v4981_v46  ;;  %v4995_v1 = vrot.slane %v4994_v45, 2  ;;  %v5069_v41 = vsel %vm4410_vm10, %v4143_v62, -inf }
 0x2f5   : > { %v4989_v61 = vmax.f32 %v4987_v16, %v4988_v37  ;;  %v5076_v2 = vsel %vm4410_vm10, %v4145_v4, -inf  ;;  %v5057_v52 = vmax.f32 %v5055_v14, %v5056_v49  ;;  %v5063_v43 = vrot.slane %v5062_v36, 4 }
 0x2f6   : > { %v4976_v26 = vrot.slane %v4975_v3, 1  ;;  %v4983_v19 = vrot.slane %v4982_v23, 1  ;;  %v4996_v6 = vmax.f32 %v4994_v45, %v4995_v1  ;;  %v5070_v11 = vrot.slane %v5069_v41, 4 }
 0x2f7   : > { %v4990_v15 = vrot.slane %v4989_v61, 1  ;;  %v5077_v17 = vrot.slane %v5076_v2, 4  ;;  %v5058_v42 = vrot.slane %v5057_v52, 2  ;;  %v5064_v35 = vmax.f32 %v5062_v36, %v5063_v43 }
 0x2f8   : > { %v4977_v21 = vmax.f32 %v4975_v3, %v4976_v26  ;;  %v4984_v55 = vmax.f32 %v4982_v23, %v4983_v19  ;;  %v4997_v10 = vrot.slane %v4996_v6, 1  ;;  %v5071_v29 = vmax.f32 %v5069_v41, %v5070_v11 }
 0x2f9   : > { %v4991_v18 = vmax.f32 %v4989_v61, %v4990_v15  ;;  %v5078_v38 = vmax.f32 %v5076_v2, %v5077_v17  ;;  %v5059_v27 = vmax.f32 %v5057_v52, %v5058_v42  ;;  %v5065_v48 = vrot.slane %v5064_v35, 2 }
 0x2fa   : > { %v4998_v60 = vmax.f32 %v4996_v6, %v4997_v10  ;;  %v5347_v57 = vmax.f32 %v4977_v21, %v8782_v12  ;;  %v5348_v44 = vmax.f32 %v4984_v55, %v8787_v5  ;;  %v5072_v24 = vrot.slane %v5071_v29, 2  ;;  %v9061_v21 = vld [vmem:[#allocation11_spill] sm:$0xff] }
 0x2fb   : > { %v5349_v30 = vmax.f32 %v4991_v18, %v8784_v9  ;;  %v5079_v20 = vrot.slane %v5078_v38, 2  ;;  %v5060_v0 = vrot.slane %v5059_v27, 1  ;;  %v5066_v45 = vmax.f32 %v5064_v35, %v5065_v48  ;;  %v9062_v35 = vld [vmem:[#allocation14_spill] sm:$0xff] }
 0x2fc   : > { %v5350_v16 = vmax.f32 %v4998_v60, %v8789_v47  ;;  %v6167_v40 = vpack.c.bf16 %v5347_v57, %v5347_v57  ;;  %v6168_v62 = vpack.c.bf16 %v5348_v44, %v5348_v44  ;;  %v5073_v37 = vmax.f32 %v5071_v29, %v5072_v24 }
 0x2fd   : > { %v6169_v46 = vpack.c.bf16 %v5349_v30, %v5349_v30  ;;  %v5080_v54 = vmax.f32 %v5078_v38, %v5079_v20  ;;  %v8824_v3 = vmax.f32 %v5059_v27, %v5060_v0  ;;  %v5067_v23 = vrot.slane %v5066_v45, 1 }
 0x2fe   : > { %v6170_v4 = vpack.c.bf16 %v5350_v16, %v5350_v16  ;;  %v5667_v14 = vunpack.c.l.b16 %v6167_v40  ;;  %v5668_v12 = vunpack.c.l.b16 %v6168_v62  ;;  %v5074_v9 = vrot.slane %v5073_v37, 1 }
 0x2ff   : > { %v5669_v5 = vunpack.c.l.b16 %v6169_v46  ;;  %v5081_v1 = vrot.slane %v5080_v54, 1  ;;  %v4095_v47 = vcombine.high %v8813_v25, %v8813_v25  ;;  %v4102_v36 = vrot.slane %v8813_v25, %v8265_v63 }
 0x300   : > { %v5670_v49 = vunpack.c.l.b16 %v6170_v4  ;;  %v5733_v61 = vsel %vm5691_vm11, %v5668_v12, %v5667_v14  ;;  %v8832_v2 = vmax.f32 %v5066_v45, %v5067_v23  ;;  %v8834_v26 = vmax.f32 %v5073_v37, %v5074_v9 }
 0x301   : > { %v5734_v41 = vsel %vm5693_vm12, %v5669_v5, %v5733_v61  ;;  %v8836_v19 = vmax.f32 %v5080_v54, %v5081_v1  ;;  %v4109_v6 = vrot.slane %v4095_v47, %v8265_v63  ;;  %v4110_v52 = vcombine.high %v4102_v36, %v4102_v36 }
 0x302   : > { %v4999_v15 = vsel %vm4410_vm10, %v4102_v36, -inf  ;;  %v8841_v43 = vsel %vm5695_vm13, %v5670_v49, %v5734_v41  ;;  %v3652_v25 = vadd.f32 %v8548_v39, %v8760_v28  ;;  %v8847_v17 = vadd.f32 %v8556_v56, %v8546_v8 }
 0x303   : > { %v5000_v11 = vrot.slane %v4999_v15, 4  ;;  %v3483_v55 = vadd.f32 %v8617_v50, %v9061_v21  ;;  %v4111_v10 = vcombine.high %v4109_v6, %v4109_v6  ;;  %v5006_v42 = vsel %vm4410_vm10, %v4110_v52, -inf }
 0x304   : > { %v5013_v18 = vsel %vm4410_vm10, %v4109_v6, -inf  ;;  %v3494_v29 = vadd.f32 %v8741_v33, %v9062_v35  ;;  %v5007_v60 = vrot.slane %v5006_v42, 4  ;;  %v3700_v44 = vmax.f32 %v3652_v25, 0.0 }
 0x305   : > { %v5001_v38 = vmax.f32 %v4999_v15, %v5000_v11  ;;  %v5014_v57 = vrot.slane %v5013_v18, 4  ;;  %v5020_v39 = vsel %vm4410_vm10, %v4111_v10, -inf  ;;  %v3644_v8 = vadd.f32 %v8572_v51, %v3483_v55 }
 0x306   : > { %v3655_v56 = vadd.f32 %v8589_v34, %v3494_v29  ;;  %v8860_v50 = vadd.f32 %v8602_v58, %v8587_v59  ;;  %v5008_v27 = vmax.f32 %v5006_v42, %v5007_v60  ;;  %v5021_v48 = vrot.slane %v5020_v39, 4 }
 0x307   : > { %v5002_v28 = vrot.slane %v5001_v38, 2  ;;  %v5015_v30 = vmax.f32 %v5013_v18, %v5014_v57  ;;  %v4180_v24 = vcombine.high %v3700_v44, %v3700_v44  ;;  %v4187_v33 = vrot.slane %v3700_v44, %v8265_v63 }
 0x308   : > { %v3698_v20 = vmax.f32 %v3644_v8, 0.0  ;;  %v8863_v16 = vmax.f32 %v3655_v56, 0.0  ;;  %v5009_v62 = vrot.slane %v5008_v27, 2  ;;  %v5022_v51 = vmax.f32 %v5020_v39, %v5021_v48 }
 0x309   : > { %v5003_v40 = vmax.f32 %v5001_v38, %v5002_v28  ;;  %v5016_v0 = vrot.slane %v5015_v30, 2  ;;  %v4194_v34 = vrot.slane %v4180_v24, %v8265_v63  ;;  %v4195_v46 = vcombine.high %v4187_v33, %v4187_v33 }
 0x30a   : > { %v5139_v59 = vsel %vm4410_vm10, %v4187_v33, -inf  ;;  %v4146_v58 = vcombine.high %v3698_v20, %v3698_v20  ;;  %v5010_v37 = vmax.f32 %v5008_v27, %v5009_v62  ;;  %v5023_v4 = vrot.slane %v5022_v51, 2 }
 0x30b   : > { %v5004_v45 = vrot.slane %v5003_v40, 1  ;;  %v5017_v54 = vmax.f32 %v5015_v30, %v5016_v0  ;;  %v4196_v14 = vcombine.high %v4194_v34, %v4194_v34  ;;  %v5140_v12 = vrot.slane %v5139_v59, 4 }
 0x30c   : > { %v5146_v5 = vsel %vm4410_vm10, %v4195_v46, -inf  ;;  %v5153_v23 = vsel %vm4410_vm10, %v4194_v34, -inf  ;;  %v5011_v1 = vrot.slane %v5010_v37, 1  ;;  %v5024_v61 = vmax.f32 %v5022_v51, %v5023_v4 }
 0x30d   : > { %v5005_v9 = vmax.f32 %v5003_v40, %v5004_v45  ;;  %v5018_v49 = vrot.slane %v5017_v54, 1  ;;  %v5141_v47 = vmax.f32 %v5139_v59, %v5140_v12  ;;  %v5147_v36 = vrot.slane %v5146_v5, 4 }
 0x30e   : > { %v5154_v41 = vrot.slane %v5153_v23, 4  ;;  %v5160_v6 = vsel %vm4410_vm10, %v4196_v14, -inf  ;;  %v5012_v52 = vmax.f32 %v5010_v37, %v5011_v1  ;;  %v5025_v11 = vrot.slane %v5024_v61, 1 }
 0x30f   : > { %v5019_v15 = vmax.f32 %v5017_v54, %v5018_v49  ;;  %v5351_v25 = vmax.f32 %v5005_v9, %v8824_v3  ;;  %v5142_v21 = vrot.slane %v5141_v47, 2  ;;  %v5148_v55 = vmax.f32 %v5146_v5, %v5147_v36 }
 0x310   : > { %v5155_v10 = vmax.f32 %v5153_v23, %v5154_v41  ;;  %v5161_v42 = vrot.slane %v5160_v6, 4  ;;  %v5026_v18 = vmax.f32 %v5024_v61, %v5025_v11  ;;  %v5352_v35 = vmax.f32 %v5012_v52, %v8832_v2 }
 0x311   : > { %v5353_v29 = vmax.f32 %v5019_v15, %v8834_v26  ;;  %v6171_v38 = vpack.c.bf16 %v5351_v25, %v5351_v25  ;;  %v5143_v60 = vmax.f32 %v5141_v47, %v5142_v21  ;;  %v5149_v57 = vrot.slane %v5148_v55, 2  ;;  %v9063_v21 = vld [vmem:[#allocation12_spill] sm:$0xff] }
 0x312   : > { %v5156_v44 = vrot.slane %v5155_v10, 2  ;;  %v5162_v39 = vmax.f32 %v5160_v6, %v5161_v42  ;;  %v5354_v8 = vmax.f32 %v5026_v18, %v8836_v19  ;;  %v6172_v56 = vpack.c.bf16 %v5352_v35, %v5352_v35 }
 0x313   : > { %v6173_v28 = vpack.c.bf16 %v5353_v29, %v5353_v29  ;;  %v5671_v27 = vunpack.c.l.b16 %v6171_v38  ;;  %v5144_v3 = vrot.slane %v5143_v60, 1  ;;  %v5150_v30 = vmax.f32 %v5148_v55, %v5149_v57 }
 0x314   : > { %v5157_v48 = vmax.f32 %v5155_v10, %v5156_v44  ;;  %v5163_v24 = vrot.slane %v5162_v39, 2  ;;  %v6174_v33 = vpack.c.bf16 %v5354_v8, %v5354_v8  ;;  %v5672_v40 = vunpack.c.l.b16 %v6172_v56 }
 0x315   : > { %v5673_v62 = vunpack.c.l.b16 %v6173_v28  ;;  %v5736_v2 = vsel %vm5697_vm14, %v5671_v27, %v8841_v43  ;;  %v8876_v26 = vmax.f32 %v5143_v60, %v5144_v3  ;;  %v5151_v0 = vrot.slane %v5150_v30, 1 }
 0x316   : > { %v5158_v51 = vrot.slane %v5157_v48, 1  ;;  %v5164_v34 = vmax.f32 %v5162_v39, %v5163_v24  ;;  %v5674_v46 = vunpack.c.l.b16 %v6174_v33  ;;  %v5737_v19 = vsel %vm5699_vm15, %v5672_v40, %v5736_v2 }
 0x317   : > { %v4153_v59 = vrot.slane %v3698_v20, %v8265_v63  ;;  %v4160_v45 = vrot.slane %v4146_v58, %v8265_v63  ;;  %v5738_v37 = vsel %vm5701_vm0, %v5673_v62, %v5737_v19  ;;  %v8882_v54 = vmax.f32 %v5150_v30, %v5151_v0 }
 0x318   : > { %v5159_v4 = vmax.f32 %v5157_v48, %v5158_v51  ;;  %v5165_v14 = vrot.slane %v5164_v34, 1  ;;  %v5739_v43 = vsel %vm5703_vm1, %v5674_v46, %v5738_v37  ;;  %v4197_v36 = vcombine.high %v8863_v16, %v8863_v16 }
 0x319   : > { %v4161_v12 = vcombine.high %v4153_v59, %v4153_v59  ;;  %v4162_v5 = vcombine.high %v4160_v45, %v4160_v45  ;;  %v5083_v23 = vsel %vm4410_vm10, %v4153_v59, -inf  ;;  %v5759_v9 = vpack.c.b16 %v5739_v43, %v5739_v43 }
 0x31a   : > { %v5166_v1 = vmax.f32 %v5164_v34, %v5165_v14  ;;  %v5084_v49 = vrot.slane %v5083_v23, 4  ;;  %v5097_v20 = vsel %vm4410_vm10, %v4160_v45, -inf  ;;  %v4204_v15 = vrot.slane %v8863_v16, %v8265_v63 }
 0x31b   : > { %v5090_v58 = vsel %vm4410_vm10, %v4161_v12, -inf  ;;  %v5098_v61 = vrot.slane %v5097_v20, 4  ;;  %v5104_v47 = vsel %vm4410_vm10, %v4162_v5, -inf  ;;  %5775 = vst [vmem:[%s8394_s20 + $0x14] sm:$0xf] %v5759_v9  ;;  %v4211_v25 = vrot.slane %v4197_v36, %v8265_v63 }
 0x31c   : > { %v5085_v41 = vmax.f32 %v5083_v23, %v5084_v49  ;;  %v5091_v6 = vrot.slane %v5090_v58, 4  ;;  %v5105_v52 = vrot.slane %v5104_v47, 4  ;;  %v3486_v55 = vadd.f32 %v8646_v53, %v9063_v21 }
 0x31d   : > { %v5099_v11 = vmax.f32 %v5097_v20, %v5098_v61  ;;  %v6635_v10 = vadd.f32 %v8662_v31, %v8658_v32  ;;  %v4212_v29 = vcombine.high %v4204_v15, %v4204_v15  ;;  %v4213_v60 = vcombine.high %v4211_v25, %v4211_v25 }
 0x31e   : > { %v5086_v42 = vrot.slane %v5085_v41, 2  ;;  %v5092_v18 = vmax.f32 %v5090_v58, %v5091_v6  ;;  %v5106_v35 = vmax.f32 %v5104_v47, %v5105_v52  ;;  %v5167_v57 = vsel %vm4410_vm10, %v4204_v15, -inf }
 0x31f   : > { %v5100_v38 = vrot.slane %v5099_v11, 2  ;;  %v5181_v44 = vsel %vm4410_vm10, %v4211_v25, -inf  ;;  %v5168_v56 = vrot.slane %v5167_v57, 4  ;;  %v5174_v53 = vsel %vm4410_vm10, %v4212_v29, -inf  ;;  %v9064_v29 = vld [vmem:[#allocation18_spill] sm:$0xff] }
 0x320   : > { %v5087_v16 = vmax.f32 %v5085_v41, %v5086_v42  ;;  %v5093_v39 = vrot.slane %v5092_v18, 2  ;;  %v5107_v8 = vrot.slane %v5106_v35, 2  ;;  %v5182_v27 = vrot.slane %v5181_v44, 4 }
 0x321   : > { %v5101_v28 = vmax.f32 %v5099_v11, %v5100_v38  ;;  %v5188_v32 = vsel %vm4410_vm10, %v4213_v60, -inf  ;;  %v5169_v48 = vmax.f32 %v5167_v57, %v5168_v56  ;;  %v5175_v33 = vrot.slane %v5174_v53, 4  ;;  %v9065_v60 = vld [vmem:[#allocation15_spill] sm:$0xff] }
 0x322   : > { %v5088_v31 = vrot.slane %v5087_v16, 1  ;;  %v5094_v3 = vmax.f32 %v5092_v18, %v5093_v39  ;;  %v5108_v30 = vmax.f32 %v5106_v35, %v5107_v8  ;;  %v5183_v40 = vmax.f32 %v5181_v44, %v5182_v27  ;;  %v9066_v8 = vld [vmem:[#allocation5_spill] sm:$0xff] }
 0x323   : > { %v5102_v24 = vrot.slane %v5101_v28, 1  ;;  %v5189_v62 = vrot.slane %v5188_v32, 4  ;;  %v5170_v34 = vrot.slane %v5169_v48, 2  ;;  %v5176_v19 = vmax.f32 %v5174_v53, %v5175_v33  ;;  %v9071_v33 = vld [vmem:[#allocation25_spill] sm:$0xff] }
 0x324   : > { %v5089_v2 = vmax.f32 %v5087_v16, %v5088_v31  ;;  %v5095_v0 = vrot.slane %v5094_v3, 1  ;;  %v5109_v51 = vrot.slane %v5108_v30, 1  ;;  %v5184_v59 = vrot.slane %v5183_v40, 2 }
 0x325   : > { %v5103_v46 = vmax.f32 %v5101_v28, %v5102_v24  ;;  %v5190_v45 = vmax.f32 %v5188_v32, %v5189_v62  ;;  %v5171_v12 = vmax.f32 %v5169_v48, %v5170_v34  ;;  %v5177_v23 = vrot.slane %v5176_v19, 2  ;;  %v9067_v28 = vld [vmem:[#allocation16_spill] sm:$0xff] }
 0x326   : > { %v5096_v37 = vmax.f32 %v5094_v3, %v5095_v0  ;;  %v5110_v14 = vmax.f32 %v5108_v30, %v5109_v51  ;;  %v5355_v43 = vmax.f32 %v5089_v2, %v8876_v26  ;;  %v5185_v9 = vmax.f32 %v5183_v40, %v5184_v59  ;;  %v9069_v32 = vld [vmem:[#allocation20_spill] sm:$0xff] }
 0x327   : > { %v5357_v5 = vmax.f32 %v5103_v46, %v5159_v4  ;;  %v5191_v49 = vrot.slane %v5190_v45, 2  ;;  %v5172_v47 = vrot.slane %v5171_v12, 1  ;;  %v5178_v41 = vmax.f32 %v5176_v19, %v5177_v23 }
 0x328   : > { %v5356_v20 = vmax.f32 %v5096_v37, %v8882_v54  ;;  %v5358_v58 = vmax.f32 %v5110_v14, %v5166_v1  ;;  %v6175_v61 = vpack.c.bf16 %v5355_v43, %v5355_v43  ;;  %v5186_v6 = vrot.slane %v5185_v9, 1 }
 0x329   : > { %v6177_v36 = vpack.c.bf16 %v5357_v5, %v5357_v5  ;;  %v5192_v52 = vmax.f32 %v5190_v45, %v5191_v49  ;;  %v8905_v42 = vmax.f32 %v5171_v12, %v5172_v47  ;;  %v5179_v26 = vrot.slane %v5178_v41, 1 }
 0x32a   : > { %v6176_v15 = vpack.c.bf16 %v5356_v20, %v5356_v20  ;;  %v6178_v11 = vpack.c.bf16 %v5358_v58, %v5358_v58  ;;  %v5675_v25 = vunpack.c.l.b16 %v6175_v61  ;;  %v3647_v35 = vadd.f32 %v8638_v13, %v3486_v55 }
 0x32b   : > { %v5677_v21 = vunpack.c.l.b16 %v6177_v36  ;;  %v3507_v54 = vadd.f32 %v6635_v10, %v9064_v29  ;;  %v8909_v1 = vmax.f32 %v5185_v9, %v5186_v6  ;;  %v5193_v38 = vrot.slane %v5192_v52, 1  ;;  %v9068_v10 = vld [vmem:[#allocation21_spill] sm:$0xff] }
 0x32c   : > { %v5676_v4 = vunpack.c.l.b16 %v6176_v15  ;;  %v5678_v18 = vunpack.c.l.b16 %v6178_v11  ;;  %v3499_v57 = vadd.f32 %v8847_v17, %v9065_v60  ;;  %v6638_v44 = vadd.f32 %v8698_v7, %v8690_v22 }
 0x32d   : > { %v3699_v39 = vmax.f32 %v3647_v35, 0.0  ;;  %v3668_v56 = vadd.f32 %v9066_v8, %v3507_v54  ;;  %v3502_v53 = vadd.f32 %v8860_v50, %v9067_v28  ;;  %v8920_v55 = vmax.f32 %v5178_v41, %v5179_v26  ;;  %v9070_v50 = vld [vmem:[#allocation23_spill] sm:$0xff] }
 0x32e   : > { %v5740_v16 = vsel %vm5691_vm11, %v5676_v4, %v5675_v25  ;;  %v3660_v27 = vadd.f32 %v9068_v10, %v3499_v57  ;;  %v3510_v31 = vadd.f32 %v6638_v44, %v9069_v32  ;;  %v8928_v30 = vmax.f32 %v5192_v52, %v5193_v38 }
 0x32f   : > { %v5741_v13 = vsel %vm5693_vm12, %v5677_v21, %v5740_v16  ;;  %v4163_v17 = vcombine.high %v3699_v39, %v3699_v39  ;;  %v4170_v3 = vrot.slane %v3699_v39, %v8265_v63  ;;  %v3704_v7 = vmax.f32 %v3668_v56, 0.0 }
 0x330   : > { %v8926_v22 = vsel %vm5695_vm13, %v5678_v18, %v5741_v13  ;;  %v8930_v48 = vmax.f32 %v3660_v27, 0.0  ;;  %v8933_v24 = vadd.f32 %v9070_v50, %v3510_v31  ;;  %v8936_v40 = vadd.f32 %v9071_v33, %v3502_v53 }
 0x331   : > { %v4177_v62 = vrot.slane %v4163_v17, %v8265_v63  ;;  %v4178_v2 = vcombine.high %v4170_v3, %v4170_v3  ;;  %v5111_v0 = vsel %vm4410_vm10, %v4170_v3, -inf  ;;  %v4248_v51 = vcombine.high %v3704_v7, %v3704_v7 }
 0x332   : > { %v5112_v34 = vrot.slane %v5111_v0, 4  ;;  %v4255_v46 = vrot.slane %v3704_v7, %v8265_v63  ;;  %v4214_v19 = vcombine.high %v8930_v48, %v8930_v48  ;;  %v8945_v59 = vrot.slane %v8930_v48, %v8265_v63 }
 0x333   : > { %v4179_v45 = vcombine.high %v4177_v62, %v4177_v62  ;;  %v5118_v37 = vsel %vm4410_vm10, %v4178_v2, -inf  ;;  %v5125_v14 = vsel %vm4410_vm10, %v4177_v62, -inf  ;;  %v4262_v43 = vrot.slane %v4248_v51, %v8265_v63 }
 0x334   : > { %v5113_v12 = vmax.f32 %v5111_v0, %v5112_v34  ;;  %v5119_v5 = vrot.slane %v5118_v37, 4  ;;  %v5126_v23 = vrot.slane %v5125_v14, 4  ;;  %v4263_v9 = vcombine.high %v4255_v46, %v4255_v46 }
 0x335   : > { %v5132_v49 = vsel %vm4410_vm10, %v4179_v45, -inf  ;;  %v4264_v20 = vcombine.high %v4262_v43, %v4262_v43  ;;  %v5251_v58 = vsel %vm4410_vm10, %v4255_v46, -inf  ;;  %v5265_v61 = vsel %vm4410_vm10, %v4262_v43, -inf }
 0x336   : > { %v5114_v47 = vrot.slane %v5113_v12, 2  ;;  %v5120_v36 = vmax.f32 %v5118_v37, %v5119_v5  ;;  %v5127_v41 = vmax.f32 %v5125_v14, %v5126_v23  ;;  %v5133_v6 = vrot.slane %v5132_v49, 4 }
 0x337   : > { %v5252_v52 = vrot.slane %v5251_v58, 4  ;;  %v5258_v15 = vsel %vm4410_vm10, %v4263_v9, -inf  ;;  %v5266_v11 = vrot.slane %v5265_v61, 4  ;;  %v5272_v25 = vsel %vm4410_vm10, %v4264_v20, -inf }
 0x338   : > { %v5115_v21 = vmax.f32 %v5113_v12, %v5114_v47  ;;  %v5121_v26 = vrot.slane %v5120_v36, 2  ;;  %v5128_v4 = vrot.slane %v5127_v41, 2  ;;  %v5134_v18 = vmax.f32 %v5132_v49, %v5133_v6 }
 0x339   : > { %v5253_v35 = vmax.f32 %v5251_v58, %v5252_v52  ;;  %v5259_v29 = vrot.slane %v5258_v15, 4  ;;  %v5267_v54 = vmax.f32 %v5265_v61, %v5266_v11  ;;  %v5273_v38 = vrot.slane %v5272_v25, 4 }
 0x33a   : > { %v5116_v60 = vrot.slane %v5115_v21, 1  ;;  %v5122_v57 = vmax.f32 %v5120_v36, %v5121_v26  ;;  %v5129_v44 = vmax.f32 %v5127_v41, %v5128_v4  ;;  %v5135_v16 = vrot.slane %v5134_v18, 2 }
 0x33b   : > { %v5254_v39 = vrot.slane %v5253_v35, 2  ;;  %v5260_v8 = vmax.f32 %v5258_v15, %v5259_v29  ;;  %v5268_v56 = vrot.slane %v5267_v54, 2  ;;  %v5274_v28 = vmax.f32 %v5272_v25, %v5273_v38 }
 0x33c   : > { %v5117_v53 = vmax.f32 %v5115_v21, %v5116_v60  ;;  %v5123_v13 = vrot.slane %v5122_v57, 1  ;;  %v5130_v10 = vrot.slane %v5129_v44, 1  ;;  %v5136_v27 = vmax.f32 %v5134_v18, %v5135_v16 }
 0x33d   : > { %v5255_v32 = vmax.f32 %v5253_v35, %v5254_v39  ;;  %v5261_v31 = vrot.slane %v5260_v8, 2  ;;  %v5269_v17 = vmax.f32 %v5267_v54, %v5268_v56  ;;  %v5275_v3 = vrot.slane %v5274_v28, 2 }
 0x33e   : > { %v5124_v7 = vmax.f32 %v5122_v57, %v5123_v13  ;;  %v5131_v48 = vmax.f32 %v5129_v44, %v5130_v10  ;;  %v5137_v50 = vrot.slane %v5136_v27, 1  ;;  %v5359_v33 = vmax.f32 %v5117_v53, %v8905_v42 }
 0x33f   : > { %v5256_v62 = vrot.slane %v5255_v32, 1  ;;  %v5262_v2 = vmax.f32 %v5260_v8, %v5261_v31  ;;  %v5270_v45 = vrot.slane %v5269_v17, 1  ;;  %v5276_v37 = vmax.f32 %v5274_v28, %v5275_v3 }
 0x340   : > { %v5138_v0 = vmax.f32 %v5136_v27, %v5137_v50  ;;  %v5360_v51 = vmax.f32 %v5124_v7, %v8920_v55  ;;  %v5361_v34 = vmax.f32 %v5131_v48, %v8909_v1  ;;  %v6179_v46 = vpack.c.bf16 %v5359_v33, %v5359_v33 }
 0x341   : > { %v4228_v14 = vrot.slane %v4214_v19, %v8265_v63  ;;  %v4229_v43 = vcombine.high %v8945_v59, %v8945_v59  ;;  %v5195_v49 = vsel %vm4410_vm10, %v8945_v59, -inf  ;;  %v5263_v15 = vrot.slane %v5262_v2, 1 }
 0x342   : > { %v5362_v12 = vmax.f32 %v5138_v0, %v8928_v30  ;;  %v6180_v5 = vpack.c.bf16 %v5360_v51, %v5360_v51  ;;  %v6181_v23 = vpack.c.bf16 %v5361_v34, %v5361_v34  ;;  %v5679_v42 = vunpack.c.l.b16 %v6179_v46 }
 0x343   : > { %v4230_v9 = vcombine.high %v4228_v14, %v4228_v14  ;;  %v5202_v55 = vsel %vm4410_vm10, %v4229_v43, -inf  ;;  %v5209_v1 = vsel %vm4410_vm10, %v4228_v14, -inf  ;;  %v5196_v47 = vrot.slane %v5195_v49, 4 }
 0x344   : > { %v6182_v20 = vpack.c.bf16 %v5362_v12, %v5362_v12  ;;  %v5680_v58 = vunpack.c.l.b16 %v6180_v5  ;;  %v5681_v61 = vunpack.c.l.b16 %v6181_v23  ;;  %v5743_v19 = vsel %vm5697_vm14, %v5679_v42, %v8926_v22 }
 0x345   : > { %v5203_v36 = vrot.slane %v5202_v55, 4  ;;  %v5210_v30 = vrot.slane %v5209_v1, 4  ;;  %v5216_v41 = vsel %vm4410_vm10, %v4230_v9, -inf  ;;  %v5197_v25 = vmax.f32 %v5195_v49, %v5196_v47 }
 0x346   : > { %v5682_v6 = vunpack.c.l.b16 %v6182_v20  ;;  %v5744_v52 = vsel %vm5699_vm15, %v5680_v58, %v5743_v19  ;;  %v5217_v59 = vrot.slane %v5216_v41, 4  ;;  %v5277_v18 = vrot.slane %v5276_v37, 1 }
 0x347   : > { %v5745_v11 = vsel %vm5701_vm0, %v5681_v61, %v5744_v52  ;;  %v5204_v21 = vmax.f32 %v5202_v55, %v5203_v36  ;;  %v5211_v26 = vmax.f32 %v5209_v1, %v5210_v30  ;;  %v5257_v35 = vmax.f32 %v5255_v32, %v5256_v62 }
 0x348   : > { %v5746_v4 = vsel %vm5703_vm1, %v5682_v6, %v5745_v11  ;;  %v5218_v22 = vmax.f32 %v5216_v41, %v5217_v59  ;;  %v5198_v54 = vrot.slane %v5197_v25, 2  ;;  %v5264_v44 = vmax.f32 %v5262_v2, %v5263_v15 }
 0x349   : > { %v5760_v29 = vpack.c.b16 %v5746_v4, %v5746_v4  ;;  %v5205_v38 = vrot.slane %v5204_v21, 2  ;;  %v5212_v60 = vrot.slane %v5211_v26, 2  ;;  %v3705_v16 = vmax.f32 %v8933_v24, 0.0 }
 0x34a   : > { %v5219_v57 = vrot.slane %v5218_v22, 2  ;;  %v3703_v39 = vmax.f32 %v8936_v40, 0.0  ;;  %v5199_v8 = vmax.f32 %v5197_v25, %v5198_v54  ;;  %v5271_v53 = vmax.f32 %v5269_v17, %v5270_v45 }
 0x34b   : > { %5776 = vst [vmem:[%s8394_s20 + $0x18] sm:$0xf] %v5760_v29  ;;  %v5206_v56 = vmax.f32 %v5204_v21, %v5205_v38  ;;  %v5213_v28 = vmax.f32 %v5211_v26, %v5212_v60  ;;  %v5278_v10 = vmax.f32 %v5276_v37, %v5277_v18  ;;  %v4265_v27 = vcombine.high %v3705_v16, %v3705_v16 }
 0x34c   : > { %v5220_v13 = vmax.f32 %v5218_v22, %v5219_v57  ;;  %v4272_v32 = vrot.slane %v3705_v16, %v8265_v63  ;;  %v5200_v31 = vrot.slane %v5199_v8, 1  ;;  %v4231_v48 = vcombine.high %v3703_v39, %v3703_v39 }
 0x34d   : > { %v5207_v3 = vrot.slane %v5206_v56, 1  ;;  %v5214_v7 = vrot.slane %v5213_v28, 1  ;;  %v4279_v33 = vrot.slane %v4265_v27, %v8265_v63  ;;  %v4238_v20 = vrot.slane %v3703_v39, %v8265_v63 }
 0x34e   : > { %v5221_v50 = vrot.slane %v5220_v13, 1  ;;  %v4280_v24 = vcombine.high %v4272_v32, %v4272_v32  ;;  %v5279_v40 = vsel %vm4410_vm10, %v4272_v32, -inf  ;;  %v5201_v62 = vmax.f32 %v5199_v8, %v5200_v31 }
 0x34f   : > { %v5208_v2 = vmax.f32 %v5206_v56, %v5207_v3  ;;  %v5215_v0 = vmax.f32 %v5213_v28, %v5214_v7  ;;  %v5280_v51 = vrot.slane %v5279_v40, 4  ;;  %v4281_v34 = vcombine.high %v4279_v33, %v4279_v33 }
 0x350   : > { %v5222_v17 = vmax.f32 %v5220_v13, %v5221_v50  ;;  %v5286_v46 = vsel %vm4410_vm10, %v4280_v24, -inf  ;;  %v5293_v45 = vsel %vm4410_vm10, %v4279_v33, -inf  ;;  %v5363_v37 = vmax.f32 %v5201_v62, %v5257_v35 }
 0x351   : > { %v5364_v14 = vmax.f32 %v5208_v2, %v5264_v44  ;;  %v5365_v43 = vmax.f32 %v5215_v0, %v5271_v53  ;;  %v5281_v12 = vmax.f32 %v5279_v40, %v5280_v51  ;;  %v5287_v23 = vrot.slane %v5286_v46, 4 }
 0x352   : > { %v5366_v5 = vmax.f32 %v5222_v17, %v5278_v10  ;;  %v5294_v42 = vrot.slane %v5293_v45, 4  ;;  %v5300_v9 = vsel %vm4410_vm10, %v4281_v34, -inf  ;;  %v6183_v49 = vpack.c.bf16 %v5363_v37, %v5363_v37 }
 0x353   : > { %v6184_v55 = vpack.c.bf16 %v5364_v14, %v5364_v14  ;;  %v6185_v1 = vpack.c.bf16 %v5365_v43, %v5365_v43  ;;  %v5288_v61 = vmax.f32 %v5286_v46, %v5287_v23  ;;  %v5301_v47 = vrot.slane %v5300_v9, 4 }
 0x354   : > { %v6186_v58 = vpack.c.bf16 %v5366_v5, %v5366_v5  ;;  %v5295_v19 = vmax.f32 %v5293_v45, %v5294_v42  ;;  %v5683_v36 = vunpack.c.l.b16 %v6183_v49  ;;  %v5282_v6 = vrot.slane %v5281_v12, 2 }
 0x355   : > { %v5684_v30 = vunpack.c.l.b16 %v6184_v55  ;;  %v5685_v41 = vunpack.c.l.b16 %v6185_v1  ;;  %v5289_v52 = vrot.slane %v5288_v61, 2  ;;  %v5302_v15 = vmax.f32 %v5300_v9, %v5301_v47 }
 0x356   : > { %v5296_v11 = vrot.slane %v5295_v19, 2  ;;  %v4245_v25 = vrot.slane %v4231_v48, %v8265_v63  ;;  %v4246_v21 = vcombine.high %v4238_v20, %v4238_v20  ;;  %v5686_v26 = vunpack.c.l.b16 %v6186_v58 }
 0x357   : > { %v5747_v59 = vsel %vm5691_vm11, %v5684_v30, %v5683_v36  ;;  %v5303_v18 = vrot.slane %v5302_v15, 2  ;;  %v5223_v35 = vsel %vm4410_vm10, %v4238_v20, -inf  ;;  %v5283_v38 = vmax.f32 %v5281_v12, %v5282_v6 }
 0x358   : > { %v5748_v4 = vsel %vm5693_vm12, %v5685_v41, %v5747_v59  ;;  %v4247_v22 = vcombine.high %v4245_v25, %v4245_v25  ;;  %v5230_v29 = vsel %vm4410_vm10, %v4246_v21, -inf  ;;  %v5237_v54 = vsel %vm4410_vm10, %v4245_v25, -inf }
 0x359   : > { %v5290_v60 = vmax.f32 %v5288_v61, %v5289_v52  ;;  %v5224_v57 = vrot.slane %v5223_v35, 4  ;;  %v5297_v44 = vmax.f32 %v5295_v19, %v5296_v11  ;;  %v5231_v16 = vrot.slane %v5230_v29, 4 }
 0x35a   : > { %v5238_v39 = vrot.slane %v5237_v54, 4  ;;  %v5244_v63 = vsel %vm4410_vm10, %v4247_v22, -inf  ;;  %v5304_v8 = vmax.f32 %v5302_v15, %v5303_v18  ;;  %v5749_v10 = vsel %vm5695_vm13, %v5686_v26, %v5748_v4 }
 0x35b   : > { %v5225_v56 = vmax.f32 %v5223_v35, %v5224_v57  ;;  %v5245_v28 = vrot.slane %v5244_v63, 4  ;;  %v5232_v53 = vmax.f32 %v5230_v29, %v5231_v16  ;;  %v5284_v27 = vrot.slane %v5283_v38, 1 }
 0x35c   : > { %v5239_v13 = vmax.f32 %v5237_v54, %v5238_v39  ;;  %v5291_v3 = vrot.slane %v5290_v60, 1  ;;  %v5298_v7 = vrot.slane %v5297_v44, 1  ;;  %v5305_v33 = vrot.slane %v5304_v8, 1 }
 0x35d   : > { %v5226_v32 = vrot.slane %v5225_v56, 2  ;;  %v5246_v31 = vmax.f32 %v5244_v63, %v5245_v28  ;;  %v5233_v48 = vrot.slane %v5232_v53, 2  ;;  %v5285_v17 = vmax.f32 %v5283_v38, %v5284_v27 }
 0x35e   : > { %v5240_v50 = vrot.slane %v5239_v13, 2  ;;  %v5292_v45 = vmax.f32 %v5290_v60, %v5291_v3  ;;  %v5299_v37 = vmax.f32 %v5297_v44, %v5298_v7  ;;  %v5306_v12 = vmax.f32 %v5304_v8, %v5305_v33 }
 0x35f   : > { %v5227_v24 = vmax.f32 %v5225_v56, %v5226_v32  ;;  %v5247_v40 = vrot.slane %v5246_v31, 2  ;;  %v5234_v62 = vmax.f32 %v5232_v53, %v5233_v48 }
 0x360   : > { %v5241_v2 = vmax.f32 %v5239_v13, %v5240_v50 }
 0x361   : > { %v5228_v0 = vrot.slane %v5227_v24, 1  ;;  %v5248_v51 = vmax.f32 %v5246_v31, %v5247_v40  ;;  %v5235_v34 = vrot.slane %v5234_v62, 1 }
 0x362   : > { %v5242_v46 = vrot.slane %v5241_v2, 1 }
 0x363   : > { %v5229_v14 = vmax.f32 %v5227_v24, %v5228_v0  ;;  %v5249_v43 = vrot.slane %v5248_v51, 1  ;;  %v5236_v5 = vmax.f32 %v5234_v62, %v5235_v34 }
 0x364   : > { %v5243_v23 = vmax.f32 %v5241_v2, %v5242_v46 }
 0x365   : > { %v5250_v42 = vmax.f32 %v5248_v51, %v5249_v43  ;;  %v5367_v9 = vmax.f32 %v5229_v14, %v5285_v17  ;;  %v5368_v49 = vmax.f32 %v5236_v5, %v5292_v45 }
 0x366   : > { %v5369_v55 = vmax.f32 %v5243_v23, %v5299_v37 }
 0x367   : > { %v5370_v1 = vmax.f32 %v5250_v42, %v5306_v12  ;;  %v6187_v20 = vpack.c.bf16 %v5367_v9, %v5367_v9  ;;  %v6188_v58 = vpack.c.bf16 %v5368_v49, %v5368_v49 }
 0x368   : > { %v6189_v61 = vpack.c.bf16 %v5369_v55, %v5369_v55 }
 0x369   : > { %v6190_v19 = vpack.c.bf16 %v5370_v1, %v5370_v1  ;;  %v5687_v47 = vunpack.c.l.b16 %v6187_v20  ;;  %v5688_v36 = vunpack.c.l.b16 %v6188_v58 }
 0x36a   : > { %v5689_v30 = vunpack.c.l.b16 %v6189_v61 }
 0x36b   : > { %v5750_v41 = vsel %vm5697_vm14, %v5687_v47, %v5749_v10  ;;  %v5690_v6 = vunpack.c.l.b16 %v6190_v19 }
 0x36c   : > { %v5751_v52 = vsel %vm5699_vm15, %v5688_v36, %v5750_v41 }
 0x36d   : > { %v5752_v15 = vsel %vm5701_vm0, %v5689_v30, %v5751_v52 }
 0x36e   : > { %v5753_v59 = vsel %vm5703_vm1, %v5690_v6, %v5752_v15 }
 0x36f   : > { %v5761_v11 = vpack.c.b16 %v5753_v59, %v5753_v59 }
 0x371   : > { %5777 = vst [vmem:[%s8394_s20 + $0x1c] sm:$0xf] %v5761_v11 }
 0x372 PF: > { %s13_s12 = sadd.s32 1, %s6967_s12  }
 0x373   : > { %p10_p4 = scmp.ge.s32.totalorder %s13_s12, 4  }
 0x375   :  { %12 = sbr.rel (!%p10_p4) target bundleno = 1 (0x1), region = 64 }

</bundles_post_ra>
